<compile_context>
chip_gen: v6e
topology: v6e:2x2x1
jax: 0.10.0
libtpu: 0.0.40
codegen_flags: <defaults>
</compile_context>

<pallas_src>
import math

import jax
import jax.numpy as jnp
import numpy as np
from jax.experimental import pallas as pl
from jax.experimental.pallas import tpu as pltpu

C = 256          # channels fixed by the module
KH = KW = 3      # 3x3 conv, padding=1, stride=1
EPS = 1e-5


def _conv3x3_accumulate(pad_ref, w_ref, slab_ref, acc_ref, N, H, W):
    """3x3 'SAME' conv as 9 [M, C] @ [C, C] MXU matmuls.

    One sublane-repack copy per kw into slab_ref (an explicit VMEM scratch, so the
    shifted slab is never a long-lived vreg value); the 3 kh taps are accumulated in
    registers and committed to the VMEM accumulator with a single (+)= per kw.
    """
    M = N * H * W
    for kw in range(KW):
        # kw (sublane) shift hoisted out of the kh loop: 3 repacks per conv, not 9.
        slab_ref[...] = pad_ref[:, :, kw:kw + W, :]          # (N, H+2, W, C) bf16
        partial = None
        for kh in range(KH):
            patch = slab_ref[:, kh:kh + H, :, :].reshape(M, C)   # tile-aligned slice
            d = jnp.dot(patch, w_ref[kh, kw],
                        preferred_element_type=jnp.float32)
            partial = d if partial is None else partial + d
        if kw == 0:
            acc_ref[...] = partial
        else:
            acc_ref[...] += partial


def _bn_scale_shift(y, g, be, m_rows):
    """Training-mode BN folded into a per-channel FMA (one pass of stats, f32).

    mean/var from sum and sum-of-squares; variance clamped at 0 against f32
    cancellation. Conv bias is omitted everywhere since BN's mean subtraction
    cancels a per-channel pre-BN bias exactly.
    """
    inv_n = 1.0 / m_rows
    s = jnp.sum(y, axis=0, keepdims=True)                    # (1, C)
    ss = jnp.sum(y * y, axis=0, keepdims=True)               # (1, C)
    mean = s * inv_n
    var = jnp.maximum(ss * inv_n - mean * mean, 0.0)
    scale = g * jax.lax.rsqrt(var + EPS)
    shift = be - mean * scale
    return scale, shift


def block_kernel(x_hbm, w1_hbm, w2_hbm, g1_ref, be1_ref, g2_ref, be2_ref,
                 o_hbm, x_buf, pad_ref, slab_ref, acc_ref, w1_buf, w2_buf, sems):
    N, H, W, _ = x_buf.shape
    Hp, Wp = H + 2, W + 2
    M = N * H * W

    # Kick off every HBM->VMEM fetch immediately: x and w1 overlap the border
    # zeroing; w2 overlaps all of conv1 / BN1 / ReLU.
    x_copy = pltpu.make_async_copy(x_hbm, x_buf, sems.at[0])
    w1_copy = pltpu.make_async_copy(w1_hbm, w1_buf, sems.at[1])
    w2_copy = pltpu.make_async_copy(w2_hbm, w2_buf, sems.at[2])
    x_copy.start()
    w1_copy.start()
    w2_copy.start()

    # Zero only the 1-pixel border of the shared padded buffer (4 thin strips);
    # the interior is always fully overwritten.
    zrow = jnp.zeros((N, 1, Wp, C), jnp.bfloat16)
    zcol = jnp.zeros((N, Hp, 1, C), jnp.bfloat16)
    pad_ref[:, 0:1, :, :] = zrow
    pad_ref[:, Hp - 1:Hp, :, :] = zrow
    pad_ref[:, :, 0:1, :] = zcol
    pad_ref[:, :, Wp - 1:Wp, :] = zcol

    # ---- conv1 (bf16 operands, f32 acc) + folded BN1 + ReLU ------------------
    x_copy.wait()
    pad_ref[:, 1:H + 1, 1:W + 1, :] = x_buf[...].astype(jnp.bfloat16)
    w1_copy.wait()
    _conv3x3_accumulate(pad_ref, w1_buf, slab_ref, acc_ref, N, H, W)

    y1 = acc_ref[...]                                         # (M, C) f32
    sc1, sh1 = _bn_scale_shift(y1, g1_ref[...], be1_ref[...], float(M))
    h1 = jnp.maximum(y1 * sc1 + sh1, 0.0)
    # Reuse the same padded buffer for conv2's input (border is already zero).
    pad_ref[:, 1:H + 1, 1:W + 1, :] = h1.reshape(N, H, W, C).astype(jnp.bfloat16)

    # ---- conv2 + folded BN2 + residual + ReLU --------------------------------
    w2_copy.wait()
    _conv3x3_accumulate(pad_ref, w2_buf, slab_ref, acc_ref, N, H, W)

    y2 = acc_ref[...]
    sc2, sh2 = _bn_scale_shift(y2, g2_ref[...], be2_ref[...], float(M))
    residual = x_buf[...].reshape(M, C)                       # f32 residual path
    acc_ref[...] = jnp.maximum(y2 * sc2 + sh2 + residual, 0.0)

    # Write the result straight from the accumulator scratch to the HBM output.
    out_copy = pltpu.make_async_copy(acc_ref, o_hbm, sems.at[3])
    out_copy.start()
    out_copy.wait()


def block_forward_nhwc(x_nhwc, w1, g1, be1, w2, g2, be2):
    """NHWC kernel entry point (no layout transposes). x_nhwc: (N, H, W, 256) f32."""
    N, H, W, Cin = x_nhwc.shape
    assert Cin == C
    M = N * H * W

    w1b = w1.astype(jnp.bfloat16)                             # bf16 MXU operands,
    w2b = w2.astype(jnp.bfloat16)                             # half the weight DMA

    # VMEM budget derived from the actual footprint (not a blanket number).
    scratch_bytes = (
        M * C * 4                                             # x landing buffer (f32)
        + N * (H + 2) * (W + 2) * C * 2                       # shared padded buffer
        + N * (H + 2) * W * C * 2                             # kw-shifted slab
        + M * C * 4                                           # conv acc / output slab
        + 2 * KH * KW * C * C * 2)                            # w1 / w2 landing buffers
    param_bytes = 2 * 4 * (C * 4)                             # four (1,C) f32 params, 2x buffered
    temp_bytes = 4 * M * C * 4                                # epilogue f32 temporaries / spills
    vmem_limit = scratch_bytes + param_bytes + temp_bytes + (4 << 20)
    vmem_limit = max(vmem_limit, 16 << 20)
    vmem_limit = min(vmem_limit, 96 << 20)                    # beyond ~64 MiB v7x needs tiling (TODO above)

    full2 = lambda shape: pl.BlockSpec(shape, lambda i: (0, 0))
    any_spec = pl.BlockSpec(memory_space=pl.ANY)

    out_flat = pl.pallas_call(
        block_kernel,
        out_shape=jax.ShapeDtypeStruct((M, C), jnp.float32),
        grid=(1,),
        in_specs=[
            any_spec,                         # x     (HBM, manual prefetch)
            any_spec,                         # w1    (HBM, manual prefetch)
            any_spec,                         # w2    (HBM, manual prefetch)
            full2(g1.shape), full2(be1.shape),
            full2(g2.shape), full2(be2.shape),
        ],
        out_specs=any_spec,                   # written by in-kernel DMA from acc
        scratch_shapes=[
            pltpu.VMEM((N, H, W, C), jnp.float32),            # x landing buffer / residual
            pltpu.VMEM((N, H + 2, W + 2, C), jnp.bfloat16),   # shared padded buffer
            pltpu.VMEM((N, H + 2, W, C), jnp.bfloat16),       # kw-shifted slab
            pltpu.VMEM((M, C), jnp.float32),                  # conv accumulator / output
            pltpu.VMEM((KH, KW, C, C), jnp.bfloat16),         # w1 landing buffer
            pltpu.VMEM((KH, KW, C, C), jnp.bfloat16),         # w2 landing buffer
            pltpu.SemaphoreType.DMA((4,)),                    # x, w1, w2, out DMAs
        ],
        compiler_params=pltpu.CompilerParams(
            dimension_semantics=("arbitrary",),
            vmem_limit_bytes=int(vmem_limit)),
    )(x_nhwc, w1b, w2b, g1, be1, g2, be2)

    return out_flat.reshape(N, H, W, C)


def block_forward(x_nchw, w1, b1, g1, be1, w2, b2, g2, be2):
    """PyTorch-parity wrapper. x_nchw: (N, 256, H, W) float32 -> same shape."""
    N, Cin, H, W = x_nchw.shape
    assert Cin == C
    # Conv biases are mathematically cancelled by training-mode BN's mean
    # subtraction, so they are dead work and never enter the kernel.
    del b1, b2

    x = jnp.transpose(x_nchw, (0, 2, 3, 1))                   # NCHW -> NHWC
    out_nhwc = block_forward_nhwc(x, w1, g1, be1, w2, g2, be2)
    return jnp.transpose(out_nhwc, (0, 3, 1, 2))              # NHWC -> NCHW


# ----------------------------- pure-JAX reference -----------------------------
def ref_block(x_nchw, w1, b1, g1, be1, w2, b2, g2, be2):
    x = jnp.transpose(x_nchw, (0, 2, 3, 1))

    def conv(x, w, b):
        y = jax.lax.conv_general_dilated(
            x, w, window_strides=(1, 1), padding="SAME",
            dimension_numbers=("NHWC", "HWIO", "NHWC"))
        return y + b.reshape(1, 1, 1, -1)

    def bn(y, g, be):
        m = jnp.mean(y, axis=(0, 1, 2), keepdims=True)
        v = jnp.mean((y - m) ** 2, axis=(0, 1, 2), keepdims=True)
        return (y - m) * jax.lax.rsqrt(v + EPS) * g.reshape(1, 1, 1, -1) \
               + be.reshape(1, 1, 1, -1)

    r = jnp.maximum(bn(conv(x, w1, b1), g1, be1), 0.0)
    r = bn(conv(r, w2, b2), g2, be2) + x
    r = jnp.maximum(r, 0.0)
    return jnp.transpose(r, (0, 3, 1, 2))


if __name__ == "__main__":
    key = jax.random.PRNGKey(0)
    kx, kw1, kb1, kw2, kb2 = jax.random.split(key, 5)

    # Small spatial size; channel count (256) is fixed by the module definition.
    N, H, W = 2, 8, 8
    x = jax.random.normal(kx, (N, C, H, W), jnp.float32)          # NCHW input

    # Deterministic parameter init (PyTorch-like uniform bounds), HWIO weights.
    fan_in = C * KH * KW
    bound = 1.0 / math.sqrt(fan_in)
    w1 = jax.random.uniform(kw1, (KH, KW, C, C), jnp.float32, -bound, bound)
    b1 = jax.random.uniform(kb1, (1, C), jnp.float32, -bound, bound)
    w2 = jax.random.uniform(kw2, (KH, KW, C, C), jnp.float32, -bound, bound)
    b2 = jax.random.uniform(kb2, (1, C), jnp.float32, -bound, bound)
    g1 = jnp.ones((1, C), jnp.float32)    # BN gamma (default init)
    be1 = jnp.zeros((1, C), jnp.float32)  # BN beta
    g2 = jnp.ones((1, C), jnp.float32)
    be2 = jnp.zeros((1, C), jnp.float32)

    out = jax.block_until_ready(
        block_forward(x, w1, b1, g1, be1, w2, b2, g2, be2))
    ref = jax.block_until_ready(
        ref_block(x, w1, b1, g1, be1, w2, b2, g2, be2))
    assert out.shape == (N, C, H, W)
    # bf16 MXU operands (activations + weights, f32 accumulation) vs the pure-f32
    # reference: expected deviation after two 2304-term convs + BN is ~1e-2 tail.
    np.testing.assert_allclose(np.asarray(out), np.asarray(ref),
                               rtol=2e-2, atol=2e-2)
    print("KERNEL_OK")
</pallas_src>

<mosaic_0001>
module attributes {stable_mosaic.version = 11 : i64} {
  func.func @block_kernel(%arg0: i32, %arg1: memref<2x8x8x256xf32, #tpu.memory_space<any>>, %arg2: memref<3x3x256x256xbf16, #tpu.memory_space<any>>, %arg3: memref<3x3x256x256xbf16, #tpu.memory_space<any>>, %arg4: memref<1x256xf32, #tpu.memory_space<vmem>>, %arg5: memref<1x256xf32, #tpu.memory_space<vmem>>, %arg6: memref<1x256xf32, #tpu.memory_space<vmem>>, %arg7: memref<1x256xf32, #tpu.memory_space<vmem>>, %arg8: memref<128x256xf32, #tpu.memory_space<any>>, %arg9: memref<2x8x8x256xf32, #tpu.memory_space<vmem>>, %arg10: memref<2x10x10x256xbf16, #tpu.memory_space<vmem>>, %arg11: memref<2x10x8x256xbf16, #tpu.memory_space<vmem>>, %arg12: memref<128x256xf32, #tpu.memory_space<vmem>>, %arg13: memref<3x3x256x256xbf16, #tpu.memory_space<vmem>>, %arg14: memref<3x3x256x256xbf16, #tpu.memory_space<vmem>>, %arg15: memref<4x!tpu.dma_semaphore, #tpu.memory_space<semaphore_mem>>) attributes {dimension_semantics = [#tpu.dimension_semantics<arbitrary>], iteration_bounds = array<i64: 1>, scalar_prefetch = 0 : i64, scratch_operands = 7 : i64, tpu.core_type = #tpu.core_type<tc>, window_params = [{}, {}, {}, {pipeline_mode = #tpu.pipeline_mode<synchronous>, transform_indices = @transform_3, window_bounds = array<i64: 1, 256>}, {pipeline_mode = #tpu.pipeline_mode<synchronous>, transform_indices = @transform_4, window_bounds = array<i64: 1, 256>}, {pipeline_mode = #tpu.pipeline_mode<synchronous>, transform_indices = @transform_5, window_bounds = array<i64: 1, 256>}, {pipeline_mode = #tpu.pipeline_mode<synchronous>, transform_indices = @transform_6, window_bounds = array<i64: 1, 256>}, {}]} {
    %c0_i32 = arith.constant 0 : i32
    %0 = tpu.memref_slice %arg15[%c0_i32] : memref<4x!tpu.dma_semaphore, #tpu.memory_space<semaphore_mem>> -> memref<1x!tpu.dma_semaphore, #tpu.memory_space<semaphore_mem>>
    %1 = tpu.memref_squeeze %0 : memref<1x!tpu.dma_semaphore, #tpu.memory_space<semaphore_mem>> -> memref<!tpu.dma_semaphore, #tpu.memory_space<semaphore_mem>>
    tpu.enqueue_dma source(%arg1 : memref<2x8x8x256xf32, #tpu.memory_space<any>>) target(%arg9 : memref<2x8x8x256xf32, #tpu.memory_space<vmem>>) target_semaphore(%1 : memref<!tpu.dma_semaphore, #tpu.memory_space<semaphore_mem>>)
    %c1_i32 = arith.constant 1 : i32
    %2 = tpu.memref_slice %arg15[%c1_i32] : memref<4x!tpu.dma_semaphore, #tpu.memory_space<semaphore_mem>> -> memref<1x!tpu.dma_semaphore, #tpu.memory_space<semaphore_mem>>
    %3 = tpu.memref_squeeze %2 : memref<1x!tpu.dma_semaphore, #tpu.memory_space<semaphore_mem>> -> memref<!tpu.dma_semaphore, #tpu.memory_space<semaphore_mem>>
    tpu.enqueue_dma source(%arg2 : memref<3x3x256x256xbf16, #tpu.memory_space<any>>) target(%arg13 : memref<3x3x256x256xbf16, #tpu.memory_space<vmem>>) target_semaphore(%3 : memref<!tpu.dma_semaphore, #tpu.memory_space<semaphore_mem>>)
    %c2_i32 = arith.constant 2 : i32
    %4 = tpu.memref_slice %arg15[%c2_i32] : memref<4x!tpu.dma_semaphore, #tpu.memory_space<semaphore_mem>> -> memref<1x!tpu.dma_semaphore, #tpu.memory_space<semaphore_mem>>
    %5 = tpu.memref_squeeze %4 : memref<1x!tpu.dma_semaphore, #tpu.memory_space<semaphore_mem>> -> memref<!tpu.dma_semaphore, #tpu.memory_space<semaphore_mem>>
    tpu.enqueue_dma source(%arg3 : memref<3x3x256x256xbf16, #tpu.memory_space<any>>) target(%arg14 : memref<3x3x256x256xbf16, #tpu.memory_space<vmem>>) target_semaphore(%5 : memref<!tpu.dma_semaphore, #tpu.memory_space<semaphore_mem>>)
    %cst = arith.constant 0.000000e+00 : bf16
    %6 = vector.broadcast %cst : bf16 to vector<2x1x10x256xbf16>
    %cst_0 = arith.constant 0.000000e+00 : bf16
    %7 = vector.broadcast %cst_0 : bf16 to vector<2x10x1x256xbf16>
    %c0 = arith.constant 0 : index
    %c0_1 = arith.constant 0 : index
    %c0_2 = arith.constant 0 : index
    %c0_3 = arith.constant 0 : index
    %8 = vector.load %arg10[%c0, %c0_1, %c0_2, %c0_3] : memref<2x10x10x256xbf16, #tpu.memory_space<vmem>>, vector<2x1x10x256xbf16>
    tpu.vector_store %arg10[%c0, %c0_1, %c0_2, %c0_3], %6 {strides = array<i32>} : memref<2x10x10x256xbf16, #tpu.memory_space<vmem>>, vector<2x1x10x256xbf16>,
    %c0_4 = arith.constant 0 : index
    %c9 = arith.constant 9 : index
    %c0_5 = arith.constant 0 : index
    %c0_6 = arith.constant 0 : index
    %9 = vector.load %arg10[%c0_4, %c9, %c0_5, %c0_6] : memref<2x10x10x256xbf16, #tpu.memory_space<vmem>>, vector<2x1x10x256xbf16>
    tpu.vector_store %arg10[%c0_4, %c9, %c0_5, %c0_6], %6 {strides = array<i32>} : memref<2x10x10x256xbf16, #tpu.memory_space<vmem>>, vector<2x1x10x256xbf16>,
    %c0_7 = arith.constant 0 : index
    %c0_8 = arith.constant 0 : index
    %c0_9 = arith.constant 0 : index
    %c0_10 = arith.constant 0 : index
    %10 = vector.load %arg10[%c0_7, %c0_8, %c0_9, %c0_10] : memref<2x10x10x256xbf16, #tpu.memory_space<vmem>>, vector<2x10x1x256xbf16>
    tpu.vector_store %arg10[%c0_7, %c0_8, %c0_9, %c0_10], %7 {strides = array<i32>} : memref<2x10x10x256xbf16, #tpu.memory_space<vmem>>, vector<2x10x1x256xbf16>,
    %c0_11 = arith.constant 0 : index
    %c0_12 = arith.constant 0 : index
    %c9_13 = arith.constant 9 : index
    %c0_14 = arith.constant 0 : index
    %11 = vector.load %arg10[%c0_11, %c0_12, %c9_13, %c0_14] : memref<2x10x10x256xbf16, #tpu.memory_space<vmem>>, vector<2x10x1x256xbf16>
    tpu.vector_store %arg10[%c0_11, %c0_12, %c9_13, %c0_14], %7 {strides = array<i32>} : memref<2x10x10x256xbf16, #tpu.memory_space<vmem>>, vector<2x10x1x256xbf16>,
    %c0_i32_15 = arith.constant 0 : i32
    %12 = tpu.memref_slice %arg15[%c0_i32_15] : memref<4x!tpu.dma_semaphore, #tpu.memory_space<semaphore_mem>> -> memref<1x!tpu.dma_semaphore, #tpu.memory_space<semaphore_mem>>
    %13 = tpu.memref_squeeze %12 : memref<1x!tpu.dma_semaphore, #tpu.memory_space<semaphore_mem>> -> memref<!tpu.dma_semaphore, #tpu.memory_space<semaphore_mem>>
    tpu.wait_dma2 semaphore(%13 : memref<!tpu.dma_semaphore, #tpu.memory_space<semaphore_mem>>) src(%arg1 : memref<2x8x8x256xf32, #tpu.memory_space<any>>) dst(%arg9 : memref<2x8x8x256xf32, #tpu.memory_space<vmem>>)
    %c0_16 = arith.constant 0 : index
    %c0_17 = arith.constant 0 : index
    %c0_18 = arith.constant 0 : index
    %c0_19 = arith.constant 0 : index
    %14 = vector.load %arg9[%c0_16, %c0_17, %c0_18, %c0_19] : memref<2x8x8x256xf32, #tpu.memory_space<vmem>>, vector<2x8x8x256xf32>
    %15 = arith.truncf %14 : vector<2x8x8x256xf32> to vector<2x8x8x256xbf16>
    %c0_20 = arith.constant 0 : index
    %c1 = arith.constant 1 : index
    %c1_21 = arith.constant 1 : index
    %c0_22 = arith.constant 0 : index
    %16 = vector.load %arg10[%c0_20, %c1, %c1_21, %c0_22] : memref<2x10x10x256xbf16, #tpu.memory_space<vmem>>, vector<2x8x8x256xbf16>
    tpu.vector_store %arg10[%c0_20, %c1, %c1_21, %c0_22], %15 {strides = array<i32>} : memref<2x10x10x256xbf16, #tpu.memory_space<vmem>>, vector<2x8x8x256xbf16>,
    %c1_i32_23 = arith.constant 1 : i32
    %17 = tpu.memref_slice %arg15[%c1_i32_23] : memref<4x!tpu.dma_semaphore, #tpu.memory_space<semaphore_mem>> -> memref<1x!tpu.dma_semaphore, #tpu.memory_space<semaphore_mem>>
    %18 = tpu.memref_squeeze %17 : memref<1x!tpu.dma_semaphore, #tpu.memory_space<semaphore_mem>> -> memref<!tpu.dma_semaphore, #tpu.memory_space<semaphore_mem>>
    tpu.wait_dma2 semaphore(%18 : memref<!tpu.dma_semaphore, #tpu.memory_space<semaphore_mem>>) src(%arg2 : memref<3x3x256x256xbf16, #tpu.memory_space<any>>) dst(%arg13 : memref<3x3x256x256xbf16, #tpu.memory_space<vmem>>)
    %c0_24 = arith.constant 0 : index
    %c0_25 = arith.constant 0 : index
    %c0_26 = arith.constant 0 : index
    %c0_27 = arith.constant 0 : index
    %19 = vector.load %arg10[%c0_24, %c0_25, %c0_26, %c0_27] : memref<2x10x10x256xbf16, #tpu.memory_space<vmem>>, vector<2x10x8x256xbf16>
    %c0_28 = arith.constant 0 : index
    %c0_29 = arith.constant 0 : index
    %c0_30 = arith.constant 0 : index
    %c0_31 = arith.constant 0 : index
    %20 = vector.load %arg11[%c0_28, %c0_29, %c0_30, %c0_31] : memref<2x10x8x256xbf16, #tpu.memory_space<vmem>>, vector<2x10x8x256xbf16>
    tpu.vector_store %arg11[%c0_28, %c0_29, %c0_30, %c0_31], %19 {strides = array<i32>} : memref<2x10x8x256xbf16, #tpu.memory_space<vmem>>, vector<2x10x8x256xbf16>,
    %c0_32 = arith.constant 0 : index
    %c0_33 = arith.constant 0 : index
    %c0_34 = arith.constant 0 : index
    %c0_35 = arith.constant 0 : index
    %21 = vector.load %arg11[%c0_32, %c0_33, %c0_34, %c0_35] : memref<2x10x8x256xbf16, #tpu.memory_space<vmem>>, vector<2x8x8x256xbf16>
    %22 = vector.shape_cast %21 : vector<2x8x8x256xbf16> to vector<128x256xbf16>
    %c0_36 = arith.constant 0 : index
    %c0_37 = arith.constant 0 : index
    %c0_38 = arith.constant 0 : index
    %c0_39 = arith.constant 0 : index
    %23 = vector.load %arg13[%c0_36, %c0_37, %c0_38, %c0_39] : memref<3x3x256x256xbf16, #tpu.memory_space<vmem>>, vector<1x1x256x256xbf16>
    %24 = vector.shape_cast %23 : vector<1x1x256x256xbf16> to vector<256x256xbf16>
    %cst_40 = arith.constant dense<0.000000e+00> : vector<128x256xf32>
    %25 = tpu.matmul %22, %24, %cst_40 {dimension_numbers = #tpu.dot_dimension_numbers<[1], [0], [0], [1], [0, 0, 1, 1], [], []>} : vector<128x256xbf16>, vector<256x256xbf16>, vector<128x256xf32> -> vector<128x256xf32>
    %c0_41 = arith.constant 0 : index
    %c1_42 = arith.constant 1 : index
    %c0_43 = arith.constant 0 : index
    %c0_44 = arith.constant 0 : index
    %26 = vector.load %arg11[%c0_41, %c1_42, %c0_43, %c0_44] : memref<2x10x8x256xbf16, #tpu.memory_space<vmem>>, vector<2x8x8x256xbf16>
    %27 = vector.shape_cast %26 : vector<2x8x8x256xbf16> to vector<128x256xbf16>
    %c1_45 = arith.constant 1 : index
    %c0_46 = arith.constant 0 : index
    %c0_47 = arith.constant 0 : index
    %c0_48 = arith.constant 0 : index
    %28 = vector.load %arg13[%c1_45, %c0_46, %c0_47, %c0_48] : memref<3x3x256x256xbf16, #tpu.memory_space<vmem>>, vector<1x1x256x256xbf16>
    %29 = vector.shape_cast %28 : vector<1x1x256x256xbf16> to vector<256x256xbf16>
    %cst_49 = arith.constant dense<0.000000e+00> : vector<128x256xf32>
    %30 = tpu.matmul %27, %29, %cst_49 {dimension_numbers = #tpu.dot_dimension_numbers<[1], [0], [0], [1], [0, 0, 1, 1], [], []>} : vector<128x256xbf16>, vector<256x256xbf16>, vector<128x256xf32> -> vector<128x256xf32>
    %31 = arith.addf %25, %30 : vector<128x256xf32>
    %c0_50 = arith.constant 0 : index
    %c2 = arith.constant 2 : index
    %c0_51 = arith.constant 0 : index
    %c0_52 = arith.constant 0 : index
    %32 = vector.load %arg11[%c0_50, %c2, %c0_51, %c0_52] : memref<2x10x8x256xbf16, #tpu.memory_space<vmem>>, vector<2x8x8x256xbf16>
    %33 = vector.shape_cast %32 : vector<2x8x8x256xbf16> to vector<128x256xbf16>
    %c2_53 = arith.constant 2 : index
    %c0_54 = arith.constant 0 : index
    %c0_55 = arith.constant 0 : index
    %c0_56 = arith.constant 0 : index
    %34 = vector.load %arg13[%c2_53, %c0_54, %c0_55, %c0_56] : memref<3x3x256x256xbf16, #tpu.memory_space<vmem>>, vector<1x1x256x256xbf16>
    %35 = vector.shape_cast %34 : vector<1x1x256x256xbf16> to vector<256x256xbf16>
    %cst_57 = arith.constant dense<0.000000e+00> : vector<128x256xf32>
    %36 = tpu.matmul %33, %35, %cst_57 {dimension_numbers = #tpu.dot_dimension_numbers<[1], [0], [0], [1], [0, 0, 1, 1], [], []>} : vector<128x256xbf16>, vector<256x256xbf16>, vector<128x256xf32> -> vector<128x256xf32>
    %37 = arith.addf %31, %36 : vector<128x256xf32>
    %c0_58 = arith.constant 0 : index
    %c0_59 = arith.constant 0 : index
    %38 = vector.load %arg12[%c0_58, %c0_59] : memref<128x256xf32, #tpu.memory_space<vmem>>, vector<128x256xf32>
    tpu.vector_store %arg12[%c0_58, %c0_59], %37 {strides = array<i32>} : memref<128x256xf32, #tpu.memory_space<vmem>>, vector<128x256xf32>,
    %c0_60 = arith.constant 0 : index
    %c0_61 = arith.constant 0 : index
    %c1_62 = arith.constant 1 : index
    %c0_63 = arith.constant 0 : index
    %39 = vector.load %arg10[%c0_60, %c0_61, %c1_62, %c0_63] : memref<2x10x10x256xbf16, #tpu.memory_space<vmem>>, vector<2x10x8x256xbf16>
    %c0_64 = arith.constant 0 : index
    %c0_65 = arith.constant 0 : index
    %c0_66 = arith.constant 0 : index
    %c0_67 = arith.constant 0 : index
    %40 = vector.load %arg11[%c0_64, %c0_65, %c0_66, %c0_67] : memref<2x10x8x256xbf16, #tpu.memory_space<vmem>>, vector<2x10x8x256xbf16>
    tpu.vector_store %arg11[%c0_64, %c0_65, %c0_66, %c0_67], %39 {strides = array<i32>} : memref<2x10x8x256xbf16, #tpu.memory_space<vmem>>, vector<2x10x8x256xbf16>,
    %c0_68 = arith.constant 0 : index
    %c0_69 = arith.constant 0 : index
    %c0_70 = arith.constant 0 : index
    %c0_71 = arith.constant 0 : index
    %41 = vector.load %arg11[%c0_68, %c0_69, %c0_70, %c0_71] : memref<2x10x8x256xbf16, #tpu.memory_space<vmem>>, vector<2x8x8x256xbf16>
    %42 = vector.shape_cast %41 : vector<2x8x8x256xbf16> to vector<128x256xbf16>
    %c0_72 = arith.constant 0 : index
    %c1_73 = arith.constant 1 : index
    %c0_74 = arith.constant 0 : index
    %c0_75 = arith.constant 0 : index
    %43 = vector.load %arg13[%c0_72, %c1_73, %c0_74, %c0_75] : memref<3x3x256x256xbf16, #tpu.memory_space<vmem>>, vector<1x1x256x256xbf16>
    %44 = vector.shape_cast %43 : vector<1x1x256x256xbf16> to vector<256x256xbf16>
    %cst_76 = arith.constant dense<0.000000e+00> : vector<128x256xf32>
    %45 = tpu.matmul %42, %44, %cst_76 {dimension_numbers = #tpu.dot_dimension_numbers<[1], [0], [0], [1], [0, 0, 1, 1], [], []>} : vector<128x256xbf16>, vector<256x256xbf16>, vector<128x256xf32> -> vector<128x256xf32>
    %c0_77 = arith.constant 0 : index
    %c1_78 = arith.constant 1 : index
    %c0_79 = arith.constant 0 : index
    %c0_80 = arith.constant 0 : index
    %46 = vector.load %arg11[%c0_77, %c1_78, %c0_79, %c0_80] : memref<2x10x8x256xbf16, #tpu.memory_space<vmem>>, vector<2x8x8x256xbf16>
    %47 = vector.shape_cast %46 : vector<2x8x8x256xbf16> to vector<128x256xbf16>
    %c1_81 = arith.constant 1 : index
    %c1_82 = arith.constant 1 : index
    %c0_83 = arith.constant 0 : index
    %c0_84 = arith.constant 0 : index
    %48 = vector.load %arg13[%c1_81, %c1_82, %c0_83, %c0_84] : memref<3x3x256x256xbf16, #tpu.memory_space<vmem>>, vector<1x1x256x256xbf16>
    %49 = vector.shape_cast %48 : vector<1x1x256x256xbf16> to vector<256x256xbf16>
    %cst_85 = arith.constant dense<0.000000e+00> : vector<128x256xf32>
    %50 = tpu.matmul %47, %49, %cst_85 {dimension_numbers = #tpu.dot_dimension_numbers<[1], [0], [0], [1], [0, 0, 1, 1], [], []>} : vector<128x256xbf16>, vector<256x256xbf16>, vector<128x256xf32> -> vector<128x256xf32>
    %51 = arith.addf %45, %50 : vector<128x256xf32>
    %c0_86 = arith.constant 0 : index
    %c2_87 = arith.constant 2 : index
    %c0_88 = arith.constant 0 : index
    %c0_89 = arith.constant 0 : index
    %52 = vector.load %arg11[%c0_86, %c2_87, %c0_88, %c0_89] : memref<2x10x8x256xbf16, #tpu.memory_space<vmem>>, vector<2x8x8x256xbf16>
    %53 = vector.shape_cast %52 : vector<2x8x8x256xbf16> to vector<128x256xbf16>
    %c2_90 = arith.constant 2 : index
    %c1_91 = arith.constant 1 : index
    %c0_92 = arith.constant 0 : index
    %c0_93 = arith.constant 0 : index
    %54 = vector.load %arg13[%c2_90, %c1_91, %c0_92, %c0_93] : memref<3x3x256x256xbf16, #tpu.memory_space<vmem>>, vector<1x1x256x256xbf16>
    %55 = vector.shape_cast %54 : vector<1x1x256x256xbf16> to vector<256x256xbf16>
    %cst_94 = arith.constant dense<0.000000e+00> : vector<128x256xf32>
    %56 = tpu.matmul %53, %55, %cst_94 {dimension_numbers = #tpu.dot_dimension_numbers<[1], [0], [0], [1], [0, 0, 1, 1], [], []>} : vector<128x256xbf16>, vector<256x256xbf16>, vector<128x256xf32> -> vector<128x256xf32>
    %57 = arith.addf %51, %56 : vector<128x256xf32>
    %c0_95 = arith.constant 0 : index
    %c0_96 = arith.constant 0 : index
    %58 = vector.load %arg12[%c0_95, %c0_96] : memref<128x256xf32, #tpu.memory_space<vmem>>, vector<128x256xf32>
    %59 = arith.addf %58, %57 : vector<128x256xf32>
    %c0_97 = arith.constant 0 : index
    %c0_98 = arith.constant 0 : index
    %60 = vector.load %arg12[%c0_97, %c0_98] : memref<128x256xf32, #tpu.memory_space<vmem>>, vector<128x256xf32>
    tpu.vector_store %arg12[%c0_97, %c0_98], %59 {strides = array<i32>} : memref<128x256xf32, #tpu.memory_space<vmem>>, vector<128x256xf32>,
    %c0_99 = arith.constant 0 : index
    %c0_100 = arith.constant 0 : index
    %c2_101 = arith.constant 2 : index
    %c0_102 = arith.constant 0 : index
    %61 = vector.load %arg10[%c0_99, %c0_100, %c2_101, %c0_102] : memref<2x10x10x256xbf16, #tpu.memory_space<vmem>>, vector<2x10x8x256xbf16>
    %c0_103 = arith.constant 0 : index
    %c0_104 = arith.constant 0 : index
    %c0_105 = arith.constant 0 : index
    %c0_106 = arith.constant 0 : index
    %62 = vector.load %arg11[%c0_103, %c0_104, %c0_105, %c0_106] : memref<2x10x8x256xbf16, #tpu.memory_space<vmem>>, vector<2x10x8x256xbf16>
    tpu.vector_store %arg11[%c0_103, %c0_104, %c0_105, %c0_106], %61 {strides = array<i32>} : memref<2x10x8x256xbf16, #tpu.memory_space<vmem>>, vector<2x10x8x256xbf16>,
    %c0_107 = arith.constant 0 : index
    %c0_108 = arith.constant 0 : index
    %c0_109 = arith.constant 0 : index
    %c0_110 = arith.constant 0 : index
    %63 = vector.load %arg11[%c0_107, %c0_108, %c0_109, %c0_110] : memref<2x10x8x256xbf16, #tpu.memory_space<vmem>>, vector<2x8x8x256xbf16>
    %64 = vector.shape_cast %63 : vector<2x8x8x256xbf16> to vector<128x256xbf16>
    %c0_111 = arith.constant 0 : index
    %c2_112 = arith.constant 2 : index
    %c0_113 = arith.constant 0 : index
    %c0_114 = arith.constant 0 : index
    %65 = vector.load %arg13[%c0_111, %c2_112, %c0_113, %c0_114] : memref<3x3x256x256xbf16, #tpu.memory_space<vmem>>, vector<1x1x256x256xbf16>
    %66 = vector.shape_cast %65 : vector<1x1x256x256xbf16> to vector<256x256xbf16>
    %cst_115 = arith.constant dense<0.000000e+00> : vector<128x256xf32>
    %67 = tpu.matmul %64, %66, %cst_115 {dimension_numbers = #tpu.dot_dimension_numbers<[1], [0], [0], [1], [0, 0, 1, 1], [], []>} : vector<128x256xbf16>, vector<256x256xbf16>, vector<128x256xf32> -> vector<128x256xf32>
    %c0_116 = arith.constant 0 : index
    %c1_117 = arith.constant 1 : index
    %c0_118 = arith.constant 0 : index
    %c0_119 = arith.constant 0 : index
    %68 = vector.load %arg11[%c0_116, %c1_117, %c0_118, %c0_119] : memref<2x10x8x256xbf16, #tpu.memory_space<vmem>>, vector<2x8x8x256xbf16>
    %69 = vector.shape_cast %68 : vector<2x8x8x256xbf16> to vector<128x256xbf16>
    %c1_120 = arith.constant 1 : index
    %c2_121 = arith.constant 2 : index
    %c0_122 = arith.constant 0 : index
    %c0_123 = arith.constant 0 : index
    %70 = vector.load %arg13[%c1_120, %c2_121, %c0_122, %c0_123] : memref<3x3x256x256xbf16, #tpu.memory_space<vmem>>, vector<1x1x256x256xbf16>
    %71 = vector.shape_cast %70 : vector<1x1x256x256xbf16> to vector<256x256xbf16>
    %cst_124 = arith.constant dense<0.000000e+00> : vector<128x256xf32>
    %72 = tpu.matmul %69, %71, %cst_124 {dimension_numbers = #tpu.dot_dimension_numbers<[1], [0], [0], [1], [0, 0, 1, 1], [], []>} : vector<128x256xbf16>, vector<256x256xbf16>, vector<128x256xf32> -> vector<128x256xf32>
    %73 = arith.addf %67, %72 : vector<128x256xf32>
    %c0_125 = arith.constant 0 : index
    %c2_126 = arith.constant 2 : index
    %c0_127 = arith.constant 0 : index
    %c0_128 = arith.constant 0 : index
    %74 = vector.load %arg11[%c0_125, %c2_126, %c0_127, %c0_128] : memref<2x10x8x256xbf16, #tpu.memory_space<vmem>>, vector<2x8x8x256xbf16>
    %75 = vector.shape_cast %74 : vector<2x8x8x256xbf16> to vector<128x256xbf16>
    %c2_129 = arith.constant 2 : index
    %c2_130 = arith.constant 2 : index
    %c0_131 = arith.constant 0 : index
    %c0_132 = arith.constant 0 : index
    %76 = vector.load %arg13[%c2_129, %c2_130, %c0_131, %c0_132] : memref<3x3x256x256xbf16, #tpu.memory_space<vmem>>, vector<1x1x256x256xbf16>
    %77 = vector.shape_cast %76 : vector<1x1x256x256xbf16> to vector<256x256xbf16>
    %cst_133 = arith.constant dense<0.000000e+00> : vector<128x256xf32>
    %78 = tpu.matmul %75, %77, %cst_133 {dimension_numbers = #tpu.dot_dimension_numbers<[1], [0], [0], [1], [0, 0, 1, 1], [], []>} : vector<128x256xbf16>, vector<256x256xbf16>, vector<128x256xf32> -> vector<128x256xf32>
    %79 = arith.addf %73, %78 : vector<128x256xf32>
    %c0_134 = arith.constant 0 : index
    %c0_135 = arith.constant 0 : index
    %80 = vector.load %arg12[%c0_134, %c0_135] : memref<128x256xf32, #tpu.memory_space<vmem>>, vector<128x256xf32>
    %81 = arith.addf %80, %79 : vector<128x256xf32>
    %c0_136 = arith.constant 0 : index
    %c0_137 = arith.constant 0 : index
    %82 = vector.load %arg12[%c0_136, %c0_137] : memref<128x256xf32, #tpu.memory_space<vmem>>, vector<128x256xf32>
    tpu.vector_store %arg12[%c0_136, %c0_137], %81 {strides = array<i32>} : memref<128x256xf32, #tpu.memory_space<vmem>>, vector<128x256xf32>,
    %c0_138 = arith.constant 0 : index
    %c0_139 = arith.constant 0 : index
    %83 = vector.load %arg12[%c0_138, %c0_139] : memref<128x256xf32, #tpu.memory_space<vmem>>, vector<128x256xf32>
    %c0_140 = arith.constant 0 : index
    %c0_141 = arith.constant 0 : index
    %84 = vector.load %arg4[%c0_140, %c0_141] : memref<1x256xf32, #tpu.memory_space<vmem>>, vector<1x256xf32>
    %c0_142 = arith.constant 0 : index
    %c0_143 = arith.constant 0 : index
    %85 = vector.load %arg5[%c0_142, %c0_143] : memref<1x256xf32, #tpu.memory_space<vmem>>, vector<1x256xf32>
    %cst_144 = arith.constant dense<0.000000e+00> : vector<256xf32>
    %86 = vector.multi_reduction <add>, %83, %cst_144 [0] : vector<128x256xf32> to vector<256xf32>
    %87 = vector.shape_cast %86 : vector<256xf32> to vector<1x256xf32>
    %88 = arith.mulf %83, %83 : vector<128x256xf32>
    %cst_145 = arith.constant dense<0.000000e+00> : vector<256xf32>
    %89 = vector.multi_reduction <add>, %88, %cst_145 [0] : vector<128x256xf32> to vector<256xf32>
    %90 = vector.shape_cast %89 : vector<256xf32> to vector<1x256xf32>
    %cst_146 = arith.constant 7.812500e-03 : f32
    %91 = vector.broadcast %cst_146 : f32 to vector<1x256xf32>
    %92 = arith.mulf %87, %91 : vector<1x256xf32>
    %cst_147 = arith.constant 7.812500e-03 : f32
    %93 = vector.broadcast %cst_147 : f32 to vector<1x256xf32>
    %94 = arith.mulf %90, %93 : vector<1x256xf32>
    %95 = arith.mulf %92, %92 : vector<1x256xf32>
    %96 = arith.subf %94, %95 : vector<1x256xf32>
    %cst_148 = arith.constant 0.000000e+00 : f32
    %97 = vector.broadcast %cst_148 : f32 to vector<1x256xf32>
    %98 = arith.maximumf %96, %97 : vector<1x256xf32>
    %cst_149 = arith.constant 9.99999974E-6 : f32
    %99 = vector.broadcast %cst_149 : f32 to vector<1x256xf32>
    %100 = arith.addf %98, %99 : vector<1x256xf32>
    %101 = math.rsqrt %100 : vector<1x256xf32>
    %102 = arith.mulf %84, %101 : vector<1x256xf32>
    %103 = arith.mulf %92, %102 : vector<1x256xf32>
    %104 = arith.subf %85, %103 : vector<1x256xf32>
    %105 = vector.broadcast %102 : vector<1x256xf32> to vector<128x256xf32>
    %106 = arith.mulf %83, %105 : vector<128x256xf32>
    %107 = vector.broadcast %104 : vector<1x256xf32> to vector<128x256xf32>
    %108 = arith.addf %106, %107 : vector<128x256xf32>
    %cst_150 = arith.constant 0.000000e+00 : f32
    %109 = vector.broadcast %cst_150 : f32 to vector<128x256xf32>
    %110 = arith.maximumf %108, %109 : vector<128x256xf32>
    %111 = vector.shape_cast %110 : vector<128x256xf32> to vector<2x8x8x256xf32>
    %112 = arith.truncf %111 : vector<2x8x8x256xf32> to vector<2x8x8x256xbf16>
    %c0_151 = arith.constant 0 : index
    %c1_152 = arith.constant 1 : index
    %c1_153 = arith.constant 1 : index
    %c0_154 = arith.constant 0 : index
    %113 = vector.load %arg10[%c0_151, %c1_152, %c1_153, %c0_154] : memref<2x10x10x256xbf16, #tpu.memory_space<vmem>>, vector<2x8x8x256xbf16>
    tpu.vector_store %arg10[%c0_151, %c1_152, %c1_153, %c0_154], %112 {strides = array<i32>} : memref<2x10x10x256xbf16, #tpu.memory_space<vmem>>, vector<2x8x8x256xbf16>,
    %c2_i32_155 = arith.constant 2 : i32
    %114 = tpu.memref_slice %arg15[%c2_i32_155] : memref<4x!tpu.dma_semaphore, #tpu.memory_space<semaphore_mem>> -> memref<1x!tpu.dma_semaphore, #tpu.memory_space<semaphore_mem>>
    %115 = tpu.memref_squeeze %114 : memref<1x!tpu.dma_semaphore, #tpu.memory_space<semaphore_mem>> -> memref<!tpu.dma_semaphore, #tpu.memory_space<semaphore_mem>>
    tpu.wait_dma2 semaphore(%115 : memref<!tpu.dma_semaphore, #tpu.memory_space<semaphore_mem>>) src(%arg3 : memref<3x3x256x256xbf16, #tpu.memory_space<any>>) dst(%arg14 : memref<3x3x256x256xbf16, #tpu.memory_space<vmem>>)
    %c0_156 = arith.constant 0 : index
    %c0_157 = arith.constant 0 : index
    %c0_158 = arith.constant 0 : index
    %c0_159 = arith.constant 0 : index
    %116 = vector.load %arg10[%c0_156, %c0_157, %c0_158, %c0_159] : memref<2x10x10x256xbf16, #tpu.memory_space<vmem>>, vector<2x10x8x256xbf16>
    %c0_160 = arith.constant 0 : index
    %c0_161 = arith.constant 0 : index
    %c0_162 = arith.constant 0 : index
    %c0_163 = arith.constant 0 : index
    %117 = vector.load %arg11[%c0_160, %c0_161, %c0_162, %c0_163] : memref<2x10x8x256xbf16, #tpu.memory_space<vmem>>, vector<2x10x8x256xbf16>
    tpu.vector_store %arg11[%c0_160, %c0_161, %c0_162, %c0_163], %116 {strides = array<i32>} : memref<2x10x8x256xbf16, #tpu.memory_space<vmem>>, vector<2x10x8x256xbf16>,
    %c0_164 = arith.constant 0 : index
    %c0_165 = arith.constant 0 : index
    %c0_166 = arith.constant 0 : index
    %c0_167 = arith.constant 0 : index
    %118 = vector.load %arg11[%c0_164, %c0_165, %c0_166, %c0_167] : memref<2x10x8x256xbf16, #tpu.memory_space<vmem>>, vector<2x8x8x256xbf16>
    %119 = vector.shape_cast %118 : vector<2x8x8x256xbf16> to vector<128x256xbf16>
    %c0_168 = arith.constant 0 : index
    %c0_169 = arith.constant 0 : index
    %c0_170 = arith.constant 0 : index
    %c0_171 = arith.constant 0 : index
    %120 = vector.load %arg14[%c0_168, %c0_169, %c0_170, %c0_171] : memref<3x3x256x256xbf16, #tpu.memory_space<vmem>>, vector<1x1x256x256xbf16>
    %121 = vector.shape_cast %120 : vector<1x1x256x256xbf16> to vector<256x256xbf16>
    %cst_172 = arith.constant dense<0.000000e+00> : vector<128x256xf32>
    %122 = tpu.matmul %119, %121, %cst_172 {dimension_numbers = #tpu.dot_dimension_numbers<[1], [0], [0], [1], [0, 0, 1, 1], [], []>} : vector<128x256xbf16>, vector<256x256xbf16>, vector<128x256xf32> -> vector<128x256xf32>
    %c0_173 = arith.constant 0 : index
    %c1_174 = arith.constant 1 : index
    %c0_175 = arith.constant 0 : index
    %c0_176 = arith.constant 0 : index
    %123 = vector.load %arg11[%c0_173, %c1_174, %c0_175, %c0_176] : memref<2x10x8x256xbf16, #tpu.memory_space<vmem>>, vector<2x8x8x256xbf16>
    %124 = vector.shape_cast %123 : vector<2x8x8x256xbf16> to vector<128x256xbf16>
    %c1_177 = arith.constant 1 : index
    %c0_178 = arith.constant 0 : index
    %c0_179 = arith.constant 0 : index
    %c0_180 = arith.constant 0 : index
    %125 = vector.load %arg14[%c1_177, %c0_178, %c0_179, %c0_180] : memref<3x3x256x256xbf16, #tpu.memory_space<vmem>>, vector<1x1x256x256xbf16>
    %126 = vector.shape_cast %125 : vector<1x1x256x256xbf16> to vector<256x256xbf16>
    %cst_181 = arith.constant dense<0.000000e+00> : vector<128x256xf32>
    %127 = tpu.matmul %124, %126, %cst_181 {dimension_numbers = #tpu.dot_dimension_numbers<[1], [0], [0], [1], [0, 0, 1, 1], [], []>} : vector<128x256xbf16>, vector<256x256xbf16>, vector<128x256xf32> -> vector<128x256xf32>
    %128 = arith.addf %122, %127 : vector<128x256xf32>
    %c0_182 = arith.constant 0 : index
    %c2_183 = arith.constant 2 : index
    %c0_184 = arith.constant 0 : index
    %c0_185 = arith.constant 0 : index
    %129 = vector.load %arg11[%c0_182, %c2_183, %c0_184, %c0_185] : memref<2x10x8x256xbf16, #tpu.memory_space<vmem>>, vector<2x8x8x256xbf16>
    %130 = vector.shape_cast %129 : vector<2x8x8x256xbf16> to vector<128x256xbf16>
    %c2_186 = arith.constant 2 : index
    %c0_187 = arith.constant 0 : index
    %c0_188 = arith.constant 0 : index
    %c0_189 = arith.constant 0 : index
    %131 = vector.load %arg14[%c2_186, %c0_187, %c0_188, %c0_189] : memref<3x3x256x256xbf16, #tpu.memory_space<vmem>>, vector<1x1x256x256xbf16>
    %132 = vector.shape_cast %131 : vector<1x1x256x256xbf16> to vector<256x256xbf16>
    %cst_190 = arith.constant dense<0.000000e+00> : vector<128x256xf32>
    %133 = tpu.matmul %130, %132, %cst_190 {dimension_numbers = #tpu.dot_dimension_numbers<[1], [0], [0], [1], [0, 0, 1, 1], [], []>} : vector<128x256xbf16>, vector<256x256xbf16>, vector<128x256xf32> -> vector<128x256xf32>
    %134 = arith.addf %128, %133 : vector<128x256xf32>
    %c0_191 = arith.constant 0 : index
    %c0_192 = arith.constant 0 : index
    %135 = vector.load %arg12[%c0_191, %c0_192] : memref<128x256xf32, #tpu.memory_space<vmem>>, vector<128x256xf32>
    tpu.vector_store %arg12[%c0_191, %c0_192], %134 {strides = array<i32>} : memref<128x256xf32, #tpu.memory_space<vmem>>, vector<128x256xf32>,
    %c0_193 = arith.constant 0 : index
    %c0_194 = arith.constant 0 : index
    %c1_195 = arith.constant 1 : index
    %c0_196 = arith.constant 0 : index
    %136 = vector.load %arg10[%c0_193, %c0_194, %c1_195, %c0_196] : memref<2x10x10x256xbf16, #tpu.memory_space<vmem>>, vector<2x10x8x256xbf16>
    %c0_197 = arith.constant 0 : index
    %c0_198 = arith.constant 0 : index
    %c0_199 = arith.constant 0 : index
    %c0_200 = arith.constant 0 : index
    %137 = vector.load %arg11[%c0_197, %c0_198, %c0_199, %c0_200] : memref<2x10x8x256xbf16, #tpu.memory_space<vmem>>, vector<2x10x8x256xbf16>
    tpu.vector_store %arg11[%c0_197, %c0_198, %c0_199, %c0_200], %136 {strides = array<i32>} : memref<2x10x8x256xbf16, #tpu.memory_space<vmem>>, vector<2x10x8x256xbf16>,
    %c0_201 = arith.constant 0 : index
    %c0_202 = arith.constant 0 : index
    %c0_203 = arith.constant 0 : index
    %c0_204 = arith.constant 0 : index
    %138 = vector.load %arg11[%c0_201, %c0_202, %c0_203, %c0_204] : memref<2x10x8x256xbf16, #tpu.memory_space<vmem>>, vector<2x8x8x256xbf16>
    %139 = vector.shape_cast %138 : vector<2x8x8x256xbf16> to vector<128x256xbf16>
    %c0_205 = arith.constant 0 : index
    %c1_206 = arith.constant 1 : index
    %c0_207 = arith.constant 0 : index
    %c0_208 = arith.constant 0 : index
    %140 = vector.load %arg14[%c0_205, %c1_206, %c0_207, %c0_208] : memref<3x3x256x256xbf16, #tpu.memory_space<vmem>>, vector<1x1x256x256xbf16>
    %141 = vector.shape_cast %140 : vector<1x1x256x256xbf16> to vector<256x256xbf16>
    %cst_209 = arith.constant dense<0.000000e+00> : vector<128x256xf32>
    %142 = tpu.matmul %139, %141, %cst_209 {dimension_numbers = #tpu.dot_dimension_numbers<[1], [0], [0], [1], [0, 0, 1, 1], [], []>} : vector<128x256xbf16>, vector<256x256xbf16>, vector<128x256xf32> -> vector<128x256xf32>
    %c0_210 = arith.constant 0 : index
    %c1_211 = arith.constant 1 : index
    %c0_212 = arith.constant 0 : index
    %c0_213 = arith.constant 0 : index
    %143 = vector.load %arg11[%c0_210, %c1_211, %c0_212, %c0_213] : memref<2x10x8x256xbf16, #tpu.memory_space<vmem>>, vector<2x8x8x256xbf16>
    %144 = vector.shape_cast %143 : vector<2x8x8x256xbf16> to vector<128x256xbf16>
    %c1_214 = arith.constant 1 : index
    %c1_215 = arith.constant 1 : index
    %c0_216 = arith.constant 0 : index
    %c0_217 = arith.constant 0 : index
    %145 = vector.load %arg14[%c1_214, %c1_215, %c0_216, %c0_217] : memref<3x3x256x256xbf16, #tpu.memory_space<vmem>>, vector<1x1x256x256xbf16>
    %146 = vector.shape_cast %145 : vector<1x1x256x256xbf16> to vector<256x256xbf16>
    %cst_218 = arith.constant dense<0.000000e+00> : vector<128x256xf32>
    %147 = tpu.matmul %144, %146, %cst_218 {dimension_numbers = #tpu.dot_dimension_numbers<[1], [0], [0], [1], [0, 0, 1, 1], [], []>} : vector<128x256xbf16>, vector<256x256xbf16>, vector<128x256xf32> -> vector<128x256xf32>
    %148 = arith.addf %142, %147 : vector<128x256xf32>
    %c0_219 = arith.constant 0 : index
    %c2_220 = arith.constant 2 : index
    %c0_221 = arith.constant 0 : index
    %c0_222 = arith.constant 0 : index
    %149 = vector.load %arg11[%c0_219, %c2_220, %c0_221, %c0_222] : memref<2x10x8x256xbf16, #tpu.memory_space<vmem>>, vector<2x8x8x256xbf16>
    %150 = vector.shape_cast %149 : vector<2x8x8x256xbf16> to vector<128x256xbf16>
    %c2_223 = arith.constant 2 : index
    %c1_224 = arith.constant 1 : index
    %c0_225 = arith.constant 0 : index
    %c0_226 = arith.constant 0 : index
    %151 = vector.load %arg14[%c2_223, %c1_224, %c0_225, %c0_226] : memref<3x3x256x256xbf16, #tpu.memory_space<vmem>>, vector<1x1x256x256xbf16>
    %152 = vector.shape_cast %151 : vector<1x1x256x256xbf16> to vector<256x256xbf16>
    %cst_227 = arith.constant dense<0.000000e+00> : vector<128x256xf32>
    %153 = tpu.matmul %150, %152, %cst_227 {dimension_numbers = #tpu.dot_dimension_numbers<[1], [0], [0], [1], [0, 0, 1, 1], [], []>} : vector<128x256xbf16>, vector<256x256xbf16>, vector<128x256xf32> -> vector<128x256xf32>
    %154 = arith.addf %148, %153 : vector<128x256xf32>
    %c0_228 = arith.constant 0 : index
    %c0_229 = arith.constant 0 : index
    %155 = vector.load %arg12[%c0_228, %c0_229] : memref<128x256xf32, #tpu.memory_space<vmem>>, vector<128x256xf32>
    %156 = arith.addf %155, %154 : vector<128x256xf32>
    %c0_230 = arith.constant 0 : index
    %c0_231 = arith.constant 0 : index
    %157 = vector.load %arg12[%c0_230, %c0_231] : memref<128x256xf32, #tpu.memory_space<vmem>>, vector<128x256xf32>
    tpu.vector_store %arg12[%c0_230, %c0_231], %156 {strides = array<i32>} : memref<128x256xf32, #tpu.memory_space<vmem>>, vector<128x256xf32>,
    %c0_232 = arith.constant 0 : index
    %c0_233 = arith.constant 0 : index
    %c2_234 = arith.constant 2 : index
    %c0_235 = arith.constant 0 : index
    %158 = vector.load %arg10[%c0_232, %c0_233, %c2_234, %c0_235] : memref<2x10x10x256xbf16, #tpu.memory_space<vmem>>, vector<2x10x8x256xbf16>
    %c0_236 = arith.constant 0 : index
    %c0_237 = arith.constant 0 : index
    %c0_238 = arith.constant 0 : index
    %c0_239 = arith.constant 0 : index
    %159 = vector.load %arg11[%c0_236, %c0_237, %c0_238, %c0_239] : memref<2x10x8x256xbf16, #tpu.memory_space<vmem>>, vector<2x10x8x256xbf16>
    tpu.vector_store %arg11[%c0_236, %c0_237, %c0_238, %c0_239], %158 {strides = array<i32>} : memref<2x10x8x256xbf16, #tpu.memory_space<vmem>>, vector<2x10x8x256xbf16>,
    %c0_240 = arith.constant 0 : index
    %c0_241 = arith.constant 0 : index
    %c0_242 = arith.constant 0 : index
    %c0_243 = arith.constant 0 : index
    %160 = vector.load %arg11[%c0_240, %c0_241, %c0_242, %c0_243] : memref<2x10x8x256xbf16, #tpu.memory_space<vmem>>, vector<2x8x8x256xbf16>
    %161 = vector.shape_cast %160 : vector<2x8x8x256xbf16> to vector<128x256xbf16>
    %c0_244 = arith.constant 0 : index
    %c2_245 = arith.constant 2 : index
    %c0_246 = arith.constant 0 : index
    %c0_247 = arith.constant 0 : index
    %162 = vector.load %arg14[%c0_244, %c2_245, %c0_246, %c0_247] : memref<3x3x256x256xbf16, #tpu.memory_space<vmem>>, vector<1x1x256x256xbf16>
    %163 = vector.shape_cast %162 : vector<1x1x256x256xbf16> to vector<256x256xbf16>
    %cst_248 = arith.constant dense<0.000000e+00> : vector<128x256xf32>
    %164 = tpu.matmul %161, %163, %cst_248 {dimension_numbers = #tpu.dot_dimension_numbers<[1], [0], [0], [1], [0, 0, 1, 1], [], []>} : vector<128x256xbf16>, vector<256x256xbf16>, vector<128x256xf32> -> vector<128x256xf32>
    %c0_249 = arith.constant 0 : index
    %c1_250 = arith.constant 1 : index
    %c0_251 = arith.constant 0 : index
    %c0_252 = arith.constant 0 : index
    %165 = vector.load %arg11[%c0_249, %c1_250, %c0_251, %c0_252] : memref<2x10x8x256xbf16, #tpu.memory_space<vmem>>, vector<2x8x8x256xbf16>
    %166 = vector.shape_cast %165 : vector<2x8x8x256xbf16> to vector<128x256xbf16>
    %c1_253 = arith.constant 1 : index
    %c2_254 = arith.constant 2 : index
    %c0_255 = arith.constant 0 : index
    %c0_256 = arith.constant 0 : index
    %167 = vector.load %arg14[%c1_253, %c2_254, %c0_255, %c0_256] : memref<3x3x256x256xbf16, #tpu.memory_space<vmem>>, vector<1x1x256x256xbf16>
    %168 = vector.shape_cast %167 : vector<1x1x256x256xbf16> to vector<256x256xbf16>
    %cst_257 = arith.constant dense<0.000000e+00> : vector<128x256xf32>
    %169 = tpu.matmul %166, %168, %cst_257 {dimension_numbers = #tpu.dot_dimension_numbers<[1], [0], [0], [1], [0, 0, 1, 1], [], []>} : vector<128x256xbf16>, vector<256x256xbf16>, vector<128x256xf32> -> vector<128x256xf32>
    %170 = arith.addf %164, %169 : vector<128x256xf32>
    %c0_258 = arith.constant 0 : index
    %c2_259 = arith.constant 2 : index
    %c0_260 = arith.constant 0 : index
    %c0_261 = arith.constant 0 : index
    %171 = vector.load %arg11[%c0_258, %c2_259, %c0_260, %c0_261] : memref<2x10x8x256xbf16, #tpu.memory_space<vmem>>, vector<2x8x8x256xbf16>
    %172 = vector.shape_cast %171 : vector<2x8x8x256xbf16> to vector<128x256xbf16>
    %c2_262 = arith.constant 2 : index
    %c2_263 = arith.constant 2 : index
    %c0_264 = arith.constant 0 : index
    %c0_265 = arith.constant 0 : index
    %173 = vector.load %arg14[%c2_262, %c2_263, %c0_264, %c0_265] : memref<3x3x256x256xbf16, #tpu.memory_space<vmem>>, vector<1x1x256x256xbf16>
    %174 = vector.shape_cast %173 : vector<1x1x256x256xbf16> to vector<256x256xbf16>
    %cst_266 = arith.constant dense<0.000000e+00> : vector<128x256xf32>
    %175 = tpu.matmul %172, %174, %cst_266 {dimension_numbers = #tpu.dot_dimension_numbers<[1], [0], [0], [1], [0, 0, 1, 1], [], []>} : vector<128x256xbf16>, vector<256x256xbf16>, vector<128x256xf32> -> vector<128x256xf32>
    %176 = arith.addf %170, %175 : vector<128x256xf32>
    %c0_267 = arith.constant 0 : index
    %c0_268 = arith.constant 0 : index
    %177 = vector.load %arg12[%c0_267, %c0_268] : memref<128x256xf32, #tpu.memory_space<vmem>>, vector<128x256xf32>
    %178 = arith.addf %177, %176 : vector<128x256xf32>
    %c0_269 = arith.constant 0 : index
    %c0_270 = arith.constant 0 : index
    %179 = vector.load %arg12[%c0_269, %c0_270] : memref<128x256xf32, #tpu.memory_space<vmem>>, vector<128x256xf32>
    tpu.vector_store %arg12[%c0_269, %c0_270], %178 {strides = array<i32>} : memref<128x256xf32, #tpu.memory_space<vmem>>, vector<128x256xf32>,
    %c0_271 = arith.constant 0 : index
    %c0_272 = arith.constant 0 : index
    %180 = vector.load %arg12[%c0_271, %c0_272] : memref<128x256xf32, #tpu.memory_space<vmem>>, vector<128x256xf32>
    %c0_273 = arith.constant 0 : index
    %c0_274 = arith.constant 0 : index
    %181 = vector.load %arg6[%c0_273, %c0_274] : memref<1x256xf32, #tpu.memory_space<vmem>>, vector<1x256xf32>
    %c0_275 = arith.constant 0 : index
    %c0_276 = arith.constant 0 : index
    %182 = vector.load %arg7[%c0_275, %c0_276] : memref<1x256xf32, #tpu.memory_space<vmem>>, vector<1x256xf32>
    %cst_277 = arith.constant dense<0.000000e+00> : vector<256xf32>
    %183 = vector.multi_reduction <add>, %180, %cst_277 [0] : vector<128x256xf32> to vector<256xf32>
    %184 = vector.shape_cast %183 : vector<256xf32> to vector<1x256xf32>
    %185 = arith.mulf %180, %180 : vector<128x256xf32>
    %cst_278 = arith.constant dense<0.000000e+00> : vector<256xf32>
    %186 = vector.multi_reduction <add>, %185, %cst_278 [0] : vector<128x256xf32> to vector<256xf32>
    %187 = vector.shape_cast %186 : vector<256xf32> to vector<1x256xf32>
    %cst_279 = arith.constant 7.812500e-03 : f32
    %188 = vector.broadcast %cst_279 : f32 to vector<1x256xf32>
    %189 = arith.mulf %184, %188 : vector<1x256xf32>
    %cst_280 = arith.constant 7.812500e-03 : f32
    %190 = vector.broadcast %cst_280 : f32 to vector<1x256xf32>
    %191 = arith.mulf %187, %190 : vector<1x256xf32>
    %192 = arith.mulf %189, %189 : vector<1x256xf32>
    %193 = arith.subf %191, %192 : vector<1x256xf32>
    %cst_281 = arith.constant 0.000000e+00 : f32
    %194 = vector.broadcast %cst_281 : f32 to vector<1x256xf32>
    %195 = arith.maximumf %193, %194 : vector<1x256xf32>
    %cst_282 = arith.constant 9.99999974E-6 : f32
    %196 = vector.broadcast %cst_282 : f32 to vector<1x256xf32>
    %197 = arith.addf %195, %196 : vector<1x256xf32>
    %198 = math.rsqrt %197 : vector<1x256xf32>
    %199 = arith.mulf %181, %198 : vector<1x256xf32>
    %200 = arith.mulf %189, %199 : vector<1x256xf32>
    %201 = arith.subf %182, %200 : vector<1x256xf32>
    %c0_283 = arith.constant 0 : index
    %c0_284 = arith.constant 0 : index
    %c0_285 = arith.constant 0 : index
    %c0_286 = arith.constant 0 : index
    %202 = vector.load %arg9[%c0_283, %c0_284, %c0_285, %c0_286] : memref<2x8x8x256xf32, #tpu.memory_space<vmem>>, vector<2x8x8x256xf32>
    %203 = vector.shape_cast %202 : vector<2x8x8x256xf32> to vector<128x256xf32>
    %204 = vector.broadcast %199 : vector<1x256xf32> to vector<128x256xf32>
    %205 = arith.mulf %180, %204 : vector<128x256xf32>
    %206 = vector.broadcast %201 : vector<1x256xf32> to vector<128x256xf32>
    %207 = arith.addf %205, %206 : vector<128x256xf32>
    %208 = arith.addf %207, %203 : vector<128x256xf32>
    %cst_287 = arith.constant 0.000000e+00 : f32
    %209 = vector.broadcast %cst_287 : f32 to vector<128x256xf32>
    %210 = arith.maximumf %208, %209 : vector<128x256xf32>
    %c0_288 = arith.constant 0 : index
    %c0_289 = arith.constant 0 : index
    %211 = vector.load %arg12[%c0_288, %c0_289] : memref<128x256xf32, #tpu.memory_space<vmem>>, vector<128x256xf32>
    tpu.vector_store %arg12[%c0_288, %c0_289], %210 {strides = array<i32>} : memref<128x256xf32, #tpu.memory_space<vmem>>, vector<128x256xf32>,
    %c3_i32 = arith.constant 3 : i32
    %212 = tpu.memref_slice %arg15[%c3_i32] : memref<4x!tpu.dma_semaphore, #tpu.memory_space<semaphore_mem>> -> memref<1x!tpu.dma_semaphore, #tpu.memory_space<semaphore_mem>>
    %213 = tpu.memref_squeeze %212 : memref<1x!tpu.dma_semaphore, #tpu.memory_space<semaphore_mem>> -> memref<!tpu.dma_semaphore, #tpu.memory_space<semaphore_mem>>
    tpu.enqueue_dma source(%arg12 : memref<128x256xf32, #tpu.memory_space<vmem>>) target(%arg8 : memref<128x256xf32, #tpu.memory_space<any>>) target_semaphore(%213 : memref<!tpu.dma_semaphore, #tpu.memory_space<semaphore_mem>>)
    %c3_i32_290 = arith.constant 3 : i32
    %214 = tpu.memref_slice %arg15[%c3_i32_290] : memref<4x!tpu.dma_semaphore, #tpu.memory_space<semaphore_mem>> -> memref<1x!tpu.dma_semaphore, #tpu.memory_space<semaphore_mem>>
    %215 = tpu.memref_squeeze %214 : memref<1x!tpu.dma_semaphore, #tpu.memory_space<semaphore_mem>> -> memref<!tpu.dma_semaphore, #tpu.memory_space<semaphore_mem>>
    tpu.wait_dma2 semaphore(%215 : memref<!tpu.dma_semaphore, #tpu.memory_space<semaphore_mem>>) src(%arg12 : memref<128x256xf32, #tpu.memory_space<vmem>>) dst(%arg8 : memref<128x256xf32, #tpu.memory_space<any>>)
    return
  }
  func.func @transform_3(%arg0: i32) -> (i32, i32) {
    %c0_i32 = arith.constant 0 : i32
    %c0_i32_0 = arith.constant 0 : i32
    %c0_i32_1 = arith.constant 0 : i32
    return %c0_i32, %c0_i32_0 : i32, i32
  }
  func.func @transform_4(%arg0: i32) -> (i32, i32) {
    %c0_i32 = arith.constant 0 : i32
    %c0_i32_0 = arith.constant 0 : i32
    %c0_i32_1 = arith.constant 0 : i32
    return %c0_i32, %c0_i32_0 : i32, i32
  }
  func.func @transform_5(%arg0: i32) -> (i32, i32) {
    %c0_i32 = arith.constant 0 : i32
    %c0_i32_0 = arith.constant 0 : i32
    %c0_i32_1 = arith.constant 0 : i32
    return %c0_i32, %c0_i32_0 : i32, i32
  }
  func.func @transform_6(%arg0: i32) -> (i32, i32) {
    %c0_i32 = arith.constant 0 : i32
    %c0_i32_0 = arith.constant 0 : i32
    %c0_i32_1 = arith.constant 0 : i32
    return %c0_i32, %c0_i32_0 : i32, i32
  }
}

</mosaic_0001>

<bundles_post_ra>
// kernel: tpu_custom_call.1
= control target key start
LH: loop header
LB: loop body
LE: loop exit
PB: predicated region body
PF: predicated region fallthrough
CT: control target
= control target key end

     0   :  { %12 = vsyncpa [#allocation10], 0  ;;  %s16021_s0 = inlined_call_operand.hbm [shape: f32[2,8,8,256], index: 0, kind: input, shape index: {}]   ;;  %s16022_s1 = inlined_call_operand.hbm [shape: bf16[3,3,256,256], index: 1, kind: input, shape index: {}]   ;;  %s16023_s2 = inlined_call_operand.hbm [shape: bf16[3,3,256,256], index: 2, kind: input, shape index: {}]   ;;  %s16024_s3 = inlined_call_operand.hbm [shape: f32[1,256], index: 3, kind: input, shape index: {}]   ;;  %s16025_s4 = inlined_call_operand.hbm [shape: f32[1,256], index: 4, kind: input, shape index: {}]   ;;  %s16026_s5 = inlined_call_operand.hbm [shape: f32[1,256], index: 5, kind: input, shape index: {}]   ;;  %s16027_s6 = inlined_call_operand.hbm [shape: f32[1,256], index: 6, kind: input, shape index: {}]   ;;  %s16028_s7 = inlined_call_operand.hbm [shape: f32[128,256], index: 7, kind: output, shape index: {}]  }
   0x1   :  { %13 = vsyncpa [#allocation12], 0 }
   0x2   :  { %14 = vsyncpa [#allocation15], 0  ;;  %s12980_s24 = smov [#allocation11]   ;;  %s12981_s26 = smov [#allocation9]  }
   0x3   :  { %s31_s25 = sshll.u32 %s12980_s24, 4  ;;  %s21_s27 = sshll.u32 %s12981_s26, 4  ;;  %s32_s25 = int_to_ptr.vmem [resolvable:$true] %s31_s25  ;;  %s22_s27 = int_to_ptr.vmem [resolvable:$true] %s21_s27 }
   0x4   :  { %s12814_s28 = scalar_lea.vmem %s32_s25, 32  ;;  %p12819_p1 = scmp.lt.s32.totalorder %s32_s25, %s32_s25 }
   0x5   :  { %p12815_p0 = scmp.ne.s32.totalorder %s32_s25, %s12814_s28  ;;  %p12820_p2 = scmp.lt.s32.totalorder %s12814_s28, %s12814_s28 }
   0x7   :  { %p12821_p3 = por %p12820_p2, %p12819_p1 }
   0x9   :  { %p12822_p4 = pnand %p12821_p3, %p12815_p0 }
   0xb   :  { %12825 = shalt.err (!%p12822_p4)
}
   0xc   :  { %34 = dma.hbm_to_vmem [thread:$0]  %s16025_s4, 32, %s32_s25, [#allocation12]  }
   0xd   :  { %s12834_s8 = scalar_lea.vmem %s22_s27, 32  ;;  %p12839_p6 = scmp.lt.s32.totalorder %s22_s27, %s22_s27 }
   0xe   :  { %p12835_p5 = scmp.ne.s32.totalorder %s22_s27, %s12834_s8  ;;  %p12840_p7 = scmp.lt.s32.totalorder %s12834_s8, %s12834_s8 }
  0x10   :  { %p12841_p8 = por %p12840_p7, %p12839_p6 }
  0x12   :  { %p12842_p9 = pnand %p12841_p8, %p12835_p5 }
  0x14   :  { %12845 = shalt.err (!%p12842_p9)
}
  0x15   :  { %24 = dma.hbm_to_vmem [thread:$0]  %s16024_s3, 32, %s22_s27, [#allocation10]  }
  0x16   :  { %s12982_s11 = smov [#allocation13]   ;;  %s12983_s13 = smov [#allocation14]  }
  0x17   :  { %s41_s12 = sshll.u32 %s12982_s11, 4  ;;  %s51_s14 = sshll.u32 %s12983_s13, 4  ;;  %s42_s12 = int_to_ptr.vmem [resolvable:$true] %s41_s12  ;;  %s52_s14 = int_to_ptr.vmem [resolvable:$true] %s51_s14 }
  0x18   :  { %s12854_s15 = scalar_lea.vmem %s42_s12, 32  ;;  %p12859_p11 = scmp.lt.s32.totalorder %s42_s12, %s42_s12 }
  0x19   :  { %p12855_p10 = scmp.ne.s32.totalorder %s42_s12, %s12854_s15  ;;  %p12860_p12 = scmp.lt.s32.totalorder %s12854_s15, %s12854_s15 }
  0x1b   :  { %p12861_p13 = por %p12860_p12, %p12859_p11 }
  0x1d   :  { %p12862_p0 = pnand %p12861_p13, %p12855_p10 }
  0x1f   :  { %12865 = shalt.err (!%p12862_p0)
}
  0x20   :  { %44 = dma.hbm_to_vmem [thread:$0]  %s16026_s5, 32, %s42_s12, [#allocation12]  }
  0x21   :  { %s12874_s17 = scalar_lea.vmem %s52_s14, 32  ;;  %p12879_p2 = scmp.lt.s32.totalorder %s52_s14, %s52_s14 }
  0x22   :  { %p12875_p1 = scmp.ne.s32.totalorder %s52_s14, %s12874_s17  ;;  %p12880_p3 = scmp.lt.s32.totalorder %s12874_s17, %s12874_s17 }
  0x24   :  { %p12881_p4 = por %p12880_p3, %p12879_p2 }
  0x26   :  { %p12882_p5 = pnand %p12881_p4, %p12875_p1 }
  0x28   :  { %12885 = shalt.err (!%p12882_p5)
}
  0x29   :  { %54 = dma.hbm_to_vmem [thread:$0]  %s16027_s6, 32, %s52_s14, [#allocation15]  }
  0x2a   :  { %12966 = dma.done.wait [#allocation10], 32  }
  0x2b   :  { %12967 = vsyncadd [#allocation10], 4294967264 }
  0x2c   :  { %12968 = dma.done.wait [#allocation12], 64  }
  0x2d   :  { %12969 = vsyncadd [#allocation12], 4294967232 }
  0x2e   :  { %12970 = dma.done.wait [#allocation15], 32  }
  0x2f   :  { %12971 = vsyncadd [#allocation15], 4294967264  ;;  %vm112_vm0 = vcmask 1040384   ;;  %v12984_v0 = vmov 0   ;;  %s12985_s5 = smov [#allocation2]   ;;  %s12986_s20 = smov [#allocation6]  }
  0x30   :  { %103 = vst [vmem:[#allocation3 + $0x110] sm:$0xff] %v12984_v0  ;;  %104 = vst [vmem:[#allocation3 + $0x38] sm:$0x11] %v12984_v0  ;;  %s75_s19 = sshll.u32 %s12985_s5, 4  ;;  %s87_s6 = sshll.u32 %s12986_s20, 4  ;;  %vm115_vm2 = vcmask 1044484   ;;  %s76_s19 = int_to_ptr.vmem [resolvable:$true] %s75_s19  ;;  %s88_s6 = int_to_ptr.vmem [resolvable:$true] %s87_s6 }
  0x31   :  { %105 = vst [vmem:[#allocation3 + $0xa0] sm:$0xff] %v12984_v0  ;;  %106 = vst [vmem:[#allocation3 + $0x20] sm:$0x11] %v12984_v0  ;;  %vm113_vm1 = vsmask.f32 256  ;;  %s12894_s21 = scalar_lea.vmem %s76_s19, 4096  ;;  %p12899_p7 = scmp.lt.s32.totalorder %s76_s19, %s76_s19 }
  0x32   :  { %108 = vst [vmem:[#allocation3 + $0xf8] sm:$0xff] %v12984_v0  ;;  %109 = vst [vmem:[#allocation3 + $0x138] sm:$0x11] %v12984_v0  ;;  %vm116_vm4 = vsmask.f32 4352  ;;  %p12895_p6 = scmp.ne.s32.totalorder %s76_s19, %s12894_s21  ;;  %p12900_p8 = scmp.lt.s32.totalorder %s12894_s21, %s12894_s21 }
  0x33   :  { %110 = vst [vmem:[#allocation3 + $0x88] sm:$0xff] %v12984_v0  ;;  %111 = vst [vmem:[#allocation3 + $0xb8] sm:$0x11] %v12984_v0 }
  0x34   :  { %vm13043_vm3 = vmand %vm112_vm0, %vm113_vm1  ;;  %p12901_p9 = por %p12900_p8, %p12899_p7 }
  0x36   :  { %p12902_p10 = pnand %p12901_p9, %p12895_p6 }
  0x38   :  { %12905 = shalt.err (!%p12902_p10)  }
  0x39   :  { %78 = dma.hbm_to_vmem [thread:$0]  %s16021_s0, 4096, %s76_s19, [#allocation8]  ;;  %vm117_vm5 = vmand %vm115_vm2, %vm116_vm4 }
  0x3a   :  { %s12914_s24 = scalar_lea.vmem %s88_s6, 36864  ;;  %p12919_p12 = scmp.lt.s32.totalorder %s88_s6, %s88_s6 }
  0x3b   :  { %p12915_p11 = scmp.ne.s32.totalorder %s88_s6, %s12914_s24  ;;  %p12920_p13 = scmp.lt.s32.totalorder %s12914_s24, %s12914_s24 }
  0x3d   :  { %p12921_p0 = por %p12920_p13, %p12919_p12 }
  0x3f   :  { %p12922_p1 = pnand %p12921_p0, %p12915_p11 }
  0x41   :  { %12925 = shalt.err (!%p12922_p1)  }
  0x42   :  { %90 = dma.hbm_to_vmem [thread:$0]  %s16022_s1, 36864, %s88_s6, [#allocation8 + $0x1]  ;;  %vm13056_vm6 = vmor %vm117_vm5, %vm13043_vm3  ;;  %v16045_v2 = vmov 0  ;;  %vm179_vm7 = vsmask.f32 7938 }
  0x43   :  { %v16046_v2 = vsel %vm13056_vm6, 4294967295, %v16045_v2  ;;  %s12987_s0 = smov [#allocation7]   ;;  %vm181_vm8 = vsmask.f32 7954  ;;  %v122_v3 = vld [vmem:[#allocation3 + $0xb0] sm:$0x11] }
  0x44   :  { %16047 = vst [vmem:[#allocation33_spill] sm:$0xff] %v16046_v2  ;;  %s99_s27 = sshll.u32 %s12987_s0, 4  ;;  %v125_v4 = vld [vmem:[#allocation3 + $0xc8] sm:$0x11]  ;;  %s100_s27 = int_to_ptr.vmem [resolvable:$true] %s99_s27 }
  0x45   :  { %v128_v5 = vld [vmem:[#allocation3 + $0x128] sm:$0x11]  ;;  %s12934_s28 = scalar_lea.vmem %s100_s27, 36864  ;;  %p12939_p3 = scmp.lt.s32.totalorder %s100_s27, %s100_s27 }
  0x46   :  { %p12935_p2 = scmp.ne.s32.totalorder %s100_s27, %s12934_s28  ;;  %p12940_p4 = scmp.lt.s32.totalorder %s12934_s28, %s12934_s28 }
  0x48   :  { %p12941_p5 = por %p12940_p4, %p12939_p3 }
  0x4a   :  { %p12942_p6 = pnand %p12941_p5, %p12935_p2 }
  0x4c   :  { %12945 = shalt.err (!%p12942_p6)  }
  0x4d   :  { %102 = dma.hbm_to_vmem [thread:$0]  %s16023_s2, 36864, %s100_s27, [#allocation8 + $0x2]  ;;  %v119_v6 = vld [vmem:[#allocation3 + $0x110] sm:$0x11]  ;;  %v123_v7 = vsel %vm13056_vm6, 0, %v122_v3  ;;  %v126_v8 = vsel %vm13056_vm6, 0, %v125_v4  ;;  %vm13081_vm9 = vmand %vm112_vm0, %vm179_vm7 }
  0x4e   :  { %v120_v9 = vsel %vm13056_vm6, 0, %v119_v6  ;;  %124 = vst [vmem:[#allocation3 + $0xb0] sm:$0x11] %v123_v7  ;;  %127 = vst [vmem:[#allocation3 + $0xc8] sm:$0x11] %v126_v8  ;;  %v129_v10 = vsel %vm13056_vm6, 0, %v128_v5 }
  0x4f   :  { %v131_v11 = vld [vmem:[#allocation3 + $0x78] sm:$0x11]  ;;  %v134_v12 = vld [vmem:[#allocation3 + $0xa8] sm:$0x11]  ;;  %121 = vst [vmem:[#allocation3 + $0x110] sm:$0x11] %v120_v9  ;;  %vm13091_vm10 = vmand %vm115_vm2, %vm181_vm8 }
  0x50   :  { %130 = vst [vmem:[#allocation3 + $0x128] sm:$0x11] %v129_v10  ;;  %v132_v13 = vsel %vm13056_vm6, 0, %v131_v11  ;;  %v135_v14 = vsel %vm13056_vm6, 0, %v134_v12  ;;  %v137_v15 = vld [vmem:[#allocation3 + $0x28] sm:$0x11]  ;;  %vm13111_vm11 = vmor %vm13091_vm10, %vm13081_vm9 }
  0x51   :  { %v140_v16 = vld [vmem:[#allocation3 + $0x70] sm:$0x11]  ;;  %133 = vst [vmem:[#allocation3 + $0x78] sm:$0x11] %v132_v13  ;;  %136 = vst [vmem:[#allocation3 + $0xa8] sm:$0x11] %v135_v14 }
  0x52   :  { %v138_v17 = vsel %vm13056_vm6, 0, %v137_v15  ;;  %v141_v18 = vsel %vm13056_vm6, 0, %v140_v16  ;;  %v143_v19 = vld [vmem:[#allocation3 + $0x90] sm:$0x11]  ;;  %v146_v20 = vld [vmem:[#allocation3 + $0xf8] sm:$0x11] }
  0x53   :  { %139 = vst [vmem:[#allocation3 + $0x28] sm:$0x11] %v138_v17  ;;  %142 = vst [vmem:[#allocation3 + $0x70] sm:$0x11] %v141_v18  ;;  %v144_v22 = vsel %vm13056_vm6, 0, %v143_v19  ;;  %v147_v23 = vsel %vm13056_vm6, 0, %v146_v20 }
  0x54   :  { %v149_v24 = vld [vmem:[#allocation3 + $0xa0] sm:$0x11]  ;;  %v152_v25 = vld [vmem:[#allocation3 + $0x108] sm:$0x11]  ;;  %145 = vst [vmem:[#allocation3 + $0x90] sm:$0x11] %v144_v22 }
  0x55   :  { %148 = vst [vmem:[#allocation3 + $0xf8] sm:$0x11] %v147_v23  ;;  %v150_v27 = vsel %vm13056_vm6, 0, %v149_v24  ;;  %v153_v28 = vsel %vm13056_vm6, 0, %v152_v25  ;;  %v155_v29 = vld [vmem:[#allocation3 + $0xd8] sm:$0x11] }
  0x56   :  { %v158_v30 = vld [vmem:[#allocation3 + $0x8] sm:$0x11]  ;;  %151 = vst [vmem:[#allocation3 + $0xa0] sm:$0x11] %v150_v27  ;;  %154 = vst [vmem:[#allocation3 + $0x108] sm:$0x11] %v153_v28 }
  0x57   :  { %v156_v31 = vsel %vm13056_vm6, 0, %v155_v29  ;;  %v159_v32 = vsel %vm13056_vm6, 0, %v158_v30  ;;  %v161_v33 = vld [vmem:[#allocation3 + $0xe0] sm:$0x11]  ;;  %v167_v37 = vld [vmem:[#allocation3 + $0xd0] sm:$0x11] }
  0x58   :  { %v164_v34 = vld [vmem:[#allocation3 + $0x100] sm:$0x11]  ;;  %157 = vst [vmem:[#allocation3 + $0xd8] sm:$0x11] %v156_v31  ;;  %160 = vst [vmem:[#allocation3 + $0x8] sm:$0x11] %v159_v32 }
  0x59   :  { %v162_v35 = vsel %vm13056_vm6, 0, %v161_v33  ;;  %v165_v36 = vsel %vm13056_vm6, 0, %v164_v34  ;;  %v170_v38 = vld [vmem:[#allocation3 + $0x58] sm:$0x11]  ;;  %v168_v40 = vsel %vm13056_vm6, 0, %v167_v37 }
  0x5a   :  { %163 = vst [vmem:[#allocation3 + $0xe0] sm:$0x11] %v162_v35  ;;  %166 = vst [vmem:[#allocation3 + $0x100] sm:$0x11] %v165_v36  ;;  %v171_v41 = vsel %vm13056_vm6, 0, %v170_v38 }
  0x5b   :  { %v173_v42 = vld [vmem:[#allocation3 + $0xc0] sm:$0x11]  ;;  %v176_v43 = vld [vmem:[#allocation3 + $0x88] sm:$0x11]  ;;  %169 = vst [vmem:[#allocation3 + $0xd0] sm:$0x11] %v168_v40 }
  0x5c   :  { %172 = vst [vmem:[#allocation3 + $0x58] sm:$0x11] %v171_v41  ;;  %v174_v44 = vsel %vm13056_vm6, 0, %v173_v42  ;;  %v177_v45 = vsel %vm13056_vm6, 0, %v176_v43  ;;  %v184_v46 = vld [vmem:[#allocation3 + $0x38] sm:$0x11] }
  0x5d   :  { %v187_v47 = vld [vmem:[#allocation3 + $0x18] sm:$0x11]  ;;  %175 = vst [vmem:[#allocation3 + $0xc0] sm:$0x11] %v174_v44  ;;  %178 = vst [vmem:[#allocation3 + $0x88] sm:$0x11] %v177_v45 }
  0x5e   :  { %v185_v48 = vsel %vm13111_vm11, 0, %v184_v46  ;;  %v188_v49 = vsel %vm13111_vm11, 0, %v187_v47  ;;  %v190_v50 = vld [vmem:[#allocation3 + $0xe8] sm:$0x11]  ;;  %v196_v54 = vld [vmem:[#allocation3 + $0xf0] sm:$0x11] }
  0x5f   :  { %v193_v51 = vld [vmem:[#allocation3 + $0x48] sm:$0x11]  ;;  %186 = vst [vmem:[#allocation3 + $0x38] sm:$0x11] %v185_v48  ;;  %189 = vst [vmem:[#allocation3 + $0x18] sm:$0x11] %v188_v49 }
  0x60   :  { %v191_v52 = vsel %vm13111_vm11, 0, %v190_v50  ;;  %v194_v53 = vsel %vm13111_vm11, 0, %v193_v51  ;;  %v199_v55 = vld [vmem:[#allocation3 + $0x60] sm:$0x11]  ;;  %v197_v56 = vsel %vm13111_vm11, 0, %v196_v54 }
  0x61   :  { %192 = vst [vmem:[#allocation3 + $0xe8] sm:$0x11] %v191_v52  ;;  %195 = vst [vmem:[#allocation3 + $0x48] sm:$0x11] %v194_v53  ;;  %v200_v57 = vsel %vm13111_vm11, 0, %v199_v55 }
  0x62   :  { %v202_v58 = vld [vmem:[#allocation3 + $0x118] sm:$0x11]  ;;  %v205_v59 = vld [vmem:[#allocation3 + $0x30] sm:$0x11]  ;;  %198 = vst [vmem:[#allocation3 + $0xf0] sm:$0x11] %v197_v56 }
  0x63   :  { %201 = vst [vmem:[#allocation3 + $0x60] sm:$0x11] %v200_v57  ;;  %v203_v60 = vsel %vm13111_vm11, 0, %v202_v58  ;;  %v206_v61 = vsel %vm13111_vm11, 0, %v205_v59  ;;  %v208_v62 = vld [vmem:[#allocation3 + $0x68] sm:$0x11] }
  0x64   :  { %v211_v63 = vld [vmem:[#allocation3 + $0x138] sm:$0x11]  ;;  %204 = vst [vmem:[#allocation3 + $0x118] sm:$0x11] %v203_v60  ;;  %207 = vst [vmem:[#allocation3 + $0x30] sm:$0x11] %v206_v61 }
  0x65   :  { %v209_v0 = vsel %vm13111_vm11, 0, %v208_v62  ;;  %v212_v1 = vsel %vm13111_vm11, 0, %v211_v63  ;;  %v214_v3 = vld [vmem:[#allocation3 + $0x20] sm:$0x11]  ;;  %v223_v8 = vld [vmem:[#allocation3 + $0x130] sm:$0x11] }
  0x66   :  { %v217_v4 = vld [vmem:[#allocation3 + $0x40] sm:$0x11]  ;;  %210 = vst [vmem:[#allocation3 + $0x68] sm:$0x11] %v209_v0  ;;  %213 = vst [vmem:[#allocation3 + $0x138] sm:$0x11] %v212_v1 }
  0x67   :  { %v215_v5 = vsel %vm13111_vm11, 0, %v214_v3  ;;  %v218_v6 = vsel %vm13111_vm11, 0, %v217_v4  ;;  %v220_v7 = vld [vmem:[#allocation3 + $0x80] sm:$0x11]  ;;  %v224_v10 = vsel %vm13111_vm11, 0, %v223_v8 }
  0x68   :  { %216 = vst [vmem:[#allocation3 + $0x20] sm:$0x11] %v215_v5  ;;  %219 = vst [vmem:[#allocation3 + $0x40] sm:$0x11] %v218_v6  ;;  %v221_v9 = vsel %vm13111_vm11, 0, %v220_v7 }
  0x69   :  { %v226_v11 = vld [vmem:[#allocation3 + $0x10] sm:$0x11]  ;;  %v229_v12 = vld [vmem:[#allocation3 + $0x98] sm:$0x11]  ;;  %222 = vst [vmem:[#allocation3 + $0x80] sm:$0x11] %v221_v9 }
  0x6a   :  { %225 = vst [vmem:[#allocation3 + $0x130] sm:$0x11] %v224_v10  ;;  %v227_v13 = vsel %vm13111_vm11, 0, %v226_v11  ;;  %v230_v14 = vsel %vm13111_vm11, 0, %v229_v12  ;;  %v232_v15 = vld [vmem:[#allocation3] sm:$0x11] }
  0x6b   :  { %v235_v16 = vld [vmem:[#allocation3 + $0x120] sm:$0x11]  ;;  %228 = vst [vmem:[#allocation3 + $0x10] sm:$0x11] %v227_v13  ;;  %231 = vst [vmem:[#allocation3 + $0x98] sm:$0x11] %v230_v14 }
  0x6c   :  { %v233_v17 = vsel %vm13111_vm11, 0, %v232_v15  ;;  %v236_v18 = vsel %vm13111_vm11, 0, %v235_v16  ;;  %v238_v19 = vld [vmem:[#allocation3 + $0x50] sm:$0x11]  ;;  %v241_v20 = vld [vmem:[#allocation3 + $0xb8] sm:$0x11] }
  0x6d   :  { %234 = vst [vmem:[#allocation3] sm:$0x11] %v233_v17  ;;  %237 = vst [vmem:[#allocation3 + $0x120] sm:$0x11] %v236_v18  ;;  %v239_v21 = vsel %vm13111_vm11, 0, %v238_v19  ;;  %v242_v22 = vsel %vm13111_vm11, 0, %v241_v20 }
  0x6e   :  { %240 = vst [vmem:[#allocation3 + $0x50] sm:$0x11] %v239_v21  ;;  %243 = vst [vmem:[#allocation3 + $0xb8] sm:$0x11] %v242_v22 }
  0x6f   :  { %12972 = dma.done.wait [#allocation8], 4096 }
  0x70   :  { %12973 = vsyncadd [#allocation8], 4294963200  ;;  %vm555_vm12 = vcmask 1043456   ;;  %v250_v23 = vld [vmem:[#allocation2] sm:$0xff]  ;;  %v251_v24 = vld [vmem:[#allocation2 + $0x8] sm:$0xff]  ;;  %vm557_vm13 = vcmask 1047556  }
  0x71   :  { %v11840_v25 = vpack.c.bf16 %v251_v24, %v250_v23  ;;  %v252_v26 = vld [vmem:[#allocation2 + $0x10] sm:$0xff]  ;;  %v253_v27 = vld [vmem:[#allocation2 + $0x18] sm:$0xff]  ;;  %vm13164_vm14 = vmand %vm555_vm12, %vm179_vm7  ;;  %v16056_v44 = vmov 0 }
  0x72   :  { %v11841_v29 = vpack.c.bf16 %v253_v27, %v252_v26  ;;  %v254_v30 = vld [vmem:[#allocation2 + $0x20] sm:$0xff]  ;;  %vm558_vm15 = vmand %vm557_vm13, %vm181_vm8  ;;  %v255_v33 = vld [vmem:[#allocation2 + $0x28] sm:$0xff] }
  0x73   :  { %v395_v31 = vshrl.u32 %v11840_v25, 16  ;;  %v398_v32 = vshll.u32 %v11840_v25, 16  ;;  %v11842_v36 = vpack.c.bf16 %v255_v33, %v254_v30  ;;  %v256_v37 = vld [vmem:[#allocation2 + $0x30] sm:$0xff]  ;;  %v257_v38 = vld [vmem:[#allocation2 + $0x38] sm:$0xff]  ;;  %v258_v42 = vld [vmem:[#allocation2 + $0x40] sm:$0xff] }
  0x74   :  { %v403_v34 = vshrl.u32 %v11841_v29, 16  ;;  %v406_v35 = vshll.u32 %v11841_v29, 16  ;;  %v563_v40 = vld [vmem:[#allocation3 + $0x18] sm:$0x11]  ;;  %v11843_v41 = vpack.c.bf16 %v257_v38, %v256_v37  ;;  %v259_v43 = vld [vmem:[#allocation2 + $0x48] sm:$0xff]  ;;  %vm13171_vm0 = vmor %vm558_vm15, %vm13164_vm14 }
  0x75   :  { %v397_v39 = vrot.slane %v395_v31, 7  ;;  %v16057_v44 = vsel %vm13171_vm0, 4294967295, %v16056_v44  ;;  %v560_v45 = vld [vmem:[#allocation3 + $0xb0] sm:$0xff]  ;;  %v569_v47 = vld [vmem:[#allocation3 + $0xe8] sm:$0x11]  ;;  %v411_v48 = vshrl.u32 %v11842_v36, 16  ;;  %v11844_v50 = vpack.c.bf16 %v259_v43, %v258_v42 }
  0x76   :  { %16058 = vst [vmem:[#allocation34_spill] sm:$0xff] %v16057_v44  ;;  %v405_v46 = vrot.slane %v403_v34, 7  ;;  %v414_v49 = vshll.u32 %v11842_v36, 16  ;;  %v566_v53 = vld [vmem:[#allocation3 + $0xc8] sm:$0xff]  ;;  %v419_v55 = vshrl.u32 %v11843_v41, 16  ;;  %v422_v56 = vshll.u32 %v11843_v41, 16 }
  0x77   :  { %v400_v51 = vor.u32 %v398_v32, %v397_v39  ;;  %v401_v52 = vrot.slane %v397_v39, 4  ;;  %v575_v54 = vld [vmem:[#allocation3 + $0x48] sm:$0x11]  ;;  %v413_v59 = vrot.slane %v411_v48, 7  ;;  %v427_v61 = vshrl.u32 %v11844_v50, 16  ;;  %v260_v62 = vld [vmem:[#allocation2 + $0x50] sm:$0xff] }
  0x78   :  { %v408_v57 = vor.u32 %v406_v35, %v405_v46  ;;  %v409_v58 = vrot.slane %v405_v46, 4  ;;  %v572_v60 = vld [vmem:[#allocation3 + $0x128] sm:$0xff]  ;;  %v261_v63 = vld [vmem:[#allocation2 + $0x58] sm:$0xff]  ;;  %v421_v3 = vrot.slane %v419_v55, 7  ;;  %v430_v5 = vshll.u32 %v11844_v50, 16  ;;  %v262_v6 = vld [vmem:[#allocation2 + $0x60] sm:$0xff] }
  0x79   :  { %v561_v0 = vsel %vm13171_vm0, %v400_v51, %v560_v45  ;;  %v564_v1 = vsel %vm13056_vm6, %v401_v52, %v563_v40  ;;  %v578_v4 = vld [vmem:[#allocation3 + $0x78] sm:$0xff]  ;;  %v263_v7 = vld [vmem:[#allocation2 + $0x68] sm:$0xff]  ;;  %v416_v10 = vor.u32 %v414_v49, %v413_v59  ;;  %v417_v11 = vrot.slane %v413_v59, 4  ;;  %v581_v12 = vld [vmem:[#allocation3 + $0xf0] sm:$0x11] }
  0x7a   :  { %562 = vst [vmem:[#allocation3 + $0xb0] sm:$0xff] %v561_v0  ;;  %565 = vst [vmem:[#allocation3 + $0x18] sm:$0x11] %v564_v1  ;;  %v567_v8 = vsel %vm13171_vm0, %v408_v57, %v566_v53  ;;  %v570_v9 = vsel %vm13056_vm6, %v409_v58, %v569_v47  ;;  %v264_v13 = vld [vmem:[#allocation2 + $0x70] sm:$0xff]  ;;  %v265_v14 = vld [vmem:[#allocation2 + $0x78] sm:$0xff]  ;;  %v424_v15 = vor.u32 %v422_v56, %v421_v3  ;;  %v425_v16 = vrot.slane %v421_v3, 4 }
  0x7b   :  { %568 = vst [vmem:[#allocation3 + $0xc8] sm:$0xff] %v567_v8  ;;  %571 = vst [vmem:[#allocation3 + $0xe8] sm:$0x11] %v570_v9  ;;  %v429_v17 = vrot.slane %v427_v61, 7  ;;  %v11845_v18 = vpack.c.bf16 %v261_v63, %v260_v62  ;;  %v573_v19 = vsel %vm13171_vm0, %v416_v10, %v572_v60  ;;  %v576_v20 = vsel %vm13056_vm6, %v417_v11, %v575_v54  ;;  %v584_v21 = vld [vmem:[#allocation3 + $0xa8] sm:$0xff]  ;;  %v266_v25 = vld [vmem:[#allocation2 + $0x80] sm:$0xff] }
  0x7c   :  { %v587_v22 = vld [vmem:[#allocation3 + $0x60] sm:$0x11]  ;;  %v11846_v23 = vpack.c.bf16 %v263_v7, %v262_v6  ;;  %v11847_v24 = vpack.c.bf16 %v265_v14, %v264_v13  ;;  %574 = vst [vmem:[#allocation3 + $0x128] sm:$0xff] %v573_v19  ;;  %577 = vst [vmem:[#allocation3 + $0x48] sm:$0x11] %v576_v20  ;;  %v579_v26 = vsel %vm13171_vm0, %v424_v15, %v578_v4  ;;  %v267_v30 = vld [vmem:[#allocation2 + $0x88] sm:$0xff] }
  0x7d   :  { %v582_v27 = vsel %vm13056_vm6, %v425_v16, %v581_v12  ;;  %v432_v28 = vor.u32 %v430_v5, %v429_v17  ;;  %v433_v29 = vrot.slane %v429_v17, 4  ;;  %v268_v31 = vld [vmem:[#allocation2 + $0x90] sm:$0xff]  ;;  %v269_v32 = vld [vmem:[#allocation2 + $0x98] sm:$0xff]  ;;  %580 = vst [vmem:[#allocation3 + $0x78] sm:$0xff] %v579_v26  ;;  %v435_v33 = vshrl.u32 %v11845_v18, 16  ;;  %v270_v37 = vld [vmem:[#allocation2 + $0xa0] sm:$0xff] }
  0x7e   :  { %583 = vst [vmem:[#allocation3 + $0xf0] sm:$0x11] %v582_v27  ;;  %v438_v34 = vshll.u32 %v11845_v18, 16  ;;  %v443_v35 = vshrl.u32 %v11846_v23, 16  ;;  %v446_v36 = vshll.u32 %v11846_v23, 16  ;;  %v271_v38 = vld [vmem:[#allocation2 + $0xa8] sm:$0xff]  ;;  %v11848_v48 = vpack.c.bf16 %v267_v30, %v266_v25 }
  0x7f   :  { %v585_v39 = vsel %vm13171_vm0, %v432_v28, %v584_v21  ;;  %v588_v40 = vsel %vm13056_vm6, %v433_v29, %v587_v22  ;;  %v451_v41 = vshrl.u32 %v11847_v24, 16  ;;  %v454_v42 = vshll.u32 %v11847_v24, 16  ;;  %v272_v43 = vld [vmem:[#allocation2 + $0xb0] sm:$0xff]  ;;  %v590_v46 = vld [vmem:[#allocation3 + $0x28] sm:$0xff]  ;;  %v273_v49 = vld [vmem:[#allocation2 + $0xb8] sm:$0xff] }
  0x80   :  { %586 = vst [vmem:[#allocation3 + $0xa8] sm:$0xff] %v585_v39  ;;  %589 = vst [vmem:[#allocation3 + $0x60] sm:$0x11] %v588_v40  ;;  %v437_v45 = vrot.slane %v435_v33, 7  ;;  %v445_v47 = vrot.slane %v443_v35, 7  ;;  %v596_v51 = vld [vmem:[#allocation3 + $0x70] sm:$0xff]  ;;  %v11849_v54 = vpack.c.bf16 %v269_v32, %v268_v31  ;;  %v11850_v55 = vpack.c.bf16 %v271_v38, %v270_v37 }
  0x81   :  { %v593_v50 = vld [vmem:[#allocation3 + $0x118] sm:$0x11]  ;;  %v599_v52 = vld [vmem:[#allocation3 + $0x30] sm:$0x11]  ;;  %v453_v53 = vrot.slane %v451_v41, 7  ;;  %v11851_v56 = vpack.c.bf16 %v273_v49, %v272_v43  ;;  %v459_v1 = vshrl.u32 %v11848_v48, 16 }
  0x82   :  { %v440_v57 = vor.u32 %v438_v34, %v437_v45  ;;  %v441_v58 = vrot.slane %v437_v45, 4  ;;  %v448_v59 = vor.u32 %v446_v36, %v445_v47  ;;  %v449_v60 = vrot.slane %v445_v47, 4  ;;  %v602_v61 = vld [vmem:[#allocation3 + $0x90] sm:$0xff]  ;;  %v605_v62 = vld [vmem:[#allocation3 + $0x68] sm:$0x11]  ;;  %v274_v9 = vld [vmem:[#allocation2 + $0xc0] sm:$0xff] }
  0x83   :  { %v456_v63 = vor.u32 %v454_v42, %v453_v53  ;;  %v457_v0 = vrot.slane %v453_v53, 4  ;;  %v462_v3 = vshll.u32 %v11848_v48, 16  ;;  %v608_v8 = vld [vmem:[#allocation3 + $0x108] sm:$0xff]  ;;  %v461_v12 = vrot.slane %v459_v1, 7  ;;  %v276_v15 = vld [vmem:[#allocation2 + $0xd0] sm:$0xff]  ;;  %v277_v16 = vld [vmem:[#allocation2 + $0xd8] sm:$0xff] }
  0x84   :  { %v591_v4 = vsel %vm13171_vm0, %v440_v57, %v590_v46  ;;  %v594_v5 = vsel %vm13056_vm6, %v441_v58, %v593_v50  ;;  %v597_v6 = vsel %vm13171_vm0, %v448_v59, %v596_v51  ;;  %v600_v7 = vsel %vm13056_vm6, %v449_v60, %v599_v52  ;;  %v275_v14 = vld [vmem:[#allocation2 + $0xc8] sm:$0xff]  ;;  %v611_v17 = vld [vmem:[#allocation3 + $0x40] sm:$0x11]  ;;  %v614_v26 = vld [vmem:[#allocation3 + $0xd8] sm:$0xff] }
  0x85   :  { %592 = vst [vmem:[#allocation3 + $0x28] sm:$0xff] %v591_v4  ;;  %595 = vst [vmem:[#allocation3 + $0x118] sm:$0x11] %v594_v5  ;;  %v603_v10 = vsel %vm13171_vm0, %v456_v63, %v602_v61  ;;  %v606_v11 = vsel %vm13056_vm6, %v457_v0, %v605_v62  ;;  %v467_v13 = vshrl.u32 %v11849_v54, 16  ;;  %v470_v18 = vshll.u32 %v11849_v54, 16  ;;  %v620_v29 = vld [vmem:[#allocation3 + $0x8] sm:$0xff] }
  0x86   :  { %598 = vst [vmem:[#allocation3 + $0x70] sm:$0xff] %v597_v6  ;;  %601 = vst [vmem:[#allocation3 + $0x30] sm:$0x11] %v600_v7  ;;  %v475_v19 = vshrl.u32 %v11850_v55, 16  ;;  %v478_v20 = vshll.u32 %v11850_v55, 16  ;;  %v483_v21 = vshrl.u32 %v11851_v56, 16  ;;  %v464_v22 = vor.u32 %v462_v3, %v461_v12 }
  0x87   :  { %604 = vst [vmem:[#allocation3 + $0x90] sm:$0xff] %v603_v10  ;;  %607 = vst [vmem:[#allocation3 + $0x68] sm:$0x11] %v606_v11  ;;  %v465_v23 = vrot.slane %v461_v12, 4  ;;  %v469_v24 = vrot.slane %v467_v13, 7  ;;  %v486_v25 = vshll.u32 %v11851_v56, 16  ;;  %v11852_v31 = vpack.c.bf16 %v275_v14, %v274_v9 }
  0x88   :  { %v617_v27 = vld [vmem:[#allocation3 + $0x80] sm:$0x11]  ;;  %v477_v28 = vrot.slane %v475_v19, 7  ;;  %v485_v30 = vrot.slane %v483_v21, 7  ;;  %v11853_v32 = vpack.c.bf16 %v277_v16, %v276_v15  ;;  %v609_v33 = vsel %vm13171_vm0, %v464_v22, %v608_v8  ;;  %v623_v37 = vld [vmem:[#allocation3 + $0x130] sm:$0x11] }
  0x89   :  { %v612_v34 = vsel %vm13056_vm6, %v465_v23, %v611_v17  ;;  %v472_v35 = vor.u32 %v470_v18, %v469_v24  ;;  %v473_v36 = vrot.slane %v469_v24, 4  ;;  %v626_v38 = vld [vmem:[#allocation3 + $0xe0] sm:$0xff]  ;;  %v629_v39 = vld [vmem:[#allocation3 + $0x10] sm:$0x11]  ;;  %610 = vst [vmem:[#allocation3 + $0x108] sm:$0xff] %v609_v33  ;;  %v279_v46 = vld [vmem:[#allocation2 + $0xe8] sm:$0xff] }
  0x8a   :  { %613 = vst [vmem:[#allocation3 + $0x40] sm:$0x11] %v612_v34  ;;  %v480_v40 = vor.u32 %v478_v20, %v477_v28  ;;  %v481_v41 = vrot.slane %v477_v28, 4  ;;  %v488_v42 = vor.u32 %v486_v25, %v485_v30  ;;  %v489_v43 = vrot.slane %v485_v30, 4  ;;  %v278_v45 = vld [vmem:[#allocation2 + $0xe0] sm:$0xff]  ;;  %v280_v51 = vld [vmem:[#allocation2 + $0xf0] sm:$0xff] }
  0x8b   :  { %v615_v47 = vsel %vm13171_vm0, %v472_v35, %v614_v26  ;;  %v618_v48 = vsel %vm13056_vm6, %v473_v36, %v617_v27  ;;  %v491_v49 = vshrl.u32 %v11852_v31, 16  ;;  %v494_v50 = vshll.u32 %v11852_v31, 16  ;;  %v281_v52 = vld [vmem:[#allocation2 + $0xf8] sm:$0xff]  ;;  %v632_v61 = vld [vmem:[#allocation3 + $0x100] sm:$0xff]  ;;  %v638_v5 = vld [vmem:[#allocation3 + $0xd0] sm:$0xff] }
  0x8c   :  { %616 = vst [vmem:[#allocation3 + $0xd8] sm:$0xff] %v615_v47  ;;  %619 = vst [vmem:[#allocation3 + $0x80] sm:$0x11] %v618_v48  ;;  %v621_v53 = vsel %vm13171_vm0, %v480_v40, %v620_v29  ;;  %v624_v54 = vsel %vm13056_vm6, %v481_v41, %v623_v37  ;;  %v627_v55 = vsel %vm13171_vm0, %v488_v42, %v626_v38  ;;  %v499_v58 = vshrl.u32 %v11853_v32, 16  ;;  %v635_v62 = vld [vmem:[#allocation3 + $0x98] sm:$0x11] }
  0x8d   :  { %v630_v56 = vsel %vm13056_vm6, %v489_v43, %v629_v39  ;;  %622 = vst [vmem:[#allocation3 + $0x8] sm:$0xff] %v621_v53  ;;  %625 = vst [vmem:[#allocation3 + $0x130] sm:$0x11] %v624_v54  ;;  %v493_v57 = vrot.slane %v491_v49, 7  ;;  %v502_v59 = vshll.u32 %v11853_v32, 16  ;;  %v11854_v60 = vpack.c.bf16 %v279_v46, %v278_v45  ;;  %v644_v15 = vld [vmem:[#allocation3 + $0x58] sm:$0xff] }
  0x8e   :  { %628 = vst [vmem:[#allocation3 + $0xe0] sm:$0xff] %v627_v55  ;;  %631 = vst [vmem:[#allocation3 + $0x10] sm:$0x11] %v630_v56  ;;  %v11855_v63 = vpack.c.bf16 %v281_v52, %v280_v51  ;;  %v501_v3 = vrot.slane %v499_v58, 7  ;;  %v641_v6 = vld [vmem:[#allocation3] sm:$0x11] }
  0x8f   :  { %v496_v0 = vor.u32 %v494_v50, %v493_v57  ;;  %v497_v1 = vrot.slane %v493_v57, 4  ;;  %v507_v4 = vshrl.u32 %v11854_v60, 16  ;;  %v510_v7 = vshll.u32 %v11854_v60, 16  ;;  %v647_v19 = vld [vmem:[#allocation3 + $0x120] sm:$0x11] }
  0x90   :  { %v515_v8 = vshrl.u32 %v11855_v63, 16  ;;  %v518_v9 = vshll.u32 %v11855_v63, 16  ;;  %v504_v12 = vor.u32 %v502_v59, %v501_v3  ;;  %v505_v13 = vrot.slane %v501_v3, 4  ;;  %v650_v20 = vld [vmem:[#allocation3 + $0xc0] sm:$0xff]  ;;  %v653_v21 = vld [vmem:[#allocation3 + $0x50] sm:$0x11] }
  0x91   :  { %v633_v10 = vsel %vm13171_vm0, %v496_v0, %v632_v61  ;;  %v636_v11 = vsel %vm13056_vm6, %v497_v1, %v635_v62  ;;  %v509_v14 = vrot.slane %v507_v4, 7 }
  0x92   :  { %634 = vst [vmem:[#allocation3 + $0x100] sm:$0xff] %v633_v10  ;;  %637 = vst [vmem:[#allocation3 + $0x98] sm:$0x11] %v636_v11  ;;  %v517_v16 = vrot.slane %v515_v8, 7  ;;  %v639_v17 = vsel %vm13171_vm0, %v504_v12, %v638_v5  ;;  %v642_v18 = vsel %vm13056_vm6, %v505_v13, %v641_v6 }
  0x93   :  { %640 = vst [vmem:[#allocation3 + $0xd0] sm:$0xff] %v639_v17  ;;  %643 = vst [vmem:[#allocation3] sm:$0x11] %v642_v18  ;;  %v512_v22 = vor.u32 %v510_v7, %v509_v14  ;;  %v513_v23 = vrot.slane %v509_v14, 4 }
  0x94   :  { %v520_v24 = vor.u32 %v518_v9, %v517_v16  ;;  %v521_v25 = vrot.slane %v517_v16, 4 }
  0x95   :  { %v645_v26 = vsel %vm13171_vm0, %v512_v22, %v644_v15  ;;  %v648_v27 = vsel %vm13056_vm6, %v513_v23, %v647_v19 }
  0x96   :  { %v651_v28 = vsel %vm13171_vm0, %v520_v24, %v650_v20  ;;  %v654_v29 = vsel %vm13056_vm6, %v521_v25, %v653_v21  ;;  %646 = vst [vmem:[#allocation3 + $0x58] sm:$0xff] %v645_v26  ;;  %649 = vst [vmem:[#allocation3 + $0x120] sm:$0x11] %v648_v27 }
  0x97   :  { %652 = vst [vmem:[#allocation3 + $0xc0] sm:$0xff] %v651_v28  ;;  %655 = vst [vmem:[#allocation3 + $0x50] sm:$0x11] %v654_v29 }
  0x98   :  { %12974 = dma.done.wait [#allocation8 + $0x1], 36864 }
  0x99   :  { %12975 = vsyncadd [#allocation8 + $0x1], 4294930432  ;;  %v11882_v30 = vld [vmem:[#allocation6 + $0x374] ss:$8 sps:$4 sm:$0xff]   ;;  %v11886_v32 = vld [vmem:[#allocation6 + $0x370] ss:$8 sps:$4 sm:$0xff]  }
  0x9a   :  { %v11884_v31 = vld [vmem:[#allocation6 + $0x74] ss:$8 sps:$4 sm:$0xff]   ;;  %1040 = vmatprep.subr.bf16.mxu0 %v11882_v30  ;;  %v11887_v33 = vld [vmem:[#allocation6 + $0x70] ss:$8 sps:$4 sm:$0xff]   ;;  %v11888_v34 = vld [vmem:[#allocation6 + $0x364] ss:$8 sps:$4 sm:$0xff]  }
  0x9b   :  { %1393 = vmatprep.subr.bf16.mxu1 %v11884_v31  ;;  %1041 = vmatpush1.bf16.msra.mxu0 %v11886_v32  ;;  %v11890_v35 = vld [vmem:[#allocation6 + $0x64] ss:$8 sps:$4 sm:$0xff]   ;;  %v11892_v36 = vld [vmem:[#allocation6 + $0x360] ss:$8 sps:$4 sm:$0xff]   ;;  %v11894_v38 = vld [vmem:[#allocation6 + $0x354] ss:$8 sps:$4 sm:$0xff]  }
  0x9c   :  { %1394 = vmatpush1.bf16.msra.mxu1 %v11887_v33  ;;  %1042 = vmatprep.subr.bf16.mxu0 %v11888_v34  ;;  %v11893_v37 = vld [vmem:[#allocation6 + $0x60] ss:$8 sps:$4 sm:$0xff]   ;;  %v11896_v39 = vld [vmem:[#allocation6 + $0x54] ss:$8 sps:$4 sm:$0xff]   ;;  %v11898_v40 = vld [vmem:[#allocation6 + $0x350] ss:$8 sps:$4 sm:$0xff]  }
  0x9d   :  { %1395 = vmatprep.subr.bf16.mxu1 %v11890_v35  ;;  %v11899_v41 = vld [vmem:[#allocation6 + $0x50] ss:$8 sps:$4 sm:$0xff]   ;;  %v11900_v42 = vld [vmem:[#allocation6 + $0x344] ss:$8 sps:$4 sm:$0xff]   ;;  %v11904_v45 = vld [vmem:[#allocation6 + $0x340] ss:$8 sps:$4 sm:$0xff]  }
  0x9e   :  { %v11902_v43 = vld [vmem:[#allocation6 + $0x44] ss:$8 sps:$4 sm:$0xff]   ;;  %v11905_v46 = vld [vmem:[#allocation6 + $0x40] ss:$8 sps:$4 sm:$0xff]   ;;  %v11906_v47 = vld [vmem:[#allocation6 + $0x334] ss:$8 sps:$4 sm:$0xff]  }
  0x9f   :  { %1043 = vmatpush1.bf16.msra.mxu0 %v11892_v36  ;;  %v11908_v48 = vld [vmem:[#allocation6 + $0x34] ss:$8 sps:$4 sm:$0xff]   ;;  %v11910_v49 = vld [vmem:[#allocation6 + $0x330] ss:$8 sps:$4 sm:$0xff]   ;;  %v11912_v51 = vld [vmem:[#allocation6 + $0x324] ss:$8 sps:$4 sm:$0xff]  }
  0xa0   :  { %1396 = vmatpush1.bf16.msra.mxu1 %v11893_v37  ;;  %1044 = vmatprep.subr.bf16.mxu0 %v11894_v38  ;;  %v11911_v50 = vld [vmem:[#allocation6 + $0x30] ss:$8 sps:$4 sm:$0xff]   ;;  %v11914_v52 = vld [vmem:[#allocation6 + $0x24] ss:$8 sps:$4 sm:$0xff]   ;;  %v11916_v53 = vld [vmem:[#allocation6 + $0x320] ss:$8 sps:$4 sm:$0xff]  }
  0xa1   :  { %1397 = vmatprep.subr.bf16.mxu1 %v11896_v39  ;;  %v11917_v54 = vld [vmem:[#allocation6 + $0x20] ss:$8 sps:$4 sm:$0xff]   ;;  %v11918_v55 = vld [vmem:[#allocation6 + $0x314] ss:$8 sps:$4 sm:$0xff]   ;;  %v11922_v57 = vld [vmem:[#allocation6 + $0x310] ss:$8 sps:$4 sm:$0xff]  }
  0xa2   :  { %v11920_v56 = vld [vmem:[#allocation6 + $0x14] ss:$8 sps:$4 sm:$0xff]   ;;  %v11923_v58 = vld [vmem:[#allocation6 + $0x10] ss:$8 sps:$4 sm:$0xff]   ;;  %v11924_v59 = vld [vmem:[#allocation6 + $0x304] ss:$8 sps:$4 sm:$0xff]  }
  0xa3   :  { %1045 = vmatpush1.bf16.msra.mxu0 %v11898_v40  ;;  %v11926_v60 = vld [vmem:[#allocation6 + $0x4] ss:$8 sps:$4 sm:$0xff]   ;;  %v11928_v61 = vld [vmem:[#allocation6 + $0x300] ss:$8 sps:$4 sm:$0xff]   ;;  %v11930_v63 = vld [vmem:[#allocation6 + $0x3f4] ss:$8 sps:$4 sm:$0xff]  }
  0xa4   :  { %1398 = vmatpush1.bf16.msra.mxu1 %v11899_v41  ;;  %1046 = vmatprep.subr.bf16.mxu0 %v11900_v42  ;;  %v11929_v62 = vld [vmem:[#allocation6] ss:$8 sps:$4 sm:$0xff]   ;;  %v11932_v0 = vld [vmem:[#allocation6 + $0xf4] ss:$8 sps:$4 sm:$0xff]   ;;  %v11934_v1 = vld [vmem:[#allocation6 + $0x3f0] ss:$8 sps:$4 sm:$0xff]  }
  0xa5   :  { %1399 = vmatprep.subr.bf16.mxu1 %v11902_v43  ;;  %v11935_v3 = vld [vmem:[#allocation6 + $0xf0] ss:$8 sps:$4 sm:$0xff]   ;;  %v11936_v4 = vld [vmem:[#allocation6 + $0x3e4] ss:$8 sps:$4 sm:$0xff]   ;;  %v11940_v6 = vld [vmem:[#allocation6 + $0x3e0] ss:$8 sps:$4 sm:$0xff]  }
  0xa6   :  { %v11938_v5 = vld [vmem:[#allocation6 + $0xe4] ss:$8 sps:$4 sm:$0xff]   ;;  %v11941_v7 = vld [vmem:[#allocation6 + $0xe0] ss:$8 sps:$4 sm:$0xff]   ;;  %v11942_v8 = vld [vmem:[#allocation6 + $0x3d4] ss:$8 sps:$4 sm:$0xff]  }
  0xa7   :  { %1047 = vmatpush1.bf16.msra.mxu0 %v11904_v45  ;;  %v11944_v9 = vld [vmem:[#allocation6 + $0xd4] ss:$8 sps:$4 sm:$0xff]   ;;  %v11946_v10 = vld [vmem:[#allocation6 + $0x3d0] ss:$8 sps:$4 sm:$0xff]   ;;  %v11948_v12 = vld [vmem:[#allocation6 + $0x3c4] ss:$8 sps:$4 sm:$0xff]  }
  0xa8   :  { %1400 = vmatpush1.bf16.msra.mxu1 %v11905_v46  ;;  %1048 = vmatprep.subr.bf16.mxu0 %v11906_v47  ;;  %v11947_v11 = vld [vmem:[#allocation6 + $0xd0] ss:$8 sps:$4 sm:$0xff]   ;;  %v11950_v13 = vld [vmem:[#allocation6 + $0xc4] ss:$8 sps:$4 sm:$0xff]   ;;  %v11952_v14 = vld [vmem:[#allocation6 + $0x3c0] ss:$8 sps:$4 sm:$0xff]  }
  0xa9   :  { %1401 = vmatprep.subr.bf16.mxu1 %v11908_v48  ;;  %v13239_v15 = vld [vmem:[#allocation3 + $0xb0] sm:$0xff]  ;;  %v13241_v16 = vld [vmem:[#allocation3 + $0xc8] sm:$0xff]  ;;  %v13251_v43 = vld [vmem:[#allocation3 + $0x78] sm:$0xff]  ;;  %vm2013_vm1 = vsmask.f32 3328  ;;  %vm3750_vm4 = vcmask 1042432  }
  0xaa   :  { %v662_v17 = vld [vmem:[#allocation3 + $0x110] sm:$0xff]  ;;  %v11953_v18 = vld [vmem:[#allocation6 + $0xc0] ss:$8 sps:$4 sm:$0xff]   ;;  %v10917_v20 = vcombine.high %v13239_v15, %v13241_v16  ;;  %v11960_v25 = vld [vmem:[#allocation6 + $0x3a4] ss:$8 sps:$4 sm:$0xff]   ;;  %v10916_v42 = vcombine.low %v13239_v15, %v13241_v16  ;;  %vm3751_vm5 = vcmask 1046532  }
  0xab   :  { %1049 = vmatpush1.bf16.msra.mxu0 %v11910_v49  ;;  %v11954_v19 = vld [vmem:[#allocation6 + $0x3b4] ss:$8 sps:$4 sm:$0xff]   ;;  %v10965_v21 = vcombine.high %v662_v17, %v13239_v15  ;;  %v11958_v23 = vld [vmem:[#allocation6 + $0x3b0] ss:$8 sps:$4 sm:$0xff]   ;;  %v11962_v26 = vld [vmem:[#allocation6 + $0xa4] ss:$8 sps:$4 sm:$0xff]   ;;  %v10964_v41 = vcombine.low %v662_v17, %v13239_v15 }
  0xac   :  { %1402 = vmatpush1.bf16.msra.mxu1 %v11911_v50  ;;  %1050 = vmatprep.subr.bf16.mxu0 %v11912_v51  ;;  %v11956_v22 = vld [vmem:[#allocation6 + $0xb4] ss:$8 sps:$4 sm:$0xff]   ;;  %v11959_v24 = vld [vmem:[#allocation6 + $0xb0] ss:$8 sps:$4 sm:$0xff]   ;;  %v11964_v27 = vld [vmem:[#allocation6 + $0x3a0] ss:$8 sps:$4 sm:$0xff]  }
  0xad   :  { %1403 = vmatprep.subr.bf16.mxu1 %v11914_v52  ;;  %1072 = vmatprep.mubr.bf16.mxu0 %v10917_v20  ;;  %v11965_v28 = vld [vmem:[#allocation6 + $0xa0] ss:$8 sps:$4 sm:$0xff]   ;;  %v11966_v29 = vld [vmem:[#allocation6 + $0x394] ss:$8 sps:$4 sm:$0xff]   ;;  %v11970_v31 = vld [vmem:[#allocation6 + $0x390] ss:$8 sps:$4 sm:$0xff]  }
  0xae   :  { %1425 = vmatprep.mubr.bf16.mxu1 %v10965_v21  ;;  %v11968_v30 = vld [vmem:[#allocation6 + $0x94] ss:$8 sps:$4 sm:$0xff]   ;;  %v11971_v32 = vld [vmem:[#allocation6 + $0x90] ss:$8 sps:$4 sm:$0xff]   ;;  %v11972_v33 = vld [vmem:[#allocation6 + $0x384] ss:$8 sps:$4 sm:$0xff]  }
  0xaf   :  { %1051 = vmatpush1.bf16.msra.mxu0 %v11916_v53  ;;  %v11974_v34 = vld [vmem:[#allocation6 + $0x84] ss:$8 sps:$4 sm:$0xff]   ;;  %v11976_v35 = vld [vmem:[#allocation6 + $0x380] ss:$8 sps:$4 sm:$0xff]   ;;  %v11982_v37 = vld [vmem:[#allocation6 + $0x674] ss:$8 sps:$4 sm:$0xff]  }
  0xb0   :  { %1404 = vmatpush1.bf16.msra.mxu1 %v11917_v54  ;;  %1052 = vmatprep.subr.bf16.mxu0 %v11918_v55  ;;  %v11977_v36 = vld [vmem:[#allocation6 + $0x80] ss:$8 sps:$4 sm:$0xff]   ;;  %v11985_v38 = vld [vmem:[#allocation6 + $0x474] ss:$8 sps:$4 sm:$0xff]   ;;  %v11980_v39 = vld [vmem:[#allocation6 + $0x670] ss:$8 sps:$4 sm:$0xff]  }
  0xb1   :  { %1405 = vmatprep.subr.bf16.mxu1 %v11920_v56  ;;  %v13246_v40 = vld [vmem:[#allocation3 + $0x128] sm:$0xff]  ;;  %v11983_v45 = vld [vmem:[#allocation6 + $0x470] ss:$8 sps:$4 sm:$0xff]   ;;  %v11996_v52 = vld [vmem:[#allocation6 + $0x654] ss:$8 sps:$4 sm:$0xff]  }
  0xb2   :  { %v11988_v46 = vld [vmem:[#allocation6 + $0x664] ss:$8 sps:$4 sm:$0xff]   ;;  %v10919_v48 = vcombine.high %v13246_v40, %v13251_v43  ;;  %v13257_v49 = vcombine.high %v13241_v16, %v13246_v40  ;;  %v11986_v50 = vld [vmem:[#allocation6 + $0x660] ss:$8 sps:$4 sm:$0xff]   ;;  %v11999_v53 = vld [vmem:[#allocation6 + $0x454] ss:$8 sps:$4 sm:$0xff]   ;;  %v10918_v55 = vcombine.low %v13246_v40, %v13251_v43  ;;  %v13264_v56 = vcombine.low %v13241_v16, %v13246_v40 }
  0xb3   :  { %1053 = vmatpush1.bf16.msra.mxu0 %v11922_v57  ;;  %v11991_v47 = vld [vmem:[#allocation6 + $0x464] ss:$8 sps:$4 sm:$0xff]   ;;  %v11989_v51 = vld [vmem:[#allocation6 + $0x460] ss:$8 sps:$4 sm:$0xff]   ;;  %v11994_v54 = vld [vmem:[#allocation6 + $0x650] ss:$8 sps:$4 sm:$0xff]  }
  0xb4   :  { %1406 = vmatpush1.bf16.msra.mxu1 %v11923_v58  ;;  %1054 = vmatprep.subr.bf16.mxu0 %v11924_v59  ;;  %v13266_v57 = vld [vmem:[#allocation3 + $0xa8] sm:$0xff]  ;;  %v11997_v59 = vld [vmem:[#allocation6 + $0x450] ss:$8 sps:$4 sm:$0xff]   ;;  %v12027_v20 = vld [vmem:[#allocation6 + $0x414] ss:$8 sps:$4 sm:$0xff]  }
  0xb5   :  { %1407 = vmatprep.subr.bf16.mxu1 %v11926_v60  ;;  %v13268_v58 = vld [vmem:[#allocation3 + $0x28] sm:$0xff]  ;;  %vm2014_vm2 = vsmask.f32 7440  ;;  %vm13567_vm7 = vmor %vm3750_vm4, %vm3751_vm5 }
  0xb6   :  { %v12002_v60 = vld [vmem:[#allocation6 + $0x644] ss:$8 sps:$4 sm:$0xff]   ;;  %v12014_v17 = vld [vmem:[#allocation6 + $0x620] ss:$8 sps:$4 sm:$0xff]   ;;  %vm13375_vm3 = vmor %vm2013_vm1, %vm2014_vm2 }
  0xb7   :  { %1055 = vmatpush1.bf16.msra.mxu0 %v11928_v61  ;;  %v12005_v61 = vld [vmem:[#allocation6 + $0x444] ss:$8 sps:$4 sm:$0xff]  }
  0xb8   :  { %1408 = vmatpush1.bf16.msra.mxu1 %v11929_v62  ;;  %1056 = vmatprep.subr.bf16.mxu0 %v11930_v63  ;;  %v10921_v62 = vcombine.high %v13266_v57, %v13268_v58  ;;  %v13274_v63 = vcombine.high %v13251_v43, %v13266_v57  ;;  %v13295_v21 = vld [vmem:[#allocation3 + $0x108] sm:$0xff] }
  0xb9   :  { %1409 = vmatprep.subr.bf16.mxu1 %v11932_v0  ;;  %v12000_v0 = vld [vmem:[#allocation6 + $0x640] ss:$8 sps:$4 sm:$0xff]  }
  0xbb   :  { %1057 = vmatpush2.bf16.msra.mxu0 %v11934_v1  ;;  %v12003_v1 = vld [vmem:[#allocation6 + $0x440] ss:$8 sps:$4 sm:$0xff]  }
  0xbc   :  { %1410 = vmatpush2.bf16.msra.mxu1 %v11935_v3  ;;  %1058 = vmatprep.subr.bf16.mxu0 %v11936_v4  ;;  %v12010_v3 = vld [vmem:[#allocation6 + $0x634] ss:$8 sps:$4 sm:$0xff]  }
  0xbd   :  { %1411 = vmatprep.subr.bf16.mxu1 %v11938_v5  ;;  %v12013_v4 = vld [vmem:[#allocation6 + $0x434] ss:$8 sps:$4 sm:$0xff]   ;;  %v12008_v5 = vld [vmem:[#allocation6 + $0x630] ss:$8 sps:$4 sm:$0xff]  }
  0xbf   :  { %1059 = vmatpush2.bf16.msra.mxu0 %v11940_v6  ;;  %v10920_v6 = vcombine.low %v13266_v57, %v13268_v58 }
  0xc0   :  { %1412 = vmatpush2.bf16.msra.mxu1 %v11941_v7  ;;  %1060 = vmatprep.subr.bf16.mxu0 %v11942_v8  ;;  %v13282_v7 = vcombine.low %v13251_v43, %v13266_v57  ;;  %v12011_v8 = vld [vmem:[#allocation6 + $0x430] ss:$8 sps:$4 sm:$0xff]  }
  0xc1   :  { %1413 = vmatprep.subr.bf16.mxu1 %v11944_v9  ;;  %v13284_v9 = vld [vmem:[#allocation3 + $0x70] sm:$0xff] }
  0xc3   :  { %1061 = vmatpush2.bf16.msra.mxu0 %v11946_v10  ;;  %v13286_v10 = vld [vmem:[#allocation3 + $0x90] sm:$0xff] }
  0xc4   :  { %1414 = vmatpush2.bf16.msra.mxu1 %v11947_v11  ;;  %1062 = vmatprep.subr.bf16.mxu0 %v11948_v12  ;;  %v12016_v11 = vld [vmem:[#allocation6 + $0x624] ss:$8 sps:$4 sm:$0xff]  }
  0xc5   :  { %1415 = vmatprep.subr.bf16.mxu1 %v11950_v13  ;;  %v12019_v12 = vld [vmem:[#allocation6 + $0x424] ss:$8 sps:$4 sm:$0xff]   ;;  %v10923_v13 = vcombine.high %v13284_v9, %v13286_v10 }
  0xc7   :  { %1063 = vmatpush2.bf16.msra.mxu0 %v11952_v14  ;;  %v13292_v14 = vcombine.high %v13268_v58, %v13284_v9 }
  0xc8   :  { %1416 = vmatpush2.bf16.msra.mxu1 %v11953_v18  ;;  %1064 = vmatprep.subr.bf16.mxu0 %v11954_v19  ;;  %v12017_v18 = vld [vmem:[#allocation6 + $0x420] ss:$8 sps:$4 sm:$0xff]   ;;  %v12024_v19 = vld [vmem:[#allocation6 + $0x614] ss:$8 sps:$4 sm:$0xff]  }
  0xc9   :  { %1417 = vmatprep.subr.bf16.mxu1 %v11956_v22  ;;  %v13298_v22 = vld [vmem:[#allocation3 + $0xd8] sm:$0xff] }
  0xcb   :  { %1065 = vmatpush2.bf16.msra.mxu0 %v11958_v23  ;;  %v10922_v23 = vcombine.low %v13284_v9, %v13286_v10 }
  0xcc   :  { %1418 = vmatpush2.bf16.msra.mxu1 %v11959_v24  ;;  %1066 = vmatprep.subr.bf16.mxu0 %v11960_v25  ;;  %v13304_v24 = vcombine.low %v13268_v58, %v13284_v9  ;;  %v672_v25 = vld [vmem:[#allocation3 + $0xa0] sm:$0xff] }
  0xcd   :  { %1419 = vmatprep.subr.bf16.mxu1 %v11962_v26  ;;  %v12022_v26 = vld [vmem:[#allocation6 + $0x610] ss:$8 sps:$4 sm:$0xff]  }
  0xcf   :  { %1067 = vmatpush2.bf16.msra.mxu0 %v11964_v27  ;;  %v12025_v27 = vld [vmem:[#allocation6 + $0x410] ss:$8 sps:$4 sm:$0xff]  }
  0xd0   :  { %1420 = vmatpush2.bf16.msra.mxu1 %v11965_v28  ;;  %1068 = vmatprep.subr.bf16.mxu0 %v11966_v29  ;;  %v12030_v28 = vld [vmem:[#allocation6 + $0x604] ss:$8 sps:$4 sm:$0xff]  }
  0xd1   :  { %1421 = vmatprep.subr.bf16.mxu1 %v11968_v30  ;;  %v12033_v29 = vld [vmem:[#allocation6 + $0x404] ss:$8 sps:$4 sm:$0xff]   ;;  %v10925_v30 = vcombine.high %v13295_v21, %v13298_v22 }
  0xd3   :  { %1069 = vmatpush2.bf16.msra.mxu0 %v11970_v31  ;;  %v10973_v31 = vcombine.high %v672_v25, %v13295_v21 }
  0xd4   :  { %1422 = vmatpush2.bf16.msra.mxu1 %v11971_v32  ;;  %1070 = vmatprep.subr.bf16.mxu0 %v11972_v33  ;;  %v12028_v32 = vld [vmem:[#allocation6 + $0x600] ss:$8 sps:$4 sm:$0xff]  }
  0xd5   :  { %1423 = vmatprep.subr.bf16.mxu1 %v11974_v34  ;;  %v12031_v33 = vld [vmem:[#allocation6 + $0x400] ss:$8 sps:$4 sm:$0xff]   ;;  %v12040_v34 = vld [vmem:[#allocation6 + $0x6f4] ss:$8 sps:$4 sm:$0xff]  }
  0xd7   :  { %1071 = vmatpush2.bf16.msra.mxu0 %v11976_v35  ;;  %v12043_v35 = vld [vmem:[#allocation6 + $0x4f4] ss:$8 sps:$4 sm:$0xff]  }
  0xd8   :  { %1424 = vmatpush2.bf16.msra.mxu1 %v11977_v36  ;;  %1796 = vmatprep.subr.bf16.mxu0 %v11982_v37  ;;  %v12038_v36 = vld [vmem:[#allocation6 + $0x6f0] ss:$8 sps:$4 sm:$0xff]   ;;  %v13310_v37 = vld [vmem:[#allocation3 + $0x8] sm:$0xff] }
  0xd9   :  { %2674 = vmatprep.subr.bf16.mxu1 %v11985_v38  ;;  %v10924_v38 = vcombine.low %v13295_v21, %v13298_v22 }
  0xda   :  { %1073 = vmatmul.mubr.bf16.vlgmr.msra.gmra.mxu0 %v10916_v42  ;;  %v12041_v42 = vld [vmem:[#allocation6 + $0x4f0] ss:$8 sps:$4 sm:$0xff]  }
  0xdb   :  { %1426 = vmatmul.mubr.bf16.vlgmr.msra.gmra.mxu1 %v10964_v41  ;;  %1797 = vmatpush1.bf16.msra.mxu0 %v11980_v39  ;;  %v10972_v39 = vcombine.low %v672_v25, %v13295_v21  ;;  %v13315_v41 = vld [vmem:[#allocation3 + $0xe0] sm:$0xff] }
  0xdc   :  { %2675 = vmatpush1.bf16.msra.mxu1 %v11983_v45  ;;  %1798 = vmatprep.subr.bf16.mxu0 %v11988_v46  ;;  %v2031_v45 = vshrl.u32 %v13239_v15, 16  ;;  %v12046_v46 = vld [vmem:[#allocation6 + $0x6e4] ss:$8 sps:$4 sm:$0xff]  }
  0xdd   :  { %2676 = vmatprep.subr.bf16.mxu1 %v11991_v47  ;;  %1082 = vmatprep.mubr.bf16.mxu0 %v10919_v48  ;;  %v12049_v47 = vld [vmem:[#allocation6 + $0x4e4] ss:$8 sps:$4 sm:$0xff]   ;;  %v2034_v48 = vshll.u32 %v13239_v15, 16  ;;  %v12059_v15 = vld [vmem:[#allocation6 + $0x4d4] ss:$8 sps:$4 sm:$0xff]  }
  0xde   :  { %1435 = vmatprep.mubr.bf16.mxu1 %v13257_v49 }
  0xdf   :  { %1799 = vmatpush1.bf16.msra.mxu0 %v11986_v50  ;;  %v10927_v50 = vcombine.high %v13310_v37, %v13315_v41 }
  0xe0   :  { %2677 = vmatpush1.bf16.msra.mxu1 %v11989_v51  ;;  %1800 = vmatprep.subr.bf16.mxu0 %v11996_v52  ;;  %v13323_v51 = vcombine.high %v13298_v22, %v13310_v37  ;;  %v2045_v52 = vshrl.u32 %v13241_v16, 16 }
  0xe1   :  { %2678 = vmatprep.subr.bf16.mxu1 %v11999_v53  ;;  %v2048_v53 = vshll.u32 %v13241_v16, 16  ;;  %v2062_v16 = vshll.u32 %v13246_v40, 16 }
  0xe2   :  { %1083 = vmatmul.mubr.bf16.gmra.mxu0 %v10918_v55  ;;  %v12047_v55 = vld [vmem:[#allocation6 + $0x4e0] ss:$8 sps:$4 sm:$0xff]  }
  0xe3   :  { %1436 = vmatmul.mubr.bf16.gmra.mxu1 %v13264_v56  ;;  %1801 = vmatpush1.bf16.msra.mxu0 %v11994_v54  ;;  %v12044_v54 = vld [vmem:[#allocation6 + $0x6e0] ss:$8 sps:$4 sm:$0xff]  }
  0xe4   :  { %2679 = vmatpush1.bf16.msra.mxu1 %v11997_v59  ;;  %1802 = vmatprep.subr.bf16.mxu0 %v12002_v60  ;;  %v12056_v59 = vld [vmem:[#allocation6 + $0x6d4] ss:$8 sps:$4 sm:$0xff]   ;;  %v2033_v60 = vrot.slane %v2031_v45, 4 }
  0xe5   :  { %2680 = vmatprep.subr.bf16.mxu1 %v12005_v61  ;;  %1092 = vmatprep.mubr.bf16.mxu0 %v10921_v62  ;;  %v2036_v61 = vrot.slane %v2034_v48, 5  ;;  %v2059_v62 = vshrl.u32 %v13246_v40, 16  ;;  %v2076_v40 = vshll.u32 %v13251_v43, 16 }
  0xe6   :  { %1445 = vmatprep.mubr.bf16.mxu1 %v13274_v63 }
  0xe7   :  { %1803 = vmatpush1.bf16.msra.mxu0 %v12000_v0  ;;  %v2047_v0 = vrot.slane %v2045_v52, 4  ;;  %v12071_v52 = vld [vmem:[#allocation6 + $0x4b0] ss:$8 sps:$4 sm:$0xff]  }
  0xe8   :  { %2681 = vmatpush1.bf16.msra.mxu1 %v12003_v1  ;;  %1804 = vmatprep.subr.bf16.mxu0 %v12010_v3  ;;  %v2050_v1 = vrot.slane %v2048_v53, 5  ;;  %v10926_v3 = vcombine.low %v13310_v37, %v13315_v41  ;;  %v12076_v53 = vld [vmem:[#allocation6 + $0x6a4] ss:$8 sps:$4 sm:$0xff]  }
  0xe9   :  { %2682 = vmatprep.subr.bf16.mxu1 %v12013_v4  ;;  %v13334_v4 = vcombine.low %v13298_v22, %v13310_v37 }
  0xea   :  { %1093 = vmatmul.mubr.bf16.gmra.mxu0 %v10920_v6  ;;  %v13336_v6 = vld [vmem:[#allocation3 + $0x100] sm:$0xff] }
  0xeb   :  { %1446 = vmatmul.mubr.bf16.gmra.mxu1 %v13282_v7  ;;  %1805 = vmatpush1.bf16.msra.mxu0 %v12008_v5  ;;  %v12054_v5 = vld [vmem:[#allocation6 + $0x6d0] ss:$8 sps:$4 sm:$0xff]  }
  0xec   :  { %2683 = vmatpush1.bf16.msra.mxu1 %v12011_v8  ;;  %1806 = vmatprep.subr.bf16.mxu0 %v12016_v11  ;;  %v13338_v8 = vld [vmem:[#allocation3 + $0xd0] sm:$0xff] }
  0xed   :  { %2684 = vmatprep.subr.bf16.mxu1 %v12019_v12  ;;  %1102 = vmatprep.mubr.bf16.mxu0 %v10923_v13  ;;  %v12057_v11 = vld [vmem:[#allocation6 + $0x4d0] ss:$8 sps:$4 sm:$0xff]   ;;  %v2073_v12 = vshrl.u32 %v13251_v43, 16  ;;  %v12062_v13 = vld [vmem:[#allocation6 + $0x6c4] ss:$8 sps:$4 sm:$0xff]   ;;  %v10929_v25 = vcombine.high %v13336_v6, %v13338_v8  ;;  %v10928_v45 = vcombine.low %v13336_v6, %v13338_v8 }
  0xee   :  { %1455 = vmatprep.mubr.bf16.mxu1 %v13292_v14  ;;  %v1976_v43 = vld [vmem:[#allocation3 + $0x18] sm:$0x11] }
  0xef   :  { %1807 = vmatpush1.bf16.msra.mxu0 %v12014_v17  ;;  %v12065_v17 = vld [vmem:[#allocation6 + $0x4c4] ss:$8 sps:$4 sm:$0xff]   ;;  %v2040_v48 = vshll.u32 %v1976_v43, 16 }
  0xf0   :  { %2685 = vmatpush1.bf16.msra.mxu1 %v12017_v18  ;;  %1808 = vmatprep.subr.bf16.mxu0 %v12024_v19  ;;  %v2037_v18 = vor.u32 %v2036_v61, %v2033_v60  ;;  %v2061_v19 = vrot.slane %v2059_v62, 4  ;;  %v12074_v61 = vld [vmem:[#allocation6 + $0x6a0] ss:$8 sps:$4 sm:$0xff]  }
  0xf1   :  { %2686 = vmatprep.subr.bf16.mxu1 %v12027_v20  ;;  %v12060_v20 = vld [vmem:[#allocation6 + $0x6c0] ss:$8 sps:$4 sm:$0xff]  }
  0xf2   :  { %1103 = vmatmul.mubr.bf16.gmra.mxu0 %v10922_v23  ;;  %v12063_v23 = vld [vmem:[#allocation6 + $0x4c0] ss:$8 sps:$4 sm:$0xff]  }
  0xf3   :  { %1456 = vmatmul.mubr.bf16.gmra.mxu1 %v13304_v24  ;;  %1809 = vmatpush1.bf16.msra.mxu0 %v12022_v26  ;;  %v13346_v26 = vcombine.high %v13315_v41, %v13336_v6  ;;  %v12077_v62 = vld [vmem:[#allocation6 + $0x4a0] ss:$8 sps:$4 sm:$0xff]  }
  0xf4   :  { %2687 = vmatpush1.bf16.msra.mxu1 %v12025_v27  ;;  %1810 = vmatprep.subr.bf16.mxu0 %v12030_v28  ;;  %v2051_v27 = vor.u32 %v2050_v1, %v2047_v0  ;;  %v2064_v28 = vrot.slane %v2062_v16, 5  ;;  %v2104_v16 = vshll.u32 %v13268_v58, 16 }
  0xf5   :  { %2688 = vmatprep.subr.bf16.mxu1 %v12033_v29  ;;  %1112 = vmatprep.mubr.bf16.mxu0 %v10925_v30  ;;  %v1978_v29 = vld [vmem:[#allocation3 + $0xe8] sm:$0x11]  ;;  %v2075_v30 = vrot.slane %v2073_v12, 4 }
  0xf6   :  { %1465 = vmatprep.mubr.bf16.mxu1 %v10973_v31  ;;  %v2078_v31 = vrot.slane %v2076_v40, 5  ;;  %v1980_v40 = vld [vmem:[#allocation3 + $0x48] sm:$0x11] }
  0xf7   :  { %1811 = vmatpush1.bf16.msra.mxu0 %v12028_v32  ;;  %v12070_v32 = vld [vmem:[#allocation6 + $0x6b4] ss:$8 sps:$4 sm:$0xff]  }
  0xf8   :  { %2689 = vmatpush1.bf16.msra.mxu1 %v12031_v33  ;;  %1812 = vmatprep.subr.bf16.mxu0 %v12040_v34  ;;  %v12073_v33 = vld [vmem:[#allocation6 + $0x4b4] ss:$8 sps:$4 sm:$0xff]   ;;  %v2087_v34 = vshrl.u32 %v13266_v57, 16 }
  0xf9   :  { %2690 = vmatprep.subr.bf16.mxu1 %v12043_v35  ;;  %v12068_v35 = vld [vmem:[#allocation6 + $0x6b0] ss:$8 sps:$4 sm:$0xff]  }
  0xfa   :  { %1113 = vmatmul.mubr.bf16.gmra.mxu0 %v10924_v38  ;;  %v2038_v38 = vrot.slane %v2037_v18, 4  ;;  %v13362_v60 = vrot.slane %v2087_v34, 4  ;;  %v12092_v34 = vld [vmem:[#allocation6 + $0x684] ss:$8 sps:$4 sm:$0xff]  }
  0xfb   :  { %1466 = vmatmul.mubr.bf16.gmra.mxu1 %v10972_v39  ;;  %1813 = vmatpush2.bf16.msra.mxu0 %v12038_v36  ;;  %v13351_v36 = vld [vmem:[#allocation3 + $0x58] sm:$0xff]  ;;  %v2052_v39 = vrot.slane %v2051_v27, 4  ;;  %v2115_v27 = vshrl.u32 %v13284_v9, 16 }
  0xfc   :  { %2691 = vmatpush2.bf16.msra.mxu1 %v12041_v42  ;;  %1814 = vmatprep.subr.bf16.mxu0 %v12046_v46  ;;  %v2065_v42 = vor.u32 %v2064_v28, %v2061_v19  ;;  %v13357_v46 = vcombine.low %v13315_v41, %v13336_v6  ;;  %v13369_v1 = vcombine.high %v13338_v8, %v13351_v36 }
  0xfd   :  { %2692 = vmatprep.subr.bf16.mxu1 %v12049_v47  ;;  %1122 = vmatprep.mubr.bf16.mxu0 %v10927_v50  ;;  %v13359_v47 = vld [vmem:[#allocation3 + $0xc0] sm:$0xff]  ;;  %v2054_v50 = vshll.u32 %v1978_v29, 16  ;;  %v2068_v29 = vshll.u32 %v1980_v40, 16 }
  0xfe   :  { %1475 = vmatprep.mubr.bf16.mxu1 %v13323_v51  ;;  %v10931_v0 = vcombine.high %v13351_v36, %v13359_v47  ;;  %v2066_v12 = vrot.slane %v2065_v42, 4  ;;  %v2129_v42 = vshrl.u32 %v13286_v10, 16 }
  0xff   :  { %1815 = vmatpush2.bf16.msra.mxu0 %v12044_v54  ;;  %v2079_v54 = vor.u32 %v2078_v31, %v2075_v30  ;;  %v12084_v31 = vld [vmem:[#allocation6 + $0x690] ss:$8 sps:$4 sm:$0xff]  }
 0x100   :  { %2693 = vmatpush2.bf16.msra.mxu1 %v12047_v55  ;;  %1816 = vmatprep.subr.bf16.mxu0 %v12056_v59  ;;  %v2090_v55 = vshll.u32 %v13266_v57, 16  ;;  %v12079_v59 = vld [vmem:[#allocation6 + $0x4a4] ss:$8 sps:$4 sm:$0xff]   ;;  %v12086_v57 = vld [vmem:[#allocation6 + $0x694] ss:$8 sps:$4 sm:$0xff]  }
 0x101   :  { %2694 = vmatprep.subr.bf16.mxu1 %v12059_v15  ;;  %v2101_v15 = vshrl.u32 %v13268_v58, 16  ;;  %v12089_v58 = vld [vmem:[#allocation6 + $0x494] ss:$8 sps:$4 sm:$0xff]  }
 0x102   :  { %1123 = vmatmul.mubr.bf16.gmra.mxu0 %v10926_v3  ;;  %v16059_v3 = vmov 0  ;;  %v2092_v18 = vrot.slane %v2090_v55, 5 }
 0x103   :  { %1476 = vmatmul.mubr.bf16.gmra.mxu1 %v13334_v4  ;;  %1817 = vmatpush2.bf16.msra.mxu0 %v12054_v5  ;;  %v16060_v3 = vsel %vm13375_vm3, 4294967295, %v16059_v3  ;;  %v2042_v5 = vrot.slane %v2040_v48, 5  ;;  %v2103_v19 = vrot.slane %v2101_v15, 4  ;;  %v2132_v48 = vshll.u32 %v13286_v10, 16 }
 0x104   :  { %2695 = vmatpush2.bf16.msra.mxu1 %v12057_v11  ;;  %1818 = vmatprep.subr.bf16.mxu0 %v12062_v13  ;;  %16061 = vst [vmem:[#allocation35_spill] sm:$0xff] %v16060_v3  ;;  %v2056_v11 = vrot.slane %v2054_v50, 5  ;;  %v1982_v13 = vld [vmem:[#allocation3 + $0xf0] sm:$0x11]  ;;  %v2093_v55 = vor.u32 %v2092_v18, %v13362_v60 }
 0x105   :  { %2696 = vmatprep.subr.bf16.mxu1 %v12065_v17  ;;  %1132 = vmatprep.mubr.bf16.mxu0 %v10929_v25  ;;  %v2080_v17 = vrot.slane %v2079_v54, 4  ;;  %v2106_v25 = vrot.slane %v2104_v16, 5  ;;  %v13389_v28 = vsel %vm13375_vm3, %v2038_v38, %v2042_v5  ;;  %v2082_v30 = vshll.u32 %v1982_v13, 16  ;;  %v12090_v38 = vld [vmem:[#allocation6 + $0x680] ss:$8 sps:$4 sm:$0xff]  }
 0x106   :  { %1485 = vmatprep.mubr.bf16.mxu1 %v13346_v26  ;;  %v13393_v43 = vsel %vm13375_vm3, %v2052_v39, %v2056_v11  ;;  %v12098_v50 = vld [vmem:[#allocation6 + $0x174] ss:$8 sps:$4 sm:$0xff]   ;;  %v2131_v16 = vrot.slane %v2129_v42, 4  ;;  %v12096_v5 = vld [vmem:[#allocation6 + $0x170] ss:$8 sps:$4 sm:$0xff]   ;;  %v2094_v18 = vrot.slane %v2093_v55, 4 }
 0x107   :  { %1819 = vmatpush2.bf16.msra.mxu0 %v12060_v20  ;;  %v10930_v20 = vcombine.low %v13351_v36, %v13359_v47  ;;  %v11061_v39 = vcombine.high %v13389_v28, %v13393_v43  ;;  %v1986_v54 = vld [vmem:[#allocation3 + $0x118] sm:$0x11]  ;;  %v2107_v15 = vor.u32 %v2106_v25, %v2103_v19  ;;  %v12107_v19 = vld [vmem:[#allocation6 + $0x764] ss:$8 sps:$4 sm:$0xff]  }
 0x108   :  { %2697 = vmatpush2.bf16.msra.mxu1 %v12063_v23  ;;  %1820 = vmatprep.subr.bf16.mxu0 %v12070_v32  ;;  %v13384_v23 = vcombine.low %v13338_v8, %v13351_v36  ;;  %v12087_v32 = vld [vmem:[#allocation6 + $0x490] ss:$8 sps:$4 sm:$0xff]   ;;  %v2110_v13 = vshll.u32 %v1986_v54, 16  ;;  %v1990_v42 = vld [vmem:[#allocation3 + $0x68] sm:$0x11] }
 0x109   :  { %2698 = vmatprep.subr.bf16.mxu1 %v12073_v33  ;;  %v2118_v33 = vshll.u32 %v13284_v9, 16  ;;  %v1984_v9 = vld [vmem:[#allocation3 + $0x60] sm:$0x11]  ;;  %v2138_v55 = vshll.u32 %v1990_v42, 16 }
 0x10a   :  { %1133 = vmatmul.mubr.bf16.gmra.mxu0 %v10928_v45  ;;  %v12093_v45 = vld [vmem:[#allocation6 + $0x480] ss:$8 sps:$4 sm:$0xff]   ;;  %v2096_v40 = vshll.u32 %v1984_v9, 16  ;;  %v12128_v42 = vld [vmem:[#allocation6 + $0x124] ss:$8 sps:$4 sm:$0xff]  }
 0x10b   :  { %1486 = vmatmul.mubr.bf16.gmra.mxu1 %v13357_v46  ;;  %1821 = vmatpush2.bf16.msra.mxu0 %v12068_v35  ;;  %v12095_v35 = vld [vmem:[#allocation6 + $0x484] ss:$8 sps:$4 sm:$0xff]  }
 0x10c   :  { %2699 = vmatpush2.bf16.msra.mxu1 %v12071_v52  ;;  %1822 = vmatprep.subr.bf16.mxu0 %v12076_v53  ;;  %v2070_v52 = vrot.slane %v2068_v29, 5  ;;  %v2084_v53 = vrot.slane %v2082_v30, 5  ;;  %v2174_v30 = vshll.u32 %v13295_v21, 16 }
 0x10d   :  { %2700 = vmatprep.subr.bf16.mxu1 %v12079_v59  ;;  %1142 = vmatprep.mubr.bf16.mxu0 %v10931_v0  ;;  %v12101_v59 = vld [vmem:[#allocation6 + $0x774] ss:$8 sps:$4 sm:$0xff]   ;;  %v11060_v0 = vcombine.low %v13389_v28, %v13393_v43 }
 0x10e   :  { %1495 = vmatprep.mubr.bf16.mxu1 %v13369_v1  ;;  %v13407_v11 = vsel %vm13375_vm3, %v2066_v12, %v2070_v52  ;;  %v13411_v60 = vsel %vm13375_vm3, %v2080_v17, %v2084_v53  ;;  %v12102_v12 = vld [vmem:[#allocation6 + $0x160] ss:$8 sps:$4 sm:$0xff]   ;;  %v2176_v52 = vrot.slane %v2174_v30, 5  ;;  %v12108_v53 = vld [vmem:[#allocation6 + $0x150] ss:$8 sps:$4 sm:$0xff]  }
 0x10f   :  { %1823 = vmatpush2.bf16.msra.mxu0 %v12074_v61  ;;  %v2117_v61 = vrot.slane %v2115_v27, 4  ;;  %v2171_v27 = vshrl.u32 %v13295_v21, 16  ;;  %v11063_v29 = vcombine.high %v13407_v11, %v13411_v60 }
 0x110   :  { %2701 = vmatpush2.bf16.msra.mxu1 %v12077_v62  ;;  %1824 = vmatprep.subr.bf16.mxu0 %v12086_v57  ;;  %v2120_v62 = vrot.slane %v2118_v33, 5  ;;  %v2134_v57 = vrot.slane %v2132_v48, 5  ;;  %v2098_v33 = vrot.slane %v2096_v40, 5  ;;  %v2213_v40 = vshrl.u32 %v13315_v41, 16 }
 0x111   :  { %2702 = vmatprep.subr.bf16.mxu1 %v12089_v58  ;;  %v12104_v58 = vld [vmem:[#allocation6 + $0x164] ss:$8 sps:$4 sm:$0xff]  }
 0x112   :  { %1143 = vmatmul.mubr.bf16.gmra.mxu0 %v10930_v20  ;;  %v2108_v20 = vrot.slane %v2107_v15, 4  ;;  %v2121_v25 = vor.u32 %v2120_v62, %v2117_v61  ;;  %v2135_v17 = vor.u32 %v2134_v57, %v2131_v16  ;;  %v13427_v9 = vsel %vm13375_vm3, %v2094_v18, %v2098_v33  ;;  %v12116_v61 = vld [vmem:[#allocation6 + $0x144] ss:$8 sps:$4 sm:$0xff]   ;;  %v12114_v57 = vld [vmem:[#allocation6 + $0x140] ss:$8 sps:$4 sm:$0xff]  }
 0x113   :  { %1496 = vmatmul.mubr.bf16.gmra.mxu1 %v13384_v23  ;;  %1825 = vmatpush2.bf16.msra.mxu0 %v12084_v31  ;;  %v2185_v31 = vshrl.u32 %v13298_v22, 16  ;;  %v12119_v62 = vld [vmem:[#allocation6 + $0x744] ss:$8 sps:$4 sm:$0xff]   ;;  %v2202_v16 = vshll.u32 %v13310_v37, 16  ;;  %v2140_v18 = vrot.slane %v2138_v55, 5  ;;  %v2215_v30 = vrot.slane %v2213_v40, 4 }
 0x114   :  { %2703 = vmatpush2.bf16.msra.mxu1 %v12087_v32  ;;  %1826 = vmatprep.subr.bf16.mxu0 %v12092_v34  ;;  %v12105_v32 = vld [vmem:[#allocation6 + $0x760] ss:$8 sps:$4 sm:$0xff]   ;;  %v2112_v34 = vrot.slane %v2110_v13, 5  ;;  %v2122_v48 = vrot.slane %v2121_v25, 4  ;;  %v2136_v21 = vrot.slane %v2135_v17, 4  ;;  %v2216_v13 = vshll.u32 %v13315_v41, 16 }
 0x115   :  { %2704 = vmatprep.subr.bf16.mxu1 %v12095_v35  ;;  %1828 = vmatprep.mubr.bf16.mxu0 %v13257_v49  ;;  %v12099_v49 = vld [vmem:[#allocation6 + $0x770] ss:$8 sps:$4 sm:$0xff]   ;;  %v1998_v25 = vld [vmem:[#allocation3 + $0x80] sm:$0x11]  ;;  %v2204_v17 = vrot.slane %v2202_v16, 5 }
 0x116   :  { %2706 = vmatprep.mubr.bf16.mxu1 %v11061_v39  ;;  %v1988_v35 = vld [vmem:[#allocation3 + $0x30] sm:$0x11]  ;;  %v13452_v33 = vsel %vm13375_vm3, %v2136_v21, %v2140_v18 }
 0x117   :  { %1827 = vmatpush2.bf16.msra.mxu0 %v12090_v38  ;;  %v2188_v38 = vshll.u32 %v13298_v22, 16  ;;  %v12113_v39 = vld [vmem:[#allocation6 + $0x754] ss:$8 sps:$4 sm:$0xff]   ;;  %v13431_v22 = vsel %vm13375_vm3, %v2108_v20, %v2112_v34  ;;  %v2124_v54 = vshll.u32 %v1988_v35, 16  ;;  %v1996_v20 = vld [vmem:[#allocation3 + $0x40] sm:$0x11] }
 0x118   :  { %2705 = vmatpush2.bf16.msra.mxu1 %v12093_v45  ;;  %3027 = vmatprep.subr.bf16.mxu0 %v12098_v50  ;;  %v12110_v45 = vld [vmem:[#allocation6 + $0x154] ss:$8 sps:$4 sm:$0xff]   ;;  %v13423_v50 = vrot.slane %v2171_v27, 4  ;;  %v12120_v41 = vld [vmem:[#allocation6 + $0x130] ss:$8 sps:$4 sm:$0xff]   ;;  %v2180_v34 = vshll.u32 %v1996_v20, 16 }
 0x119   :  { %3429 = vmatprep.subr.bf16.mxu1 %v12101_v59  ;;  %v2187_v59 = vrot.slane %v2185_v31, 4  ;;  %v2190_v15 = vrot.slane %v2188_v38, 5  ;;  %v13444_v31 = vld [vmem:[#allocation3 + $0xf8] sm:$0xff]  ;;  %v2218_v38 = vrot.slane %v2216_v13, 5  ;;  %v2244_v13 = vshll.u32 %v13338_v8, 16 }
 0x11a   :  { %1829 = vmatmul.mubr.bf16.vlgmr.msra.gmra.mxu0 %v13264_v56  ;;  %v11062_v56 = vcombine.low %v13407_v11, %v13411_v60  ;;  %v2177_v27 = vor.u32 %v2176_v52, %v13423_v50  ;;  %v12123_v35 = vld [vmem:[#allocation6 + $0x730] ss:$8 sps:$4 sm:$0xff]   ;;  %v12129_v50 = vld [vmem:[#allocation6 + $0x720] ss:$8 sps:$4 sm:$0xff]   ;;  %v11019_v21 = vcombine.high %v13286_v10, %v13444_v31  ;;  %v2182_v55 = vrot.slane %v2180_v34, 5 }
 0x11b   :  { %2707 = vmatmul.mubr.bf16.vlgmr.msra.gmra.mxu1 %v11060_v0  ;;  %3028 = vmatpush1.bf16.msra.mxu0 %v12096_v5  ;;  %v2199_v0 = vshrl.u32 %v13310_v37, 16  ;;  %v11065_v5 = vcombine.high %v13427_v9, %v13431_v22  ;;  %v12125_v37 = vld [vmem:[#allocation6 + $0x734] ss:$8 sps:$4 sm:$0xff]   ;;  %v2219_v16 = vor.u32 %v2218_v38, %v2215_v30  ;;  %v12137_v18 = vld [vmem:[#allocation6 + $0x710] ss:$8 sps:$4 sm:$0xff]   ;;  %v2246_v30 = vrot.slane %v2244_v13, 5 }
 0x11c   :  { %3430 = vmatpush1.bf16.msra.mxu1 %v12099_v49  ;;  %3029 = vmatprep.subr.bf16.mxu0 %v12104_v58  ;;  %v12117_v49 = vld [vmem:[#allocation6 + $0x740] ss:$8 sps:$4 sm:$0xff]   ;;  %v2126_v58 = vrot.slane %v2124_v54, 5  ;;  %v12136_v54 = vld [vmem:[#allocation6 + $0x114] ss:$8 sps:$4 sm:$0xff]   ;;  %v2255_v34 = vshrl.u32 %v13351_v36, 16 }
 0x11d   :  { %3431 = vmatprep.subr.bf16.mxu1 %v12107_v19  ;;  %1838 = vmatprep.mubr.bf16.mxu0 %v13274_v63  ;;  %v12111_v63 = vld [vmem:[#allocation6 + $0x750] ss:$8 sps:$4 sm:$0xff]   ;;  %v12122_v19 = vld [vmem:[#allocation6 + $0x134] ss:$8 sps:$4 sm:$0xff]   ;;  %v12143_v38 = vld [vmem:[#allocation6 + $0x700] ss:$8 sps:$4 sm:$0xff]  }
 0x11e   :  { %2716 = vmatprep.mubr.bf16.mxu1 %v11063_v29  ;;  %v2201_v29 = vrot.slane %v2199_v0, 4  ;;  %v12139_v0 = vld [vmem:[#allocation6 + $0x714] ss:$8 sps:$4 sm:$0xff]  }
 0x11f   :  { %3030 = vmatpush1.bf16.msra.mxu0 %v12102_v12  ;;  %v2191_v12 = vor.u32 %v2190_v15, %v2187_v59  ;;  %v2000_v15 = vld [vmem:[#allocation3 + $0x130] sm:$0x11] }
 0x120   :  { %3432 = vmatpush1.bf16.msra.mxu1 %v12105_v32  ;;  %3031 = vmatprep.subr.bf16.mxu0 %v12110_v45  ;;  %v13448_v32 = vsel %vm13375_vm3, %v2122_v48, %v2126_v58  ;;  %v12131_v45 = vld [vmem:[#allocation6 + $0x724] ss:$8 sps:$4 sm:$0xff]   ;;  %v12126_v48 = vld [vmem:[#allocation6 + $0x120] ss:$8 sps:$4 sm:$0xff]   ;;  %v2208_v40 = vshll.u32 %v2000_v15, 16  ;;  %v2257_v15 = vrot.slane %v2255_v34, 4 }
 0x121   :  { %3433 = vmatprep.subr.bf16.mxu1 %v12113_v39  ;;  %v2227_v39 = vshrl.u32 %v13336_v6, 16  ;;  %v11067_v52 = vcombine.high %v13448_v32, %v13452_v33  ;;  %v12134_v58 = vld [vmem:[#allocation6 + $0x110] ss:$8 sps:$4 sm:$0xff]  }
 0x122   :  { %1839 = vmatmul.mubr.bf16.gmra.mxu0 %v13282_v7  ;;  %v11064_v7 = vcombine.low %v13427_v9, %v13431_v22 }
 0x123   :  { %2717 = vmatmul.mubr.bf16.gmra.mxu1 %v11062_v56  ;;  %3032 = vmatpush1.bf16.msra.mxu0 %v12108_v53  ;;  %v2230_v56 = vshll.u32 %v13336_v6, 16  ;;  %v2178_v53 = vrot.slane %v2177_v27, 4  ;;  %v2002_v6 = vld [vmem:[#allocation3 + $0x10] sm:$0x11]  ;;  %v2220_v27 = vrot.slane %v2219_v16, 4 }
 0x124   :  { %3434 = vmatpush1.bf16.msra.mxu1 %v12111_v63  ;;  %3033 = vmatprep.subr.bf16.mxu0 %v12116_v61  ;;  %v2192_v63 = vrot.slane %v2191_v12, 4  ;;  %v2205_v61 = vor.u32 %v2204_v17, %v2201_v29  ;;  %v2210_v17 = vrot.slane %v2208_v40, 5 }
 0x125   :  { %3435 = vmatprep.subr.bf16.mxu1 %v12119_v62  ;;  %1848 = vmatprep.mubr.bf16.mxu0 %v13292_v14  ;;  %v2194_v14 = vshll.u32 %v1998_v25, 16  ;;  %v2241_v62 = vshrl.u32 %v13338_v8, 16  ;;  %v2222_v25 = vshll.u32 %v2002_v6, 16  ;;  %v12145_v8 = vld [vmem:[#allocation6 + $0x704] ss:$8 sps:$4 sm:$0xff]  }
 0x126   :  { %2726 = vmatprep.mubr.bf16.mxu1 %v11065_v5  ;;  %v2232_v5 = vrot.slane %v2230_v56, 5  ;;  %v12148_v56 = vld [vmem:[#allocation6 + $0x1f4] ss:$8 sps:$4 sm:$0xff]  }
 0x127   :  { %3034 = vmatpush1.bf16.msra.mxu0 %v12114_v57  ;;  %v2196_v59 = vrot.slane %v2194_v14, 5  ;;  %v2229_v57 = vrot.slane %v2227_v39, 4  ;;  %v2224_v14 = vrot.slane %v2222_v25, 5  ;;  %v2269_v39 = vshrl.u32 %v13359_v47, 16  ;;  %v2010_v25 = vld [vmem:[#allocation3 + $0x50] sm:$0x11] }
 0x128   :  { %3436 = vmatpush1.bf16.msra.mxu1 %v12117_v49  ;;  %3035 = vmatprep.subr.bf16.mxu0 %v12122_v19  ;;  %v11066_v49 = vcombine.low %v13448_v32, %v13452_v33  ;;  %v13469_v19 = vsel %vm13375_vm3, %v2178_v53, %v2182_v55 }
 0x129   :  { %3437 = vmatprep.subr.bf16.mxu1 %v12125_v37  ;;  %v13473_v20 = vsel %vm13375_vm3, %v2192_v63, %v2196_v59  ;;  %v2206_v37 = vrot.slane %v2205_v61, 4  ;;  %v2233_v12 = vor.u32 %v2232_v5, %v2229_v57  ;;  %v12146_v63 = vld [vmem:[#allocation6 + $0x1f0] ss:$8 sps:$4 sm:$0xff]   ;;  %v13490_v59 = vsel %vm13375_vm3, %v2220_v27, %v2224_v14  ;;  %v12152_v57 = vld [vmem:[#allocation6 + $0x1e0] ss:$8 sps:$4 sm:$0xff]  }
 0x12a   :  { %1849 = vmatmul.mubr.bf16.gmra.mxu0 %v13304_v24  ;;  %v11018_v24 = vcombine.low %v13286_v10, %v13444_v31  ;;  %v12142_v10 = vld [vmem:[#allocation6 + $0x104] ss:$8 sps:$4 sm:$0xff]   ;;  %v11069_v29 = vcombine.high %v13469_v19, %v13473_v20  ;;  %v11068_v55 = vcombine.low %v13469_v19, %v13473_v20  ;;  %v2271_v61 = vrot.slane %v2269_v39, 4  ;;  %v12155_v5 = vld [vmem:[#allocation6 + $0x7e0] ss:$8 sps:$4 sm:$0xff]  }
 0x12b   :  { %2727 = vmatmul.mubr.bf16.gmra.mxu1 %v11064_v7  ;;  %3036 = vmatpush1.bf16.msra.mxu0 %v12120_v41  ;;  %v2243_v7 = vrot.slane %v2241_v62, 4  ;;  %v12140_v41 = vld [vmem:[#allocation6 + $0x100] ss:$8 sps:$4 sm:$0xff]   ;;  %v12154_v62 = vld [vmem:[#allocation6 + $0x1e4] ss:$8 sps:$4 sm:$0xff]  }
 0x12c   :  { %3438 = vmatpush1.bf16.msra.mxu1 %v12123_v35  ;;  %3037 = vmatprep.subr.bf16.mxu0 %v12128_v42  ;;  %v2004_v35 = vld [vmem:[#allocation3 + $0x98] sm:$0x11]  ;;  %v2006_v42 = vld [vmem:[#allocation3] sm:$0x11] }
 0x12d   :  { %3439 = vmatprep.subr.bf16.mxu1 %v12131_v45  ;;  %1858 = vmatprep.mubr.bf16.mxu0 %v11019_v21  ;;  %v2258_v45 = vshll.u32 %v13351_v36, 16  ;;  %v2234_v21 = vrot.slane %v2233_v12, 4  ;;  %v2247_v53 = vor.u32 %v2246_v30, %v2243_v7  ;;  %v13486_v36 = vsel %vm13375_vm3, %v2206_v37, %v2210_v17  ;;  %v12163_v37 = vld [vmem:[#allocation6 + $0x7d4] ss:$8 sps:$4 sm:$0xff]   ;;  %v12158_v7 = vld [vmem:[#allocation6 + $0x1d0] ss:$8 sps:$4 sm:$0xff]  }
 0x12e   :  { %2736 = vmatprep.mubr.bf16.mxu1 %v11067_v52  ;;  %v2236_v52 = vshll.u32 %v2004_v35, 16  ;;  %v11070_v12 = vcombine.low %v13486_v36, %v13490_v59  ;;  %v2278_v17 = vshll.u32 %v2010_v25, 16  ;;  %v12166_v14 = vld [vmem:[#allocation6 + $0x1c4] ss:$8 sps:$4 sm:$0xff]  }
 0x12f   :  { %3038 = vmatpush1.bf16.msra.mxu0 %v12126_v48  ;;  %v12151_v48 = vld [vmem:[#allocation6 + $0x7f4] ss:$8 sps:$4 sm:$0xff]   ;;  %v2260_v6 = vrot.slane %v2258_v45, 5  ;;  %v2248_v13 = vrot.slane %v2247_v53, 4  ;;  %v12169_v35 = vld [vmem:[#allocation6 + $0x7c4] ss:$8 sps:$4 sm:$0xff]  }
 0x130   :  { %3440 = vmatpush1.bf16.msra.mxu1 %v12129_v50  ;;  %3039 = vmatprep.subr.bf16.mxu0 %v12136_v54  ;;  %v2272_v50 = vshll.u32 %v13359_v47, 16  ;;  %v2250_v54 = vshll.u32 %v2006_v42, 16  ;;  %v2238_v40 = vrot.slane %v2236_v52, 5  ;;  %v12167_v45 = vld [vmem:[#allocation6 + $0x7c0] ss:$8 sps:$4 sm:$0xff]  }
 0x131   :  { %3441 = vmatprep.subr.bf16.mxu1 %v12139_v0  ;;  %v12157_v0 = vld [vmem:[#allocation6 + $0x7e4] ss:$8 sps:$4 sm:$0xff]   ;;  %v1974_v53 = vld [vmem:[#allocation3 + $0x38] sm:$0x11] }
 0x132   :  { %1859 = vmatmul.mubr.bf16.gmra.mxu0 %v11018_v24  ;;  %v2274_v16 = vrot.slane %v2272_v50, 5  ;;  %v11071_v24 = vcombine.high %v13486_v36, %v13490_v59  ;;  %v2280_v50 = vrot.slane %v2278_v17, 5  ;;  %v12193_v17 = vld [vmem:[#allocation6 + $0x780] ss:$8 sps:$4 sm:$0xff]  }
 0x133   :  { %2737 = vmatmul.mubr.bf16.gmra.mxu1 %v11066_v49  ;;  %3040 = vmatpush1.bf16.msra.mxu0 %v12134_v58  ;;  %v2252_v49 = vrot.slane %v2250_v54, 5  ;;  %v12160_v58 = vld [vmem:[#allocation6 + $0x1d4] ss:$8 sps:$4 sm:$0xff]  }
 0x134   :  { %3442 = vmatpush1.bf16.msra.mxu1 %v12137_v18  ;;  %3041 = vmatprep.subr.bf16.mxu0 %v12142_v10  ;;  %v2008_v18 = vld [vmem:[#allocation3 + $0x120] sm:$0x11]  ;;  %v1973_v10 = vld [vmem:[#allocation3 + $0x110] sm:$0xff]  ;;  %v2275_v27 = vor.u32 %v2274_v16, %v2271_v61 }
 0x135   :  { %3443 = vmatprep.subr.bf16.mxu1 %v12145_v8  ;;  %1868 = vmatprep.mubr.bf16.mxu0 %v13323_v51  ;;  %v12149_v51 = vld [vmem:[#allocation6 + $0x7f0] ss:$8 sps:$4 sm:$0xff]   ;;  %v2261_v8 = vor.u32 %v2260_v6, %v2257_v15  ;;  %v2017_v30 = vshrl.u32 %v1973_v10, 16  ;;  %v2020_v34 = vshll.u32 %v1973_v10, 16  ;;  %v12172_v54 = vld [vmem:[#allocation6 + $0x1b4] ss:$8 sps:$4 sm:$0xff]  }
 0x136   :  { %2746 = vmatprep.mubr.bf16.mxu1 %v11069_v29  ;;  %v2264_v29 = vshll.u32 %v2008_v18, 16  ;;  %v12170_v15 = vld [vmem:[#allocation6 + $0x1b0] ss:$8 sps:$4 sm:$0xff]   ;;  %v12181_v16 = vld [vmem:[#allocation6 + $0x7a4] ss:$8 sps:$4 sm:$0xff]  }
 0x137   :  { %3042 = vmatpush1.bf16.msra.mxu0 %v12140_v41  ;;  %v13504_v41 = vsel %vm13375_vm3, %v2248_v13, %v2252_v49  ;;  %v2262_v42 = vrot.slane %v2261_v8, 4  ;;  %v2022_v52 = vrot.slane %v2020_v34, 5  ;;  %v12176_v13 = vld [vmem:[#allocation6 + $0x1a0] ss:$8 sps:$4 sm:$0xff]   ;;  %v12189_v18 = vld [vmem:[#allocation6 + $0x794] ss:$8 sps:$4 sm:$0xff]  }
 0x138   :  { %3444 = vmatpush1.bf16.msra.mxu1 %v12143_v38  ;;  %3043 = vmatprep.subr.bf16.mxu0 %v12148_v56  ;;  %v12164_v38 = vld [vmem:[#allocation6 + $0x1c0] ss:$8 sps:$4 sm:$0xff]   ;;  %v2276_v56 = vrot.slane %v2275_v27, 4  ;;  %v12187_v8 = vld [vmem:[#allocation6 + $0x790] ss:$8 sps:$4 sm:$0xff]  }
 0x139   :  { %3445 = vmatprep.subr.bf16.mxu1 %v12151_v48  ;;  %v2266_v48 = vrot.slane %v2264_v29, 5  ;;  %v12179_v49 = vld [vmem:[#allocation6 + $0x7a0] ss:$8 sps:$4 sm:$0xff]   ;;  %v12192_v27 = vld [vmem:[#allocation6 + $0x184] ss:$8 sps:$4 sm:$0xff]   ;;  %v11111_v29 = vcombine.high %v13393_v43, %v13407_v11 }
 0x13a   :  { %1869 = vmatmul.mubr.bf16.gmra.mxu0 %v13334_v4  ;;  %v13500_v4 = vsel %vm13375_vm3, %v2234_v21, %v2238_v40  ;;  %v2019_v21 = vrot.slane %v2017_v30, 4  ;;  %v13520_v6 = vsel %vm13375_vm3, %v2276_v56, %v2280_v50  ;;  %v12198_v30 = vld [vmem:[#allocation6 + $0x574] ss:$8 sps:$4 sm:$0xff]   ;;  %v12207_v56 = vld [vmem:[#allocation6 + $0x264] ss:$8 sps:$4 sm:$0xff]  }
 0x13b   :  { %2747 = vmatmul.mubr.bf16.gmra.mxu1 %v11068_v55  ;;  %3044 = vmatpush2.bf16.msra.mxu0 %v12146_v63  ;;  %v11073_v39 = vcombine.high %v13500_v4, %v13504_v41  ;;  %v12175_v55 = vld [vmem:[#allocation6 + $0x7b4] ss:$8 sps:$4 sm:$0xff]   ;;  %v11072_v63 = vcombine.low %v13500_v4, %v13504_v41  ;;  %v12205_v50 = vld [vmem:[#allocation6 + $0x260] ss:$8 sps:$4 sm:$0xff]  }
 0x13c   :  { %3446 = vmatpush2.bf16.msra.mxu1 %v12149_v51  ;;  %3045 = vmatprep.subr.bf16.mxu0 %v12154_v62  ;;  %v13516_v51 = vsel %vm13375_vm3, %v2262_v42, %v2266_v48  ;;  %v2023_v61 = vor.u32 %v2022_v52, %v2019_v21  ;;  %v2026_v62 = vshll.u32 %v1974_v53, 16  ;;  %v12201_v34 = vld [vmem:[#allocation6 + $0x274] ss:$8 sps:$4 sm:$0xff]   ;;  %v2146_v42 = vshll.u32 %v13444_v31, 16  ;;  %v1993_v52 = vld [vmem:[#allocation3 + $0xa0] sm:$0xff] }
 0x13d   :  { %3447 = vmatprep.subr.bf16.mxu1 %v12157_v0  ;;  %1878 = vmatprep.mubr.bf16.mxu0 %v13346_v26  ;;  %v12161_v26 = vld [vmem:[#allocation6 + $0x7d0] ss:$8 sps:$4 sm:$0xff]   ;;  %v12178_v0 = vld [vmem:[#allocation6 + $0x1a4] ss:$8 sps:$4 sm:$0xff]   ;;  %v11074_v10 = vcombine.low %v13516_v51, %v13520_v6  ;;  %v11113_v48 = vcombine.high %v13411_v60, %v13427_v9  ;;  %v12213_v53 = vld [vmem:[#allocation6 + $0x254] ss:$8 sps:$4 sm:$0xff]  }
 0x13e   :  { %2756 = vmatprep.mubr.bf16.mxu1 %v11071_v24  ;;  %v2024_v24 = vrot.slane %v2023_v61, 4  ;;  %v2028_v40 = vrot.slane %v2026_v62, 5  ;;  %v1992_v21 = vld [vmem:[#allocation3 + $0x138] sm:$0x11]  ;;  %v2160_v61 = vshll.u32 %v1993_v52, 16 }
 0x13f   :  { %3046 = vmatpush2.bf16.msra.mxu0 %v12152_v57  ;;  %v12208_v62 = vld [vmem:[#allocation6 + $0x550] ss:$8 sps:$4 sm:$0xff]  }
 0x140   :  { %3448 = vmatpush2.bf16.msra.mxu1 %v12155_v5  ;;  %3047 = vmatprep.subr.bf16.mxu0 %v12160_v58  ;;  %v11075_v5 = vcombine.high %v13516_v51, %v13520_v6  ;;  %v12186_v58 = vld [vmem:[#allocation6 + $0x194] ss:$8 sps:$4 sm:$0xff]  }
 0x141   :  { %3449 = vmatprep.subr.bf16.mxu1 %v12163_v37  ;;  %v12184_v37 = vld [vmem:[#allocation6 + $0x190] ss:$8 sps:$4 sm:$0xff]  }
 0x142   :  { %1879 = vmatmul.mubr.bf16.gmra.mxu0 %v13357_v46  ;;  %v13512_v46 = vld [vmem:[#allocation3 + $0x88] sm:$0xff] }
 0x143   :  { %2757 = vmatmul.mubr.bf16.gmra.mxu1 %v11070_v12  ;;  %3048 = vmatpush2.bf16.msra.mxu0 %v12158_v7  ;;  %v11027_v57 = vcombine.high %v13359_v47, %v13512_v46  ;;  %v11026_v25 = vcombine.low %v13359_v47, %v13512_v46  ;;  %v12195_v12 = vld [vmem:[#allocation6 + $0x784] ss:$8 sps:$4 sm:$0xff]   ;;  %v12190_v47 = vld [vmem:[#allocation6 + $0x180] ss:$8 sps:$4 sm:$0xff]  }
 0x144   :  { %3450 = vmatpush2.bf16.msra.mxu1 %v12161_v26  ;;  %3049 = vmatprep.subr.bf16.mxu0 %v12166_v14  ;;  %v11110_v14 = vcombine.low %v13393_v43, %v13407_v11  ;;  %v2148_v11 = vrot.slane %v2146_v42, 5  ;;  %v12235_v42 = vld [vmem:[#allocation6 + $0x210] ss:$8 sps:$4 sm:$0xff]  }
 0x145   :  { %3451 = vmatprep.subr.bf16.mxu1 %v12169_v35  ;;  %1888 = vmatprep.mubr.bf16.mxu0 %v13369_v1  ;;  %v12173_v1 = vld [vmem:[#allocation6 + $0x7b0] ss:$8 sps:$4 sm:$0xff]   ;;  %v2143_v35 = vshrl.u32 %v13444_v31, 16  ;;  %v12210_v31 = vld [vmem:[#allocation6 + $0x554] ss:$8 sps:$4 sm:$0xff]  }
 0x146   :  { %2766 = vmatprep.mubr.bf16.mxu1 %v11073_v39  ;;  %v12204_v39 = vld [vmem:[#allocation6 + $0x564] ss:$8 sps:$4 sm:$0xff]  }
 0x147   :  { %3050 = vmatpush2.bf16.msra.mxu0 %v12164_v38  ;;  %v12196_v38 = vld [vmem:[#allocation6 + $0x570] ss:$8 sps:$4 sm:$0xff]   ;;  %v2145_v43 = vrot.slane %v2143_v35, 4 }
 0x148   :  { %3452 = vmatpush2.bf16.msra.mxu1 %v12167_v45  ;;  %3051 = vmatprep.subr.bf16.mxu0 %v12172_v54  ;;  %v12199_v45 = vld [vmem:[#allocation6 + $0x270] ss:$8 sps:$4 sm:$0xff]   ;;  %v11112_v54 = vcombine.low %v13411_v60, %v13427_v9  ;;  %v2162_v9 = vrot.slane %v2160_v61, 5 }
 0x149   :  { %3453 = vmatprep.subr.bf16.mxu1 %v12175_v55  ;;  %v2149_v55 = vor.u32 %v2148_v11, %v2145_v43  ;;  %v12246_v43 = vld [vmem:[#allocation6 + $0x5f4] ss:$8 sps:$4 sm:$0xff]  }
 0x14a   :  { %1889 = vmatmul.mubr.bf16.gmra.mxu0 %v13384_v23  ;;  %v2029_v23 = vsel %vm13375_vm3, %v2024_v24, %v2028_v40  ;;  %v12214_v40 = vld [vmem:[#allocation6 + $0x540] ss:$8 sps:$4 sm:$0xff]   ;;  %v12249_v11 = vld [vmem:[#allocation6 + $0x2f4] ss:$8 sps:$4 sm:$0xff]  }
 0x14b   :  { %2767 = vmatmul.mubr.bf16.gmra.mxu1 %v11072_v63  ;;  %3052 = vmatpush2.bf16.msra.mxu0 %v12170_v15  ;;  %v11109_v7 = vcombine.high %v2029_v23, %v13389_v28  ;;  %v11108_v26 = vcombine.low %v2029_v23, %v13389_v28  ;;  %v12202_v28 = vld [vmem:[#allocation6 + $0x560] ss:$8 sps:$4 sm:$0xff]   ;;  %v2152_v63 = vshll.u32 %v1992_v21, 16  ;;  %v2157_v15 = vshrl.u32 %v1993_v52, 16 }
 0x14c   :  { %3454 = vmatpush2.bf16.msra.mxu1 %v12173_v1  ;;  %3053 = vmatprep.subr.bf16.mxu0 %v12178_v0  ;;  %v12211_v1 = vld [vmem:[#allocation6 + $0x250] ss:$8 sps:$4 sm:$0xff]   ;;  %v12216_v0 = vld [vmem:[#allocation6 + $0x544] ss:$8 sps:$4 sm:$0xff]   ;;  %v2286_v21 = vshll.u32 %v13512_v46, 16 }
 0x14d   :  { %3455 = vmatprep.subr.bf16.mxu1 %v12181_v16  ;;  %1898 = vmatprep.mubr.bf16.mxu0 %v11027_v57  ;;  %v12219_v16 = vld [vmem:[#allocation6 + $0x244] ss:$8 sps:$4 sm:$0xff]   ;;  %v11115_v57 = vcombine.high %v13431_v22, %v13448_v32  ;;  %v2154_v24 = vrot.slane %v2152_v63, 5  ;;  %v2159_v60 = vrot.slane %v2157_v15, 4  ;;  %v11118_v63 = vcombine.low %v13473_v20, %v13486_v36  ;;  %v3689_v15 = vld [vmem:[#allocation3 + $0x138] sm:$0x11] }
 0x14e   :  { %2776 = vmatprep.mubr.bf16.mxu1 %v11075_v5  ;;  %v2150_v5 = vrot.slane %v2149_v55, 4 }
 0x14f   :  { %3054 = vmatpush2.bf16.msra.mxu0 %v12176_v13  ;;  %v12217_v13 = vld [vmem:[#allocation6 + $0x240] ss:$8 sps:$4 sm:$0xff]  }
 0x150   :  { %3456 = vmatpush2.bf16.msra.mxu1 %v12179_v49  ;;  %3055 = vmatprep.subr.bf16.mxu0 %v12186_v58  ;;  %v1994_v49 = vld [vmem:[#allocation3 + $0x20] sm:$0x11]  ;;  %v12222_v58 = vld [vmem:[#allocation6 + $0x534] ss:$8 sps:$4 sm:$0xff]   ;;  %v2155_v23 = vsel %vm13375_vm3, %v2150_v5, %v2154_v24 }
 0x151   :  { %3457 = vmatprep.subr.bf16.mxu1 %v12189_v18  ;;  %v12225_v18 = vld [vmem:[#allocation6 + $0x234] ss:$8 sps:$4 sm:$0xff]  }
 0x152   :  { %1899 = vmatmul.mubr.bf16.gmra.mxu0 %v11026_v25  ;;  %v11114_v25 = vcombine.low %v13431_v22, %v13448_v32  ;;  %v12226_v22 = vld [vmem:[#allocation6 + $0x520] ss:$8 sps:$4 sm:$0xff]  }
 0x153   :  { %2777 = vmatmul.mubr.bf16.gmra.mxu1 %v11074_v10  ;;  %3056 = vmatpush2.bf16.msra.mxu0 %v12184_v37  ;;  %v12220_v10 = vld [vmem:[#allocation6 + $0x530] ss:$8 sps:$4 sm:$0xff]   ;;  %v2163_v37 = vor.u32 %v2162_v9, %v2159_v60  ;;  %v12229_v32 = vld [vmem:[#allocation6 + $0x220] ss:$8 sps:$4 sm:$0xff]  }
 0x154   :  { %3458 = vmatpush2.bf16.msra.mxu1 %v12187_v8  ;;  %3057 = vmatprep.subr.bf16.mxu0 %v12192_v27  ;;  %v2166_v8 = vshll.u32 %v1994_v49, 16  ;;  %v12223_v27 = vld [vmem:[#allocation6 + $0x230] ss:$8 sps:$4 sm:$0xff]   ;;  %v12253_v49 = vld [vmem:[#allocation6 + $0x2e0] ss:$8 sps:$4 sm:$0xff]  }
 0x155   :  { %3459 = vmatprep.subr.bf16.mxu1 %v12195_v12  ;;  %3059 = vmatprep.mubr.bf16.mxu0 %v11109_v7  ;;  %v12228_v12 = vld [vmem:[#allocation6 + $0x524] ss:$8 sps:$4 sm:$0xff]   ;;  %v2012_v60 = vld [vmem:[#allocation3 + $0xb8] sm:$0x11] }
 0x156   :  { %3461 = vmatprep.mubr.bf16.mxu1 %v11111_v29  ;;  %v12231_v7 = vld [vmem:[#allocation6 + $0x224] ss:$8 sps:$4 sm:$0xff]  }
 0x157   :  { %3058 = vmatpush2.bf16.msra.mxu0 %v12190_v47  ;;  %v2164_v47 = vrot.slane %v2163_v37, 4  ;;  %v12256_v37 = vld [vmem:[#allocation6 + $0x5d0] ss:$8 sps:$4 sm:$0xff]  }
 0x158   :  { %3460 = vmatpush2.bf16.msra.mxu1 %v12193_v17  ;;  %4211 = vmatprep.subr.bf16.mxu0 %v12198_v30  ;;  %v2168_v17 = vrot.slane %v2166_v8, 5  ;;  %v12234_v30 = vld [vmem:[#allocation6 + $0x514] ss:$8 sps:$4 sm:$0xff]   ;;  %v12259_v8 = vld [vmem:[#allocation6 + $0x2d0] ss:$8 sps:$4 sm:$0xff]  }
 0x159   :  { %4564 = vmatprep.subr.bf16.mxu1 %v12201_v34  ;;  %v12237_v34 = vld [vmem:[#allocation6 + $0x214] ss:$8 sps:$4 sm:$0xff]  }
 0x15a   :  { %3060 = vmatmul.mubr.bf16.vlgmr.msra.gmra.mxu0 %v11108_v26  ;;  %v11162_v26 = vcombine.low %v13452_v33, %v2155_v23  ;;  %v2169_v35 = vsel %vm13375_vm3, %v2164_v47, %v2168_v17  ;;  %v12262_v17 = vld [vmem:[#allocation6 + $0x5c0] ss:$8 sps:$4 sm:$0xff]  }
 0x15b   :  { %3462 = vmatmul.mubr.bf16.vlgmr.msra.gmra.mxu1 %v11110_v14  ;;  %4212 = vmatpush1.bf16.msra.mxu0 %v12196_v38  ;;  %v12240_v38 = vld [vmem:[#allocation6 + $0x504] ss:$8 sps:$4 sm:$0xff]   ;;  %v11116_v55 = vcombine.low %v2169_v35, %v13469_v19 }
 0x15c   :  { %4565 = vmatpush1.bf16.msra.mxu1 %v12199_v45  ;;  %4213 = vmatprep.subr.bf16.mxu0 %v12204_v39  ;;  %v12243_v45 = vld [vmem:[#allocation6 + $0x204] ss:$8 sps:$4 sm:$0xff]   ;;  %v12238_v39 = vld [vmem:[#allocation6 + $0x500] ss:$8 sps:$4 sm:$0xff]  }
 0x15d   :  { %4566 = vmatprep.subr.bf16.mxu1 %v12207_v56  ;;  %3069 = vmatprep.mubr.bf16.mxu0 %v11111_v29  ;;  %v11163_v29 = vcombine.high %v13452_v33, %v2155_v23  ;;  %v11117_v56 = vcombine.high %v2169_v35, %v13469_v19  ;;  %v12241_v33 = vld [vmem:[#allocation6 + $0x200] ss:$8 sps:$4 sm:$0xff]   ;;  %v16062_v19 = vmov 0  ;;  %v11120_v23 = vcombine.low %v13490_v59, %v13500_v4 }
 0x15e   :  { %3471 = vmatprep.mubr.bf16.mxu1 %v11113_v48  ;;  %v16063_v19 = vsel %vm13567_vm7, 4294967295, %v16062_v19  ;;  %v13593_v35 = vcombine.low %v13504_v41, %v13516_v51 }
 0x15f   :  { %4214 = vmatpush1.bf16.msra.mxu0 %v12202_v28  ;;  %v3686_v28 = vld [vmem:[#allocation3 + $0x90] sm:$0xee]  ;;  %16064 = vst [vmem:[#allocation36_spill] sm:$0xff] %v16063_v19 }
 0x160   :  { %4567 = vmatpush1.bf16.msra.mxu1 %v12205_v50  ;;  %4215 = vmatprep.subr.bf16.mxu0 %v12210_v31  ;;  %v3687_v50 = vld [vmem:[#allocation3 + $0x68] sm:$0x11]  ;;  %v2283_v31 = vshrl.u32 %v13512_v46, 16  ;;  %v11212_v52 = vrot.slane %v3686_v28, 9  ;;  %v11121_v46 = vcombine.high %v13490_v59, %v13500_v4  ;;  %v12270_v59 = vld [vmem:[#allocation6 + $0x5b4] ss:$8 sps:$4 sm:$0xff]  }
 0x161   :  { %4568 = vmatprep.subr.bf16.mxu1 %v12213_v53  ;;  %v3787_v53 = vrot.slane %v3687_v50, 5  ;;  %v12273_v4 = vld [vmem:[#allocation6 + $0x2b4] ss:$8 sps:$4 sm:$0xff]   ;;  %v12279_v28 = vld [vmem:[#allocation6 + $0x2a4] ss:$8 sps:$4 sm:$0xff]  }
 0x162   :  { %3070 = vmatmul.mubr.bf16.gmra.mxu0 %v11110_v14  ;;  %v12232_v14 = vld [vmem:[#allocation6 + $0x510] ss:$8 sps:$4 sm:$0xff]  }
 0x163   :  { %3472 = vmatmul.mubr.bf16.gmra.mxu1 %v11112_v54  ;;  %4216 = vmatpush1.bf16.msra.mxu0 %v12208_v62  ;;  %v12244_v62 = vld [vmem:[#allocation6 + $0x5f0] ss:$8 sps:$4 sm:$0xff]   ;;  %v13573_v5 = vsel %vm13567_vm7, %v11212_v52, %v3787_v53 }
 0x164   :  { %4569 = vmatpush1.bf16.msra.mxu1 %v12211_v1  ;;  %4217 = vmatprep.subr.bf16.mxu0 %v12216_v0  ;;  %v12247_v1 = vld [vmem:[#allocation6 + $0x2f0] ss:$8 sps:$4 sm:$0xff]   ;;  %v3791_v0 = vrot.slane %v3689_v15, 5  ;;  %v3708_v15 = vld [vmem:[#allocation3 + $0x88] sm:$0xee] }
 0x165   :  { %4570 = vmatprep.subr.bf16.mxu1 %v12219_v16  ;;  %3079 = vmatprep.mubr.bf16.mxu0 %v11113_v48  ;;  %v11119_v48 = vcombine.high %v13473_v20, %v13486_v36  ;;  %v12252_v16 = vld [vmem:[#allocation6 + $0x5e4] ss:$8 sps:$4 sm:$0xff]   ;;  %v2285_v20 = vrot.slane %v2283_v31, 4  ;;  %v2288_v36 = vrot.slane %v2286_v21, 5  ;;  %v12277_v21 = vld [vmem:[#allocation6 + $0x2a0] ss:$8 sps:$4 sm:$0xff]  }
 0x166   :  { %3481 = vmatprep.mubr.bf16.mxu1 %v11115_v57 }
 0x167   :  { %4218 = vmatpush1.bf16.msra.mxu0 %v12214_v40 }
 0x168   :  { %4571 = vmatpush1.bf16.msra.mxu1 %v12217_v13  ;;  %4219 = vmatprep.subr.bf16.mxu0 %v12222_v58  ;;  %v12250_v13 = vld [vmem:[#allocation6 + $0x5e0] ss:$8 sps:$4 sm:$0xff]   ;;  %v12258_v58 = vld [vmem:[#allocation6 + $0x5d4] ss:$8 sps:$4 sm:$0xff]  }
 0x169   :  { %4572 = vmatprep.subr.bf16.mxu1 %v12225_v18  ;;  %v12261_v18 = vld [vmem:[#allocation6 + $0x2d4] ss:$8 sps:$4 sm:$0xff]  }
 0x16a   :  { %3080 = vmatmul.mubr.bf16.gmra.mxu0 %v11112_v54  ;;  %v3688_v54 = vld [vmem:[#allocation3 + $0xf8] sm:$0xee] }
 0x16b   :  { %3482 = vmatmul.mubr.bf16.gmra.mxu1 %v11114_v25  ;;  %4220 = vmatpush1.bf16.msra.mxu0 %v12220_v10  ;;  %v11213_v61 = vrot.slane %v3688_v54, 9  ;;  %v2292_v10 = vshll.u32 %v2012_v60, 16  ;;  %v3679_v60 = vld [vmem:[#allocation3 + $0xf0] sm:$0x11] }
 0x16c   :  { %4573 = vmatpush1.bf16.msra.mxu1 %v12223_v27  ;;  %4221 = vmatprep.subr.bf16.mxu0 %v12228_v12  ;;  %v12264_v27 = vld [vmem:[#allocation6 + $0x5c4] ss:$8 sps:$4 sm:$0xff]  }
 0x16d   :  { %4574 = vmatprep.subr.bf16.mxu1 %v12231_v7  ;;  %3089 = vmatprep.mubr.bf16.mxu0 %v11115_v57  ;;  %v12255_v57 = vld [vmem:[#allocation6 + $0x2e4] ss:$8 sps:$4 sm:$0xff]   ;;  %v13577_v24 = vsel %vm13567_vm7, %v11213_v61, %v3791_v0  ;;  %v11123_v7 = vcombine.high %v13504_v41, %v13516_v51  ;;  %v2294_v47 = vrot.slane %v2292_v10, 5  ;;  %v3709_v61 = vld [vmem:[#allocation3 + $0xb8] sm:$0x11]  ;;  %v11223_v0 = vrot.slane %v3708_v15, 9 }
 0x16e   :  { %3491 = vmatprep.mubr.bf16.mxu1 %v11163_v29  ;;  %v12267_v12 = vld [vmem:[#allocation6 + $0x2c4] ss:$8 sps:$4 sm:$0xff]   ;;  %v3685_v15 = vld [vmem:[#allocation3 + $0x30] sm:$0x11]  ;;  %v16067_v2 = vcombine.low %v13573_v5, %v13577_v24 }
 0x16f   :  { %4222 = vmatpush1.bf16.msra.mxu0 %v12226_v22  ;;  %v12265_v22 = vld [vmem:[#allocation6 + $0x2c0] ss:$8 sps:$4 sm:$0xff]   ;;  %v12288_v10 = vld [vmem:[#allocation6 + $0x584] ss:$8 sps:$4 sm:$0xff]  }
 0x170   :  { %4575 = vmatpush1.bf16.msra.mxu1 %v12229_v32  ;;  %4223 = vmatprep.subr.bf16.mxu0 %v12234_v30  ;;  %v12268_v32 = vld [vmem:[#allocation6 + $0x5b0] ss:$8 sps:$4 sm:$0xff]  }
 0x171   :  { %4576 = vmatprep.subr.bf16.mxu1 %v12237_v34  ;;  %v12271_v30 = vld [vmem:[#allocation6 + $0x2b0] ss:$8 sps:$4 sm:$0xff]  }
 0x172   :  { %3090 = vmatmul.mubr.bf16.gmra.mxu0 %v11114_v25  ;;  %v2289_v25 = vor.u32 %v2288_v36, %v2285_v20  ;;  %v3677_v20 = vld [vmem:[#allocation3 + $0x48] sm:$0x11]  ;;  %v3678_v36 = vld [vmem:[#allocation3 + $0x78] sm:$0xee] }
 0x173   :  { %3492 = vmatmul.mubr.bf16.gmra.mxu1 %v11162_v26  ;;  %4224 = vmatpush1.bf16.msra.mxu0 %v12232_v14  ;;  %v3672_v26 = vld [vmem:[#allocation3 + $0xb0] sm:$0xee]  ;;  %v3673_v14 = vld [vmem:[#allocation3 + $0x18] sm:$0x11] }
 0x174   :  { %4577 = vmatpush1.bf16.msra.mxu1 %v12235_v42  ;;  %4225 = vmatprep.subr.bf16.mxu0 %v12240_v38  ;;  %v2290_v29 = vrot.slane %v2289_v25, 4  ;;  %v3674_v42 = vld [vmem:[#allocation3 + $0xc8] sm:$0xee]  ;;  %v3675_v38 = vld [vmem:[#allocation3 + $0xe8] sm:$0x11]  ;;  %v3759_v31 = vrot.slane %v3673_v14, 5 }
 0x175   :  { %4578 = vmatprep.subr.bf16.mxu1 %v12243_v45  ;;  %3099 = vmatprep.mubr.bf16.mxu0 %v11117_v56  ;;  %v3670_v45 = vld [vmem:[#allocation3 + $0x110] sm:$0xee]  ;;  %v3706_v56 = vld [vmem:[#allocation3 + $0xc0] sm:$0xee]  ;;  %v11206_v41 = vrot.slane %v3674_v42, 9  ;;  %v3763_v51 = vrot.slane %v3675_v38, 5 }
 0x176   :  { %3501 = vmatprep.mubr.bf16.mxu1 %v11119_v48  ;;  %v13589_v34 = vsel %vm13375_vm3, %v2290_v29, %v2294_v47  ;;  %v11204_v52 = vrot.slane %v3670_v45, 9  ;;  %v11222_v54 = vrot.slane %v3706_v56, 9  ;;  %v12283_v25 = vld [vmem:[#allocation6 + $0x290] ss:$8 sps:$4 sm:$0xff]   ;;  %v3682_v14 = vld [vmem:[#allocation3 + $0x28] sm:$0xee] }
 0x177   :  { %4226 = vmatpush1.bf16.msra.mxu0 %v12238_v39  ;;  %v3671_v39 = vld [vmem:[#allocation3 + $0x38] sm:$0x11]  ;;  %v11171_v50 = vcombine.high %v13520_v6, %v13589_v34 }
 0x178   :  { %4579 = vmatpush1.bf16.msra.mxu1 %v12241_v33  ;;  %4227 = vmatprep.subr.bf16.mxu0 %v12246_v43  ;;  %v12276_v33 = vld [vmem:[#allocation6 + $0x5a4] ss:$8 sps:$4 sm:$0xff]   ;;  %v12274_v43 = vld [vmem:[#allocation6 + $0x5a0] ss:$8 sps:$4 sm:$0xff]   ;;  %v3755_v53 = vrot.slane %v3671_v39, 5 }
 0x179   :  { %4580 = vmatprep.subr.bf16.mxu1 %v12249_v11  ;;  %v11205_v11 = vrot.slane %v3672_v26, 9  ;;  %v3681_v26 = vld [vmem:[#allocation3 + $0x60] sm:$0x11]  ;;  %v12292_v45 = vld [vmem:[#allocation6 + $0x870] ss:$8 sps:$4 sm:$0xff]  }
 0x17a   :  { %3100 = vmatmul.mubr.bf16.gmra.mxu0 %v11116_v55 }
 0x17b   :  { %3502 = vmatmul.mubr.bf16.gmra.mxu1 %v11118_v63  ;;  %4228 = vmatpush2.bf16.msra.mxu0 %v12244_v62  ;;  %v12285_v62 = vld [vmem:[#allocation6 + $0x294] ss:$8 sps:$4 sm:$0xff]  }
 0x17c   :  { %4581 = vmatpush2.bf16.msra.mxu1 %v12247_v1  ;;  %4229 = vmatprep.subr.bf16.mxu0 %v12252_v16  ;;  %v3676_v1 = vld [vmem:[#allocation3 + $0x128] sm:$0xee]  ;;  %v3831_v16 = vrot.slane %v3709_v61, 5 }
 0x17d   :  { %4582 = vmatprep.subr.bf16.mxu1 %v12255_v57  ;;  %3109 = vmatprep.mubr.bf16.mxu0 %v11119_v48  ;;  %v3707_v48 = vld [vmem:[#allocation3 + $0x50] sm:$0x11]  ;;  %v11170_v57 = vcombine.low %v13520_v6, %v13589_v34  ;;  %v3680_v34 = vld [vmem:[#allocation3 + $0xa8] sm:$0xee] }
 0x17e   :  { %3511 = vmatprep.mubr.bf16.mxu1 %v11121_v46  ;;  %v3827_v55 = vrot.slane %v3707_v48, 5  ;;  %v13614_v6 = vsel %vm13567_vm7, %v11223_v0, %v3831_v16  ;;  %v12297_v48 = vld [vmem:[#allocation6 + $0x864] ss:$8 sps:$4 sm:$0xff]  }
 0x17f   :  { %4230 = vmatpush2.bf16.msra.mxu0 %v12250_v13  ;;  %v12280_v13 = vld [vmem:[#allocation6 + $0x590] ss:$8 sps:$4 sm:$0xff]  }
 0x180   :  { %4583 = vmatpush2.bf16.msra.mxu1 %v12253_v49  ;;  %4231 = vmatprep.subr.bf16.mxu0 %v12258_v58  ;;  %v13604_v49 = vsel %vm13567_vm7, %v11206_v41, %v3763_v51  ;;  %v3756_v58 = vsel %vm13567_vm7, %v11204_v52, %v3755_v53  ;;  %v12295_v51 = vld [vmem:[#allocation6 + $0x860] ss:$8 sps:$4 sm:$0xff]   ;;  %v12300_v53 = vld [vmem:[#allocation6 + $0x854] ss:$8 sps:$4 sm:$0xff]  }
 0x181   :  { %4584 = vmatprep.subr.bf16.mxu1 %v12261_v18  ;;  %v13610_v18 = vsel %vm13567_vm7, %v11222_v54, %v3827_v55 }
 0x182   :  { %3110 = vmatmul.mubr.bf16.gmra.mxu0 %v11118_v63  ;;  %v12282_v63 = vld [vmem:[#allocation6 + $0x594] ss:$8 sps:$4 sm:$0xff]  }
 0x183   :  { %3512 = vmatmul.mubr.bf16.gmra.mxu1 %v11120_v23  ;;  %4232 = vmatpush2.bf16.msra.mxu0 %v12256_v37 }
 0x184   :  { %4585 = vmatpush2.bf16.msra.mxu1 %v12259_v8  ;;  %4233 = vmatprep.subr.bf16.mxu0 %v12264_v27  ;;  %v12291_v8 = vld [vmem:[#allocation6 + $0x284] ss:$8 sps:$4 sm:$0xff]   ;;  %v3767_v27 = vrot.slane %v3677_v20, 5 }
 0x185   :  { %4586 = vmatprep.subr.bf16.mxu1 %v12267_v12  ;;  %3119 = vmatprep.mubr.bf16.mxu0 %v11121_v46  ;;  %v3760_v46 = vsel %vm13567_vm7, %v11205_v11, %v3759_v31  ;;  %v11208_v12 = vrot.slane %v3678_v36, 9 }
 0x186   :  { %3521 = vmatprep.mubr.bf16.mxu1 %v11123_v7  ;;  %v11225_v47 = vcombine.high %v3760_v46, %v13604_v49  ;;  %v11272_v42 = vcombine.low %v3756_v58, %v3760_v46  ;;  %v11224_v38 = vcombine.low %v3760_v46, %v13604_v49 }
 0x187   :  { %4234 = vmatpush2.bf16.msra.mxu0 %v12262_v17  ;;  %v11273_v17 = vcombine.high %v3756_v58, %v3760_v46  ;;  %v12298_v46 = vld [vmem:[#allocation6 + $0x850] ss:$8 sps:$4 sm:$0xff]  }
 0x188   :  { %4587 = vmatpush2.bf16.msra.mxu1 %v12265_v22  ;;  %4235 = vmatprep.subr.bf16.mxu0 %v12270_v59  ;;  %v12286_v22 = vld [vmem:[#allocation6 + $0x580] ss:$8 sps:$4 sm:$0xff]  }
 0x189   :  { %4588 = vmatprep.subr.bf16.mxu1 %v12273_v4  ;;  %v12289_v59 = vld [vmem:[#allocation6 + $0x280] ss:$8 sps:$4 sm:$0xff]   ;;  %v12294_v4 = vld [vmem:[#allocation6 + $0x874] ss:$8 sps:$4 sm:$0xff]  }
 0x18a   :  { %3120 = vmatmul.mubr.bf16.gmra.mxu0 %v11120_v23  ;;  %v11207_v23 = vrot.slane %v3676_v1, 9 }
 0x18b   :  { %3522 = vmatmul.mubr.bf16.gmra.mxu1 %v13593_v35  ;;  %4236 = vmatpush2.bf16.msra.mxu0 %v12268_v32 }
 0x18c   :  { %4589 = vmatpush2.bf16.msra.mxu1 %v12271_v30  ;;  %4237 = vmatprep.subr.bf16.mxu0 %v12276_v33  ;;  %v3768_v32 = vsel %vm13567_vm7, %v11207_v23, %v3767_v27  ;;  %v11209_v33 = vrot.slane %v3680_v34, 9 }
 0x18d   :  { %4590 = vmatprep.subr.bf16.mxu1 %v12279_v28  ;;  %3129 = vmatprep.mubr.bf16.mxu0 %v11123_v7  ;;  %v3771_v7 = vrot.slane %v3679_v60, 5  ;;  %v13631_v56 = vcombine.high %v13604_v49, %v3768_v32  ;;  %v3775_v28 = vrot.slane %v3681_v26, 5  ;;  %v13648_v16 = vcombine.low %v13604_v49, %v3768_v32  ;;  %v3695_v26 = vld [vmem:[#allocation3 + $0x80] sm:$0x11] }
 0x18e   :  { %3531 = vmatprep.mubr.bf16.mxu1 %v11171_v50  ;;  %v11210_v50 = vrot.slane %v3682_v14, 9  ;;  %v3783_v60 = vrot.slane %v3685_v15, 5  ;;  %v3690_v14 = vld [vmem:[#allocation3 + $0xa0] sm:$0xee] }
 0x18f   :  { %4238 = vmatpush2.bf16.msra.mxu0 %v12274_v43  ;;  %v13626_v30 = vsel %vm13567_vm7, %v11208_v12, %v3771_v7  ;;  %v13638_v54 = vsel %vm13567_vm7, %v11209_v33, %v3775_v28  ;;  %v12301_v12 = vld [vmem:[#allocation6 + $0x840] ss:$8 sps:$4 sm:$0xff]   ;;  %v12306_v7 = vld [vmem:[#allocation6 + $0x834] ss:$8 sps:$4 sm:$0xff]   ;;  %v12304_v28 = vld [vmem:[#allocation6 + $0x830] ss:$8 sps:$4 sm:$0xff]  }
 0x190   :  { %4591 = vmatpush2.bf16.msra.mxu1 %v12277_v21  ;;  %4239 = vmatprep.subr.bf16.mxu0 %v12282_v63  ;;  %v11227_v39 = vcombine.high %v3768_v32, %v13626_v30  ;;  %v3684_v63 = vld [vmem:[#allocation3 + $0x70] sm:$0xee]  ;;  %v11226_v0 = vcombine.low %v3768_v32, %v13626_v30  ;;  %v3694_v32 = vld [vmem:[#allocation3 + $0xd8] sm:$0xee] }
 0x191   :  { %4592 = vmatprep.subr.bf16.mxu1 %v12285_v62  ;;  %v11211_v36 = vrot.slane %v3684_v63, 9 }
 0x192   :  { %3130 = vmatmul.mubr.bf16.gmra.mxu0 %v13593_v35  ;;  %v3683_v35 = vld [vmem:[#allocation3 + $0x118] sm:$0x11] }
 0x193   :  { %3532 = vmatmul.mubr.bf16.gmra.mxu1 %v11170_v57  ;;  %4240 = vmatpush2.bf16.msra.mxu0 %v12280_v13  ;;  %v3779_v43 = vrot.slane %v3683_v35, 5  ;;  %v3691_v35 = vld [vmem:[#allocation3 + $0x20] sm:$0x11] }
 0x194   :  { %4593 = vmatpush2.bf16.msra.mxu1 %v12283_v25  ;;  %4241 = vmatprep.subr.bf16.mxu0 %v12288_v10  ;;  %v12303_v25 = vld [vmem:[#allocation6 + $0x844] ss:$8 sps:$4 sm:$0xff]   ;;  %v13656_v10 = vcombine.high %v13626_v30, %v13638_v54 }
 0x195   :  { %4594 = vmatprep.subr.bf16.mxu1 %v12291_v8  ;;  %4243 = vmatprep.mubr.bf16.mxu0 %v11225_v47  ;;  %v13642_v55 = vsel %vm13567_vm7, %v11210_v50, %v3779_v43  ;;  %v13665_v47 = vsel %vm13567_vm7, %v11211_v36, %v3783_v60  ;;  %v12312_v36 = vld [vmem:[#allocation6 + $0x814] ss:$8 sps:$4 sm:$0xff]  }
 0x196   :  { %4596 = vmatprep.mubr.bf16.mxu1 %v11273_v17  ;;  %v11229_v20 = vcombine.high %v13638_v54, %v13642_v55  ;;  %v11231_v50 = vcombine.high %v13665_v47, %v13573_v5 }
 0x197   :  { %4242 = vmatpush2.bf16.msra.mxu0 %v12286_v22 }
 0x198   :  { %4595 = vmatpush2.bf16.msra.mxu1 %v12289_v59  ;;  %4966 = vmatprep.subr.bf16.mxu0 %v12294_v4  ;;  %v3692_v59 = vld [vmem:[#allocation3 + $0x108] sm:$0xee]  ;;  %v3693_v4 = vld [vmem:[#allocation3 + $0x40] sm:$0x11] }
 0x199   :  { %v11215_v43 = vrot.slane %v3692_v59, 9  ;;  %v11230_v59 = vcombine.low %v13665_v47, %v13573_v5 }
 0x19a   :  { %v1074_v11 = vpop.f32.mrf.mxu0  ;;  %4244 = vmatmul.mubr.bf16.vlgmr.msra.gmra.mxu0 %v11224_v38 }
 0x19b   :  { %v1427_v31 = vpop.f32.mrf.mxu1  ;;  %4597 = vmatmul.mubr.bf16.vlgmr.msra.gmra.mxu1 %v11272_v42  ;;  %4967 = vmatpush1.bf16.msra.mxu0 %v12292_v45  ;;  %v11228_v45 = vcombine.low %v13638_v54, %v13642_v55 }
 0x19c   :  { %v13633_v41 = vadd.f32 %v1427_v31, %v1074_v11  ;;  %4253 = vmatprep.mubr.bf16.mxu0 %v11227_v39  ;;  %v1076_v21 = vpop.f32.mrf.mxu0  ;;  %4968 = vmatprep.subr.bf16.mxu0 %v12297_v48  ;;  %v13674_v39 = vcombine.low %v13626_v30, %v13638_v54  ;;  %v13678_v48 = vcombine.high %v13642_v55, %v13665_v47  ;;  %v3799_v11 = vrot.slane %v3693_v4, 5 }
 0x19d   :  { %v1429_v52 = vpop.f32.mrf.mxu1  ;;  %4606 = vmatprep.mubr.bf16.mxu1 %v13631_v56  ;;  %v3803_v30 = vrot.slane %v3695_v26, 5  ;;  %v3795_v54 = vrot.slane %v3691_v35, 5  ;;  %v13708_v4 = vcombine.low %v13642_v55, %v13665_v47  ;;  %v12310_v26 = vld [vmem:[#allocation6 + $0x810] ss:$8 sps:$4 sm:$0xff]  }
 0x19e   :  { %v13644_v61 = vadd.f32 %v1429_v52, %v1076_v21  ;;  %v1078_v62 = vpop.f32.mrf.mxu0  ;;  %v12309_v21 = vld [vmem:[#allocation6 + $0x824] ss:$8 sps:$4 sm:$0xff]   ;;  %v11216_v52 = vrot.slane %v3694_v32, 9  ;;  %v13692_v60 = vsel %vm13567_vm7, %v11215_v43, %v3799_v11 }
 0x19f   :  { %v1431_v1 = vpop.f32.mrf.mxu1  ;;  %4969 = vmatpush1.bf16.msra.mxu0 %v12295_v51 }
 0x1a0   :  { %v13650_v57 = vadd.f32 %v1431_v1, %v1078_v62  ;;  %v1080_v13 = vpop.f32.mrf.mxu0  ;;  %4970 = vmatprep.subr.bf16.mxu0 %v12300_v53  ;;  %v11214_v53 = vrot.slane %v3690_v14, 9 }
 0x1a1   :  { %v1433_v58 = vpop.f32.mrf.mxu1 }
 0x1a2   :  { %v13658_v23 = vadd.f32 %v1433_v58, %v1080_v13  ;;  %v1084_v49 = vpop.f32.mrf.mxu0  ;;  %4254 = vmatmul.mubr.bf16.gmra.mxu0 %v11226_v0  ;;  %v12307_v0 = vld [vmem:[#allocation6 + $0x820] ss:$8 sps:$4 sm:$0xff]   ;;  %v13696_v13 = vsel %vm13567_vm7, %v11216_v52, %v3803_v30  ;;  %v13700_v58 = vsel %vm13567_vm7, %v11214_v53, %v3795_v54  ;;  %v12318_v53 = vld [vmem:[#allocation6 + $0x8f4] ss:$8 sps:$4 sm:$0xff]  }
 0x1a3   :  { %v1437_v8 = vpop.f32.mrf.mxu1  ;;  %4607 = vmatmul.mubr.bf16.gmra.mxu1 %v13648_v16  ;;  %4971 = vmatpush1.bf16.msra.mxu0 %v12298_v46  ;;  %v11233_v14 = vcombine.high %v13692_v60, %v13696_v13  ;;  %v11281_v35 = vcombine.high %v13700_v58, %v13692_v60 }
 0x1a4   :  { %v13661_v27 = vadd.f32 %v1437_v8, %v1084_v49  ;;  %4263 = vmatprep.mubr.bf16.mxu0 %v11229_v20  ;;  %v1086_v17 = vpop.f32.mrf.mxu0  ;;  %4972 = vmatprep.subr.bf16.mxu0 %v12303_v25  ;;  %v3696_v25 = vld [vmem:[#allocation3 + $0x8] sm:$0xee]  ;;  %v3697_v8 = vld [vmem:[#allocation3 + $0x130] sm:$0x11] }
 0x1a5   :  { %v1439_v22 = vpop.f32.mrf.mxu1  ;;  %4616 = vmatprep.mubr.bf16.mxu1 %v13656_v10 }
 0x1a6   :  { %v13668_v34 = vadd.f32 %v1439_v22, %v1086_v17  ;;  %v1088_v42 = vpop.f32.mrf.mxu0 }
 0x1a7   :  { %v1441_v38 = vpop.f32.mrf.mxu1  ;;  %4973 = vmatpush1.bf16.msra.mxu0 %v12301_v12  ;;  %v3698_v12 = vld [vmem:[#allocation3 + $0xe0] sm:$0xee] }
 0x1a8   :  { %v13680_v33 = vadd.f32 %v1441_v38, %v1088_v42  ;;  %v1090_v31 = vpop.f32.mrf.mxu0  ;;  %4974 = vmatprep.subr.bf16.mxu0 %v12306_v7  ;;  %v3699_v7 = vld [vmem:[#allocation3 + $0x10] sm:$0x11]  ;;  %v11218_v43 = vrot.slane %v3698_v12, 9  ;;  %v11280_v12 = vcombine.low %v13700_v58, %v13692_v60 }
 0x1a9   :  { %v1443_v51 = vpop.f32.mrf.mxu1  ;;  %v3811_v11 = vrot.slane %v3699_v7, 5  ;;  %v11232_v7 = vcombine.low %v13692_v60, %v13696_v13 }
 0x1aa   :  { %v13684_v63 = vadd.f32 %v1443_v51, %v1090_v31  ;;  %v1094_v15 = vpop.f32.mrf.mxu0  ;;  %4264 = vmatmul.mubr.bf16.gmra.mxu0 %v11228_v45  ;;  %v12315_v45 = vld [vmem:[#allocation6 + $0x804] ss:$8 sps:$4 sm:$0xff]  }
 0x1ab   :  { %v1447_v62 = vpop.f32.mrf.mxu1  ;;  %4617 = vmatmul.mubr.bf16.gmra.mxu1 %v13674_v39  ;;  %4975 = vmatpush1.bf16.msra.mxu0 %v12304_v28  ;;  %v11217_v28 = vrot.slane %v3696_v25, 9 }
 0x1ac   :  { %v13687_v1 = vadd.f32 %v1447_v62, %v1094_v15  ;;  %4273 = vmatprep.mubr.bf16.mxu0 %v11231_v50  ;;  %v1096_v46 = vpop.f32.mrf.mxu0  ;;  %4976 = vmatprep.subr.bf16.mxu0 %v12309_v21  ;;  %v3807_v50 = vrot.slane %v3697_v8, 5  ;;  %v12313_v21 = vld [vmem:[#allocation6 + $0x800] ss:$8 sps:$4 sm:$0xff]   ;;  %v13725_v15 = vsel %vm13567_vm7, %v11218_v43, %v3811_v11 }
 0x1ad   :  { %v1449_v20 = vpop.f32.mrf.mxu1  ;;  %4626 = vmatprep.mubr.bf16.mxu1 %v13678_v48  ;;  %v3700_v62 = vld [vmem:[#allocation3 + $0x100] sm:$0xee] }
 0x1ae   :  { %v13702_v49 = vadd.f32 %v1449_v20, %v1096_v46  ;;  %v1098_v17 = vpop.f32.mrf.mxu0  ;;  %v3808_v54 = vsel %vm13567_vm7, %v11217_v28, %v3807_v50  ;;  %v3701_v46 = vld [vmem:[#allocation3 + $0x98] sm:$0x11]  ;;  %v3702_v20 = vld [vmem:[#allocation3 + $0xd0] sm:$0xee] }
 0x1af   :  { %v1451_v22 = vpop.f32.mrf.mxu1  ;;  %4977 = vmatpush1.bf16.msra.mxu0 %v12307_v0  ;;  %v11220_v28 = vrot.slane %v3702_v20, 9  ;;  %v3705_v20 = vld [vmem:[#allocation3 + $0x120] sm:$0x11] }
 0x1b0   :  { %v13710_v32 = vadd.f32 %v1451_v22, %v1098_v17  ;;  %v1100_v42 = vpop.f32.mrf.mxu0  ;;  %4978 = vmatprep.subr.bf16.mxu0 %v12312_v36  ;;  %v3703_v36 = vld [vmem:[#allocation3] sm:$0x11]  ;;  %v12316_v22 = vld [vmem:[#allocation6 + $0x8f0] ss:$8 sps:$4 sm:$0xff]  }
 0x1b1   :  { %v1453_v38 = vpop.f32.mrf.mxu1  ;;  %v3819_v58 = vrot.slane %v3703_v36, 5 }
 0x1b2   :  { %v13716_v55 = vadd.f32 %v1453_v38, %v1100_v42  ;;  %v1104_v47 = vpop.f32.mrf.mxu0  ;;  %4274 = vmatmul.mubr.bf16.gmra.mxu0 %v11230_v59  ;;  %v11235_v59 = vcombine.high %v3808_v54, %v13725_v15  ;;  %v12321_v42 = vld [vmem:[#allocation6 + $0x8e4] ss:$8 sps:$4 sm:$0xff]   ;;  %v11219_v38 = vrot.slane %v3700_v62, 9 }
 0x1b3   :  { %v1457_v31 = vpop.f32.mrf.mxu1  ;;  %4627 = vmatmul.mubr.bf16.gmra.mxu1 %v13708_v4  ;;  %4979 = vmatpush1.bf16.msra.mxu0 %v12310_v26  ;;  %v13737_v26 = vcombine.high %v13696_v13, %v3808_v54 }
 0x1b4   :  { %v13719_v51 = vadd.f32 %v1457_v31, %v1104_v47  ;;  %4283 = vmatprep.mubr.bf16.mxu0 %v11233_v14  ;;  %v1106_v52 = vpop.f32.mrf.mxu0  ;;  %4980 = vmatprep.subr.bf16.mxu0 %v12315_v45  ;;  %v3815_v45 = vrot.slane %v3701_v46, 5  ;;  %v12319_v47 = vld [vmem:[#allocation6 + $0x8e0] ss:$8 sps:$4 sm:$0xff]   ;;  %v3704_v46 = vld [vmem:[#allocation3 + $0x58] sm:$0xee] }
 0x1b5   :  { %v1459_v30 = vpop.f32.mrf.mxu1  ;;  %4636 = vmatprep.mubr.bf16.mxu1 %v11281_v35 }
 0x1b6   :  { %v13727_v0 = vadd.f32 %v1459_v30, %v1106_v52  ;;  %v1108_v25 = vpop.f32.mrf.mxu0  ;;  %v12324_v52 = vld [vmem:[#allocation6 + $0x8d4] ss:$8 sps:$4 sm:$0xff]   ;;  %v3816_v30 = vsel %vm13567_vm7, %v11219_v38, %v3815_v45  ;;  %v11221_v45 = vrot.slane %v3704_v46, 9 }
 0x1b7   :  { %v1461_v8 = vpop.f32.mrf.mxu1  ;;  %4981 = vmatpush1.bf16.msra.mxu0 %v12313_v21  ;;  %v13760_v38 = vcombine.high %v13725_v15, %v3816_v30 }
 0x1b8   :  { %v13733_v17 = vadd.f32 %v1461_v8, %v1108_v25  ;;  %v1110_v14 = vpop.f32.mrf.mxu0  ;;  %4982 = vmatprep.subr.bf16.mxu0 %v12318_v53  ;;  %v13748_v53 = vsel %vm13567_vm7, %v11220_v28, %v3819_v58  ;;  %v11234_v8 = vcombine.low %v3808_v54, %v13725_v15  ;;  %v3823_v28 = vrot.slane %v3705_v20, 5 }
 0x1b9   :  { %v1463_v35 = vpop.f32.mrf.mxu1 }
 0x1ba   :  { %v13739_v50 = vadd.f32 %v1463_v35, %v1110_v14  ;;  %v1114_v60 = vpop.f32.mrf.mxu0  ;;  %4284 = vmatmul.mubr.bf16.gmra.mxu0 %v11232_v7 }
 0x1bb   :  { %v1467_v43 = vpop.f32.mrf.mxu1  ;;  %4637 = vmatmul.mubr.bf16.gmra.mxu1 %v11280_v12  ;;  %4983 = vmatpush2.bf16.msra.mxu0 %v12316_v22  ;;  %v13754_v12 = vcombine.low %v13696_v13, %v3808_v54  ;;  %v12322_v22 = vld [vmem:[#allocation6 + $0x8d0] ss:$8 sps:$4 sm:$0xff]  }
 0x1bc   :  { %v13741_v11 = vadd.f32 %v1467_v43, %v1114_v60  ;;  %4293 = vmatprep.mubr.bf16.mxu0 %v11235_v59  ;;  %v1116_v31 = vpop.f32.mrf.mxu0  ;;  %4984 = vmatprep.subr.bf16.mxu0 %v12321_v42  ;;  %v11237_v59 = vcombine.high %v3816_v30, %v13748_v53  ;;  %v12327_v42 = vld [vmem:[#allocation6 + $0x8c4] ss:$8 sps:$4 sm:$0xff]   ;;  %v12325_v43 = vld [vmem:[#allocation6 + $0x8c0] ss:$8 sps:$4 sm:$0xff]  }
 0x1bd   :  { %v1469_v21 = vpop.f32.mrf.mxu1  ;;  %4646 = vmatprep.mubr.bf16.mxu1 %v13737_v26 }
 0x1be   :  { %v13750_v62 = vadd.f32 %v1469_v21, %v1116_v31  ;;  %v1118_v36 = vpop.f32.mrf.mxu0  ;;  %v12330_v21 = vld [vmem:[#allocation6 + $0x8b4] ss:$8 sps:$4 sm:$0xff]  }
 0x1bf   :  { %v1471_v25 = vpop.f32.mrf.mxu1  ;;  %4985 = vmatpush2.bf16.msra.mxu0 %v12319_v47 }
 0x1c0   :  { %v13756_v7 = vadd.f32 %v1471_v25, %v1118_v36  ;;  %v1120_v14 = vpop.f32.mrf.mxu0  ;;  %4986 = vmatprep.subr.bf16.mxu0 %v12324_v52  ;;  %v3824_v52 = vsel %vm13567_vm7, %v11221_v45, %v3823_v28  ;;  %v11236_v25 = vcombine.low %v3816_v30, %v13748_v53 }
 0x1c1   :  { %v1473_v35 = vpop.f32.mrf.mxu1  ;;  %v13780_v45 = vcombine.high %v13748_v53, %v3824_v52 }
 0x1c2   :  { %v13762_v58 = vadd.f32 %v1473_v35, %v1120_v14  ;;  %v1124_v60 = vpop.f32.mrf.mxu0  ;;  %4294 = vmatmul.mubr.bf16.gmra.mxu0 %v11234_v8  ;;  %v13774_v8 = vcombine.low %v13725_v15, %v3816_v30  ;;  %v11239_v14 = vcombine.high %v3824_v52, %v13610_v18  ;;  %v12331_v30 = vld [vmem:[#allocation6 + $0x8a0] ss:$8 sps:$4 sm:$0xff]  }
 0x1c3   :  { %v1477_v13 = vpop.f32.mrf.mxu1  ;;  %4647 = vmatmul.mubr.bf16.gmra.mxu1 %v13754_v12  ;;  %4987 = vmatpush2.bf16.msra.mxu0 %v12322_v22 }
 0x1c4   :  { %v13765_v54 = vadd.f32 %v1477_v13, %v1124_v60  ;;  %4303 = vmatprep.mubr.bf16.mxu0 %v11237_v59  ;;  %v1126_v47 = vpop.f32.mrf.mxu0  ;;  %4988 = vmatprep.subr.bf16.mxu0 %v12327_v42  ;;  %v12328_v59 = vld [vmem:[#allocation6 + $0x8b0] ss:$8 sps:$4 sm:$0xff]   ;;  %v12333_v60 = vld [vmem:[#allocation6 + $0x8a4] ss:$8 sps:$4 sm:$0xff]  }
 0x1c5   :  { %v1479_v31 = vpop.f32.mrf.mxu1  ;;  %4656 = vmatprep.mubr.bf16.mxu1 %v13760_v38 }
 0x1c6   :  { %v13770_v46 = vadd.f32 %v1479_v31, %v1126_v47  ;;  %v1128_v20 = vpop.f32.mrf.mxu0 }
 0x1c7   :  { %v1481_v36 = vpop.f32.mrf.mxu1  ;;  %4989 = vmatpush2.bf16.msra.mxu0 %v12325_v43 }
 0x1c8   :  { %v13776_v22 = vadd.f32 %v1481_v36, %v1128_v20  ;;  %v1130_v35 = vpop.f32.mrf.mxu0  ;;  %4990 = vmatprep.subr.bf16.mxu0 %v12330_v21  ;;  %v12336_v21 = vld [vmem:[#allocation6 + $0x894] ss:$8 sps:$4 sm:$0xff]  }
 0x1c9   :  { %v1483_v42 = vpop.f32.mrf.mxu1 }
 0x1ca   :  { %v13782_v28 = vadd.f32 %v1483_v42, %v1130_v35  ;;  %v1134_v13 = vpop.f32.mrf.mxu0  ;;  %4304 = vmatmul.mubr.bf16.gmra.mxu0 %v11236_v25  ;;  %v11238_v42 = vcombine.low %v3824_v52, %v13610_v18  ;;  %v13792_v25 = vcombine.low %v13748_v53, %v3824_v52  ;;  %v12337_v53 = vld [vmem:[#allocation6 + $0x880] ss:$8 sps:$4 sm:$0xff]  }
 0x1cb   :  { %v1487_v47 = vpop.f32.mrf.mxu1  ;;  %4657 = vmatmul.mubr.bf16.gmra.mxu1 %v13774_v8  ;;  %4991 = vmatpush2.bf16.msra.mxu0 %v12328_v59  ;;  %v12334_v59 = vld [vmem:[#allocation6 + $0x890] ss:$8 sps:$4 sm:$0xff]  }
 0x1cc   :  { %v13785_v15 = vadd.f32 %v1487_v47, %v1134_v13  ;;  %4313 = vmatprep.mubr.bf16.mxu0 %v11239_v14  ;;  %v1136_v43 = vpop.f32.mrf.mxu0  ;;  %4992 = vmatprep.subr.bf16.mxu0 %v12333_v60  ;;  %v12339_v60 = vld [vmem:[#allocation6 + $0x884] ss:$8 sps:$4 sm:$0xff]  }
 0x1cd   :  { %v1489_v31 = vpop.f32.mrf.mxu1  ;;  %4666 = vmatprep.mubr.bf16.mxu1 %v13780_v45 }
 0x1ce   :  { %v13788_v20 = vadd.f32 %v1489_v31, %v1136_v43  ;;  %v1138_v36 = vpop.f32.mrf.mxu0 }
 0x1cf   :  { %v1491_v35 = vpop.f32.mrf.mxu1  ;;  %4993 = vmatpush2.bf16.msra.mxu0 %v12331_v30 }
 0x1d0   :  { %v13794_v13 = vadd.f32 %v1491_v35, %v1138_v36  ;;  %v1140_v14 = vpop.f32.mrf.mxu0  ;;  %4994 = vmatprep.subr.bf16.mxu0 %v12336_v21 }
 0x1d1   :  { %v1493_v47 = vpop.f32.mrf.mxu1 }
 0x1d2   :  { %v13796_v29 = vadd.f32 %v1493_v47, %v1140_v14  ;;  %v1144_v37 = vpop.f32.mrf.mxu0  ;;  %4314 = vmatmul.mubr.bf16.gmra.mxu0 %v11238_v42 }
 0x1d3   :  { %v1497_v43 = vpop.f32.mrf.mxu1  ;;  %4667 = vmatmul.mubr.bf16.gmra.mxu1 %v13792_v25  ;;  %4995 = vmatpush2.bf16.msra.mxu0 %v12334_v59 }
 0x1d4   :  { %v13799_v31 = vadd.f32 %v1497_v43, %v1144_v37  ;;  %4998 = vmatprep.mubr.bf16.mxu0 %v13631_v56  ;;  %v1146_v52 = vpop.f32.mrf.mxu0  ;;  %4996 = vmatprep.subr.bf16.mxu0 %v12339_v60 }
 0x1d5   :  { %v1499_v30 = vpop.f32.mrf.mxu1 }
 0x1d6   :  { %v13802_v36 = vadd.f32 %v1499_v30, %v1146_v52  ;;  %v1148_v21 = vpop.f32.mrf.mxu0 }
 0x1d7   :  { %v1501_v35 = vpop.f32.mrf.mxu1  ;;  %4997 = vmatpush2.bf16.msra.mxu0 %v12337_v53 }
 0x1d8   :  { %v13804_v14 = vadd.f32 %v1501_v35, %v1148_v21  ;;  %v1150_v47 = vpop.f32.mrf.mxu0 }
 0x1d9   :  { %v1503_v42 = vpop.f32.mrf.mxu1 }
 0x1da   :  { %v13806_v9 = vadd.f32 %v1503_v42, %v1150_v47  ;;  %v1830_v37 = vpop.f32.mrf.mxu0  ;;  %4999 = vmatmul.mubr.bf16.vlgmr.msra.gmra.mxu0 %v13648_v16 }
 0x1db   :  { %v13808_v43 = vpop.f32.mrf.mxu1  ;;  %v13812_v56 = vadd.f32 %v1830_v37, %v13633_v41  ;;  %5008 = vmatprep.mubr.bf16.mxu0 %v13656_v10 }
 0x1dc   :  { %v1832_v59 = vpop.f32.mrf.mxu0 }
 0x1dd   :  { %v13815_v60 = vpop.f32.mrf.mxu1  ;;  %v13818_v52 = vadd.f32 %v1832_v59, %v13644_v61 }
 0x1de   :  { %v1834_v53 = vpop.f32.mrf.mxu0 }
 0x1df   :  { %v13820_v30 = vpop.f32.mrf.mxu1  ;;  %v13823_v21 = vadd.f32 %v1834_v53, %v13650_v57 }
 0x1e0   :  { %v1836_v35 = vpop.f32.mrf.mxu0 }
 0x1e1   :  { %v13825_v47 = vpop.f32.mrf.mxu1  ;;  %v13828_v41 = vadd.f32 %v1836_v35, %v13658_v23 }
 0x1e2   :  { %v1840_v16 = vpop.f32.mrf.mxu0  ;;  %5009 = vmatmul.mubr.bf16.gmra.mxu0 %v13674_v39 }
 0x1e3   :  { %v13830_v10 = vpop.f32.mrf.mxu1  ;;  %v13834_v61 = vadd.f32 %v1840_v16, %v13661_v27  ;;  %5018 = vmatprep.mubr.bf16.mxu0 %v13678_v48  ;;  %v16065_v16 = vcombine.high %v13573_v5, %v13577_v24 }
 0x1e4   :  { %v1842_v42 = vpop.f32.mrf.mxu0 }
 0x1e5   :  { %v13837_v37 = vpop.f32.mrf.mxu1  ;;  %v13840_v57 = vadd.f32 %v1842_v42, %v13668_v34 }
 0x1e6   :  { %v1844_v59 = vpop.f32.mrf.mxu0 }
 0x1e7   :  { %v13842_v53 = vpop.f32.mrf.mxu1  ;;  %v13845_v23 = vadd.f32 %v1844_v59, %v13680_v33 }
 0x1e8   :  { %v1846_v35 = vpop.f32.mrf.mxu0 }
 0x1e9   :  { %v13847_v40 = vpop.f32.mrf.mxu1  ;;  %v13850_v27 = vadd.f32 %v1846_v35, %v13684_v63 }
 0x1ea   :  { %v1850_v39 = vpop.f32.mrf.mxu0  ;;  %5019 = vmatmul.mubr.bf16.gmra.mxu0 %v13708_v4 }
 0x1eb   :  { %v13852_v48 = vpop.f32.mrf.mxu1  ;;  %v13856_v34 = vadd.f32 %v1850_v39, %v13687_v1  ;;  %5028 = vmatprep.mubr.bf16.mxu0 %v16065_v16 }
 0x1ec   :  { %v1852_v33 = vpop.f32.mrf.mxu0 }
 0x1ed   :  { %v13861_v42 = vpop.f32.mrf.mxu1  ;;  %v13864_v59 = vadd.f32 %v1852_v33, %v13702_v49 }
 0x1ee   :  { %v1854_v63 = vpop.f32.mrf.mxu0 }
 0x1ef   :  { %v13866_v35 = vpop.f32.mrf.mxu1  ;;  %v13869_v19 = vadd.f32 %v1854_v63, %v13710_v32 }
 0x1f0   :  { %v1856_v4 = vpop.f32.mrf.mxu0 }
 0x1f1   :  { %v13871_v3 = vpop.f32.mrf.mxu1  ;;  %v13874_v1 = vadd.f32 %v1856_v4, %v13716_v55 }
 0x1f2   :  { %v1860_v39 = vpop.f32.mrf.mxu0  ;;  %5029 = vmatmul.mubr.bf16.gmra.mxu0 %v16067_v2 }
 0x1f3   :  { %16066 = vst [vmem:[#allocation37_spill] sm:$0xff] %v13874_v1  ;;  %v13876_v16 = vpop.f32.mrf.mxu1  ;;  %v13882_v49 = vadd.f32 %v1860_v39, %v13719_v51  ;;  %5038 = vmatprep.mubr.bf16.mxu0 %v13737_v26 }
 0x1f4   :  { %v1862_v32 = vpop.f32.mrf.mxu0 }
 0x1f5   :  { %v13885_v33 = vpop.f32.mrf.mxu1  ;;  %v13888_v63 = vadd.f32 %v1862_v32, %v13727_v0 }
 0x1f6   :  { %v1864_v55 = vpop.f32.mrf.mxu0 }
 0x1f7   :  { %v13890_v4 = vpop.f32.mrf.mxu1  ;;  %v13893_v44 = vadd.f32 %v1864_v55, %v13733_v17 }
 0x1f8   :  { %v1866_v1 = vpop.f32.mrf.mxu0 }
 0x1f9   :  { %v13895_v5 = vpop.f32.mrf.mxu1  ;;  %v13898_v2 = vadd.f32 %v1866_v1, %v13739_v50 }
 0x1fa   :  { %v1870_v24 = vpop.f32.mrf.mxu0  ;;  %5039 = vmatmul.mubr.bf16.gmra.mxu0 %v13754_v12 }
 0x1fb   :  { %16068 = vst [vmem:[#allocation38_spill] sm:$0xff] %v13898_v2  ;;  %v13900_v51 = vpop.f32.mrf.mxu1  ;;  %v13904_v0 = vadd.f32 %v1870_v24, %v13741_v11  ;;  %5048 = vmatprep.mubr.bf16.mxu0 %v13760_v38 }
 0x1fc   :  { %v1872_v26 = vpop.f32.mrf.mxu0 }
 0x1fd   :  { %v13907_v39 = vpop.f32.mrf.mxu1  ;;  %v13910_v17 = vadd.f32 %v1872_v26, %v13750_v62 }
 0x1fe   :  { %v1874_v32 = vpop.f32.mrf.mxu0 }
 0x1ff   :  { %v13912_v55 = vpop.f32.mrf.mxu1  ;;  %v13915_v50 = vadd.f32 %v1874_v32, %v13756_v7 }
 0x200   :  { %v1876_v1 = vpop.f32.mrf.mxu0 }
 0x201   :  { %16069 = vst [vmem:[#allocation39_spill] sm:$0xff] %v13915_v50  ;;  %v13917_v2 = vpop.f32.mrf.mxu1  ;;  %v13920_v11 = vadd.f32 %v1876_v1, %v13762_v58 }
 0x202   :  { %v1880_v12 = vpop.f32.mrf.mxu0  ;;  %5049 = vmatmul.mubr.bf16.gmra.mxu0 %v13774_v8 }
 0x203   :  { %16070 = vst [vmem:[#allocation40_spill] sm:$0xff] %v13920_v11  ;;  %v13922_v38 = vpop.f32.mrf.mxu1  ;;  %v13926_v62 = vadd.f32 %v1880_v12, %v13765_v54  ;;  %5058 = vmatprep.mubr.bf16.mxu0 %v13780_v45  ;;  %v16074_v12 = vcombine.high %v13610_v18, %v13614_v6 }
 0x204   :  { %v1882_v24 = vpop.f32.mrf.mxu0 }
 0x205   :  { %v13929_v26 = vpop.f32.mrf.mxu1  ;;  %v13932_v7 = vadd.f32 %v1882_v24, %v13770_v46 }
 0x206   :  { %v1884_v32 = vpop.f32.mrf.mxu0 }
 0x207   :  { %v13934_v50 = vpop.f32.mrf.mxu1  ;;  %v13937_v58 = vadd.f32 %v1884_v32, %v13776_v22 }
 0x208   :  { %v1886_v1 = vpop.f32.mrf.mxu0 }
 0x209   :  { %v13939_v11 = vpop.f32.mrf.mxu1  ;;  %v13942_v54 = vadd.f32 %v1886_v1, %v13782_v28 }
 0x20a   :  { %v1890_v8 = vpop.f32.mrf.mxu0  ;;  %5059 = vmatmul.mubr.bf16.gmra.mxu0 %v13792_v25 }
 0x20b   :  { %16071 = vst [vmem:[#allocation41_spill] sm:$0xff] %v13942_v54  ;;  %v13944_v45 = vpop.f32.mrf.mxu1  ;;  %v13948_v46 = vadd.f32 %v1890_v8, %v13785_v15  ;;  %5068 = vmatprep.mubr.bf16.mxu0 %v16074_v12 }
 0x20c   :  { %16072 = vst [vmem:[#allocation42_spill] sm:$0xff] %v13944_v45  ;;  %v1892_v22 = vpop.f32.mrf.mxu0 }
 0x20d   :  { %16073 = vst [vmem:[#allocation43_spill] sm:$0xff] %v13948_v46  ;;  %v13953_v24 = vpop.f32.mrf.mxu1  ;;  %v13956_v32 = vadd.f32 %v1892_v22, %v13788_v20  ;;  %v16078_v46 = vcombine.low %v13610_v18, %v13614_v6 }
 0x20e   :  { %v1894_v28 = vpop.f32.mrf.mxu0 }
 0x20f   :  { %16075 = vst [vmem:[#allocation44_spill] sm:$0xff] %v13956_v32  ;;  %v13958_v1 = vpop.f32.mrf.mxu1  ;;  %v13961_v54 = vadd.f32 %v1894_v28, %v13794_v13 }
 0x210   :  { %v1896_v25 = vpop.f32.mrf.mxu0 }
 0x211   :  { %16076 = vst [vmem:[#allocation45_spill] sm:$0xff] %v13961_v54  ;;  %v13963_v45 = vpop.f32.mrf.mxu1  ;;  %v13966_v15 = vadd.f32 %v1896_v25, %v13796_v29 }
 0x212   :  { %v1900_v8 = vpop.f32.mrf.mxu0  ;;  %5069 = vmatmul.mubr.bf16.gmra.mxu0 %v16078_v46 }
 0x213   :  { %16077 = vst [vmem:[#allocation46_spill] sm:$0xff] %v13966_v15  ;;  %v13968_v12 = vpop.f32.mrf.mxu1  ;;  %v13974_v20 = vadd.f32 %v1900_v8, %v13799_v31 }
 0x214   :  { %v1902_v22 = vpop.f32.mrf.mxu0 }
 0x215   :  { %16079 = vst [vmem:[#allocation47_spill] sm:$0xff] %v13974_v20  ;;  %v13976_v32 = vpop.f32.mrf.mxu1  ;;  %v13979_v13 = vadd.f32 %v1902_v22, %v13802_v36 }
 0x216   :  { %v1904_v28 = vpop.f32.mrf.mxu0 }
 0x217   :  { %16080 = vst [vmem:[#allocation48_spill] sm:$0xff] %v13979_v13  ;;  %v13981_v54 = vpop.f32.mrf.mxu1  ;;  %v13984_v29 = vadd.f32 %v1904_v28, %v13804_v14 }
 0x218   :  { %16081 = vst [vmem:[#allocation49_spill] sm:$0xff] %v13981_v54  ;;  %v1906_v25 = vpop.f32.mrf.mxu0 }
 0x219   :  { %16082 = vst [vmem:[#allocation50_spill] sm:$0xff] %v13984_v29  ;;  %v13986_v15 = vpop.f32.mrf.mxu1  ;;  %v13989_v18 = vadd.f32 %v1906_v25, %v13806_v9 }
 0x21a   :  { %16083 = vst [vmem:[#allocation51_spill] sm:$0xff] %v13986_v15  ;;  %v3061_v6 = vpop.f32.mrf.mxu0 }
 0x21b   :  { %16084 = vst [vmem:[#allocation52_spill] sm:$0xff] %v13989_v18  ;;  %v3463_v31 = vpop.f32.mrf.mxu1  ;;  %v3062_v46 = vadd.f32 %v3061_v6, %v13808_v43 }
 0x21c   :  { %v3063_v8 = vpop.f32.mrf.mxu0 }
 0x21d   :  { %v3465_v20 = vpop.f32.mrf.mxu1  ;;  %v3542_v36 = vadd.f32 %v3463_v31, %v3062_v46  ;;  %v3064_v22 = vadd.f32 %v3063_v8, %v13815_v60 }
 0x21e   :  { %v3065_v13 = vpop.f32.mrf.mxu0 }
 0x21f   :  { %v3467_v54 = vpop.f32.mrf.mxu1  ;;  %v13994_v14 = vadd.f32 %v3542_v36, %v13812_v56  ;;  %v3543_v28 = vadd.f32 %v3465_v20, %v3064_v22  ;;  %v3066_v29 = vadd.f32 %v3065_v13, %v13820_v30 }
 0x220   :  { %v3067_v15 = vpop.f32.mrf.mxu0 }
 0x221   :  { %v3469_v9 = vpop.f32.mrf.mxu1  ;;  %v13998_v25 = vadd.f32 %v3543_v28, %v13818_v52  ;;  %v3544_v18 = vadd.f32 %v3467_v54, %v3066_v29  ;;  %v3068_v43 = vadd.f32 %v3067_v15, %v13825_v47 }
 0x222   :  { %v3071_v6 = vpop.f32.mrf.mxu0 }
 0x223   :  { %v3473_v31 = vpop.f32.mrf.mxu1  ;;  %v14002_v60 = vadd.f32 %v3544_v18, %v13823_v21  ;;  %v3545_v46 = vadd.f32 %v3469_v9, %v3068_v43  ;;  %v3072_v56 = vadd.f32 %v3071_v6, %v13830_v10 }
 0x224   :  { %v3073_v8 = vpop.f32.mrf.mxu0 }
 0x225   :  { %v3475_v20 = vpop.f32.mrf.mxu1  ;;  %v14006_v30 = vadd.f32 %v3545_v46, %v13828_v41  ;;  %v3546_v13 = vadd.f32 %v3473_v31, %v3072_v56  ;;  %v3074_v52 = vadd.f32 %v3073_v8, %v13837_v37 }
 0x226   :  { %v3075_v36 = vpop.f32.mrf.mxu0 }
 0x227   :  { %v3477_v54 = vpop.f32.mrf.mxu1  ;;  %v14010_v47 = vadd.f32 %v3546_v13, %v13834_v61  ;;  %v3547_v15 = vadd.f32 %v3475_v20, %v3074_v52  ;;  %v3076_v21 = vadd.f32 %v3075_v36, %v13842_v53 }
 0x228   :  { %v3077_v29 = vpop.f32.mrf.mxu0 }
 0x229   :  { %v3479_v18 = vpop.f32.mrf.mxu1  ;;  %v14014_v10 = vadd.f32 %v3547_v15, %v13840_v57  ;;  %v3548_v22 = vadd.f32 %v3477_v54, %v3076_v21  ;;  %v3078_v41 = vadd.f32 %v3077_v29, %v13847_v40 }
 0x22a   :  { %v3081_v28 = vpop.f32.mrf.mxu0 }
 0x22b   :  { %v3483_v9 = vpop.f32.mrf.mxu1  ;;  %v14018_v37 = vadd.f32 %v3548_v22, %v13845_v23  ;;  %v3549_v43 = vadd.f32 %v3479_v18, %v3078_v41  ;;  %v3082_v61 = vadd.f32 %v3081_v28, %v13852_v48  ;;  %v16085_v22 = vld [vmem:[#allocation37_spill] sm:$0xff] }
 0x22c   :  { %v3083_v6 = vpop.f32.mrf.mxu0 }
 0x22d   :  { %v3485_v31 = vpop.f32.mrf.mxu1  ;;  %v14022_v53 = vadd.f32 %v3549_v43, %v13850_v27  ;;  %v3550_v46 = vadd.f32 %v3483_v9, %v3082_v61  ;;  %v3084_v57 = vadd.f32 %v3083_v6, %v13861_v42 }
 0x22e   :  { %v3085_v56 = vpop.f32.mrf.mxu0 }
 0x22f   :  { %v3487_v8 = vpop.f32.mrf.mxu1  ;;  %v14026_v40 = vadd.f32 %v3550_v46, %v13856_v34  ;;  %v3551_v20 = vadd.f32 %v3485_v31, %v3084_v57  ;;  %v3086_v23 = vadd.f32 %v3085_v56, %v13866_v35 }
 0x230   :  { %v3087_v13 = vpop.f32.mrf.mxu0 }
 0x231   :  { %v3489_v52 = vpop.f32.mrf.mxu1  ;;  %v14030_v48 = vadd.f32 %v3551_v20, %v13864_v59  ;;  %v3552_v36 = vadd.f32 %v3487_v8, %v3086_v23  ;;  %v3088_v27 = vadd.f32 %v3087_v13, %v13871_v3  ;;  %v16086_v13 = vld [vmem:[#allocation38_spill] sm:$0xff] }
 0x232   :  { %v3091_v54 = vpop.f32.mrf.mxu0 }
 0x233   :  { %v3493_v15 = vpop.f32.mrf.mxu1  ;;  %v14034_v42 = vadd.f32 %v3552_v36, %v13869_v19  ;;  %v3553_v21 = vadd.f32 %v3489_v52, %v3088_v27  ;;  %v3092_v34 = vadd.f32 %v3091_v54, %v13876_v16 }
 0x234   :  { %v3093_v29 = vpop.f32.mrf.mxu0 }
 0x235   :  { %v3495_v18 = vpop.f32.mrf.mxu1  ;;  %v14038_v35 = vadd.f32 %v3553_v21, %v16085_v22  ;;  %v3554_v41 = vadd.f32 %v3493_v15, %v3092_v34  ;;  %v3094_v59 = vadd.f32 %v3093_v29, %v13885_v33 }
 0x236   :  { %v3095_v28 = vpop.f32.mrf.mxu0 }
 0x237   :  { %v3497_v9 = vpop.f32.mrf.mxu1  ;;  %v14042_v3 = vadd.f32 %v3554_v41, %v13882_v49  ;;  %v3555_v43 = vadd.f32 %v3495_v18, %v3094_v59  ;;  %v3096_v19 = vadd.f32 %v3095_v28, %v13890_v4  ;;  %v16090_v41 = vld [vmem:[#allocation39_spill] sm:$0xff] }
 0x238   :  { %v3097_v61 = vpop.f32.mrf.mxu0 }
 0x239   :  { %v3499_v6 = vpop.f32.mrf.mxu1  ;;  %v14046_v16 = vadd.f32 %v3555_v43, %v13888_v63  ;;  %v3556_v31 = vadd.f32 %v3497_v9, %v3096_v19  ;;  %v3098_v46 = vadd.f32 %v3097_v61, %v13895_v5  ;;  %v16092_v43 = vld [vmem:[#allocation40_spill] sm:$0xff] }
 0x23a   :  { %v3101_v57 = vpop.f32.mrf.mxu0 }
 0x23b   :  { %v3503_v56 = vpop.f32.mrf.mxu1  ;;  %v14050_v33 = vadd.f32 %v3556_v31, %v13893_v44  ;;  %v3557_v8 = vadd.f32 %v3499_v6, %v3098_v46  ;;  %v3102_v49 = vadd.f32 %v3101_v57, %v13900_v51 }
 0x23c   :  { %v3103_v20 = vpop.f32.mrf.mxu0 }
 0x23d   :  { %v3505_v23 = vpop.f32.mrf.mxu1  ;;  %v14054_v4 = vadd.f32 %v3557_v8, %v16086_v13  ;;  %v3558_v52 = vadd.f32 %v3503_v56, %v3102_v49  ;;  %v3104_v63 = vadd.f32 %v3103_v20, %v13907_v39 }
 0x23e   :  { %v3105_v36 = vpop.f32.mrf.mxu0 }
 0x23f   :  { %16087 = vst [vmem:[#allocation37_spill] sm:$0xff] %v14054_v4  ;;  %v3507_v27 = vpop.f32.mrf.mxu1  ;;  %v14058_v5 = vadd.f32 %v3558_v52, %v13904_v0  ;;  %v3559_v54 = vadd.f32 %v3505_v23, %v3104_v63  ;;  %v3106_v44 = vadd.f32 %v3105_v36, %v13912_v55  ;;  %v16097_v52 = vld [vmem:[#allocation42_spill] sm:$0xff] }
 0x240   :  { %v3107_v15 = vpop.f32.mrf.mxu0 }
 0x241   :  { %16088 = vst [vmem:[#allocation38_spill] sm:$0xff] %v14058_v5  ;;  %v3509_v21 = vpop.f32.mrf.mxu1  ;;  %v14062_v51 = vadd.f32 %v3559_v54, %v13910_v17  ;;  %v3560_v34 = vadd.f32 %v3507_v27, %v3106_v44  ;;  %v3108_v29 = vadd.f32 %v3107_v15, %v13917_v2  ;;  %v16098_v27 = vld [vmem:[#allocation41_spill] sm:$0xff] }
 0x242   :  { %v3111_v18 = vpop.f32.mrf.mxu0 }
 0x243   :  { %16089 = vst [vmem:[#allocation53_spill] sm:$0xff] %v14062_v51  ;;  %v3513_v22 = vpop.f32.mrf.mxu1  ;;  %v14066_v39 = vadd.f32 %v3560_v34, %v16090_v41  ;;  %v3561_v59 = vadd.f32 %v3509_v21, %v3108_v29  ;;  %v3112_v0 = vadd.f32 %v3111_v18, %v13922_v38  ;;  %v16100_v21 = vld [vmem:[#allocation43_spill] sm:$0xff] }
 0x244   :  { %v3113_v28 = vpop.f32.mrf.mxu0 }
 0x245   :  { %16091 = vst [vmem:[#allocation39_spill] sm:$0xff] %v14066_v39  ;;  %v3515_v9 = vpop.f32.mrf.mxu1  ;;  %v14070_v55 = vadd.f32 %v3561_v59, %v16092_v43  ;;  %v3562_v19 = vadd.f32 %v3513_v22, %v3112_v0  ;;  %v3114_v17 = vadd.f32 %v3113_v28, %v13929_v26  ;;  %v16102_v22 = vld [vmem:[#allocation44_spill] sm:$0xff]  ;;  %v16104_v43 = vld [vmem:[#allocation45_spill] sm:$0xff] }
 0x246   :  { %v3115_v61 = vpop.f32.mrf.mxu0 }
 0x247   :  { %16093 = vst [vmem:[#allocation40_spill] sm:$0xff] %v14070_v55  ;;  %v3517_v6 = vpop.f32.mrf.mxu1  ;;  %v14074_v2 = vadd.f32 %v3562_v19, %v13926_v62  ;;  %v3563_v31 = vadd.f32 %v3515_v9, %v3114_v17  ;;  %v3116_v46 = vadd.f32 %v3115_v61, %v13934_v50 }
 0x248   :  { %v3117_v57 = vpop.f32.mrf.mxu0 }
 0x249   :  { %16094 = vst [vmem:[#allocation54_spill] sm:$0xff] %v14074_v2  ;;  %v3519_v56 = vpop.f32.mrf.mxu1  ;;  %v14078_v38 = vadd.f32 %v3563_v31, %v13932_v7  ;;  %v3564_v8 = vadd.f32 %v3517_v6, %v3116_v46  ;;  %v3118_v49 = vadd.f32 %v3117_v57, %v13939_v11  ;;  %v16106_v31 = vld [vmem:[#allocation46_spill] sm:$0xff] }
 0x24a   :  { %v3121_v20 = vpop.f32.mrf.mxu0 }
 0x24b   :  { %16095 = vst [vmem:[#allocation55_spill] sm:$0xff] %v14078_v38  ;;  %v3523_v23 = vpop.f32.mrf.mxu1  ;;  %v14082_v26 = vadd.f32 %v3564_v8, %v13937_v58  ;;  %v3565_v13 = vadd.f32 %v3519_v56, %v3118_v49  ;;  %v3122_v62 = vadd.f32 %v3121_v20, %v16097_v52  ;;  %v16108_v49 = vld [vmem:[#allocation47_spill] sm:$0xff] }
 0x24c   :  { %v3123_v63 = vpop.f32.mrf.mxu0 }
 0x24d   :  { %16096 = vst [vmem:[#allocation56_spill] sm:$0xff] %v14082_v26  ;;  %v3525_v36 = vpop.f32.mrf.mxu1  ;;  %v14086_v50 = vadd.f32 %v3565_v13, %v16098_v27  ;;  %v3566_v54 = vadd.f32 %v3523_v23, %v3122_v62  ;;  %v3124_v7 = vadd.f32 %v3123_v63, %v13953_v24  ;;  %v16110_v23 = vld [vmem:[#allocation49_spill] sm:$0xff]  ;;  %v16111_v63 = vld [vmem:[#allocation48_spill] sm:$0xff]  ;;  %v16113_v27 = vld [vmem:[#allocation51_spill] sm:$0xff] }
 0x24e   :  { %v3125_v44 = vpop.f32.mrf.mxu0 }
 0x24f   :  { %16099 = vst [vmem:[#allocation42_spill] sm:$0xff] %v14086_v50  ;;  %v3527_v15 = vpop.f32.mrf.mxu1  ;;  %v14090_v11 = vadd.f32 %v3566_v54, %v16100_v21  ;;  %v3567_v34 = vadd.f32 %v3525_v36, %v3124_v7  ;;  %v3126_v58 = vadd.f32 %v3125_v44, %v13958_v1 }
 0x250   :  { %v3127_v29 = vpop.f32.mrf.mxu0 }
 0x251   :  { %16101 = vst [vmem:[#allocation41_spill] sm:$0xff] %v14090_v11  ;;  %v3529_v18 = vpop.f32.mrf.mxu1  ;;  %v14094_v41 = vadd.f32 %v3567_v34, %v16102_v22  ;;  %v3568_v59 = vadd.f32 %v3527_v15, %v3126_v58  ;;  %v3128_v0 = vadd.f32 %v3127_v29, %v13963_v45  ;;  %v16114_v15 = vld [vmem:[#allocation50_spill] sm:$0xff]  ;;  %v16116_v29 = vld [vmem:[#allocation52_spill] sm:$0xff] }
 0x252   :  { %v3131_v28 = vpop.f32.mrf.mxu0 }
 0x253   :  { %16103 = vst [vmem:[#allocation43_spill] sm:$0xff] %v14094_v41  ;;  %v3533_v9 = vpop.f32.mrf.mxu1  ;;  %v14098_v24 = vadd.f32 %v3568_v59, %v16104_v43  ;;  %v3569_v19 = vadd.f32 %v3529_v18, %v3128_v0  ;;  %v3132_v17 = vadd.f32 %v3131_v28, %v13968_v12 }
 0x254   :  { %v3133_v61 = vpop.f32.mrf.mxu0 }
 0x255   :  { %16105 = vst [vmem:[#allocation44_spill] sm:$0xff] %v14098_v24  ;;  %v3535_v6 = vpop.f32.mrf.mxu1  ;;  %v14102_v1 = vadd.f32 %v3569_v19, %v16106_v31  ;;  %v3570_v46 = vadd.f32 %v3533_v9, %v3132_v17  ;;  %v3134_v57 = vadd.f32 %v3133_v61, %v13976_v32 }
 0x256   :  { %v3135_v56 = vpop.f32.mrf.mxu0 }
 0x257   :  { %16107 = vst [vmem:[#allocation45_spill] sm:$0xff] %v14102_v1  ;;  %v3537_v8 = vpop.f32.mrf.mxu1  ;;  %v14106_v45 = vadd.f32 %v3570_v46, %v16108_v49  ;;  %v3571_v20 = vadd.f32 %v3535_v6, %v3134_v57  ;;  %v3136_v13 = vadd.f32 %v3135_v56, %v16110_v23 }
 0x258   :  { %v3137_v52 = vpop.f32.mrf.mxu0 }
 0x259   :  { %16109 = vst [vmem:[#allocation46_spill] sm:$0xff] %v14106_v45  ;;  %v3539_v62 = vpop.f32.mrf.mxu1  ;;  %v14110_v12 = vadd.f32 %v3571_v20, %v16111_v63  ;;  %v3572_v36 = vadd.f32 %v3537_v8, %v3136_v13  ;;  %v3138_v54 = vadd.f32 %v3137_v52, %v16113_v27 }
 0x25a   :  { %v4245_v7 = vpop.f32.mrf.mxu0 }
 0x25b   :  { %16112 = vst [vmem:[#allocation47_spill] sm:$0xff] %v14110_v12  ;;  %v4598_v44 = vpop.f32.mrf.mxu1  ;;  %v14114_v32 = vadd.f32 %v3572_v36, %v16114_v15  ;;  %v3573_v21 = vadd.f32 %v3539_v62, %v3138_v54 }
 0x25c   :  { %v4247_v34 = vpop.f32.mrf.mxu0 }
 0x25d   :  { %16115 = vst [vmem:[#allocation49_spill] sm:$0xff] %v14114_v32  ;;  %v4600_v58 = vpop.f32.mrf.mxu1  ;;  %v14117_v18 = vadd.f32 %v3573_v21, %v16116_v29 }
 0x25e   :  { %v4249_v22 = vpop.f32.mrf.mxu0  ;;  %v4601_v4 = vadd.f32 %v4600_v58, %v4247_v34 }
 0x25f   :  { %16117 = vst [vmem:[#allocation48_spill] sm:$0xff] %v14117_v18  ;;  %v4602_v59 = vpop.f32.mrf.mxu1 }
 0x260   :  { %v4251_v0 = vpop.f32.mrf.mxu0 }
 0x261   :  { %v4604_v28 = vpop.f32.mrf.mxu1 }
 0x262   :  { %v4255_v9 = vpop.f32.mrf.mxu0 }
 0x263   :  { %v4608_v43 = vpop.f32.mrf.mxu1 }
 0x264   :  { %v14119_v19 = vpop.f32.mrf.mxu0 }
 0x265   :  { %v4610_v61 = vpop.f32.mrf.mxu1 }
 0x266   :  { %v14121_v17 = vpop.f32.mrf.mxu0 }
 0x267   :  { %v4612_v46 = vpop.f32.mrf.mxu1 }
 0x268   :  { %v14123_v6 = vpop.f32.mrf.mxu0 }
 0x269   :  { %v14131_v8 = vpop.f32.mrf.mxu1 }
 0x26a   :  { %v14125_v31 = vpop.f32.mrf.mxu0 }
 0x26b   :  { %v14137_v23 = vpop.f32.mrf.mxu1 }
 0x26c   :  { %v14127_v57 = vpop.f32.mrf.mxu0 }
 0x26d   :  { %v14143_v62 = vpop.f32.mrf.mxu1 }
 0x26e   :  { %v14129_v56 = vpop.f32.mrf.mxu0 }
 0x26f   :  { %v14149_v27 = vpop.f32.mrf.mxu1 }
 0x270   :  { %v14133_v49 = vpop.f32.mrf.mxu0 }
 0x271   :  { %v14155_v21 = vpop.f32.mrf.mxu1 }
 0x272   :  { %v14135_v20 = vpop.f32.mrf.mxu0 }
 0x273   :  { %v14161_v32 = vpop.f32.mrf.mxu1 }
 0x274   :  { %v14139_v13 = vpop.f32.mrf.mxu0 }
 0x275   :  { %v14167_v1 = vpop.f32.mrf.mxu1 }
 0x276   :  { %v14141_v52 = vpop.f32.mrf.mxu0 }
 0x277   :  { %v14173_v11 = vpop.f32.mrf.mxu1 }
 0x278   :  { %v14145_v63 = vpop.f32.mrf.mxu0 }
 0x279   :  { %v14179_v38 = vpop.f32.mrf.mxu1 }
 0x27a   :  { %v14147_v36 = vpop.f32.mrf.mxu0 }
 0x27b   :  { %v14185_v39 = vpop.f32.mrf.mxu1 }
 0x27c   :  { %v14151_v54 = vpop.f32.mrf.mxu0 }
 0x27e   :  { %v14153_v15 = vpop.f32.mrf.mxu0 }
 0x27f   :  { %16118 = vst [vmem:[#allocation51_spill] sm:$0xff] %v14153_v15 }
 0x280   :  { %v14157_v29 = vpop.f32.mrf.mxu0 }
 0x281   :  { %16119 = vst [vmem:[#allocation50_spill] sm:$0xff] %v14157_v29 }
 0x282   :  { %v14159_v18 = vpop.f32.mrf.mxu0 }
 0x283   :  { %16120 = vst [vmem:[#allocation52_spill] sm:$0xff] %v14159_v18 }
 0x284   :  { %v14163_v12 = vpop.f32.mrf.mxu0 }
 0x285   :  { %16121 = vst [vmem:[#allocation57_spill] sm:$0xff] %v14163_v12 }
 0x286   :  { %v14165_v45 = vpop.f32.mrf.mxu0 }
 0x287   :  { %16122 = vst [vmem:[#allocation58_spill] sm:$0xff] %v14165_v45  ;;  %v4599_v45 = vadd.f32 %v4598_v44, %v4245_v7 }
 0x288   :  { %v14169_v24 = vpop.f32.mrf.mxu0 }
 0x289   :  { %16123 = vst [vmem:[#allocation59_spill] sm:$0xff] %v14169_v24  ;;  %v14191_v24 = vpop.f32.mrf.mxu1 }
 0x28a   :  { %v14171_v41 = vpop.f32.mrf.mxu0 }
 0x28b   :  { %16124 = vst [vmem:[#allocation60_spill] sm:$0xff] %v14171_v41  ;;  %v14195_v12 = vpop.f32.mrf.mxu1 }
 0x28c   :  { %v14175_v50 = vpop.f32.mrf.mxu0 }
 0x28d   :  { %16125 = vst [vmem:[#allocation61_spill] sm:$0xff] %v14175_v50  ;;  %v14204_v7 = vpop.f32.mrf.mxu1 }
 0x28e   :  { %v14177_v26 = vpop.f32.mrf.mxu0 }
 0x28f   :  { %16126 = vst [vmem:[#allocation62_spill] sm:$0xff] %v14177_v26 }
 0x290   :  { %v14181_v2 = vpop.f32.mrf.mxu0 }
 0x291   :  { %16127 = vst [vmem:[#allocation63_spill] sm:$0xff] %v14181_v2  ;;  %v4603_v2 = vadd.f32 %v4602_v59, %v4249_v22  ;;  %v4615_v22 = vadd.f32 %v14131_v8, %v14123_v6 }
 0x292   :  { %v14183_v55 = vpop.f32.mrf.mxu0 }
 0x293   :  { %16128 = vst [vmem:[#allocation64_spill] sm:$0xff] %v14183_v55 }
 0x294   :  { %v14187_v51 = vpop.f32.mrf.mxu0 }
 0x295   :  { %16129 = vst [vmem:[#allocation65_spill] sm:$0xff] %v14187_v51  ;;  %v4605_v51 = vadd.f32 %v4604_v28, %v4251_v0 }
 0x296   :  { %v14189_v5 = vpop.f32.mrf.mxu0 }
 0x297   :  { %16130 = vst [vmem:[#allocation66_spill] sm:$0xff] %v14189_v5 }
 0x298   :  { %v14193_v41 = vpop.f32.mrf.mxu0 }
 0x299   :  { %16131 = vst [vmem:[#allocation67_spill] sm:$0xff] %v14193_v41 }
 0x29a   :  { %v5000_v50 = vpop.f32.mrf.mxu0 }
 0x29b   :  { %v5079_v26 = vadd.f32 %v5000_v50, %v4599_v45  ;;  %v4609_v50 = vadd.f32 %v4608_v43, %v4255_v9  ;;  %v4619_v9 = vadd.f32 %v14137_v23, %v14125_v31  ;;  %v4623_v31 = vadd.f32 %v14149_v27, %v14129_v56 }
 0x29c   :  { %v5002_v18 = vpop.f32.mrf.mxu0  ;;  %v4629_v56 = vadd.f32 %v14161_v32, %v14135_v20  ;;  %v4633_v32 = vadd.f32 %v14173_v11, %v14141_v52  ;;  %v4639_v11 = vadd.f32 %v14185_v39, %v14147_v36 }
 0x29d   :  { %v14198_v55 = vadd.f32 %v5079_v26, %v13994_v14  ;;  %v5080_v29 = vadd.f32 %v5002_v18, %v4601_v4  ;;  %v4613_v18 = vadd.f32 %v4612_v46, %v14121_v17 }
 0x29e   :  { %v5004_v15 = vpop.f32.mrf.mxu0 }
 0x29f   :  { %5175 = vst [vmem:[#allocation5] sm:$0xff] %v14198_v55  ;;  %v14202_v5 = vadd.f32 %v5080_v29, %v13998_v25  ;;  %v5081_v41 = vadd.f32 %v5004_v15, %v4603_v2  ;;  %v4611_v25 = vadd.f32 %v4610_v61, %v14119_v19  ;;  %v14215_v2 = vpop.f32.mrf.mxu1 }
 0x2a0   :  { %v5006_v44 = vpop.f32.mrf.mxu0 }
 0x2a1   :  { %5176 = vst [vmem:[#allocation5 + $0x8] sm:$0xff] %v14202_v5  ;;  %v14208_v45 = vadd.f32 %v5081_v41, %v14002_v60  ;;  %v5082_v14 = vadd.f32 %v5006_v44, %v4605_v51  ;;  %v4650_v59 = vpop.f32.mrf.mxu1 }
 0x2a2   :  { %v5010_v26 = vpop.f32.mrf.mxu0 }
 0x2a3   :  { %5177 = vst [vmem:[#allocation5 + $0x10] sm:$0xff] %v14208_v45  ;;  %v14212_v4 = vadd.f32 %v5082_v14, %v14006_v30  ;;  %v5083_v34 = vadd.f32 %v5010_v26, %v4609_v50  ;;  %v4652_v6 = vpop.f32.mrf.mxu1 }
 0x2a4   :  { %v5012_v58 = vpop.f32.mrf.mxu0 }
 0x2a5   :  { %5178 = vst [vmem:[#allocation5 + $0x18] sm:$0xff] %v14212_v4  ;;  %v14220_v60 = vadd.f32 %v5083_v34, %v14010_v47  ;;  %v5084_v51 = vadd.f32 %v5012_v58, %v4611_v25  ;;  %v4654_v29 = vpop.f32.mrf.mxu1 }
 0x2a6   :  { %v5014_v41 = vpop.f32.mrf.mxu0 }
 0x2a7   :  { %5179 = vst [vmem:[#allocation5 + $0x20] sm:$0xff] %v14220_v60  ;;  %v5085_v30 = vadd.f32 %v5014_v41, %v4613_v18  ;;  %v14226_v0 = vadd.f32 %v5084_v51, %v14014_v10  ;;  %v4621_v10 = vadd.f32 %v14143_v62, %v14127_v57  ;;  %v4658_v50 = vpop.f32.mrf.mxu1  ;;  %v16133_v18 = vld [vmem:[#allocation50_spill] sm:$0xff]  ;;  %v16134_v41 = vld [vmem:[#allocation52_spill] sm:$0xff] }
 0x2a8   :  { %v5016_v28 = vpop.f32.mrf.mxu0  ;;  %v4645_v51 = vadd.f32 %v14204_v7, %v16133_v18 }
 0x2a9   :  { %v14231_v43 = vadd.f32 %v5085_v30, %v14018_v37  ;;  %v5086_v47 = vadd.f32 %v5016_v28, %v4615_v22  ;;  %5180 = vst [vmem:[#allocation5 + $0x28] sm:$0xff] %v14226_v0  ;;  %v14273_v25 = vpop.f32.mrf.mxu1  ;;  %v5285_v22 = vmul.f32 %v14208_v45, %v14208_v45  ;;  %v16137_v30 = vld [vmem:[#allocation58_spill] sm:$0xff] }
 0x2aa   :  { %v5020_v19 = vpop.f32.mrf.mxu0  ;;  %v4653_v28 = vadd.f32 %v4652_v6, %v16137_v30  ;;  %v5241_v6 = vadd.f32 %v14208_v45, %v14198_v55 }
 0x2ab   :  { %5181 = vst [vmem:[#allocation5 + $0x30] sm:$0xff] %v14231_v43  ;;  %v14236_v17 = vadd.f32 %v5086_v47, %v14022_v53  ;;  %v5087_v61 = vadd.f32 %v5020_v19, %v4619_v9  ;;  %v4625_v53 = vadd.f32 %v14155_v21, %v14133_v49  ;;  %v4662_v47 = vpop.f32.mrf.mxu1  ;;  %v5283_v19 = vmul.f32 %v14198_v55, %v14198_v55 }
 0x2ac   :  { %v5022_v46 = vpop.f32.mrf.mxu0 }
 0x2ad   :  { %5182 = vst [vmem:[#allocation5 + $0x38] sm:$0xff] %v14236_v17  ;;  %v14244_v37 = vadd.f32 %v5087_v61, %v14026_v40  ;;  %v5088_v8 = vadd.f32 %v5022_v46, %v4621_v10  ;;  %v16139_v10 = vld [vmem:[#allocation60_spill] sm:$0xff] }
 0x2ae   :  { %v5024_v23 = vpop.f32.mrf.mxu0  ;;  %v14310_v46 = vadd.f32 %v4658_v50, %v16139_v10  ;;  %v4664_v50 = vpop.f32.mrf.mxu1 }
 0x2af   :  { %5183 = vst [vmem:[#allocation5 + $0x40] sm:$0xff] %v14244_v37  ;;  %v5089_v15 = vadd.f32 %v5024_v23, %v4623_v31  ;;  %v14250_v57 = vadd.f32 %v5088_v8, %v14030_v48  ;;  %v4631_v48 = vadd.f32 %v14167_v1, %v14139_v13  ;;  %v5284_v31 = vmul.f32 %v14202_v5, %v14202_v5  ;;  %v16140_v8 = vld [vmem:[#allocation38_spill] sm:$0xff] }
 0x2b0   :  { %v5026_v62 = vpop.f32.mrf.mxu0  ;;  %v4668_v30 = vpop.f32.mrf.mxu1 }
 0x2b1   :  { %v14255_v27 = vadd.f32 %v5089_v15, %v14034_v42  ;;  %v5090_v40 = vadd.f32 %v5026_v62, %v4625_v53  ;;  %5184 = vst [vmem:[#allocation5 + $0x48] sm:$0xff] %v14250_v57  ;;  %v5315_v53 = vadd.f32 %v5285_v22, %v5283_v19  ;;  %v5288_v15 = vmul.f32 %v14226_v0, %v14226_v0 }
 0x2b2   :  { %v5030_v44 = vpop.f32.mrf.mxu0 }
 0x2b3   :  { %5185 = vst [vmem:[#allocation5 + $0x50] sm:$0xff] %v14255_v27  ;;  %v14260_v49 = vadd.f32 %v5090_v40, %v14038_v35  ;;  %v5091_v21 = vadd.f32 %v5030_v44, %v4629_v56  ;;  %v4635_v35 = vadd.f32 %v14179_v38, %v14145_v63  ;;  %v16132_v38 = vld [vmem:[#allocation51_spill] sm:$0xff]  ;;  %v5262_v40 = vadd.f32 %v14212_v4, %v14202_v5 }
 0x2b4   :  { %v5032_v14 = vpop.f32.mrf.mxu0  ;;  %v4643_v63 = vadd.f32 %v14195_v12, %v16132_v38  ;;  %v16136_v12 = vld [vmem:[#allocation37_spill] sm:$0xff]  ;;  %v5293_v22 = vmul.f32 %v14255_v27, %v14255_v27 }
 0x2b5   :  { %5186 = vst [vmem:[#allocation5 + $0x58] sm:$0xff] %v14260_v49  ;;  %v14268_v42 = vadd.f32 %v5091_v21, %v14042_v3  ;;  %v5092_v20 = vadd.f32 %v5032_v14, %v4631_v48  ;;  %v4641_v3 = vadd.f32 %v14191_v24, %v14151_v54  ;;  %v16135_v24 = vld [vmem:[#allocation57_spill] sm:$0xff]  ;;  %v5242_v21 = vadd.f32 %v5241_v6, %v14220_v60 }
 0x2b6   :  { %v5034_v26 = vpop.f32.mrf.mxu0  ;;  %v4651_v36 = vadd.f32 %v4650_v59, %v16135_v24  ;;  %v5287_v59 = vmul.f32 %v14220_v60, %v14220_v60 }
 0x2b7   :  { %5187 = vst [vmem:[#allocation5 + $0x60] sm:$0xff] %v14268_v42  ;;  %v5093_v34 = vadd.f32 %v5034_v26, %v4633_v32  ;;  %v14276_v1 = vadd.f32 %v5092_v20, %v14046_v16  ;;  %v4649_v16 = vadd.f32 %v14215_v2, %v16134_v41  ;;  %v16138_v2 = vld [vmem:[#allocation59_spill] sm:$0xff]  ;;  %v5290_v32 = vmul.f32 %v14236_v17, %v14236_v17  ;;  %v16141_v26 = vld [vmem:[#allocation53_spill] sm:$0xff] }
 0x2b8   :  { %v5036_v13 = vpop.f32.mrf.mxu0  ;;  %v14303_v9 = vadd.f32 %v4654_v29, %v16138_v2  ;;  %v5289_v29 = vmul.f32 %v14231_v43, %v14231_v43  ;;  %v5316_v14 = vadd.f32 %v5315_v53, %v5287_v59  ;;  %v5291_v20 = vmul.f32 %v14244_v37, %v14244_v37 }
 0x2b9   :  { %v14283_v52 = vadd.f32 %v5093_v34, %v14050_v33  ;;  %v5094_v58 = vadd.f32 %v5036_v13, %v4635_v35  ;;  %5188 = vst [vmem:[#allocation5 + $0x68] sm:$0xff] %v14276_v1  ;;  %v5286_v33 = vmul.f32 %v14212_v4, %v14212_v4  ;;  %v5263_v13 = vadd.f32 %v5262_v40, %v14226_v0 }
 0x2ba   :  { %v5040_v39 = vpop.f32.mrf.mxu0  ;;  %v5317_v18 = vadd.f32 %v5316_v14, %v5289_v29  ;;  %v5292_v41 = vmul.f32 %v14250_v57, %v14250_v57  ;;  %v5294_v59 = vmul.f32 %v14260_v49, %v14260_v49 }
 0x2bb   :  { %5189 = vst [vmem:[#allocation5 + $0x70] sm:$0xff] %v14283_v52  ;;  %v14299_v54 = vadd.f32 %v5094_v58, %v16136_v12  ;;  %v5095_v7 = vadd.f32 %v5040_v39, %v4639_v11  ;;  %v5336_v44 = vadd.f32 %v5286_v33, %v5284_v31  ;;  %v5243_v11 = vadd.f32 %v5242_v21, %v14231_v43  ;;  %v16143_v12 = vld [vmem:[#allocation40_spill] sm:$0xff]  ;;  %v16144_v31 = vld [vmem:[#allocation61_spill] sm:$0xff]  ;;  %v16146_v21 = vld [vmem:[#allocation62_spill] sm:$0xff] }
 0x2bc   :  { %v5042_v61 = vpop.f32.mrf.mxu0  ;;  %v5264_v24 = vadd.f32 %v5263_v13, %v14236_v17  ;;  %v5318_v19 = vadd.f32 %v5317_v18, %v5291_v20  ;;  %v4661_v6 = vadd.f32 %v14273_v25, %v16144_v31  ;;  %v5297_v14 = vmul.f32 %v14283_v52, %v14283_v52  ;;  %v4670_v20 = vpop.f32.mrf.mxu1 }
 0x2bd   :  { %5190 = vst [vmem:[#allocation5 + $0x78] sm:$0xff] %v14299_v54  ;;  %v14318_v23 = vadd.f32 %v5095_v7, %v16140_v8  ;;  %v5096_v62 = vadd.f32 %v5042_v61, %v4641_v3  ;;  %v16142_v3 = vld [vmem:[#allocation39_spill] sm:$0xff]  ;;  %v5244_v33 = vadd.f32 %v5243_v11, %v14244_v37  ;;  %v5295_v61 = vmul.f32 %v14268_v42, %v14268_v42 }
 0x2be   :  { %v5044_v56 = vpop.f32.mrf.mxu0  ;;  %v5265_v8 = vadd.f32 %v5264_v24, %v14250_v57  ;;  %v16147_v11 = vld [vmem:[#allocation55_spill] sm:$0xff] }
 0x2bf   :  { %5191 = vst [vmem:[#allocation5 + $0x80] sm:$0xff] %v14318_v23  ;;  %v5097_v48 = vadd.f32 %v5044_v56, %v4643_v63  ;;  %v14333_v35 = vadd.f32 %v5096_v62, %v16141_v26  ;;  %v5337_v63 = vadd.f32 %v5336_v44, %v5288_v15  ;;  %v5245_v53 = vadd.f32 %v5244_v33, %v14255_v27 }
 0x2c0   :  { %v5046_v34 = vpop.f32.mrf.mxu0  ;;  %v5319_v62 = vadd.f32 %v5318_v19, %v5293_v22  ;;  %v5296_v56 = vmul.f32 %v14276_v1, %v14276_v1  ;;  %v5266_v25 = vadd.f32 %v5265_v8, %v14260_v49  ;;  %v16150_v19 = vld [vmem:[#allocation42_spill] sm:$0xff]  ;;  %v4672_v8 = vpop.f32.mrf.mxu1 }
 0x2c1   :  { %v14338_v58 = vadd.f32 %v5097_v48, %v16142_v3  ;;  %v5098_v38 = vadd.f32 %v5046_v34, %v4645_v51  ;;  %5192 = vst [vmem:[#allocation5 + $0x88] sm:$0xff] %v14333_v35  ;;  %v5338_v2 = vadd.f32 %v5337_v63, %v5290_v32  ;;  %v4663_v48 = vadd.f32 %v4662_v47, %v16146_v21  ;;  %v16148_v63 = vld [vmem:[#allocation56_spill] sm:$0xff] }
 0x2c2   :  { %v5050_v39 = vpop.f32.mrf.mxu0  ;;  %v5246_v34 = vadd.f32 %v5245_v53, %v14268_v42  ;;  %v5320_v13 = vadd.f32 %v5319_v62, %v5295_v61  ;;  %v5298_v47 = vmul.f32 %v14299_v54, %v14299_v54 }
 0x2c3   :  { %5193 = vst [vmem:[#allocation5 + $0x90] sm:$0xff] %v14338_v58  ;;  %v14349_v7 = vadd.f32 %v5098_v38, %v16143_v12  ;;  %v5099_v51 = vadd.f32 %v5050_v39, %v4649_v16  ;;  %v16145_v16 = vld [vmem:[#allocation54_spill] sm:$0xff]  ;;  %v5339_v29 = vadd.f32 %v5338_v2, %v5292_v41  ;;  %v5299_v38 = vmul.f32 %v14318_v23, %v14318_v23  ;;  %v16149_v41 = vld [vmem:[#allocation63_spill] sm:$0xff] }
 0x2c4   :  { %v5052_v10 = vpop.f32.mrf.mxu0  ;;  %v4665_v22 = vadd.f32 %v4664_v50, %v16149_v41  ;;  %v5267_v39 = vadd.f32 %v5266_v25, %v14276_v1  ;;  %v5247_v33 = vadd.f32 %v5246_v34, %v14283_v52  ;;  %v5300_v2 = vmul.f32 %v14333_v35, %v14333_v35  ;;  %v16151_v50 = vld [vmem:[#allocation64_spill] sm:$0xff] }
 0x2c5   :  { %5194 = vst [vmem:[#allocation5 + $0x98] sm:$0xff] %v14349_v7  ;;  %v14361_v15 = vadd.f32 %v5099_v51, %v16145_v16  ;;  %v5100_v40 = vadd.f32 %v5052_v10, %v4651_v36  ;;  %v5340_v26 = vadd.f32 %v5339_v29, %v5294_v59  ;;  %v5321_v51 = vadd.f32 %v5320_v13, %v5297_v14  ;;  %v16152_v10 = vld [vmem:[#allocation65_spill] sm:$0xff] }
 0x2c6   :  { %v5054_v44 = vpop.f32.mrf.mxu0  ;;  %v4669_v61 = vadd.f32 %v4668_v30, %v16151_v50  ;;  %v4671_v31 = vadd.f32 %v4670_v20, %v16152_v10  ;;  %v5268_v53 = vadd.f32 %v5267_v39, %v14299_v54  ;;  %v5301_v16 = vmul.f32 %v14338_v58, %v14338_v58  ;;  %v16154_v20 = vld [vmem:[#allocation66_spill] sm:$0xff] }
 0x2c7   :  { %5195 = vst [vmem:[#allocation5 + $0xa0] sm:$0xff] %v14361_v15  ;;  %v5101_v32 = vadd.f32 %v5054_v44, %v4653_v28  ;;  %v14372_v3 = vadd.f32 %v5100_v40, %v16147_v11  ;;  %v5341_v24 = vadd.f32 %v5340_v26, %v5296_v56  ;;  %v5248_v56 = vadd.f32 %v5247_v33, %v14318_v23  ;;  %v16153_v44 = vld [vmem:[#allocation41_spill] sm:$0xff]  ;;  %v16156_v33 = vld [vmem:[#allocation44_spill] sm:$0xff] }
 0x2c8   :  { %v5056_v36 = vpop.f32.mrf.mxu0  ;;  %v5322_v40 = vadd.f32 %v5321_v51, %v5299_v38  ;;  %v5302_v30 = vmul.f32 %v14349_v7, %v14349_v7  ;;  %v5303_v25 = vmul.f32 %v14361_v15, %v14361_v15  ;;  %v4673_v26 = vadd.f32 %v4672_v8, %v16154_v20 }
 0x2c9   :  { %v14379_v18 = vadd.f32 %v5101_v32, %v16148_v63  ;;  %v5102_v28 = vadd.f32 %v5056_v36, %v14303_v9  ;;  %5196 = vst [vmem:[#allocation5 + $0xa8] sm:$0xff] %v14372_v3  ;;  %v5342_v62 = vadd.f32 %v5341_v24, %v5298_v47  ;;  %v5249_v13 = vadd.f32 %v5248_v56, %v14338_v58  ;;  %v16155_v63 = vld [vmem:[#allocation43_spill] sm:$0xff] }
 0x2ca   :  { %v5060_v12 = vpop.f32.mrf.mxu0  ;;  %v5323_v36 = vadd.f32 %v5322_v40, %v5301_v16  ;;  %v5304_v38 = vmul.f32 %v14372_v3, %v14372_v3 }
 0x2cb   :  { %5197 = vst [vmem:[#allocation5 + $0xb0] sm:$0xff] %v14379_v18  ;;  %v14390_v59 = vadd.f32 %v5102_v28, %v16150_v19  ;;  %v5103_v9 = vadd.f32 %v5060_v12, %v14310_v46  ;;  %v5269_v46 = vadd.f32 %v5268_v53, %v14333_v35  ;;  %v5343_v34 = vadd.f32 %v5342_v62, %v5300_v2  ;;  %v16157_v53 = vld [vmem:[#allocation45_spill] sm:$0xff] }
 0x2cc   :  { %v5062_v29 = vpop.f32.mrf.mxu0  ;;  %v5250_v39 = vadd.f32 %v5249_v13, %v14361_v15  ;;  %v5305_v24 = vmul.f32 %v14379_v18, %v14379_v18  ;;  %v5324_v2 = vadd.f32 %v5323_v36, %v5303_v25 }
 0x2cd   :  { %5198 = vst [vmem:[#allocation5 + $0xb8] sm:$0xff] %v14390_v59  ;;  %v14401_v21 = vadd.f32 %v5103_v9, %v16153_v44  ;;  %v5104_v14 = vadd.f32 %v5062_v29, %v4661_v6  ;;  %v5270_v47 = vadd.f32 %v5269_v46, %v14349_v7  ;;  %v4674_v6 = vpop.f32.mrf.mxu1  ;;  %v5344_v51 = vadd.f32 %v5343_v34, %v5302_v30  ;;  %v16158_v29 = vld [vmem:[#allocation67_spill] sm:$0xff] }
 0x2ce   :  { %v5064_v32 = vpop.f32.mrf.mxu0  ;;  %v5306_v9 = vmul.f32 %v14390_v59, %v14390_v59  ;;  %v5251_v10 = vadd.f32 %v5250_v39, %v14379_v18  ;;  %v4675_v62 = vadd.f32 %v4674_v6, %v16158_v29  ;;  %v5325_v30 = vadd.f32 %v5324_v2, %v5305_v24  ;;  %v16160_v24 = vld [vmem:[#allocation47_spill] sm:$0xff]  ;;  %v16161_v2 = vld [vmem:[#allocation49_spill] sm:$0xff]  ;;  %v16162_v29 = vld [vmem:[#allocation48_spill] sm:$0xff] }
 0x2cf   :  { %5199 = vst [vmem:[#allocation5 + $0xc0] sm:$0xff] %v14401_v21  ;;  %v5105_v11 = vadd.f32 %v5064_v32, %v4663_v48  ;;  %v14415_v28 = vadd.f32 %v5104_v14, %v16155_v63  ;;  %v5271_v19 = vadd.f32 %v5270_v47, %v14372_v3  ;;  %v5307_v8 = vmul.f32 %v14401_v21, %v14401_v21  ;;  %v16159_v32 = vld [vmem:[#allocation46_spill] sm:$0xff] }
 0x2d0   :  { %v5066_v41 = vpop.f32.mrf.mxu0  ;;  %v5345_v56 = vadd.f32 %v5344_v51, %v5304_v38  ;;  %v5252_v25 = vadd.f32 %v5251_v10, %v14401_v21 }
 0x2d1   :  { %v14421_v12 = vadd.f32 %v5105_v11, %v16156_v33  ;;  %v5106_v48 = vadd.f32 %v5066_v41, %v4665_v22  ;;  %5200 = vst [vmem:[#allocation5 + $0xc8] sm:$0xff] %v14415_v28  ;;  %v5272_v40 = vadd.f32 %v5271_v19, %v14390_v59  ;;  %v5308_v44 = vmul.f32 %v14415_v28, %v14415_v28 }
 0x2d2   :  { %v5070_v50 = vpop.f32.mrf.mxu0  ;;  %v5326_v47 = vadd.f32 %v5325_v30, %v5307_v8 }
 0x2d3   :  { %5201 = vst [vmem:[#allocation5 + $0xd0] sm:$0xff] %v14421_v12  ;;  %v14432_v16 = vadd.f32 %v5106_v48, %v16157_v53  ;;  %v5107_v22 = vadd.f32 %v5070_v50, %v4669_v61  ;;  %v5309_v14 = vmul.f32 %v14421_v12, %v14421_v12  ;;  %v5346_v61 = vadd.f32 %v5345_v56, %v5306_v9 }
 0x2d4   :  { %v5072_v46 = vpop.f32.mrf.mxu0  ;;  %v5273_v34 = vadd.f32 %v5272_v40, %v14415_v28  ;;  %v5253_v38 = vadd.f32 %v5252_v25, %v14421_v12 }
 0x2d5   :  { %5202 = vst [vmem:[#allocation5 + $0xd8] sm:$0xff] %v14432_v16  ;;  %v14443_v20 = vadd.f32 %v5107_v22, %v16159_v32  ;;  %v5310_v13 = vmul.f32 %v14432_v16, %v14432_v16  ;;  %v5108_v11 = vadd.f32 %v5072_v46, %v4671_v31  ;;  %v5347_v6 = vadd.f32 %v5346_v61, %v5308_v44 }
 0x2d6   :  { %v5074_v36 = vpop.f32.mrf.mxu0  ;;  %v5274_v39 = vadd.f32 %v5273_v34, %v14432_v16  ;;  %v5327_v51 = vadd.f32 %v5326_v47, %v5309_v14 }
 0x2d7   :  { %5203 = vst [vmem:[#allocation5 + $0xe0] sm:$0xff] %v14443_v20  ;;  %v5311_v63 = vmul.f32 %v14443_v20, %v14443_v20  ;;  %v5109_v41 = vadd.f32 %v5074_v36, %v4673_v26  ;;  %v14454_v33 = vadd.f32 %v5108_v11, %v16160_v24  ;;  %v5254_v31 = vadd.f32 %v5253_v38, %v14443_v20 }
 0x2d8   :  { %v5076_v48 = vpop.f32.mrf.mxu0  ;;  %v5348_v50 = vadd.f32 %v5347_v6, %v5310_v13 }
 0x2d9   :  { %v14458_v19 = vadd.f32 %v5109_v41, %v16161_v2  ;;  %v5110_v9 = vadd.f32 %v5076_v48, %v4675_v62  ;;  %5204 = vst [vmem:[#allocation5 + $0xe8] sm:$0xff] %v14454_v33  ;;  %v5275_v10 = vadd.f32 %v5274_v39, %v14454_v33  ;;  %v5312_v26 = vmul.f32 %v14454_v33, %v14454_v33 }
 0x2da   :  { %v5328_v8 = vadd.f32 %v5327_v51, %v5311_v63 }
 0x2db   :  { %5205 = vst [vmem:[#allocation5 + $0xf0] sm:$0xff] %v14458_v19  ;;  %v5255_v53 = vadd.f32 %v5254_v31, %v14458_v19  ;;  %v5313_v22 = vmul.f32 %v14458_v19, %v14458_v19  ;;  %v14469_v56 = vadd.f32 %v5110_v9, %v16162_v29  ;;  %v5349_v62 = vadd.f32 %v5348_v50, %v5312_v26 }
 0x2dd   :  { %v5256_v40 = vrot.slane %v5255_v53, 4  ;;  %v5329_v44 = vadd.f32 %v5328_v8, %v5313_v22  ;;  %5206 = vst [vmem:[#allocation5 + $0xf8] sm:$0xff] %v14469_v56  ;;  %v5276_v46 = vadd.f32 %v5275_v10, %v14469_v56  ;;  %v5314_v30 = vmul.f32 %v14469_v56, %v14469_v56 }
 0x2df   :  { %v5257_v25 = vadd.f32 %v5256_v40, %v5255_v53  ;;  %v5330_v14 = vrot.slane %v5329_v44, 4  ;;  %v5277_v32 = vrot.slane %v5276_v46, 4  ;;  %v5350_v61 = vadd.f32 %v5349_v62, %v5314_v30 }
 0x2e1   :  { %v5258_v34 = vrot.slane %v5257_v25, 2  ;;  %v5331_v13 = vadd.f32 %v5330_v14, %v5329_v44  ;;  %v5278_v11 = vadd.f32 %v5277_v32, %v5276_v46  ;;  %v5351_v36 = vrot.slane %v5350_v61, 4 }
 0x2e3   :  { %v5259_v47 = vadd.f32 %v5258_v34, %v5257_v25  ;;  %v5332_v38 = vrot.slane %v5331_v13, 2  ;;  %v5279_v63 = vrot.slane %v5278_v11, 2  ;;  %v5352_v41 = vadd.f32 %v5351_v36, %v5350_v61 }
 0x2e4   :  { %v12988_v34 = vmov 1966171168  }
 0x2e5   :  { %v5260_v6 = vrot.slane %v5259_v47, 1  ;;  %v5333_v39 = vadd.f32 %v5332_v38, %v5331_v13  ;;  %v5280_v24 = vadd.f32 %v5279_v63, %v5278_v11  ;;  %v5353_v48 = vrot.slane %v5352_v41, 2 }
 0x2e6   :  { %v5375_v13 = vunpack.c.l.s4 %v12988_v34  ;;  %v5377_v11 = vlaneseq }
 0x2e7   :  { %v5261_v51 = vadd.f32 %v5260_v6, %v5259_v47  ;;  %v5334_v31 = vrot.slane %v5333_v39, 1  ;;  %v5281_v2 = vrot.slane %v5280_v24, 1  ;;  %v5354_v9 = vadd.f32 %v5353_v48, %v5352_v41 }
 0x2e8   :  { %v5376_v36 = vunpack.c.0.s8 %v5375_v13  ;;  %v5378_v47 = vshrl.u32 %v5377_v11, 7 }
 0x2e9   :  { %v5335_v50 = vadd.f32 %v5334_v31, %v5333_v39  ;;  %v5357_v10 = vmul.f32 0.0078125, %v5261_v51  ;;  %v5282_v26 = vadd.f32 %v5281_v2, %v5280_v24  ;;  %v5355_v8 = vrot.slane %v5354_v9, 1  ;;  %v5239_v24 = vld [vmem:[#allocation9] sm:$0x3] }
 0x2ea   :  { %v14475_v63 = vsub.s32 %v5376_v36, %v5378_v47  ;;  %v14479_v51 = vsub.s32 0, %v5378_v47  ;;  %v14481_v31 = vsub.s32 1, %v5378_v47 }
 0x2eb   :  { %v5359_v53 = vmul.f32 0.0078125, %v5335_v50  ;;  %v5361_v22 = vmul.f32 %v5357_v10, %v5357_v10  ;;  %v5356_v29 = vadd.f32 %v5355_v8, %v5354_v9  ;;  %v5358_v62 = vmul.f32 0.0078125, %v5282_v26 }
 0x2ec   :  { %16163 = vst [vmem:[#allocation51_spill] sm:$0xff] %v14475_v63  ;;  %16164 = vst [vmem:[#allocation50_spill] sm:$0xff] %v14479_v51 }
 0x2ed   :  { %v5363_v40 = vsub.f32 %v5359_v53, %v5361_v22  ;;  %v5360_v44 = vmul.f32 0.0078125, %v5356_v29  ;;  %v5362_v46 = vmul.f32 %v5358_v62, %v5358_v62  ;;  %16165 = vst [vmem:[#allocation52_spill] sm:$0xff] %v14481_v31 }
 0x2ef   :  { %v5365_v30 = vmax.f32 %v5363_v40, 0.0  ;;  %v5364_v25 = vsub.f32 %v5360_v44, %v5362_v46 }
 0x2f1   :  { %v5367_v14 = vadd.f32 1e-05, %v5365_v30  ;;  %v5366_v32 = vmax.f32 %v5364_v25, 0.0 }
 0x2f3   :  { %v5368_v61 = vadd.f32 1e-05, %v5366_v32  ;;  %12340 = vrsqrt.f32 %v5367_v14 }
 0x2f5   :  { %12342 = vrsqrt.f32 %v5368_v61 }
 0x300   :  { %v12341_v38 = vpop.eup %12340 }
 0x302   :  { %v12343_v41 = vpop.eup %12342 }
 0x303   :  { %v5373_v6 = vcombine.low %v12341_v38, %v12343_v41 }
 0x305   :  { %v5380_v39 = vrot.slane %v5373_v6, %v14475_v63 }
 0x307   :  { %v5387_v48 = vrot.slane %v5380_v39, %v14475_v63 }
 0x309   :  { %v5389_v2 = vmul.f32 %v5387_v48, %v5239_v24 }
 0x30b   :  { %v5394_v9 = vrot.slane %v5389_v2, %v14479_v51  ;;  %v5398_v50 = vrot.slane %v5389_v2, %v14481_v31 }
 0x30d   :  { %v5401_v26 = vmul.f32 %v5394_v9, %v5357_v10  ;;  %v5402_v8 = vmul.f32 %v5398_v50, %v5358_v62  ;;  %v5422_v22 = vmul.f32 %v5394_v9, %v14198_v55  ;;  %v5423_v29 = vmul.f32 %v5398_v50, %v14202_v5  ;;  %v5240_v62 = vld [vmem:[#allocation11] sm:$0x3] }
 0x30e   :  { %v5424_v40 = vmul.f32 %v5394_v9, %v14208_v45  ;;  %v5425_v44 = vmul.f32 %v5398_v50, %v14212_v4  ;;  %v5426_v46 = vmul.f32 %v5394_v9, %v14220_v60  ;;  %v5427_v25 = vmul.f32 %v5398_v50, %v14226_v0 }
 0x30f   :  { %v5405_v53 = vcombine.low %v5401_v26, %v5402_v8  ;;  %v5428_v14 = vmul.f32 %v5394_v9, %v14231_v43  ;;  %v5429_v10 = vmul.f32 %v5398_v50, %v14236_v17  ;;  %v5430_v32 = vmul.f32 %v5394_v9, %v14244_v37 }
 0x310   :  { %v5431_v55 = vmul.f32 %v5398_v50, %v14250_v57  ;;  %v5432_v5 = vmul.f32 %v5394_v9, %v14255_v27  ;;  %v5433_v45 = vmul.f32 %v5398_v50, %v14260_v49  ;;  %v5434_v60 = vmul.f32 %v5394_v9, %v14268_v42 }
 0x311   :  { %v5412_v30 = vrot.slane %v5405_v53, %v14475_v63  ;;  %v5435_v61 = vmul.f32 %v5398_v50, %v14276_v1  ;;  %v5436_v0 = vmul.f32 %v5394_v9, %v14283_v52  ;;  %v5437_v43 = vmul.f32 %v5398_v50, %v14299_v54 }
 0x312   :  { %v5438_v17 = vmul.f32 %v5394_v9, %v14318_v23  ;;  %v5439_v37 = vmul.f32 %v5398_v50, %v14333_v35  ;;  %v5440_v57 = vmul.f32 %v5394_v9, %v14338_v58  ;;  %v5449_v27 = vmul.f32 %v5398_v50, %v14432_v16 }
 0x313   :  { %v5419_v4 = vrot.slane %v5412_v30, %v14475_v63  ;;  %v5450_v49 = vmul.f32 %v5394_v9, %v14443_v20  ;;  %v5451_v13 = vmul.f32 %v5398_v50, %v14454_v33  ;;  %v5441_v42 = vmul.f32 %v5398_v50, %v14349_v7 }
 0x314   :  { %v5442_v1 = vmul.f32 %v5394_v9, %v14361_v15  ;;  %v5452_v52 = vmul.f32 %v5394_v9, %v14458_v19  ;;  %v5453_v54 = vmul.f32 %v5398_v50, %v14469_v56  ;;  %v5443_v23 = vmul.f32 %v5398_v50, %v14372_v3 }
 0x315   :  { %v5421_v34 = vsub.f32 %v5240_v62, %v5419_v4  ;;  %v5444_v35 = vmul.f32 %v5394_v9, %v14379_v18  ;;  %v5445_v20 = vmul.f32 %v5398_v50, %v14390_v59  ;;  %v5446_v33 = vmul.f32 %v5394_v9, %v14401_v21 }
 0x316   :  { %v5447_v7 = vmul.f32 %v5398_v50, %v14415_v28  ;;  %v5448_v15 = vmul.f32 %v5394_v9, %v14421_v12 }
 0x317   :  { %v5458_v58 = vrot.slane %v5421_v34, %v14479_v51  ;;  %v5462_v16 = vrot.slane %v5421_v34, %v14481_v31 }
 0x319   :  { %v14521_v11 = vadd.f32 %v5458_v58, %v5422_v22  ;;  %v14523_v19 = vadd.f32 %v5462_v16, %v5423_v29  ;;  %v14525_v56 = vadd.f32 %v5458_v58, %v5424_v40  ;;  %v14527_v3 = vadd.f32 %v5462_v16, %v5425_v44 }
 0x31a   :  { %v14529_v18 = vadd.f32 %v5458_v58, %v5426_v46  ;;  %v5470_v36 = vadd.f32 %v5462_v16, %v5427_v25  ;;  %v5471_v47 = vadd.f32 %v5458_v58, %v5428_v14  ;;  %v5472_v38 = vadd.f32 %v5462_v16, %v5429_v10 }
 0x31b   :  { %v5473_v59 = vadd.f32 %v5458_v58, %v5430_v32  ;;  %v5474_v41 = vadd.f32 %v5462_v16, %v5431_v55  ;;  %v5475_v21 = vadd.f32 %v5458_v58, %v5432_v5  ;;  %v5476_v6 = vadd.f32 %v5462_v16, %v5433_v45 }
 0x31c   :  { %v5477_v28 = vadd.f32 %v5458_v58, %v5434_v60  ;;  %v5478_v39 = vadd.f32 %v5462_v16, %v5435_v61  ;;  %v5479_v12 = vadd.f32 %v5458_v58, %v5436_v0  ;;  %v5480_v24 = vadd.f32 %v5462_v16, %v5437_v43 }
 0x31d   :  { %v5481_v48 = vadd.f32 %v5458_v58, %v5438_v17  ;;  %v5482_v2 = vadd.f32 %v5462_v16, %v5439_v37  ;;  %v5483_v9 = vadd.f32 %v5458_v58, %v5440_v57  ;;  %v5484_v50 = vadd.f32 %v5462_v16, %v5441_v42 }
 0x31e   :  { %v5485_v26 = vadd.f32 %v5458_v58, %v5442_v1  ;;  %v5486_v8 = vadd.f32 %v5462_v16, %v5443_v23  ;;  %v5487_v53 = vadd.f32 %v5458_v58, %v5444_v35  ;;  %v5488_v22 = vadd.f32 %v5462_v16, %v5445_v20 }
 0x31f   :  { %v5489_v29 = vadd.f32 %v5458_v58, %v5446_v33  ;;  %v5490_v40 = vadd.f32 %v5462_v16, %v5447_v7  ;;  %v5491_v44 = vadd.f32 %v5458_v58, %v5448_v15  ;;  %v5492_v46 = vadd.f32 %v5462_v16, %v5449_v27 }
 0x320   :  { %v5493_v30 = vadd.f32 %v5458_v58, %v5450_v49  ;;  %v5494_v25 = vadd.f32 %v5462_v16, %v5451_v13  ;;  %v5495_v14 = vadd.f32 %v5458_v58, %v5452_v52  ;;  %v5496_v10 = vadd.f32 %v5462_v16, %v5453_v54 }
 0x321   :  { %v5497_v62 = vmax.f32 %v14521_v11, 0.0  ;;  %v5498_v32 = vmax.f32 %v14523_v19, 0.0  ;;  %v5499_v55 = vmax.f32 %v14525_v56, 0.0  ;;  %v5500_v5 = vmax.f32 %v14527_v3, 0.0 }
 0x322   :  { %v5501_v45 = vmax.f32 %v14529_v18, 0.0  ;;  %v5502_v4 = vmax.f32 %v5470_v36, 0.0  ;;  %v5503_v60 = vmax.f32 %v5471_v47, 0.0  ;;  %v5504_v61 = vmax.f32 %v5472_v38, 0.0 }
 0x323   :  { %v5505_v0 = vmax.f32 %v5473_v59, 0.0  ;;  %v5506_v43 = vmax.f32 %v5474_v41, 0.0  ;;  %v5507_v17 = vmax.f32 %v5475_v21, 0.0  ;;  %v5508_v37 = vmax.f32 %v5476_v6, 0.0 }
 0x324   :  { %v5509_v57 = vmax.f32 %v5477_v28, 0.0  ;;  %v5510_v34 = vmax.f32 %v5478_v39, 0.0  ;;  %v5511_v27 = vmax.f32 %v5479_v12, 0.0  ;;  %v5512_v49 = vmax.f32 %v5480_v24, 0.0 }
 0x325   :  { %v5513_v13 = vmax.f32 %v5481_v48, 0.0  ;;  %v5514_v42 = vmax.f32 %v5482_v2, 0.0  ;;  %v5515_v1 = vmax.f32 %v5483_v9, 0.0  ;;  %v5516_v52 = vmax.f32 %v5484_v50, 0.0 }
 0x326   :  { %v5517_v54 = vmax.f32 %v5485_v26, 0.0  ;;  %v5518_v23 = vmax.f32 %v5486_v8, 0.0  ;;  %v5519_v35 = vmax.f32 %v5487_v53, 0.0  ;;  %v5520_v58 = vmax.f32 %v5488_v22, 0.0 }
 0x327   :  { %v5521_v16 = vmax.f32 %v5489_v29, 0.0  ;;  %v5522_v20 = vmax.f32 %v5490_v40, 0.0  ;;  %v5523_v33 = vmax.f32 %v5491_v44, 0.0  ;;  %v5524_v7 = vmax.f32 %v5492_v46, 0.0 }
 0x328   :  { %v5525_v15 = vmax.f32 %v5493_v30, 0.0  ;;  %v5526_v11 = vmax.f32 %v5494_v25, 0.0  ;;  %v5527_v19 = vmax.f32 %v5495_v14, 0.0  ;;  %v5528_v56 = vmax.f32 %v5496_v10, 0.0 }
 0x329   :  { %v11856_v3 = vpack.c.bf16 %v5498_v32, %v5497_v62  ;;  %v11857_v18 = vpack.c.bf16 %v5500_v5, %v5499_v55  ;;  %v11858_v36 = vpack.c.bf16 %v5502_v4, %v5501_v45  ;;  %v11859_v47 = vpack.c.bf16 %v5504_v61, %v5503_v60 }
 0x32a   :  { %v11860_v38 = vpack.c.bf16 %v5506_v43, %v5505_v0  ;;  %v11861_v59 = vpack.c.bf16 %v5508_v37, %v5507_v17  ;;  %v11862_v41 = vpack.c.bf16 %v5510_v34, %v5509_v57  ;;  %v11863_v21 = vpack.c.bf16 %v5512_v49, %v5511_v27 }
 0x32b   :  { %v11864_v6 = vpack.c.bf16 %v5514_v42, %v5513_v13  ;;  %v14536_v28 = vpack.c.bf16 %v5516_v52, %v5515_v1  ;;  %v14538_v39 = vpack.c.bf16 %v5518_v23, %v5517_v54  ;;  %v14540_v12 = vpack.c.bf16 %v5520_v58, %v5519_v35 }
 0x32c   :  { %v14542_v24 = vpack.c.bf16 %v5522_v20, %v5521_v16  ;;  %v14544_v48 = vpack.c.bf16 %v5524_v7, %v5523_v33  ;;  %v14546_v2 = vpack.c.bf16 %v5526_v11, %v5525_v15  ;;  %v14548_v9 = vpack.c.bf16 %v5528_v56, %v5527_v19 }
 0x32d   :  { %v5642_v50 = vshrl.u32 %v11856_v3, 16  ;;  %v5645_v26 = vshll.u32 %v11856_v3, 16  ;;  %v5650_v8 = vshrl.u32 %v11857_v18, 16  ;;  %v5653_v53 = vshll.u32 %v11857_v18, 16 }
 0x32e   :  { %v5658_v22 = vshrl.u32 %v11858_v36, 16  ;;  %v5661_v29 = vshll.u32 %v11858_v36, 16  ;;  %v5666_v40 = vshrl.u32 %v11859_v47, 16  ;;  %v5669_v44 = vshll.u32 %v11859_v47, 16 }
 0x32f   :  { %v14550_v46 = vrot.slane %v5642_v50, 7  ;;  %v14552_v30 = vrot.slane %v5650_v8, 7  ;;  %v5674_v25 = vshrl.u32 %v11860_v38, 16  ;;  %v5677_v14 = vshll.u32 %v11860_v38, 16  ;;  %v5840_v38 = vld [vmem:[#allocation3 + $0x30] sm:$0x11] }
 0x330   :  { %v14554_v10 = vrot.slane %v5658_v22, 7  ;;  %v14556_v62 = vrot.slane %v5666_v40, 7  ;;  %v5682_v32 = vshrl.u32 %v11861_v59, 16  ;;  %v5685_v55 = vshll.u32 %v11861_v59, 16  ;;  %v5801_v22 = vld [vmem:[#allocation3 + $0xb0] sm:$0xff] }
 0x331   :  { %v14559_v5 = vor.u32 %v5645_v26, %v14550_v46  ;;  %v5648_v45 = vrot.slane %v14550_v46, 4  ;;  %v14563_v4 = vor.u32 %v5653_v53, %v14552_v30  ;;  %v5656_v60 = vrot.slane %v14552_v30, 4  ;;  %v5837_v26 = vld [vmem:[#allocation3 + $0x70] sm:$0xff]  ;;  %v5855_v30 = vld [vmem:[#allocation3 + $0xd8] sm:$0xff] }
 0x332   :  { %v14567_v61 = vor.u32 %v5661_v29, %v14554_v10  ;;  %v5664_v0 = vrot.slane %v14554_v10, 4  ;;  %v14571_v43 = vor.u32 %v5669_v44, %v14556_v62  ;;  %v5672_v17 = vrot.slane %v14556_v62, 4  ;;  %v5804_v29 = vld [vmem:[#allocation3 + $0x18] sm:$0x11] }
 0x333   :  { %v14574_v37 = vrot.slane %v5674_v25, 7  ;;  %v14576_v57 = vrot.slane %v5682_v32, 7  ;;  %v5690_v34 = vshrl.u32 %v11862_v41, 16  ;;  %v5693_v27 = vshll.u32 %v11862_v41, 16  ;;  %v5807_v25 = vld [vmem:[#allocation3 + $0xc8] sm:$0xff] }
 0x334   :  { %v5698_v49 = vshrl.u32 %v11863_v21, 16  ;;  %v5701_v13 = vshll.u32 %v11863_v21, 16  ;;  %v5706_v42 = vshrl.u32 %v11864_v6, 16  ;;  %v5709_v1 = vshll.u32 %v11864_v6, 16 }
 0x335   :  { %v14579_v52 = vor.u32 %v5677_v14, %v14574_v37  ;;  %v5680_v54 = vrot.slane %v14574_v37, 4  ;;  %v14583_v23 = vor.u32 %v5685_v55, %v14576_v57  ;;  %v5688_v35 = vrot.slane %v14576_v57, 4  ;;  %v5810_v14 = vld [vmem:[#allocation3 + $0xe8] sm:$0x11] }
 0x336   :  { %v14586_v58 = vrot.slane %v5690_v34, 7  ;;  %v14588_v16 = vrot.slane %v5698_v49, 7  ;;  %v14590_v20 = vrot.slane %v5706_v42, 7  ;;  %v5714_v33 = vshrl.u32 %v14536_v28, 16  ;;  %v5813_v49 = vld [vmem:[#allocation3 + $0x128] sm:$0xff]  ;;  %v5819_v42 = vld [vmem:[#allocation3 + $0x78] sm:$0xff] }
 0x337   :  { %v5717_v7 = vshll.u32 %v14536_v28, 16  ;;  %v5722_v15 = vshrl.u32 %v14538_v39, 16  ;;  %v5725_v11 = vshll.u32 %v14538_v39, 16  ;;  %v5730_v19 = vshrl.u32 %v14540_v12, 16 }
 0x338   :  { %v14598_v56 = vor.u32 %v5693_v27, %v14586_v58  ;;  %v5696_v3 = vrot.slane %v14586_v58, 4  ;;  %v14602_v18 = vor.u32 %v5701_v13, %v14588_v16  ;;  %v5704_v36 = vrot.slane %v14588_v16, 4  ;;  %v5816_v13 = vld [vmem:[#allocation3 + $0x48] sm:$0x11] }
 0x339   :  { %v14606_v47 = vor.u32 %v5709_v1, %v14590_v20  ;;  %v14609_v59 = vrot.slane %v5714_v33, 7  ;;  %v14611_v41 = vrot.slane %v5722_v15, 7  ;;  %v14613_v21 = vrot.slane %v5730_v19, 7  ;;  %v5822_v1 = vld [vmem:[#allocation3 + $0xf0] sm:$0x11] }
 0x33a   :  { %v5733_v6 = vshll.u32 %v14540_v12, 16  ;;  %v5738_v28 = vshrl.u32 %v14542_v24, 16  ;;  %v5741_v39 = vshll.u32 %v14542_v24, 16  ;;  %v5746_v24 = vshrl.u32 %v14544_v48, 16  ;;  %v5828_v19 = vld [vmem:[#allocation3 + $0x60] sm:$0x11] }
 0x33b   :  { %v14619_v50 = vor.u32 %v5717_v7, %v14609_v59  ;;  %v14623_v8 = vor.u32 %v5725_v11, %v14611_v41  ;;  %v5749_v32 = vshll.u32 %v14544_v48, 16  ;;  %v5754_v55 = vshrl.u32 %v14546_v2, 16  ;;  %v5825_v48 = vld [vmem:[#allocation3 + $0xa8] sm:$0xff] }
 0x33c   :  { %v14627_v40 = vor.u32 %v5733_v6, %v14613_v21  ;;  %v14630_v44 = vrot.slane %v5738_v28, 7  ;;  %v5757_v34 = vshll.u32 %v14546_v2, 16  ;;  %v5762_v27 = vshrl.u32 %v14548_v9, 16  ;;  %v5834_v6 = vld [vmem:[#allocation3 + $0x118] sm:$0x11] }
 0x33d   :  { %v14641_v15 = vrot.slane %v5746_v24, 7  ;;  %v5765_v11 = vshll.u32 %v14548_v9, 16  ;;  %v14644_v28 = vrot.slane %v5754_v55, 7  ;;  %v5802_v53 = vsel %vm13171_vm0, %v14559_v5, %v5801_v22  ;;  %v5831_v24 = vld [vmem:[#allocation3 + $0x28] sm:$0xff]  ;;  %v5843_v5 = vld [vmem:[#allocation3 + $0x90] sm:$0xff] }
 0x33e   :  { %v14638_v33 = vor.u32 %v5741_v39, %v14630_v44  ;;  %v14646_v2 = vrot.slane %v5762_v27, 7  ;;  %v5805_v7 = vsel %vm13056_vm6, %v5648_v45, %v5804_v29  ;;  %5803 = vst [vmem:[#allocation3 + $0xb0] sm:$0xff] %v5802_v53  ;;  %v5808_v27 = vsel %vm13171_vm0, %v14563_v4, %v5807_v25  ;;  %v5846_v45 = vld [vmem:[#allocation3 + $0x68] sm:$0x11]  ;;  %v5852_v22 = vld [vmem:[#allocation3 + $0x40] sm:$0x11] }
 0x33f   :  { %v14656_v9 = vor.u32 %v5749_v32, %v14641_v15  ;;  %v5752_v55 = vrot.slane %v14641_v15, 4  ;;  %5806 = vst [vmem:[#allocation3 + $0x18] sm:$0x11] %v5805_v7  ;;  %v5811_v46 = vsel %vm13056_vm6, %v5656_v60, %v5810_v14  ;;  %v14667_v29 = vor.u32 %v5757_v34, %v14644_v28  ;;  %5809 = vst [vmem:[#allocation3 + $0xc8] sm:$0xff] %v5808_v27  ;;  %v5849_v4 = vld [vmem:[#allocation3 + $0x108] sm:$0xff]  ;;  %v5867_v7 = vld [vmem:[#allocation3 + $0xe0] sm:$0xff] }
 0x340   :  { %v5760_v32 = vrot.slane %v14644_v28, 4  ;;  %v14671_v53 = vor.u32 %v5765_v11, %v14646_v2  ;;  %5812 = vst [vmem:[#allocation3 + $0xe8] sm:$0x11] %v5811_v46  ;;  %v5858_v25 = vld [vmem:[#allocation3 + $0x80] sm:$0x11]  ;;  %v5814_v60 = vsel %vm13171_vm0, %v14567_v61, %v5813_v49  ;;  %v5817_v14 = vsel %vm13056_vm6, %v5664_v0, %v5816_v13  ;;  %v5861_v27 = vld [vmem:[#allocation3 + $0x8] sm:$0xff] }
 0x341   :  { %v5820_v34 = vsel %vm13171_vm0, %v14571_v43, %v5819_v42  ;;  %v5823_v11 = vsel %vm13056_vm6, %v5672_v17, %v5822_v1  ;;  %v5864_v46 = vld [vmem:[#allocation3 + $0x130] sm:$0x11]  ;;  %5815 = vst [vmem:[#allocation3 + $0x128] sm:$0xff] %v5814_v60  ;;  %5818 = vst [vmem:[#allocation3 + $0x48] sm:$0x11] %v5817_v14  ;;  %v5826_v10 = vsel %vm13171_vm0, %v14579_v52, %v5825_v48  ;;  %v5873_v17 = vld [vmem:[#allocation3 + $0x100] sm:$0xff] }
 0x342   :  { %5821 = vst [vmem:[#allocation3 + $0x78] sm:$0xff] %v5820_v34  ;;  %5824 = vst [vmem:[#allocation3 + $0xf0] sm:$0x11] %v5823_v11  ;;  %v5829_v61 = vsel %vm13056_vm6, %v5680_v54, %v5828_v19  ;;  %v5832_v62 = vsel %vm13171_vm0, %v14583_v23, %v5831_v24  ;;  %v5835_v0 = vsel %vm13056_vm6, %v5688_v35, %v5834_v6  ;;  %v5870_v43 = vld [vmem:[#allocation3 + $0x10] sm:$0x11]  ;;  %v5885_v13 = vld [vmem:[#allocation3 + $0x58] sm:$0xff] }
 0x343   :  { %v5876_v49 = vld [vmem:[#allocation3 + $0x98] sm:$0x11]  ;;  %5827 = vst [vmem:[#allocation3 + $0xa8] sm:$0xff] %v5826_v10  ;;  %5830 = vst [vmem:[#allocation3 + $0x60] sm:$0x11] %v5829_v61  ;;  %v5838_v37 = vsel %vm13171_vm0, %v14598_v56, %v5837_v26  ;;  %v5841_v52 = vsel %vm13056_vm6, %v5696_v3, %v5840_v38  ;;  %v5844_v57 = vsel %vm13171_vm0, %v14602_v18, %v5843_v5  ;;  %v5879_v23 = vld [vmem:[#allocation3 + $0xd0] sm:$0xff] }
 0x344   :  { %5833 = vst [vmem:[#allocation3 + $0x28] sm:$0xff] %v5832_v62  ;;  %5836 = vst [vmem:[#allocation3 + $0x118] sm:$0x11] %v5835_v0  ;;  %v5847_v54 = vsel %vm13056_vm6, %v5704_v36, %v5846_v45  ;;  %v5882_v35 = vld [vmem:[#allocation3] sm:$0x11]  ;;  %v5850_v58 = vsel %vm13171_vm0, %v14606_v47, %v5849_v4  ;;  %v16168_v56 = vrot.slane %v14590_v20, 4  ;;  %v5856_v16 = vsel %vm13171_vm0, %v14619_v50, %v5855_v30 }
 0x345   :  { %5839 = vst [vmem:[#allocation3 + $0x70] sm:$0xff] %v5838_v37  ;;  %5842 = vst [vmem:[#allocation3 + $0x30] sm:$0x11] %v5841_v52  ;;  %v16169_v18 = vrot.slane %v14609_v59, 4  ;;  %v5888_v38 = vld [vmem:[#allocation3 + $0x120] sm:$0x11]  ;;  %v5862_v20 = vsel %vm13171_vm0, %v14623_v8, %v5861_v27  ;;  %v5868_v59 = vsel %vm13171_vm0, %v14627_v40, %v5867_v7  ;;  %v5883_v40 = vsel %vm13056_vm6, %v5752_v55, %v5882_v35 }
 0x346   :  { %5845 = vst [vmem:[#allocation3 + $0x90] sm:$0xff] %v5844_v57  ;;  %5848 = vst [vmem:[#allocation3 + $0x68] sm:$0x11] %v5847_v54  ;;  %v5853_v3 = vsel %vm13056_vm6, %v16168_v56, %v5852_v22  ;;  %v5891_v26 = vld [vmem:[#allocation3 + $0xc0] sm:$0xff]  ;;  %v5894_v42 = vld [vmem:[#allocation3 + $0x50] sm:$0x11] }
 0x347   :  { %v5859_v36 = vsel %vm13056_vm6, %v16169_v18, %v5858_v25  ;;  %5851 = vst [vmem:[#allocation3 + $0x108] sm:$0xff] %v5850_v58  ;;  %5854 = vst [vmem:[#allocation3 + $0x40] sm:$0x11] %v5853_v3  ;;  %v16170_v47 = vrot.slane %v14611_v41, 4  ;;  %v16171_v1 = vrot.slane %v14613_v21, 4  ;;  %v5874_v41 = vsel %vm13171_vm0, %v14638_v33, %v5873_v17 }
 0x348   :  { %5857 = vst [vmem:[#allocation3 + $0xd8] sm:$0xff] %v5856_v16  ;;  %5860 = vst [vmem:[#allocation3 + $0x80] sm:$0x11] %v5859_v36  ;;  %v16172_v8 = vrot.slane %v14630_v44, 4  ;;  %v5880_v21 = vsel %vm13171_vm0, %v14656_v9, %v5879_v23  ;;  %v5886_v44 = vsel %vm13171_vm0, %v14667_v29, %v5885_v13  ;;  %v5889_v33 = vsel %vm13056_vm6, %v5760_v32, %v5888_v38 }
 0x349   :  { %v5865_v50 = vsel %vm13056_vm6, %v16170_v47, %v5864_v46  ;;  %v5871_v48 = vsel %vm13056_vm6, %v16171_v1, %v5870_v43  ;;  %5863 = vst [vmem:[#allocation3 + $0x8] sm:$0xff] %v5862_v20  ;;  %5869 = vst [vmem:[#allocation3 + $0xe0] sm:$0xff] %v5868_v59  ;;  %v5892_v15 = vsel %vm13171_vm0, %v14671_v53, %v5891_v26  ;;  %v16173_v6 = vrot.slane %v14646_v2, 4 }
 0x34a   :  { %5866 = vst [vmem:[#allocation3 + $0x130] sm:$0x11] %v5865_v50  ;;  %5872 = vst [vmem:[#allocation3 + $0x10] sm:$0x11] %v5871_v48  ;;  %v5877_v19 = vsel %vm13056_vm6, %v16172_v8, %v5876_v49 }
 0x34b   :  { %5875 = vst [vmem:[#allocation3 + $0x100] sm:$0xff] %v5874_v41  ;;  %5878 = vst [vmem:[#allocation3 + $0x98] sm:$0x11] %v5877_v19  ;;  %v5895_v24 = vsel %vm13056_vm6, %v16173_v6, %v5894_v42 }
 0x34c   :  { %5881 = vst [vmem:[#allocation3 + $0xd0] sm:$0xff] %v5880_v21  ;;  %5884 = vst [vmem:[#allocation3] sm:$0x11] %v5883_v40 }
 0x34d   :  { %5887 = vst [vmem:[#allocation3 + $0x58] sm:$0xff] %v5886_v44  ;;  %5890 = vst [vmem:[#allocation3 + $0x120] sm:$0x11] %v5889_v33 }
 0x34e   :  { %5893 = vst [vmem:[#allocation3 + $0xc0] sm:$0xff] %v5892_v15  ;;  %5896 = vst [vmem:[#allocation3 + $0x50] sm:$0x11] %v5895_v24 }
 0x34f   :  { %12976 = dma.done.wait [#allocation8 + $0x2], 36864 }
 0x350   :  { %12977 = vsyncadd [#allocation8 + $0x2], 4294930432  ;;  %v12344_v9 = vld [vmem:[#allocation7 + $0x374] ss:$8 sps:$4 sm:$0xff]   ;;  %v12348_v55 = vld [vmem:[#allocation7 + $0x370] ss:$8 sps:$4 sm:$0xff]  }
 0x351   :  { %v12346_v28 = vld [vmem:[#allocation7 + $0x74] ss:$8 sps:$4 sm:$0xff]   ;;  %6276 = vmatprep.subr.bf16.mxu1 %v12344_v9  ;;  %v12349_v5 = vld [vmem:[#allocation7 + $0x70] ss:$8 sps:$4 sm:$0xff]   ;;  %v12350_v45 = vld [vmem:[#allocation7 + $0x364] ss:$8 sps:$4 sm:$0xff]  }
 0x352   :  { %6629 = vmatprep.subr.bf16.mxu0 %v12346_v28  ;;  %6277 = vmatpush1.bf16.msra.mxu1 %v12348_v55  ;;  %v12352_v12 = vld [vmem:[#allocation7 + $0x64] ss:$8 sps:$4 sm:$0xff]   ;;  %v12354_v2 = vld [vmem:[#allocation7 + $0x360] ss:$8 sps:$4 sm:$0xff]   ;;  %v12356_v22 = vld [vmem:[#allocation7 + $0x354] ss:$8 sps:$4 sm:$0xff]  }
 0x353   :  { %6630 = vmatpush1.bf16.msra.mxu0 %v12349_v5  ;;  %6278 = vmatprep.subr.bf16.mxu1 %v12350_v45  ;;  %v12355_v39 = vld [vmem:[#allocation7 + $0x60] ss:$8 sps:$4 sm:$0xff]   ;;  %v12358_v29 = vld [vmem:[#allocation7 + $0x54] ss:$8 sps:$4 sm:$0xff]   ;;  %v12360_v32 = vld [vmem:[#allocation7 + $0x350] ss:$8 sps:$4 sm:$0xff]  }
 0x354   :  { %6631 = vmatprep.subr.bf16.mxu0 %v12352_v12  ;;  %v12361_v53 = vld [vmem:[#allocation7 + $0x50] ss:$8 sps:$4 sm:$0xff]   ;;  %v12362_v7 = vld [vmem:[#allocation7 + $0x344] ss:$8 sps:$4 sm:$0xff]   ;;  %v12366_v30 = vld [vmem:[#allocation7 + $0x340] ss:$8 sps:$4 sm:$0xff]  }
 0x355   :  { %v12364_v4 = vld [vmem:[#allocation7 + $0x44] ss:$8 sps:$4 sm:$0xff]   ;;  %v12367_v25 = vld [vmem:[#allocation7 + $0x40] ss:$8 sps:$4 sm:$0xff]   ;;  %v12368_v60 = vld [vmem:[#allocation7 + $0x334] ss:$8 sps:$4 sm:$0xff]  }
 0x356   :  { %6279 = vmatpush1.bf16.msra.mxu1 %v12354_v2  ;;  %v12370_v14 = vld [vmem:[#allocation7 + $0x34] ss:$8 sps:$4 sm:$0xff]   ;;  %v12372_v34 = vld [vmem:[#allocation7 + $0x330] ss:$8 sps:$4 sm:$0xff]   ;;  %v12374_v27 = vld [vmem:[#allocation7 + $0x324] ss:$8 sps:$4 sm:$0xff]  }
 0x357   :  { %6632 = vmatpush1.bf16.msra.mxu0 %v12355_v39  ;;  %6280 = vmatprep.subr.bf16.mxu1 %v12356_v22  ;;  %v12373_v11 = vld [vmem:[#allocation7 + $0x30] ss:$8 sps:$4 sm:$0xff]   ;;  %v12376_v46 = vld [vmem:[#allocation7 + $0x24] ss:$8 sps:$4 sm:$0xff]   ;;  %v12378_v10 = vld [vmem:[#allocation7 + $0x320] ss:$8 sps:$4 sm:$0xff]  }
 0x358   :  { %6633 = vmatprep.subr.bf16.mxu0 %v12358_v29  ;;  %v12379_v61 = vld [vmem:[#allocation7 + $0x20] ss:$8 sps:$4 sm:$0xff]   ;;  %v12380_v62 = vld [vmem:[#allocation7 + $0x314] ss:$8 sps:$4 sm:$0xff]   ;;  %v12384_v43 = vld [vmem:[#allocation7 + $0x310] ss:$8 sps:$4 sm:$0xff]  }
 0x359   :  { %v12382_v0 = vld [vmem:[#allocation7 + $0x14] ss:$8 sps:$4 sm:$0xff]   ;;  %v12385_v17 = vld [vmem:[#allocation7 + $0x10] ss:$8 sps:$4 sm:$0xff]   ;;  %v12386_v49 = vld [vmem:[#allocation7 + $0x304] ss:$8 sps:$4 sm:$0xff]  }
 0x35a   :  { %6281 = vmatpush1.bf16.msra.mxu1 %v12360_v32  ;;  %v12388_v37 = vld [vmem:[#allocation7 + $0x4] ss:$8 sps:$4 sm:$0xff]   ;;  %v12390_v52 = vld [vmem:[#allocation7 + $0x300] ss:$8 sps:$4 sm:$0xff]   ;;  %v12392_v54 = vld [vmem:[#allocation7 + $0x3f4] ss:$8 sps:$4 sm:$0xff]  }
 0x35b   :  { %6634 = vmatpush1.bf16.msra.mxu0 %v12361_v53  ;;  %6282 = vmatprep.subr.bf16.mxu1 %v12362_v7  ;;  %v12391_v57 = vld [vmem:[#allocation7] ss:$8 sps:$4 sm:$0xff]   ;;  %v12394_v23 = vld [vmem:[#allocation7 + $0xf4] ss:$8 sps:$4 sm:$0xff]   ;;  %v12396_v35 = vld [vmem:[#allocation7 + $0x3f0] ss:$8 sps:$4 sm:$0xff]  }
 0x35c   :  { %6635 = vmatprep.subr.bf16.mxu0 %v12364_v4  ;;  %v12397_v13 = vld [vmem:[#allocation7 + $0xf0] ss:$8 sps:$4 sm:$0xff]   ;;  %v12398_v58 = vld [vmem:[#allocation7 + $0x3e4] ss:$8 sps:$4 sm:$0xff]   ;;  %v12402_v3 = vld [vmem:[#allocation7 + $0x3e0] ss:$8 sps:$4 sm:$0xff]  }
 0x35d   :  { %v12400_v56 = vld [vmem:[#allocation7 + $0xe4] ss:$8 sps:$4 sm:$0xff]   ;;  %v12403_v16 = vld [vmem:[#allocation7 + $0xe0] ss:$8 sps:$4 sm:$0xff]   ;;  %v12404_v18 = vld [vmem:[#allocation7 + $0x3d4] ss:$8 sps:$4 sm:$0xff]  }
 0x35e   :  { %6283 = vmatpush1.bf16.msra.mxu1 %v12366_v30  ;;  %v12406_v36 = vld [vmem:[#allocation7 + $0xd4] ss:$8 sps:$4 sm:$0xff]   ;;  %v12408_v38 = vld [vmem:[#allocation7 + $0x3d0] ss:$8 sps:$4 sm:$0xff]   ;;  %v12410_v42 = vld [vmem:[#allocation7 + $0x3c4] ss:$8 sps:$4 sm:$0xff]  }
 0x35f   :  { %6636 = vmatpush1.bf16.msra.mxu0 %v12367_v25  ;;  %6284 = vmatprep.subr.bf16.mxu1 %v12368_v60  ;;  %v12409_v26 = vld [vmem:[#allocation7 + $0xd0] ss:$8 sps:$4 sm:$0xff]   ;;  %v12412_v20 = vld [vmem:[#allocation7 + $0xc4] ss:$8 sps:$4 sm:$0xff]   ;;  %v12414_v47 = vld [vmem:[#allocation7 + $0x3c0] ss:$8 sps:$4 sm:$0xff]  }
 0x360   :  { %6637 = vmatprep.subr.bf16.mxu0 %v12370_v14  ;;  %v14772_v50 = vld [vmem:[#allocation3 + $0xb0] sm:$0xff]  ;;  %v14774_v59 = vld [vmem:[#allocation3 + $0xc8] sm:$0xff]  ;;  %v14784_v30 = vld [vmem:[#allocation3 + $0x78] sm:$0xff]  ;;  %s12989_s2 = smov [#allocation5]  }
 0x361   :  { %v5899_v1 = vld [vmem:[#allocation3 + $0x110] sm:$0xff]  ;;  %v12415_v48 = vld [vmem:[#allocation7 + $0xc0] ss:$8 sps:$4 sm:$0xff]   ;;  %v11385_v8 = vcombine.high %v14772_v50, %v14774_v59  ;;  %v12422_v33 = vld [vmem:[#allocation7 + $0x3a4] ss:$8 sps:$4 sm:$0xff]   ;;  %v11384_v4 = vcombine.low %v14772_v50, %v14774_v59  ;;  %s10862_s30 = sshll.u32 %s12989_s2, 4  ;;  %s10863_s30 = int_to_ptr.vmem [resolvable:$true] %s10862_s30 }
 0x362   :  { %6285 = vmatpush1.bf16.msra.mxu1 %v12372_v34  ;;  %v12416_v41 = vld [vmem:[#allocation7 + $0x3b4] ss:$8 sps:$4 sm:$0xff]   ;;  %v11433_v19 = vcombine.high %v5899_v1, %v14772_v50  ;;  %v12420_v40 = vld [vmem:[#allocation7 + $0x3b0] ss:$8 sps:$4 sm:$0xff]   ;;  %v12424_v15 = vld [vmem:[#allocation7 + $0xa4] ss:$8 sps:$4 sm:$0xff]   ;;  %v11432_v7 = vcombine.low %v5899_v1, %v14772_v50  ;;  %p12951_p8 = scmp.lt.s32.totalorder %s10863_s30, %s10863_s30 }
 0x363   :  { %6638 = vmatpush1.bf16.msra.mxu0 %v12373_v11  ;;  %6286 = vmatprep.subr.bf16.mxu1 %v12374_v27  ;;  %v12418_v21 = vld [vmem:[#allocation7 + $0xb4] ss:$8 sps:$4 sm:$0xff]   ;;  %v12421_v44 = vld [vmem:[#allocation7 + $0xb0] ss:$8 sps:$4 sm:$0xff]   ;;  %v12426_v6 = vld [vmem:[#allocation7 + $0x3a0] ss:$8 sps:$4 sm:$0xff]  }
 0x364   :  { %6639 = vmatprep.subr.bf16.mxu0 %v12376_v46  ;;  %6308 = vmatprep.mubr.bf16.mxu1 %v11385_v8  ;;  %v12427_v24 = vld [vmem:[#allocation7 + $0xa0] ss:$8 sps:$4 sm:$0xff]   ;;  %v12428_v9 = vld [vmem:[#allocation7 + $0x394] ss:$8 sps:$4 sm:$0xff]   ;;  %v12432_v55 = vld [vmem:[#allocation7 + $0x390] ss:$8 sps:$4 sm:$0xff]  }
 0x365   :  { %6661 = vmatprep.mubr.bf16.mxu0 %v11433_v19  ;;  %v12430_v28 = vld [vmem:[#allocation7 + $0x94] ss:$8 sps:$4 sm:$0xff]   ;;  %v12433_v5 = vld [vmem:[#allocation7 + $0x90] ss:$8 sps:$4 sm:$0xff]   ;;  %v12434_v45 = vld [vmem:[#allocation7 + $0x384] ss:$8 sps:$4 sm:$0xff]  }
 0x366   :  { %6287 = vmatpush1.bf16.msra.mxu1 %v12378_v10  ;;  %v12436_v12 = vld [vmem:[#allocation7 + $0x84] ss:$8 sps:$4 sm:$0xff]   ;;  %v12438_v2 = vld [vmem:[#allocation7 + $0x380] ss:$8 sps:$4 sm:$0xff]   ;;  %v12444_v22 = vld [vmem:[#allocation7 + $0x674] ss:$8 sps:$4 sm:$0xff]  }
 0x367   :  { %6640 = vmatpush1.bf16.msra.mxu0 %v12379_v61  ;;  %6288 = vmatprep.subr.bf16.mxu1 %v12380_v62  ;;  %v12439_v39 = vld [vmem:[#allocation7 + $0x80] ss:$8 sps:$4 sm:$0xff]   ;;  %v12447_v29 = vld [vmem:[#allocation7 + $0x474] ss:$8 sps:$4 sm:$0xff]   ;;  %v12442_v32 = vld [vmem:[#allocation7 + $0x670] ss:$8 sps:$4 sm:$0xff]  }
 0x368   :  { %6641 = vmatprep.subr.bf16.mxu0 %v12382_v0  ;;  %v14779_v53 = vld [vmem:[#allocation3 + $0x128] sm:$0xff]  ;;  %v12445_v25 = vld [vmem:[#allocation7 + $0x470] ss:$8 sps:$4 sm:$0xff]   ;;  %v12458_v10 = vld [vmem:[#allocation7 + $0x654] ss:$8 sps:$4 sm:$0xff]   ;;  %s12946_s8 = scalar_lea.vmem %s10863_s30, 4096 }
 0x369   :  { %v12450_v60 = vld [vmem:[#allocation7 + $0x664] ss:$8 sps:$4 sm:$0xff]   ;;  %v11387_v34 = vcombine.high %v14779_v53, %v14784_v30  ;;  %v14790_v11 = vcombine.high %v14774_v59, %v14779_v53  ;;  %v12448_v27 = vld [vmem:[#allocation7 + $0x660] ss:$8 sps:$4 sm:$0xff]   ;;  %v12461_v61 = vld [vmem:[#allocation7 + $0x454] ss:$8 sps:$4 sm:$0xff]   ;;  %v11386_v0 = vcombine.low %v14779_v53, %v14784_v30  ;;  %p12947_p7 = scmp.ne.s32.totalorder %s10863_s30, %s12946_s8  ;;  %p12952_p9 = scmp.lt.s32.totalorder %s12946_s8, %s12946_s8 }
 0x36a   :  { %6289 = vmatpush1.bf16.msra.mxu1 %v12384_v43  ;;  %v12453_v14 = vld [vmem:[#allocation7 + $0x464] ss:$8 sps:$4 sm:$0xff]   ;;  %v12451_v46 = vld [vmem:[#allocation7 + $0x460] ss:$8 sps:$4 sm:$0xff]   ;;  %v12456_v62 = vld [vmem:[#allocation7 + $0x650] ss:$8 sps:$4 sm:$0xff]   ;;  %v14797_v43 = vcombine.low %v14774_v59, %v14779_v53 }
 0x36b   :  { %6642 = vmatpush1.bf16.msra.mxu0 %v12385_v17  ;;  %6290 = vmatprep.subr.bf16.mxu1 %v12386_v49  ;;  %v14799_v17 = vld [vmem:[#allocation3 + $0xa8] sm:$0xff]  ;;  %v14823_v1 = vld [vmem:[#allocation3 + $0x90] sm:$0xff]  ;;  %p12953_p10 = por %p12952_p9, %p12951_p8 }
 0x36c   :  { %6643 = vmatprep.subr.bf16.mxu0 %v12388_v37  ;;  %v14801_v49 = vld [vmem:[#allocation3 + $0x28] sm:$0xff]  ;;  %v12459_v37 = vld [vmem:[#allocation7 + $0x450] ss:$8 sps:$4 sm:$0xff]  }
 0x36d   :  { %p12954_p11 = pnand %p12953_p10, %p12947_p7 }
 0x36e   :  { %6291 = vmatpush1.bf16.msra.mxu1 %v12390_v52  ;;  %v12464_v52 = vld [vmem:[#allocation7 + $0x644] ss:$8 sps:$4 sm:$0xff]  }
 0x36f   :  { %6644 = vmatpush1.bf16.msra.mxu0 %v12391_v57  ;;  %6292 = vmatprep.subr.bf16.mxu1 %v12392_v54  ;;  %v12467_v57 = vld [vmem:[#allocation7 + $0x444] ss:$8 sps:$4 sm:$0xff]   ;;  %v11389_v54 = vcombine.high %v14799_v17, %v14801_v49 }
 0x370   :  { %6645 = vmatprep.subr.bf16.mxu0 %v12394_v23  ;;  %v14807_v23 = vcombine.high %v14784_v30, %v14799_v17 }
 0x372   :  { %6293 = vmatpush2.bf16.msra.mxu1 %v12396_v35  ;;  %v12462_v35 = vld [vmem:[#allocation7 + $0x640] ss:$8 sps:$4 sm:$0xff]  }
 0x373   :  { %6646 = vmatpush2.bf16.msra.mxu0 %v12397_v13  ;;  %6294 = vmatprep.subr.bf16.mxu1 %v12398_v58  ;;  %v12465_v13 = vld [vmem:[#allocation7 + $0x440] ss:$8 sps:$4 sm:$0xff]   ;;  %v7263_v58 = vshrl.u32 %v14772_v50, 16 }
 0x374   :  { %6647 = vmatprep.subr.bf16.mxu0 %v12400_v56  ;;  %v12472_v56 = vld [vmem:[#allocation7 + $0x634] ss:$8 sps:$4 sm:$0xff]  }
 0x376   :  { %6295 = vmatpush2.bf16.msra.mxu1 %v12402_v3  ;;  %v12475_v3 = vld [vmem:[#allocation7 + $0x434] ss:$8 sps:$4 sm:$0xff]  }
 0x377   :  { %6648 = vmatpush2.bf16.msra.mxu0 %v12403_v16  ;;  %6296 = vmatprep.subr.bf16.mxu1 %v12404_v18  ;;  %v7266_v16 = vshll.u32 %v14772_v50, 16  ;;  %v12470_v18 = vld [vmem:[#allocation7 + $0x630] ss:$8 sps:$4 sm:$0xff]   ;;  %v12478_v50 = vld [vmem:[#allocation7 + $0x624] ss:$8 sps:$4 sm:$0xff]  }
 0x378   :  { %6649 = vmatprep.subr.bf16.mxu0 %v12406_v36  ;;  %v7277_v36 = vshrl.u32 %v14774_v59, 16 }
 0x37a   :  { %6297 = vmatpush2.bf16.msra.mxu1 %v12408_v38  ;;  %v7280_v38 = vshll.u32 %v14774_v59, 16  ;;  %v7268_v59 = vrot.slane %v7266_v16, 5 }
 0x37b   :  { %6650 = vmatpush2.bf16.msra.mxu0 %v12409_v26  ;;  %6298 = vmatprep.subr.bf16.mxu1 %v12410_v42  ;;  %v11388_v26 = vcombine.low %v14799_v17, %v14801_v49  ;;  %v14819_v42 = vcombine.low %v14784_v30, %v14799_v17 }
 0x37c   :  { %6651 = vmatprep.subr.bf16.mxu0 %v12412_v20  ;;  %v12473_v20 = vld [vmem:[#allocation7 + $0x430] ss:$8 sps:$4 sm:$0xff]  }
 0x37e   :  { %6299 = vmatpush2.bf16.msra.mxu1 %v12414_v47  ;;  %v14821_v47 = vld [vmem:[#allocation3 + $0x70] sm:$0xff] }
 0x37f   :  { %6652 = vmatpush2.bf16.msra.mxu0 %v12415_v48  ;;  %6300 = vmatprep.subr.bf16.mxu1 %v12416_v41  ;;  %v12481_v48 = vld [vmem:[#allocation7 + $0x424] ss:$8 sps:$4 sm:$0xff]   ;;  %v7265_v41 = vrot.slane %v7263_v58, 4  ;;  %v11391_v8 = vcombine.high %v14821_v47, %v14823_v1  ;;  %v14829_v19 = vcombine.high %v14801_v49, %v14821_v47  ;;  %v12503_v58 = vld [vmem:[#allocation7 + $0x4f0] ss:$8 sps:$4 sm:$0xff]  }
 0x380   :  { %6653 = vmatprep.subr.bf16.mxu0 %v12418_v21  ;;  %v7279_v21 = vrot.slane %v7277_v36, 4  ;;  %v12511_v36 = vld [vmem:[#allocation7 + $0x4e4] ss:$8 sps:$4 sm:$0xff]  }
 0x382   :  { %6301 = vmatpush2.bf16.msra.mxu1 %v12420_v40  ;;  %v7282_v40 = vrot.slane %v7280_v38, 5 }
 0x383   :  { %6654 = vmatpush2.bf16.msra.mxu0 %v12421_v44  ;;  %6302 = vmatprep.subr.bf16.mxu1 %v12422_v33  ;;  %v12476_v44 = vld [vmem:[#allocation7 + $0x620] ss:$8 sps:$4 sm:$0xff]  }
 0x384   :  { %6655 = vmatprep.subr.bf16.mxu0 %v12424_v15  ;;  %v12479_v33 = vld [vmem:[#allocation7 + $0x420] ss:$8 sps:$4 sm:$0xff]   ;;  %v12486_v15 = vld [vmem:[#allocation7 + $0x614] ss:$8 sps:$4 sm:$0xff]  }
 0x386   :  { %6303 = vmatpush2.bf16.msra.mxu1 %v12426_v6  ;;  %v12489_v6 = vld [vmem:[#allocation7 + $0x414] ss:$8 sps:$4 sm:$0xff]  }
 0x387   :  { %6656 = vmatpush2.bf16.msra.mxu0 %v12427_v24  ;;  %6304 = vmatprep.subr.bf16.mxu1 %v12428_v9  ;;  %v14832_v24 = vld [vmem:[#allocation3 + $0x108] sm:$0xff]  ;;  %v14835_v9 = vld [vmem:[#allocation3 + $0xd8] sm:$0xff] }
 0x388   :  { %6657 = vmatprep.subr.bf16.mxu0 %v12430_v28  ;;  %v7269_v28 = vor.u32 %v7268_v59, %v7265_v41  ;;  %v12509_v41 = vld [vmem:[#allocation7 + $0x4e0] ss:$8 sps:$4 sm:$0xff]   ;;  %v12518_v59 = vld [vmem:[#allocation7 + $0x6d4] ss:$8 sps:$4 sm:$0xff]  }
 0x38a   :  { %6305 = vmatpush2.bf16.msra.mxu1 %v12432_v55  ;;  %v7283_v55 = vor.u32 %v7282_v40, %v7279_v21 }
 0x38b   :  { %6658 = vmatpush2.bf16.msra.mxu0 %v12433_v5  ;;  %6306 = vmatprep.subr.bf16.mxu1 %v12434_v45  ;;  %v11390_v5 = vcombine.low %v14821_v47, %v14823_v1  ;;  %v14841_v45 = vcombine.low %v14801_v49, %v14821_v47 }
 0x38c   :  { %6659 = vmatprep.subr.bf16.mxu0 %v12436_v12  ;;  %v5909_v12 = vld [vmem:[#allocation3 + $0xa0] sm:$0xff] }
 0x38e   :  { %6307 = vmatpush2.bf16.msra.mxu1 %v12438_v2  ;;  %v12484_v2 = vld [vmem:[#allocation7 + $0x610] ss:$8 sps:$4 sm:$0xff]  }
 0x38f   :  { %6660 = vmatpush2.bf16.msra.mxu0 %v12439_v39  ;;  %7031 = vmatprep.subr.bf16.mxu1 %v12444_v22  ;;  %v12487_v39 = vld [vmem:[#allocation7 + $0x410] ss:$8 sps:$4 sm:$0xff]   ;;  %v12492_v22 = vld [vmem:[#allocation7 + $0x604] ss:$8 sps:$4 sm:$0xff]  }
 0x390   :  { %7906 = vmatprep.subr.bf16.mxu0 %v12447_v29  ;;  %v12495_v29 = vld [vmem:[#allocation7 + $0x404] ss:$8 sps:$4 sm:$0xff]  }
 0x391   :  { %6309 = vmatmul.mubr.bf16.vlgmr.msra.gmra.mxu1 %v11384_v4  ;;  %v11441_v4 = vcombine.high %v5909_v12, %v14832_v24 }
 0x392   :  { %6662 = vmatmul.mubr.bf16.vlgmr.msra.gmra.mxu0 %v11432_v7  ;;  %7032 = vmatpush1.bf16.msra.mxu1 %v12442_v32  ;;  %v12490_v32 = vld [vmem:[#allocation7 + $0x600] ss:$8 sps:$4 sm:$0xff]   ;;  %v11393_v7 = vcombine.high %v14832_v24, %v14835_v9 }
 0x393   :  { %7907 = vmatpush1.bf16.msra.mxu0 %v12445_v25  ;;  %7033 = vmatprep.subr.bf16.mxu1 %v12450_v60  ;;  %v7270_v25 = vrot.slane %v7269_v28, 4  ;;  %v7284_v60 = vrot.slane %v7283_v55, 4  ;;  %v12519_v28 = vld [vmem:[#allocation7 + $0x4d0] ss:$8 sps:$4 sm:$0xff]   ;;  %v7294_v55 = vshll.u32 %v14779_v53, 16 }
 0x394   :  { %7908 = vmatprep.subr.bf16.mxu0 %v12453_v14  ;;  %6318 = vmatprep.mubr.bf16.mxu1 %v11387_v34  ;;  %v12493_v14 = vld [vmem:[#allocation7 + $0x400] ss:$8 sps:$4 sm:$0xff]   ;;  %v7211_v34 = vld [vmem:[#allocation3 + $0x18] sm:$0x11] }
 0x395   :  { %6671 = vmatprep.mubr.bf16.mxu0 %v14790_v11 }
 0x396   :  { %7034 = vmatpush1.bf16.msra.mxu1 %v12448_v27  ;;  %v7213_v27 = vld [vmem:[#allocation3 + $0xe8] sm:$0x11] }
 0x397   :  { %7909 = vmatpush1.bf16.msra.mxu0 %v12451_v46  ;;  %7035 = vmatprep.subr.bf16.mxu1 %v12458_v10  ;;  %v12502_v46 = vld [vmem:[#allocation7 + $0x6f4] ss:$8 sps:$4 sm:$0xff]   ;;  %v7272_v10 = vshll.u32 %v7211_v34, 16  ;;  %v12530_v34 = vld [vmem:[#allocation7 + $0x6b0] ss:$8 sps:$4 sm:$0xff]  }
 0x398   :  { %7910 = vmatprep.subr.bf16.mxu0 %v12461_v61  ;;  %v7286_v61 = vshll.u32 %v7213_v27, 16  ;;  %v14895_v27 = vld [vmem:[#allocation3 + $0x58] sm:$0xff] }
 0x399   :  { %6319 = vmatmul.mubr.bf16.gmra.mxu1 %v11386_v0  ;;  %v12500_v0 = vld [vmem:[#allocation7 + $0x6f0] ss:$8 sps:$4 sm:$0xff]  }
 0x39a   :  { %6672 = vmatmul.mubr.bf16.gmra.mxu0 %v14797_v43  ;;  %7036 = vmatpush1.bf16.msra.mxu1 %v12456_v62  ;;  %v12505_v62 = vld [vmem:[#allocation7 + $0x4f4] ss:$8 sps:$4 sm:$0xff]  }
 0x39b   :  { %7911 = vmatpush1.bf16.msra.mxu0 %v12459_v37  ;;  %7037 = vmatprep.subr.bf16.mxu1 %v12464_v52  ;;  %v14847_v37 = vld [vmem:[#allocation3 + $0x8] sm:$0xff]  ;;  %v7274_v52 = vrot.slane %v7272_v10, 5 }
 0x39c   :  { %7912 = vmatprep.subr.bf16.mxu0 %v12467_v57  ;;  %6328 = vmatprep.mubr.bf16.mxu1 %v11389_v54  ;;  %v7288_v57 = vrot.slane %v7286_v61, 5  ;;  %v11392_v54 = vcombine.low %v14832_v24, %v14835_v9  ;;  %v14877_v40 = vcombine.low %v14835_v9, %v14847_v37  ;;  %v14903_v61 = vld [vmem:[#allocation3 + $0xc0] sm:$0xff] }
 0x39d   :  { %6681 = vmatprep.mubr.bf16.mxu0 %v14807_v23 }
 0x39e   :  { %7038 = vmatpush1.bf16.msra.mxu1 %v12462_v35  ;;  %v11440_v35 = vcombine.low %v5909_v12, %v14832_v24  ;;  %v14860_v16 = vsel %vm13375_vm3, %v7284_v60, %v7288_v57  ;;  %v12524_v12 = vld [vmem:[#allocation7 + $0x6c4] ss:$8 sps:$4 sm:$0xff]  }
 0x39f   :  { %7913 = vmatpush1.bf16.msra.mxu0 %v12465_v13  ;;  %7039 = vmatprep.subr.bf16.mxu1 %v12472_v56  ;;  %v14852_v13 = vld [vmem:[#allocation3 + $0xe0] sm:$0xff] }
 0x3a0   :  { %7914 = vmatprep.subr.bf16.mxu0 %v12475_v3  ;;  %v14856_v3 = vsel %vm13375_vm3, %v7270_v25, %v7274_v52  ;;  %v11394_v21 = vcombine.low %v14847_v37, %v14852_v13  ;;  %v12532_v25 = vld [vmem:[#allocation7 + $0x6b4] ss:$8 sps:$4 sm:$0xff]   ;;  %v7319_v52 = vshrl.u32 %v14799_v17, 16  ;;  %v12541_v57 = vld [vmem:[#allocation7 + $0x4a4] ss:$8 sps:$4 sm:$0xff]  }
 0x3a1   :  { %6329 = vmatmul.mubr.bf16.gmra.mxu1 %v11388_v26  ;;  %v11529_v38 = vcombine.high %v14856_v3, %v14860_v16  ;;  %v11528_v26 = vcombine.low %v14856_v3, %v14860_v16 }
 0x3a2   :  { %6682 = vmatmul.mubr.bf16.gmra.mxu0 %v14819_v42  ;;  %7040 = vmatpush1.bf16.msra.mxu1 %v12470_v18  ;;  %v12508_v18 = vld [vmem:[#allocation7 + $0x6e4] ss:$8 sps:$4 sm:$0xff]  }
 0x3a3   :  { %7915 = vmatpush1.bf16.msra.mxu0 %v12473_v20  ;;  %7041 = vmatprep.subr.bf16.mxu1 %v12478_v50  ;;  %v11395_v20 = vcombine.high %v14847_v37, %v14852_v13  ;;  %v14870_v50 = vcombine.high %v14835_v9, %v14847_v37 }
 0x3a4   :  { %7916 = vmatprep.subr.bf16.mxu0 %v12481_v48  ;;  %6338 = vmatprep.mubr.bf16.mxu1 %v11391_v8  ;;  %v12506_v48 = vld [vmem:[#allocation7 + $0x6e0] ss:$8 sps:$4 sm:$0xff]   ;;  %v12521_v8 = vld [vmem:[#allocation7 + $0x4d4] ss:$8 sps:$4 sm:$0xff]  }
 0x3a5   :  { %6691 = vmatprep.mubr.bf16.mxu0 %v14829_v19 }
 0x3a6   :  { %7042 = vmatpush1.bf16.msra.mxu1 %v12476_v44  ;;  %v12516_v44 = vld [vmem:[#allocation7 + $0x6d0] ss:$8 sps:$4 sm:$0xff]  }
 0x3a7   :  { %7917 = vmatpush1.bf16.msra.mxu0 %v12479_v33  ;;  %7043 = vmatprep.subr.bf16.mxu1 %v12486_v15  ;;  %v14879_v33 = vld [vmem:[#allocation3 + $0x100] sm:$0xff]  ;;  %v14881_v15 = vld [vmem:[#allocation3 + $0xd0] sm:$0xff] }
 0x3a8   :  { %7918 = vmatprep.subr.bf16.mxu0 %v12489_v6  ;;  %v7291_v6 = vshrl.u32 %v14779_v53, 16  ;;  %v12525_v53 = vld [vmem:[#allocation7 + $0x4c0] ss:$8 sps:$4 sm:$0xff]   ;;  %v14901_v10 = vcombine.low %v14852_v13, %v14879_v33 }
 0x3a9   :  { %6339 = vmatmul.mubr.bf16.gmra.mxu1 %v11390_v5  ;;  %v7305_v5 = vshrl.u32 %v14784_v30, 16 }
 0x3aa   :  { %6692 = vmatmul.mubr.bf16.gmra.mxu0 %v14841_v45  ;;  %7044 = vmatpush1.bf16.msra.mxu1 %v12484_v2  ;;  %v12527_v2 = vld [vmem:[#allocation7 + $0x4c4] ss:$8 sps:$4 sm:$0xff]  }
 0x3ab   :  { %7919 = vmatpush1.bf16.msra.mxu0 %v12487_v39  ;;  %7045 = vmatprep.subr.bf16.mxu1 %v12492_v22  ;;  %v7308_v39 = vshll.u32 %v14784_v30, 16  ;;  %v11397_v22 = vcombine.high %v14879_v33, %v14881_v15  ;;  %v12535_v30 = vld [vmem:[#allocation7 + $0x4b4] ss:$8 sps:$4 sm:$0xff]   ;;  %v7307_v60 = vrot.slane %v7305_v5, 4 }
 0x3ac   :  { %7920 = vmatprep.subr.bf16.mxu0 %v12495_v29  ;;  %6348 = vmatprep.mubr.bf16.mxu1 %v11393_v7  ;;  %v14891_v29 = vcombine.high %v14852_v13, %v14879_v33  ;;  %v7293_v7 = vrot.slane %v7291_v6, 4  ;;  %v12551_v6 = vld [vmem:[#allocation7 + $0x494] ss:$8 sps:$4 sm:$0xff]  }
 0x3ad   :  { %6701 = vmatprep.mubr.bf16.mxu0 %v11441_v4  ;;  %v7296_v4 = vrot.slane %v7294_v55, 5 }
 0x3ae   :  { %7046 = vmatpush1.bf16.msra.mxu1 %v12490_v32  ;;  %v12522_v32 = vld [vmem:[#allocation7 + $0x6c0] ss:$8 sps:$4 sm:$0xff]  }
 0x3af   :  { %7921 = vmatpush1.bf16.msra.mxu0 %v12493_v14  ;;  %7047 = vmatprep.subr.bf16.mxu1 %v12502_v46  ;;  %v7310_v14 = vrot.slane %v7308_v39, 5  ;;  %v11396_v46 = vcombine.low %v14879_v33, %v14881_v15  ;;  %v11398_v39 = vcombine.low %v14895_v27, %v14903_v61 }
 0x3b0   :  { %7922 = vmatprep.subr.bf16.mxu0 %v12505_v62  ;;  %v12533_v62 = vld [vmem:[#allocation7 + $0x4b0] ss:$8 sps:$4 sm:$0xff]  }
 0x3b1   :  { %6349 = vmatmul.mubr.bf16.gmra.mxu1 %v11392_v54  ;;  %v7297_v54 = vor.u32 %v7296_v4, %v7293_v7  ;;  %v12546_v7 = vld [vmem:[#allocation7 + $0x690] ss:$8 sps:$4 sm:$0xff]  }
 0x3b2   :  { %6702 = vmatmul.mubr.bf16.gmra.mxu0 %v11440_v35  ;;  %7048 = vmatpush2.bf16.msra.mxu1 %v12500_v0  ;;  %v12538_v0 = vld [vmem:[#allocation7 + $0x6a4] ss:$8 sps:$4 sm:$0xff]   ;;  %v7311_v35 = vor.u32 %v7310_v14, %v7307_v60  ;;  %v12549_v4 = vld [vmem:[#allocation7 + $0x490] ss:$8 sps:$4 sm:$0xff]   ;;  %v7361_v14 = vshrl.u32 %v14823_v1, 16 }
 0x3b3   :  { %7923 = vmatpush2.bf16.msra.mxu0 %v12503_v58  ;;  %7049 = vmatprep.subr.bf16.mxu1 %v12508_v18  ;;  %v7322_v58 = vshll.u32 %v14799_v17, 16  ;;  %v12536_v18 = vld [vmem:[#allocation7 + $0x6a0] ss:$8 sps:$4 sm:$0xff]   ;;  %v12557_v60 = vld [vmem:[#allocation7 + $0x484] ss:$8 sps:$4 sm:$0xff]  }
 0x3b4   :  { %7924 = vmatprep.subr.bf16.mxu0 %v12511_v36  ;;  %6358 = vmatprep.mubr.bf16.mxu1 %v11395_v20  ;;  %v11399_v36 = vcombine.high %v14895_v27, %v14903_v61  ;;  %v14911_v20 = vcombine.high %v14881_v15, %v14895_v27  ;;  %v7215_v17 = vld [vmem:[#allocation3 + $0x48] sm:$0x11]  ;;  %v7312_v55 = vrot.slane %v7311_v35, 4 }
 0x3b5   :  { %6711 = vmatprep.mubr.bf16.mxu0 %v14870_v50  ;;  %v7324_v5 = vrot.slane %v7322_v58, 5  ;;  %v12563_v58 = vld [vmem:[#allocation7 + $0x774] ss:$8 sps:$4 sm:$0xff]  }
 0x3b6   :  { %7050 = vmatpush2.bf16.msra.mxu1 %v12506_v48  ;;  %v7333_v48 = vshrl.u32 %v14801_v49, 16 }
 0x3b7   :  { %7925 = vmatpush2.bf16.msra.mxu0 %v12509_v41  ;;  %7051 = vmatprep.subr.bf16.mxu1 %v12518_v59  ;;  %v7336_v41 = vshll.u32 %v14801_v49, 16  ;;  %v12539_v59 = vld [vmem:[#allocation7 + $0x4a0] ss:$8 sps:$4 sm:$0xff]  }
 0x3b8   :  { %7926 = vmatprep.subr.bf16.mxu0 %v12521_v8  ;;  %v12548_v8 = vld [vmem:[#allocation7 + $0x694] ss:$8 sps:$4 sm:$0xff]   ;;  %v7335_v49 = vrot.slane %v7333_v48, 4 }
 0x3b9   :  { %6359 = vmatmul.mubr.bf16.gmra.mxu1 %v11394_v21  ;;  %v7217_v21 = vld [vmem:[#allocation3 + $0xf0] sm:$0x11] }
 0x3ba   :  { %6712 = vmatmul.mubr.bf16.gmra.mxu0 %v14877_v40  ;;  %7052 = vmatpush2.bf16.msra.mxu1 %v12516_v44  ;;  %v7321_v44 = vrot.slane %v7319_v52, 4 }
 0x3bb   :  { %7927 = vmatpush2.bf16.msra.mxu0 %v12519_v28  ;;  %7053 = vmatprep.subr.bf16.mxu1 %v12524_v12  ;;  %v7298_v28 = vrot.slane %v7297_v54, 4  ;;  %v7338_v12 = vrot.slane %v7336_v41, 5  ;;  %v7219_v54 = vld [vmem:[#allocation3 + $0x60] sm:$0x11]  ;;  %v7363_v41 = vrot.slane %v7361_v14, 4 }
 0x3bc   :  { %7928 = vmatprep.subr.bf16.mxu0 %v12527_v2  ;;  %6368 = vmatprep.mubr.bf16.mxu1 %v11397_v22  ;;  %v7347_v2 = vshrl.u32 %v14821_v47, 16  ;;  %v14922_v22 = vcombine.low %v14881_v15, %v14895_v27  ;;  %v7325_v35 = vor.u32 %v7324_v5, %v7321_v44  ;;  %v7328_v44 = vshll.u32 %v7219_v54, 16  ;;  %v12566_v5 = vld [vmem:[#allocation7 + $0x164] ss:$8 sps:$4 sm:$0xff]  }
 0x3bd   :  { %6721 = vmatprep.mubr.bf16.mxu0 %v14891_v29  ;;  %v7225_v14 = vld [vmem:[#allocation3 + $0x68] sm:$0x11] }
 0x3be   :  { %7054 = vmatpush2.bf16.msra.mxu1 %v12522_v32  ;;  %v7300_v32 = vshll.u32 %v7215_v17, 16 }
 0x3bf   :  { %7929 = vmatpush2.bf16.msra.mxu0 %v12525_v53  ;;  %7055 = vmatprep.subr.bf16.mxu1 %v12532_v25  ;;  %v7314_v53 = vshll.u32 %v7217_v21, 16  ;;  %v7350_v25 = vshll.u32 %v14821_v47, 16  ;;  %v7221_v47 = vld [vmem:[#allocation3 + $0x118] sm:$0x11] }
 0x3c0   :  { %7930 = vmatprep.subr.bf16.mxu0 %v12535_v30  ;;  %v12554_v30 = vld [vmem:[#allocation7 + $0x684] ss:$8 sps:$4 sm:$0xff]   ;;  %v7302_v52 = vrot.slane %v7300_v32, 5 }
 0x3c1   :  { %6369 = vmatmul.mubr.bf16.gmra.mxu1 %v11396_v46  ;;  %v12555_v46 = vld [vmem:[#allocation7 + $0x480] ss:$8 sps:$4 sm:$0xff]   ;;  %v7352_v48 = vrot.slane %v7350_v25, 5  ;;  %v7330_v25 = vrot.slane %v7328_v44, 5 }
 0x3c2   :  { %6722 = vmatmul.mubr.bf16.gmra.mxu0 %v14901_v10  ;;  %7056 = vmatpush2.bf16.msra.mxu1 %v12530_v34  ;;  %v12552_v34 = vld [vmem:[#allocation7 + $0x680] ss:$8 sps:$4 sm:$0xff]   ;;  %v14934_v17 = vsel %vm13375_vm3, %v7298_v28, %v7302_v52 }
 0x3c3   :  { %7931 = vmatpush2.bf16.msra.mxu0 %v12533_v62  ;;  %7057 = vmatprep.subr.bf16.mxu1 %v12538_v0  ;;  %v7364_v62 = vshll.u32 %v14823_v1, 16  ;;  %v12560_v0 = vld [vmem:[#allocation7 + $0x174] ss:$8 sps:$4 sm:$0xff]   ;;  %v12564_v28 = vld [vmem:[#allocation7 + $0x160] ss:$8 sps:$4 sm:$0xff]  }
 0x3c4   :  { %7932 = vmatprep.subr.bf16.mxu0 %v12541_v57  ;;  %6378 = vmatprep.mubr.bf16.mxu1 %v11399_v36  ;;  %v7316_v57 = vrot.slane %v7314_v53, 5  ;;  %v7349_v36 = vrot.slane %v7347_v2, 4  ;;  %v7406_v53 = vshll.u32 %v14832_v24, 16 }
 0x3c5   :  { %6731 = vmatprep.mubr.bf16.mxu0 %v14911_v20 }
 0x3c6   :  { %7058 = vmatpush2.bf16.msra.mxu1 %v12536_v18  ;;  %v7339_v18 = vor.u32 %v7338_v12, %v7335_v49  ;;  %v14938_v21 = vsel %vm13375_vm3, %v7312_v55, %v7316_v57  ;;  %v7326_v49 = vrot.slane %v7325_v35, 4  ;;  %v7353_v2 = vor.u32 %v7352_v48, %v7349_v36  ;;  %v12570_v57 = vld [vmem:[#allocation7 + $0x150] ss:$8 sps:$4 sm:$0xff]   ;;  %v12578_v36 = vld [vmem:[#allocation7 + $0x144] ss:$8 sps:$4 sm:$0xff]  }
 0x3c7   :  { %7933 = vmatpush2.bf16.msra.mxu0 %v12539_v59  ;;  %7059 = vmatprep.subr.bf16.mxu1 %v12548_v8  ;;  %v7366_v59 = vrot.slane %v7364_v62, 5  ;;  %v12558_v8 = vld [vmem:[#allocation7 + $0x170] ss:$8 sps:$4 sm:$0xff]   ;;  %v11531_v32 = vcombine.high %v14934_v17, %v14938_v21  ;;  %v7408_v52 = vrot.slane %v7406_v53, 5  ;;  %v7370_v35 = vshll.u32 %v7225_v14, 16 }
 0x3c8   :  { %7934 = vmatprep.subr.bf16.mxu0 %v12551_v6  ;;  %v7342_v6 = vshll.u32 %v7221_v47, 16  ;;  %v7340_v12 = vrot.slane %v7339_v18, 4  ;;  %v7354_v62 = vrot.slane %v7353_v2, 4  ;;  %v14957_v54 = vsel %vm13375_vm3, %v7326_v49, %v7330_v25  ;;  %v12581_v48 = vld [vmem:[#allocation7 + $0x744] ss:$8 sps:$4 sm:$0xff]  }
 0x3c9   :  { %6379 = vmatmul.mubr.bf16.gmra.mxu1 %v11398_v39  ;;  %v7403_v39 = vshrl.u32 %v14832_v24, 16  ;;  %v7367_v55 = vor.u32 %v7366_v59, %v7363_v41  ;;  %v12572_v24 = vld [vmem:[#allocation7 + $0x154] ss:$8 sps:$4 sm:$0xff]   ;;  %v7431_v41 = vshrl.u32 %v14847_v37, 16  ;;  %v7434_v59 = vshll.u32 %v14847_v37, 16 }
 0x3ca   :  { %6732 = vmatmul.mubr.bf16.gmra.mxu0 %v14922_v22  ;;  %7060 = vmatpush2.bf16.msra.mxu1 %v12546_v7  ;;  %v7417_v7 = vshrl.u32 %v14835_v9, 16  ;;  %v7231_v2 = vld [vmem:[#allocation3 + $0x40] sm:$0x11]  ;;  %v12587_v37 = vld [vmem:[#allocation7 + $0x734] ss:$8 sps:$4 sm:$0xff]  }
 0x3cb   :  { %7935 = vmatpush2.bf16.msra.mxu0 %v12549_v4  ;;  %7061 = vmatprep.subr.bf16.mxu1 %v12554_v30  ;;  %v12567_v4 = vld [vmem:[#allocation7 + $0x760] ss:$8 sps:$4 sm:$0xff]   ;;  %v7344_v30 = vrot.slane %v7342_v6, 5  ;;  %v7445_v6 = vshrl.u32 %v14852_v13, 16  ;;  %v7436_v53 = vrot.slane %v7434_v59, 5 }
 0x3cc   :  { %7936 = vmatprep.subr.bf16.mxu0 %v12557_v60  ;;  %7063 = vmatprep.mubr.bf16.mxu1 %v14790_v11  ;;  %v12561_v11 = vld [vmem:[#allocation7 + $0x770] ss:$8 sps:$4 sm:$0xff]   ;;  %v12601_v59 = vld [vmem:[#allocation7 + $0x714] ss:$8 sps:$4 sm:$0xff]  }
 0x3cd   :  { %7938 = vmatprep.mubr.bf16.mxu0 %v11529_v38  ;;  %v12569_v38 = vld [vmem:[#allocation7 + $0x764] ss:$8 sps:$4 sm:$0xff]   ;;  %v7223_v60 = vld [vmem:[#allocation3 + $0x30] sm:$0x11] }
 0x3ce   :  { %7062 = vmatpush2.bf16.msra.mxu1 %v12552_v34  ;;  %v7420_v34 = vshll.u32 %v14835_v9, 16  ;;  %v14961_v9 = vsel %vm13375_vm3, %v7340_v12, %v7344_v30  ;;  %v7356_v47 = vshll.u32 %v7223_v60, 16  ;;  %v12584_v12 = vld [vmem:[#allocation7 + $0x134] ss:$8 sps:$4 sm:$0xff]   ;;  %v7412_v60 = vshll.u32 %v7231_v2, 16 }
 0x3cf   :  { %7937 = vmatpush2.bf16.msra.mxu0 %v12555_v46  ;;  %8259 = vmatprep.subr.bf16.mxu1 %v12560_v0  ;;  %v12575_v46 = vld [vmem:[#allocation7 + $0x754] ss:$8 sps:$4 sm:$0xff]   ;;  %v14953_v0 = vrot.slane %v7403_v39, 4  ;;  %v11533_v44 = vcombine.high %v14957_v54, %v14961_v9  ;;  %v7233_v39 = vld [vmem:[#allocation3 + $0x80] sm:$0x11] }
 0x3d0   :  { %8661 = vmatprep.subr.bf16.mxu0 %v12563_v58  ;;  %v7419_v58 = vrot.slane %v7417_v7, 4  ;;  %v7422_v18 = vrot.slane %v7420_v34, 5  ;;  %v7358_v49 = vrot.slane %v7356_v47, 5  ;;  %v7447_v7 = vrot.slane %v7445_v6, 4  ;;  %v12585_v14 = vld [vmem:[#allocation7 + $0x730] ss:$8 sps:$4 sm:$0xff]  }
 0x3d1   :  { %7064 = vmatmul.mubr.bf16.vlgmr.msra.gmra.mxu1 %v14797_v43  ;;  %v11530_v43 = vcombine.low %v14934_v17, %v14938_v21  ;;  %v12590_v34 = vld [vmem:[#allocation7 + $0x124] ss:$8 sps:$4 sm:$0xff]  }
 0x3d2   :  { %7939 = vmatmul.mubr.bf16.vlgmr.msra.gmra.mxu0 %v11528_v26  ;;  %8260 = vmatpush1.bf16.msra.mxu1 %v12558_v8  ;;  %v7368_v26 = vrot.slane %v7367_v55, 4  ;;  %v12576_v8 = vld [vmem:[#allocation7 + $0x140] ss:$8 sps:$4 sm:$0xff]   ;;  %v7433_v55 = vrot.slane %v7431_v41, 4  ;;  %v14978_v25 = vsel %vm13375_vm3, %v7354_v62, %v7358_v49  ;;  %v7473_v41 = vshrl.u32 %v14881_v15, 16 }
 0x3d3   :  { %8662 = vmatpush1.bf16.msra.mxu0 %v12561_v11  ;;  %8261 = vmatprep.subr.bf16.mxu1 %v12566_v5  ;;  %v7448_v11 = vshll.u32 %v14852_v13, 16  ;;  %v12579_v5 = vld [vmem:[#allocation7 + $0x740] ss:$8 sps:$4 sm:$0xff]   ;;  %v12582_v13 = vld [vmem:[#allocation7 + $0x130] ss:$8 sps:$4 sm:$0xff]  }
 0x3d4   :  { %8663 = vmatprep.subr.bf16.mxu0 %v12569_v38  ;;  %7073 = vmatprep.mubr.bf16.mxu1 %v14807_v23  ;;  %v12573_v23 = vld [vmem:[#allocation7 + $0x750] ss:$8 sps:$4 sm:$0xff]   ;;  %v7372_v38 = vrot.slane %v7370_v35, 5  ;;  %v12588_v62 = vld [vmem:[#allocation7 + $0x120] ss:$8 sps:$4 sm:$0xff]  }
 0x3d5   :  { %7948 = vmatprep.mubr.bf16.mxu0 %v11531_v32  ;;  %v7423_v32 = vor.u32 %v7422_v18, %v7419_v58  ;;  %v12598_v35 = vld [vmem:[#allocation7 + $0x114] ss:$8 sps:$4 sm:$0xff]  }
 0x3d6   :  { %8262 = vmatpush1.bf16.msra.mxu1 %v12564_v28  ;;  %v7409_v28 = vor.u32 %v7408_v52, %v14953_v0  ;;  %v14982_v30 = vsel %vm13375_vm3, %v7368_v26, %v7372_v38  ;;  %v7462_v0 = vshll.u32 %v14879_v33, 16  ;;  %v12591_v52 = vld [vmem:[#allocation7 + $0x720] ss:$8 sps:$4 sm:$0xff]   ;;  %v12596_v38 = vld [vmem:[#allocation7 + $0x110] ss:$8 sps:$4 sm:$0xff]  }
 0x3d7   :  { %8664 = vmatpush1.bf16.msra.mxu0 %v12567_v4  ;;  %8263 = vmatprep.subr.bf16.mxu1 %v12572_v24  ;;  %v14974_v4 = vld [vmem:[#allocation3 + $0xf8] sm:$0xff]  ;;  %v7450_v24 = vrot.slane %v7448_v11, 5  ;;  %v7424_v58 = vrot.slane %v7423_v32, 4  ;;  %v11534_v49 = vcombine.low %v14978_v25, %v14982_v30 }
 0x3d8   :  { %8665 = vmatprep.subr.bf16.mxu0 %v12575_v46  ;;  %v12593_v46 = vld [vmem:[#allocation7 + $0x724] ss:$8 sps:$4 sm:$0xff]   ;;  %v11487_v26 = vcombine.high %v14823_v1, %v14974_v4  ;;  %v7410_v47 = vrot.slane %v7409_v28, 4  ;;  %v7464_v6 = vrot.slane %v7462_v0, 5  ;;  %v7501_v0 = vshrl.u32 %v14903_v61, 16 }
 0x3d9   :  { %7074 = vmatmul.mubr.bf16.gmra.mxu1 %v14819_v42  ;;  %v11532_v42 = vcombine.low %v14957_v54, %v14961_v9 }
 0x3da   :  { %7949 = vmatmul.mubr.bf16.gmra.mxu0 %v11530_v43  ;;  %8264 = vmatpush1.bf16.msra.mxu1 %v12570_v57  ;;  %v7459_v43 = vshrl.u32 %v14879_v33, 16  ;;  %v11535_v57 = vcombine.high %v14978_v25, %v14982_v30  ;;  %v7237_v33 = vld [vmem:[#allocation3 + $0x10] sm:$0x11] }
 0x3db   :  { %8666 = vmatpush1.bf16.msra.mxu0 %v12573_v23  ;;  %8265 = vmatprep.subr.bf16.mxu1 %v12578_v36  ;;  %v7414_v23 = vrot.slane %v7412_v60, 5  ;;  %v7235_v36 = vld [vmem:[#allocation3 + $0x130] sm:$0x11] }
 0x3dc   :  { %8667 = vmatprep.subr.bf16.mxu0 %v12581_v48  ;;  %7083 = vmatprep.mubr.bf16.mxu1 %v14829_v19  ;;  %v7426_v19 = vshll.u32 %v7233_v39, 16  ;;  %v7437_v48 = vor.u32 %v7436_v53, %v7433_v55  ;;  %v7440_v11 = vshll.u32 %v7235_v36, 16  ;;  %v12602_v55 = vld [vmem:[#allocation7 + $0x100] ss:$8 sps:$4 sm:$0xff]  }
 0x3dd   :  { %7958 = vmatprep.mubr.bf16.mxu0 %v11533_v44  ;;  %v7461_v44 = vrot.slane %v7459_v43, 4  ;;  %v14999_v2 = vsel %vm13375_vm3, %v7410_v47, %v7414_v23  ;;  %v7490_v43 = vshll.u32 %v14895_v27, 16 }
 0x3de   :  { %8266 = vmatpush1.bf16.msra.mxu1 %v12576_v8  ;;  %v7428_v18 = vrot.slane %v7426_v19, 5  ;;  %v7451_v8 = vor.u32 %v7450_v24, %v7447_v7  ;;  %v7438_v28 = vrot.slane %v7437_v48, 4  ;;  %v7442_v7 = vrot.slane %v7440_v11, 5  ;;  %v7241_v24 = vld [vmem:[#allocation3] sm:$0x11] }
 0x3df   :  { %8668 = vmatpush1.bf16.msra.mxu0 %v12579_v5  ;;  %8267 = vmatprep.subr.bf16.mxu1 %v12584_v12  ;;  %v7476_v5 = vshll.u32 %v14881_v15, 16  ;;  %v12599_v12 = vld [vmem:[#allocation7 + $0x710] ss:$8 sps:$4 sm:$0xff]   ;;  %v12607_v15 = vld [vmem:[#allocation7 + $0x704] ss:$8 sps:$4 sm:$0xff]   ;;  %v7487_v19 = vshrl.u32 %v14895_v27, 16 }
 0x3e0   :  { %8669 = vmatprep.subr.bf16.mxu0 %v12587_v37  ;;  %v15003_v39 = vsel %vm13375_vm3, %v7424_v58, %v7428_v18  ;;  %v7454_v37 = vshll.u32 %v7237_v33, 16  ;;  %v7452_v32 = vrot.slane %v7451_v8, 4  ;;  %v7482_v23 = vshll.u32 %v7241_v24, 16  ;;  %v12608_v18 = vld [vmem:[#allocation7 + $0x1f0] ss:$8 sps:$4 sm:$0xff]  }
 0x3e1   :  { %7084 = vmatmul.mubr.bf16.gmra.mxu1 %v14841_v45  ;;  %v11486_v45 = vcombine.low %v14823_v1, %v14974_v4  ;;  %v12604_v1 = vld [vmem:[#allocation7 + $0x104] ss:$8 sps:$4 sm:$0xff]   ;;  %v11537_v53 = vcombine.high %v14999_v2, %v15003_v39  ;;  %v7478_v60 = vrot.slane %v7476_v5, 5  ;;  %v11536_v58 = vcombine.low %v14999_v2, %v15003_v39 }
 0x3e2   :  { %7959 = vmatmul.mubr.bf16.gmra.mxu0 %v11532_v42  ;;  %8268 = vmatpush1.bf16.msra.mxu1 %v12582_v13  ;;  %v7465_v42 = vor.u32 %v7464_v6, %v7461_v44  ;;  %v7475_v13 = vrot.slane %v7473_v41, 4  ;;  %v15016_v27 = vsel %vm13375_vm3, %v7438_v28, %v7442_v7  ;;  %v7489_v33 = vrot.slane %v7487_v19, 4  ;;  %v12619_v8 = vld [vmem:[#allocation7 + $0x7e4] ss:$8 sps:$4 sm:$0xff]   ;;  %v12614_v6 = vld [vmem:[#allocation7 + $0x1e0] ss:$8 sps:$4 sm:$0xff]  }
 0x3e3   :  { %8670 = vmatpush1.bf16.msra.mxu0 %v12585_v14  ;;  %8269 = vmatprep.subr.bf16.mxu1 %v12590_v34  ;;  %v7456_v14 = vrot.slane %v7454_v37, 5  ;;  %v7239_v34 = vld [vmem:[#allocation3 + $0x98] sm:$0x11]  ;;  %v7492_v48 = vrot.slane %v7490_v43, 5  ;;  %v7503_v41 = vrot.slane %v7501_v0, 4  ;;  %v7208_v28 = vld [vmem:[#allocation3 + $0x110] sm:$0xff] }
 0x3e4   :  { %8671 = vmatprep.subr.bf16.mxu0 %v12593_v46  ;;  %7093 = vmatprep.mubr.bf16.mxu1 %v11487_v26  ;;  %v12605_v46 = vld [vmem:[#allocation7 + $0x700] ss:$8 sps:$4 sm:$0xff]   ;;  %v7504_v26 = vshll.u32 %v14903_v61, 16  ;;  %v7468_v47 = vshll.u32 %v7239_v34, 16  ;;  %v7249_v19 = vshrl.u32 %v7208_v28, 16 }
 0x3e5   :  { %7968 = vmatprep.mubr.bf16.mxu0 %v11535_v57  ;;  %v7466_v57 = vrot.slane %v7465_v42, 4  ;;  %v15020_v36 = vsel %vm13375_vm3, %v7452_v32, %v7456_v14  ;;  %v7243_v37 = vld [vmem:[#allocation3 + $0x120] sm:$0x11]  ;;  %v7493_v32 = vor.u32 %v7492_v48, %v7489_v33  ;;  %v7252_v14 = vshll.u32 %v7208_v28, 16 }
 0x3e6   :  { %8270 = vmatpush1.bf16.msra.mxu1 %v12588_v62  ;;  %v12610_v62 = vld [vmem:[#allocation7 + $0x1f4] ss:$8 sps:$4 sm:$0xff]   ;;  %v7506_v44 = vrot.slane %v7504_v26, 5  ;;  %v11539_v11 = vcombine.high %v15016_v27, %v15020_v36  ;;  %v7470_v5 = vrot.slane %v7468_v47, 5  ;;  %v7496_v7 = vshll.u32 %v7243_v37, 16 }
 0x3e7   :  { %8672 = vmatpush1.bf16.msra.mxu0 %v12591_v52  ;;  %8271 = vmatprep.subr.bf16.mxu1 %v12598_v35  ;;  %v12613_v52 = vld [vmem:[#allocation7 + $0x7f4] ss:$8 sps:$4 sm:$0xff]   ;;  %v7479_v35 = vor.u32 %v7478_v60, %v7475_v13  ;;  %v11538_v13 = vcombine.low %v15016_v27, %v15020_v36  ;;  %v12628_v34 = vld [vmem:[#allocation7 + $0x1c4] ss:$8 sps:$4 sm:$0xff]   ;;  %v12626_v43 = vld [vmem:[#allocation7 + $0x1c0] ss:$8 sps:$4 sm:$0xff]  }
 0x3e8   :  { %8673 = vmatprep.subr.bf16.mxu0 %v12601_v59  ;;  %v12616_v59 = vld [vmem:[#allocation7 + $0x1e4] ss:$8 sps:$4 sm:$0xff]   ;;  %v7507_v42 = vor.u32 %v7506_v44, %v7503_v41  ;;  %v12629_v0 = vld [vmem:[#allocation7 + $0x7c0] ss:$8 sps:$4 sm:$0xff]   ;;  %v7498_v26 = vrot.slane %v7496_v7, 5  ;;  %v7251_v47 = vrot.slane %v7249_v19, 4 }
 0x3e9   :  { %7094 = vmatmul.mubr.bf16.gmra.mxu1 %v11486_v45  ;;  %v12617_v45 = vld [vmem:[#allocation7 + $0x7e0] ss:$8 sps:$4 sm:$0xff]   ;;  %v12631_v24 = vld [vmem:[#allocation7 + $0x7c4] ss:$8 sps:$4 sm:$0xff]   ;;  %v12648_v37 = vld [vmem:[#allocation7 + $0x194] ss:$8 sps:$4 sm:$0xff]  }
 0x3ea   :  { %7969 = vmatmul.mubr.bf16.gmra.mxu0 %v11534_v49  ;;  %8272 = vmatpush1.bf16.msra.mxu1 %v12596_v38  ;;  %v7480_v49 = vrot.slane %v7479_v35, 4  ;;  %v7484_v38 = vrot.slane %v7482_v23, 5  ;;  %v7254_v35 = vrot.slane %v7252_v14, 5  ;;  %v7209_v23 = vld [vmem:[#allocation3 + $0x38] sm:$0x11] }
 0x3eb   :  { %8674 = vmatpush1.bf16.msra.mxu0 %v12599_v12  ;;  %8273 = vmatprep.subr.bf16.mxu1 %v12604_v1  ;;  %v12622_v12 = vld [vmem:[#allocation7 + $0x1d4] ss:$8 sps:$4 sm:$0xff]   ;;  %v12640_v44 = vld [vmem:[#allocation7 + $0x1a4] ss:$8 sps:$4 sm:$0xff]   ;;  %v12655_v19 = vld [vmem:[#allocation7 + $0x780] ss:$8 sps:$4 sm:$0xff]  }
 0x3ec   :  { %8675 = vmatprep.subr.bf16.mxu0 %v12607_v15  ;;  %7103 = vmatprep.mubr.bf16.mxu1 %v14870_v50  ;;  %v12611_v50 = vld [vmem:[#allocation7 + $0x7f0] ss:$8 sps:$4 sm:$0xff]   ;;  %v12625_v15 = vld [vmem:[#allocation7 + $0x7d4] ss:$8 sps:$4 sm:$0xff]  }
 0x3ed   :  { %7978 = vmatprep.mubr.bf16.mxu0 %v11537_v53  ;;  %v7245_v1 = vld [vmem:[#allocation3 + $0x50] sm:$0x11]  ;;  %v15034_v53 = vsel %vm13375_vm3, %v7480_v49, %v7484_v38  ;;  %v12638_v38 = vld [vmem:[#allocation7 + $0x1a0] ss:$8 sps:$4 sm:$0xff]  }
 0x3ee   :  { %8274 = vmatpush1.bf16.msra.mxu1 %v12602_v55  ;;  %v12620_v55 = vld [vmem:[#allocation7 + $0x1d0] ss:$8 sps:$4 sm:$0xff]   ;;  %v7510_v60 = vshll.u32 %v7245_v1, 16  ;;  %v12651_v1 = vld [vmem:[#allocation7 + $0x794] ss:$8 sps:$4 sm:$0xff]  }
 0x3ef   :  { %8676 = vmatpush1.bf16.msra.mxu0 %v12605_v46  ;;  %8275 = vmatprep.subr.bf16.mxu1 %v12610_v62  ;;  %v7494_v46 = vrot.slane %v7493_v32, 4  ;;  %v12646_v32 = vld [vmem:[#allocation7 + $0x190] ss:$8 sps:$4 sm:$0xff]   ;;  %v12660_v14 = vld [vmem:[#allocation7 + $0x574] ss:$8 sps:$4 sm:$0xff]  }
 0x3f0   :  { %8677 = vmatprep.subr.bf16.mxu0 %v12613_v52  ;;  %v7508_v52 = vrot.slane %v7507_v42, 4  ;;  %v12649_v42 = vld [vmem:[#allocation7 + $0x790] ss:$8 sps:$4 sm:$0xff]  }
 0x3f1   :  { %7104 = vmatmul.mubr.bf16.gmra.mxu1 %v14877_v40  ;;  %v15030_v40 = vsel %vm13375_vm3, %v7466_v57, %v7470_v5  ;;  %v7512_v57 = vrot.slane %v7510_v60, 5  ;;  %v15046_v48 = vsel %vm13375_vm3, %v7494_v46, %v7498_v26  ;;  %v11579_v60 = vcombine.high %v14860_v16, %v14934_v17  ;;  %v12669_v26 = vld [vmem:[#allocation7 + $0x264] ss:$8 sps:$4 sm:$0xff]  }
 0x3f2   :  { %7979 = vmatmul.mubr.bf16.gmra.mxu0 %v11536_v58  ;;  %8276 = vmatpush2.bf16.msra.mxu1 %v12608_v18  ;;  %v11541_v62 = vcombine.high %v15030_v40, %v15034_v53  ;;  %v12634_v58 = vld [vmem:[#allocation7 + $0x1b4] ss:$8 sps:$4 sm:$0xff]   ;;  %v11540_v33 = vcombine.low %v15030_v40, %v15034_v53  ;;  %v7375_v46 = vshrl.u32 %v14974_v4, 16 }
 0x3f3   :  { %8678 = vmatpush2.bf16.msra.mxu0 %v12611_v50  ;;  %8277 = vmatprep.subr.bf16.mxu1 %v12616_v59  ;;  %v12637_v18 = vld [vmem:[#allocation7 + $0x7b4] ss:$8 sps:$4 sm:$0xff]   ;;  %v12632_v50 = vld [vmem:[#allocation7 + $0x1b0] ss:$8 sps:$4 sm:$0xff]   ;;  %v15050_v41 = vsel %vm13375_vm3, %v7508_v52, %v7512_v57  ;;  %v7255_v59 = vor.u32 %v7254_v35, %v7251_v47  ;;  %v12666_v52 = vld [vmem:[#allocation7 + $0x564] ss:$8 sps:$4 sm:$0xff]   ;;  %v11581_v57 = vcombine.high %v14938_v21, %v14957_v54 }
 0x3f4   :  { %8679 = vmatprep.subr.bf16.mxu0 %v12619_v8  ;;  %7113 = vmatprep.mubr.bf16.mxu1 %v14891_v29  ;;  %v12623_v29 = vld [vmem:[#allocation7 + $0x7d0] ss:$8 sps:$4 sm:$0xff]   ;;  %v7258_v8 = vshll.u32 %v7209_v23, 16  ;;  %v12667_v47 = vld [vmem:[#allocation7 + $0x260] ss:$8 sps:$4 sm:$0xff]  }
 0x3f5   :  { %7988 = vmatprep.mubr.bf16.mxu0 %v11539_v11  ;;  %v11543_v11 = vcombine.high %v15046_v48, %v15050_v41  ;;  %v7256_v5 = vrot.slane %v7255_v59, 4  ;;  %v7227_v35 = vld [vmem:[#allocation3 + $0x138] sm:$0x11]  ;;  %v7228_v23 = vld [vmem:[#allocation3 + $0xa0] sm:$0xff] }
 0x3f6   :  { %8278 = vmatpush2.bf16.msra.mxu1 %v12614_v6  ;;  %v12643_v6 = vld [vmem:[#allocation7 + $0x7a4] ss:$8 sps:$4 sm:$0xff]   ;;  %v7260_v49 = vrot.slane %v7258_v8, 5  ;;  %v7389_v59 = vshrl.u32 %v7228_v23, 16  ;;  %v7392_v8 = vshll.u32 %v7228_v23, 16 }
 0x3f7   :  { %8680 = vmatpush2.bf16.msra.mxu0 %v12617_v45  ;;  %8279 = vmatprep.subr.bf16.mxu1 %v12622_v12  ;;  %v12641_v12 = vld [vmem:[#allocation7 + $0x7a0] ss:$8 sps:$4 sm:$0xff]  }
 0x3f8   :  { %8681 = vmatprep.subr.bf16.mxu0 %v12625_v15  ;;  %v11542_v15 = vcombine.low %v15046_v48, %v15050_v41 }
 0x3f9   :  { %7114 = vmatmul.mubr.bf16.gmra.mxu1 %v14901_v10  ;;  %v15042_v10 = vld [vmem:[#allocation3 + $0x88] sm:$0xff] }
 0x3fa   :  { %7989 = vmatmul.mubr.bf16.gmra.mxu0 %v11538_v13  ;;  %8280 = vmatpush2.bf16.msra.mxu1 %v12620_v55  ;;  %v11495_v45 = vcombine.high %v14903_v61, %v15042_v10  ;;  %v11494_v28 = vcombine.low %v14903_v61, %v15042_v10  ;;  %v12654_v13 = vld [vmem:[#allocation7 + $0x184] ss:$8 sps:$4 sm:$0xff]   ;;  %v12652_v61 = vld [vmem:[#allocation7 + $0x180] ss:$8 sps:$4 sm:$0xff]   ;;  %v7518_v23 = vshll.u32 %v15042_v10, 16 }
 0x3fb   :  { %8682 = vmatpush2.bf16.msra.mxu0 %v12623_v29  ;;  %8281 = vmatprep.subr.bf16.mxu1 %v12628_v34  ;;  %v12657_v55 = vld [vmem:[#allocation7 + $0x784] ss:$8 sps:$4 sm:$0xff]   ;;  %v12663_v29 = vld [vmem:[#allocation7 + $0x274] ss:$8 sps:$4 sm:$0xff]  }
 0x3fc   :  { %8683 = vmatprep.subr.bf16.mxu0 %v12631_v24  ;;  %7123 = vmatprep.mubr.bf16.mxu1 %v14911_v20  ;;  %v12635_v20 = vld [vmem:[#allocation7 + $0x7b0] ss:$8 sps:$4 sm:$0xff]   ;;  %v11578_v24 = vcombine.low %v14860_v16, %v14934_v17  ;;  %v7377_v16 = vrot.slane %v7375_v46, 4 }
 0x3fd   :  { %7998 = vmatprep.mubr.bf16.mxu0 %v11541_v62  ;;  %v12661_v62 = vld [vmem:[#allocation7 + $0x270] ss:$8 sps:$4 sm:$0xff]  }
 0x3fe   :  { %8282 = vmatpush2.bf16.msra.mxu1 %v12626_v43  ;;  %v7378_v43 = vshll.u32 %v14974_v4, 16  ;;  %v12672_v4 = vld [vmem:[#allocation7 + $0x554] ss:$8 sps:$4 sm:$0xff]   ;;  %v12694_v46 = vld [vmem:[#allocation7 + $0x510] ss:$8 sps:$4 sm:$0xff]  }
 0x3ff   :  { %8684 = vmatpush2.bf16.msra.mxu0 %v12629_v0  ;;  %8283 = vmatprep.subr.bf16.mxu1 %v12634_v58  ;;  %v12658_v0 = vld [vmem:[#allocation7 + $0x570] ss:$8 sps:$4 sm:$0xff]   ;;  %v12675_v58 = vld [vmem:[#allocation7 + $0x254] ss:$8 sps:$4 sm:$0xff]  }
 0x400   :  { %8685 = vmatprep.subr.bf16.mxu0 %v12637_v18  ;;  %v7380_v17 = vrot.slane %v7378_v43, 5  ;;  %v11580_v18 = vcombine.low %v14938_v21, %v14957_v54  ;;  %v7391_v21 = vrot.slane %v7389_v59, 4  ;;  %v7394_v54 = vrot.slane %v7392_v8, 5 }
 0x401   :  { %7124 = vmatmul.mubr.bf16.gmra.mxu1 %v14922_v22  ;;  %v7261_v22 = vsel %vm13375_vm3, %v7256_v5, %v7260_v49  ;;  %v11589_v59 = vcombine.high %v15020_v36, %v15030_v40  ;;  %v7520_v8 = vrot.slane %v7518_v23, 5  ;;  %v12745_v23 = vld [vmem:[#allocation7 + $0x290] ss:$8 sps:$4 sm:$0xff]  }
 0x402   :  { %7999 = vmatmul.mubr.bf16.gmra.mxu0 %v11540_v33  ;;  %8284 = vmatpush2.bf16.msra.mxu1 %v12632_v50  ;;  %v11577_v7 = vcombine.high %v7261_v22, %v14856_v3  ;;  %v11576_v34 = vcombine.low %v7261_v22, %v14856_v3  ;;  %v12664_v3 = vld [vmem:[#allocation7 + $0x560] ss:$8 sps:$4 sm:$0xff]   ;;  %v7381_v33 = vor.u32 %v7380_v17, %v7377_v16  ;;  %v7384_v50 = vshll.u32 %v7227_v35, 16  ;;  %v12682_v22 = vld [vmem:[#allocation7 + $0x530] ss:$8 sps:$4 sm:$0xff]  }
 0x403   :  { %8686 = vmatpush2.bf16.msra.mxu0 %v12635_v20  ;;  %8285 = vmatprep.subr.bf16.mxu1 %v12640_v44  ;;  %v12670_v20 = vld [vmem:[#allocation7 + $0x550] ss:$8 sps:$4 sm:$0xff]   ;;  %v12711_v16 = vld [vmem:[#allocation7 + $0x2f4] ss:$8 sps:$4 sm:$0xff]   ;;  %v7515_v35 = vshrl.u32 %v15042_v10, 16 }
 0x404   :  { %8687 = vmatprep.subr.bf16.mxu0 %v12643_v6  ;;  %7133 = vmatprep.mubr.bf16.mxu1 %v11495_v45  ;;  %v12673_v44 = vld [vmem:[#allocation7 + $0x250] ss:$8 sps:$4 sm:$0xff]   ;;  %v12678_v6 = vld [vmem:[#allocation7 + $0x544] ss:$8 sps:$4 sm:$0xff]   ;;  %v7382_v5 = vrot.slane %v7381_v33, 4  ;;  %v7386_v49 = vrot.slane %v7384_v50, 5 }
 0x405   :  { %8008 = vmatprep.mubr.bf16.mxu0 %v11543_v11  ;;  %v12681_v45 = vld [vmem:[#allocation7 + $0x244] ss:$8 sps:$4 sm:$0xff]   ;;  %v11583_v11 = vcombine.high %v14961_v9, %v14978_v25  ;;  %v7247_v10 = vld [vmem:[#allocation3 + $0xb8] sm:$0x11] }
 0x406   :  { %8286 = vmatpush2.bf16.msra.mxu1 %v12638_v38  ;;  %v12676_v38 = vld [vmem:[#allocation7 + $0x540] ss:$8 sps:$4 sm:$0xff]   ;;  %v12714_v33 = vld [vmem:[#allocation7 + $0x5e4] ss:$8 sps:$4 sm:$0xff]  }
 0x407   :  { %8688 = vmatpush2.bf16.msra.mxu0 %v12641_v12  ;;  %8287 = vmatprep.subr.bf16.mxu1 %v12648_v37  ;;  %v12679_v12 = vld [vmem:[#allocation7 + $0x240] ss:$8 sps:$4 sm:$0xff]   ;;  %v12717_v50 = vld [vmem:[#allocation7 + $0x2e4] ss:$8 sps:$4 sm:$0xff]  }
 0x408   :  { %8689 = vmatprep.subr.bf16.mxu0 %v12651_v1  ;;  %v7229_v37 = vld [vmem:[#allocation3 + $0x20] sm:$0x11]  ;;  %v12684_v1 = vld [vmem:[#allocation7 + $0x534] ss:$8 sps:$4 sm:$0xff]  }
 0x409   :  { %7134 = vmatmul.mubr.bf16.gmra.mxu1 %v11494_v28  ;;  %v12687_v28 = vld [vmem:[#allocation7 + $0x234] ss:$8 sps:$4 sm:$0xff]  }
 0x40a   :  { %8009 = vmatmul.mubr.bf16.gmra.mxu0 %v11542_v15  ;;  %8288 = vmatpush2.bf16.msra.mxu1 %v12646_v32  ;;  %v11582_v15 = vcombine.low %v14961_v9, %v14978_v25  ;;  %v7387_v32 = vsel %vm13375_vm3, %v7382_v5, %v7386_v49  ;;  %v12688_v9 = vld [vmem:[#allocation7 + $0x520] ss:$8 sps:$4 sm:$0xff]   ;;  %v12718_v5 = vld [vmem:[#allocation7 + $0x5d0] ss:$8 sps:$4 sm:$0xff]  }
 0x40b   :  { %8690 = vmatpush2.bf16.msra.mxu0 %v12649_v42  ;;  %8289 = vmatprep.subr.bf16.mxu1 %v12654_v13  ;;  %v7395_v42 = vor.u32 %v7394_v54, %v7391_v21  ;;  %v7398_v13 = vshll.u32 %v7229_v37, 16  ;;  %v12691_v25 = vld [vmem:[#allocation7 + $0x220] ss:$8 sps:$4 sm:$0xff]   ;;  %v12721_v49 = vld [vmem:[#allocation7 + $0x2d0] ss:$8 sps:$4 sm:$0xff]  }
 0x40c   :  { %8691 = vmatprep.subr.bf16.mxu0 %v12657_v55  ;;  %8291 = vmatprep.mubr.bf16.mxu1 %v11577_v7  ;;  %v12685_v55 = vld [vmem:[#allocation7 + $0x230] ss:$8 sps:$4 sm:$0xff]   ;;  %v12690_v7 = vld [vmem:[#allocation7 + $0x524] ss:$8 sps:$4 sm:$0xff]  }
 0x40d   :  { %8693 = vmatprep.mubr.bf16.mxu0 %v11579_v60  ;;  %v12726_v21 = vld [vmem:[#allocation7 + $0x5c4] ss:$8 sps:$4 sm:$0xff]  }
 0x40e   :  { %8290 = vmatpush2.bf16.msra.mxu1 %v12652_v61  ;;  %v11631_v61 = vcombine.high %v14982_v30, %v7387_v32  ;;  %v12729_v54 = vld [vmem:[#allocation7 + $0x2c4] ss:$8 sps:$4 sm:$0xff]  }
 0x40f   :  { %8692 = vmatpush2.bf16.msra.mxu0 %v12655_v19  ;;  %9440 = vmatprep.subr.bf16.mxu1 %v12660_v14  ;;  %v7396_v19 = vrot.slane %v7395_v42, 4  ;;  %v7400_v14 = vrot.slane %v7398_v13, 5  ;;  %v8904_v13 = vld [vmem:[#allocation3 + $0xb0] sm:$0xee] }
 0x410   :  { %9793 = vmatprep.subr.bf16.mxu0 %v12663_v29  ;;  %v12696_v29 = vld [vmem:[#allocation7 + $0x514] ss:$8 sps:$4 sm:$0xff]  }
 0x411   :  { %8292 = vmatmul.mubr.bf16.vlgmr.msra.gmra.mxu1 %v11576_v34  ;;  %v12699_v34 = vld [vmem:[#allocation7 + $0x214] ss:$8 sps:$4 sm:$0xff]   ;;  %v7401_v43 = vsel %vm13375_vm3, %v7396_v19, %v7400_v14  ;;  %v12738_v14 = vld [vmem:[#allocation7 + $0x5a4] ss:$8 sps:$4 sm:$0xff]  }
 0x412   :  { %8694 = vmatmul.mubr.bf16.vlgmr.msra.gmra.mxu0 %v11578_v24  ;;  %9441 = vmatpush1.bf16.msra.mxu1 %v12658_v0  ;;  %v12697_v0 = vld [vmem:[#allocation7 + $0x210] ss:$8 sps:$4 sm:$0xff]   ;;  %v11584_v17 = vcombine.low %v7401_v43, %v14999_v2 }
 0x413   :  { %9794 = vmatpush1.bf16.msra.mxu0 %v12661_v62  ;;  %9442 = vmatprep.subr.bf16.mxu1 %v12666_v52  ;;  %v12702_v62 = vld [vmem:[#allocation7 + $0x504] ss:$8 sps:$4 sm:$0xff]   ;;  %v8903_v19 = vld [vmem:[#allocation3 + $0x38] sm:$0x11] }
 0x414   :  { %9795 = vmatprep.subr.bf16.mxu0 %v12669_v26  ;;  %8301 = vmatprep.mubr.bf16.mxu1 %v11579_v60  ;;  %v12693_v60 = vld [vmem:[#allocation7 + $0x224] ss:$8 sps:$4 sm:$0xff]   ;;  %v11585_v26 = vcombine.high %v7401_v43, %v14999_v2  ;;  %v7517_v2 = vrot.slane %v7515_v35, 4  ;;  %v12739_v43 = vld [vmem:[#allocation7 + $0x2a0] ss:$8 sps:$4 sm:$0xff]  }
 0x415   :  { %8703 = vmatprep.mubr.bf16.mxu0 %v11581_v57  ;;  %v12705_v52 = vld [vmem:[#allocation7 + $0x204] ss:$8 sps:$4 sm:$0xff]   ;;  %v12742_v35 = vld [vmem:[#allocation7 + $0x590] ss:$8 sps:$4 sm:$0xff]  }
 0x416   :  { %9443 = vmatpush1.bf16.msra.mxu1 %v12664_v3  ;;  %v12700_v3 = vld [vmem:[#allocation7 + $0x500] ss:$8 sps:$4 sm:$0xff]  }
 0x417   :  { %9796 = vmatpush1.bf16.msra.mxu0 %v12667_v47  ;;  %9444 = vmatprep.subr.bf16.mxu1 %v12672_v4  ;;  %v12708_v47 = vld [vmem:[#allocation7 + $0x5f4] ss:$8 sps:$4 sm:$0xff]   ;;  %v11586_v4 = vcombine.low %v15003_v39, %v15016_v27 }
 0x418   :  { %9797 = vmatprep.subr.bf16.mxu0 %v12675_v58  ;;  %v12706_v58 = vld [vmem:[#allocation7 + $0x5f0] ss:$8 sps:$4 sm:$0xff]  }
 0x419   :  { %8302 = vmatmul.mubr.bf16.gmra.mxu1 %v11578_v24  ;;  %v11630_v24 = vcombine.low %v14982_v30, %v7387_v32  ;;  %v12703_v30 = vld [vmem:[#allocation7 + $0x200] ss:$8 sps:$4 sm:$0xff]   ;;  %v11590_v32 = vcombine.low %v15034_v53, %v15046_v48 }
 0x41a   :  { %8704 = vmatmul.mubr.bf16.gmra.mxu0 %v11580_v18  ;;  %9445 = vmatpush1.bf16.msra.mxu1 %v12670_v20  ;;  %v12720_v20 = vld [vmem:[#allocation7 + $0x5d4] ss:$8 sps:$4 sm:$0xff]  }
 0x41b   :  { %9798 = vmatpush1.bf16.msra.mxu0 %v12673_v44  ;;  %9446 = vmatprep.subr.bf16.mxu1 %v12678_v6  ;;  %v12723_v44 = vld [vmem:[#allocation7 + $0x2d4] ss:$8 sps:$4 sm:$0xff]   ;;  %v11588_v6 = vcombine.low %v15020_v36, %v15030_v40  ;;  %v12724_v36 = vld [vmem:[#allocation7 + $0x5c0] ss:$8 sps:$4 sm:$0xff]  }
 0x41c   :  { %9799 = vmatprep.subr.bf16.mxu0 %v12681_v45  ;;  %8311 = vmatprep.mubr.bf16.mxu1 %v11581_v57  ;;  %v11587_v57 = vcombine.high %v15003_v39, %v15016_v27  ;;  %v12712_v39 = vld [vmem:[#allocation7 + $0x5e0] ss:$8 sps:$4 sm:$0xff]   ;;  %v7521_v45 = vor.u32 %v7520_v8, %v7517_v2 }
 0x41d   :  { %8713 = vmatprep.mubr.bf16.mxu0 %v11583_v11  ;;  %v12715_v27 = vld [vmem:[#allocation7 + $0x2e0] ss:$8 sps:$4 sm:$0xff]  }
 0x41e   :  { %9447 = vmatpush1.bf16.msra.mxu1 %v12676_v38  ;;  %v11591_v38 = vcombine.high %v15034_v53, %v15046_v48  ;;  %v12727_v40 = vld [vmem:[#allocation7 + $0x2c0] ss:$8 sps:$4 sm:$0xff]  }
 0x41f   :  { %9800 = vmatpush1.bf16.msra.mxu0 %v12679_v12  ;;  %9448 = vmatprep.subr.bf16.mxu1 %v12684_v1  ;;  %v7522_v12 = vrot.slane %v7521_v45, 4  ;;  %v12732_v1 = vld [vmem:[#allocation7 + $0x5b4] ss:$8 sps:$4 sm:$0xff]   ;;  %v8913_v45 = vld [vmem:[#allocation3 + $0x60] sm:$0x11] }
 0x420   :  { %9801 = vmatprep.subr.bf16.mxu0 %v12687_v28  ;;  %v12735_v28 = vld [vmem:[#allocation7 + $0x2b4] ss:$8 sps:$4 sm:$0xff]  }
 0x421   :  { %8312 = vmatmul.mubr.bf16.gmra.mxu1 %v11580_v18  ;;  %v12709_v18 = vld [vmem:[#allocation7 + $0x2f0] ss:$8 sps:$4 sm:$0xff]  }
 0x422   :  { %8714 = vmatmul.mubr.bf16.gmra.mxu0 %v11582_v15  ;;  %9449 = vmatpush1.bf16.msra.mxu1 %v12682_v22  ;;  %v12733_v22 = vld [vmem:[#allocation7 + $0x2b0] ss:$8 sps:$4 sm:$0xff]  }
 0x423   :  { %9802 = vmatpush1.bf16.msra.mxu0 %v12685_v55  ;;  %9450 = vmatprep.subr.bf16.mxu1 %v12690_v7  ;;  %v8905_v55 = vld [vmem:[#allocation3 + $0x18] sm:$0x11]  ;;  %v8906_v7 = vld [vmem:[#allocation3 + $0xc8] sm:$0xee] }
 0x424   :  { %9803 = vmatprep.subr.bf16.mxu0 %v12693_v60  ;;  %8321 = vmatprep.mubr.bf16.mxu1 %v11583_v11  ;;  %v7524_v11 = vshll.u32 %v7247_v10, 16  ;;  %v8907_v60 = vld [vmem:[#allocation3 + $0xe8] sm:$0x11]  ;;  %v11674_v56 = vrot.slane %v8906_v7, 9  ;;  %v12756_v10 = vld [vmem:[#allocation7 + $0x874] ss:$8 sps:$4 sm:$0xff]  }
 0x425   :  { %8723 = vmatprep.mubr.bf16.mxu0 %v11631_v61  ;;  %v8902_v61 = vld [vmem:[#allocation3 + $0x110] sm:$0xee]  ;;  %v8992_v53 = vrot.slane %v8907_v60, 5 }
 0x426   :  { %9451 = vmatpush1.bf16.msra.mxu1 %v12688_v9  ;;  %v7526_v37 = vrot.slane %v7524_v11, 5  ;;  %v12741_v9 = vld [vmem:[#allocation7 + $0x2a4] ss:$8 sps:$4 sm:$0xff]   ;;  %v11672_v48 = vrot.slane %v8902_v61, 9  ;;  %v12762_v7 = vld [vmem:[#allocation7 + $0x854] ss:$8 sps:$4 sm:$0xff]  }
 0x427   :  { %9804 = vmatpush1.bf16.msra.mxu0 %v12691_v25  ;;  %9452 = vmatprep.subr.bf16.mxu1 %v12696_v29  ;;  %v11673_v29 = vrot.slane %v8904_v13, 9  ;;  %v8914_v11 = vld [vmem:[#allocation3 + $0x28] sm:$0xee] }
 0x428   :  { %9805 = vmatprep.subr.bf16.mxu0 %v12699_v34  ;;  %v7527_v42 = vsel %vm13375_vm3, %v7522_v12, %v7526_v37  ;;  %v8988_v34 = vrot.slane %v8905_v55, 5  ;;  %v12759_v37 = vld [vmem:[#allocation7 + $0x864] ss:$8 sps:$4 sm:$0xff]  }
 0x429   :  { %8322 = vmatmul.mubr.bf16.gmra.mxu1 %v11582_v15  ;;  %v12730_v15 = vld [vmem:[#allocation7 + $0x5b0] ss:$8 sps:$4 sm:$0xff]   ;;  %v11639_v25 = vcombine.high %v15050_v41, %v7527_v42 }
 0x42a   :  { %8724 = vmatmul.mubr.bf16.gmra.mxu0 %v11630_v24  ;;  %9453 = vmatpush1.bf16.msra.mxu1 %v12694_v46  ;;  %v8984_v24 = vrot.slane %v8903_v19, 5  ;;  %v12736_v46 = vld [vmem:[#allocation7 + $0x5a0] ss:$8 sps:$4 sm:$0xff]   ;;  %v8916_v19 = vld [vmem:[#allocation3 + $0x70] sm:$0xee] }
 0x42b   :  { %9806 = vmatpush1.bf16.msra.mxu0 %v12697_v0  ;;  %9454 = vmatprep.subr.bf16.mxu1 %v12702_v62  ;;  %v12744_v0 = vld [vmem:[#allocation7 + $0x594] ss:$8 sps:$4 sm:$0xff]  }
 0x42c   :  { %9807 = vmatprep.subr.bf16.mxu0 %v12705_v52  ;;  %8331 = vmatprep.mubr.bf16.mxu1 %v11585_v26  ;;  %v12747_v62 = vld [vmem:[#allocation7 + $0x294] ss:$8 sps:$4 sm:$0xff]   ;;  %v8908_v52 = vld [vmem:[#allocation3 + $0x128] sm:$0xee]  ;;  %v8909_v26 = vld [vmem:[#allocation3 + $0x48] sm:$0x11] }
 0x42d   :  { %8733 = vmatprep.mubr.bf16.mxu0 %v11587_v57 }
 0x42e   :  { %9455 = vmatpush1.bf16.msra.mxu1 %v12700_v3  ;;  %v8911_v3 = vld [vmem:[#allocation3 + $0xf0] sm:$0x11] }
 0x42f   :  { %9808 = vmatpush1.bf16.msra.mxu0 %v12703_v30  ;;  %9456 = vmatprep.subr.bf16.mxu1 %v12708_v47  ;;  %v11638_v30 = vcombine.low %v15050_v41, %v7527_v42  ;;  %v8996_v41 = vrot.slane %v8909_v26, 5  ;;  %v12757_v42 = vld [vmem:[#allocation7 + $0x860] ss:$8 sps:$4 sm:$0xff]  }
 0x430   :  { %9809 = vmatprep.subr.bf16.mxu0 %v12711_v16  ;;  %v8989_v16 = vsel %vm13567_vm7, %v11673_v29, %v8988_v34  ;;  %v8919_v29 = vld [vmem:[#allocation3 + $0x68] sm:$0x11] }
 0x431   :  { %8332 = vmatmul.mubr.bf16.gmra.mxu1 %v11584_v17  ;;  %v15109_v17 = vsel %vm13567_vm7, %v11674_v56, %v8992_v53 }
 0x432   :  { %8734 = vmatmul.mubr.bf16.gmra.mxu0 %v11586_v4  ;;  %9457 = vmatpush2.bf16.msra.mxu1 %v12706_v58  ;;  %v12750_v58 = vld [vmem:[#allocation7 + $0x584] ss:$8 sps:$4 sm:$0xff]   ;;  %v11693_v2 = vcombine.high %v8989_v16, %v15109_v17 }
 0x433   :  { %9810 = vmatpush2.bf16.msra.mxu0 %v12709_v18  ;;  %9458 = vmatprep.subr.bf16.mxu1 %v12714_v33  ;;  %v12753_v18 = vld [vmem:[#allocation7 + $0x284] ss:$8 sps:$4 sm:$0xff]   ;;  %v11675_v33 = vrot.slane %v8908_v52, 9 }
 0x434   :  { %9811 = vmatprep.subr.bf16.mxu0 %v12717_v50  ;;  %8341 = vmatprep.mubr.bf16.mxu1 %v11587_v57  ;;  %v8910_v57 = vld [vmem:[#allocation3 + $0x78] sm:$0xee] }
 0x435   :  { %8743 = vmatprep.mubr.bf16.mxu0 %v11589_v59  ;;  %v11676_v50 = vrot.slane %v8910_v57, 9  ;;  %v12765_v57 = vld [vmem:[#allocation7 + $0x844] ss:$8 sps:$4 sm:$0xff]  }
 0x436   :  { %9459 = vmatpush2.bf16.msra.mxu1 %v12712_v39  ;;  %v12748_v39 = vld [vmem:[#allocation7 + $0x580] ss:$8 sps:$4 sm:$0xff]  }
 0x437   :  { %9812 = vmatpush2.bf16.msra.mxu0 %v12715_v27  ;;  %9460 = vmatprep.subr.bf16.mxu1 %v12720_v20  ;;  %v12751_v27 = vld [vmem:[#allocation7 + $0x280] ss:$8 sps:$4 sm:$0xff]   ;;  %v8997_v20 = vsel %vm13567_vm7, %v11675_v33, %v8996_v41 }
 0x438   :  { %9813 = vmatprep.subr.bf16.mxu0 %v12723_v44  ;;  %v15123_v12 = vcombine.high %v15109_v17, %v8997_v20 }
 0x439   :  { %8342 = vmatmul.mubr.bf16.gmra.mxu1 %v11586_v4  ;;  %v8985_v4 = vsel %vm13567_vm7, %v11672_v48, %v8984_v24  ;;  %v15140_v48 = vcombine.low %v15109_v17, %v8997_v20 }
 0x43a   :  { %8744 = vmatmul.mubr.bf16.gmra.mxu0 %v11588_v6  ;;  %9461 = vmatpush2.bf16.msra.mxu1 %v12718_v5  ;;  %v11741_v8 = vcombine.high %v8985_v4, %v8989_v16  ;;  %v8915_v5 = vld [vmem:[#allocation3 + $0x118] sm:$0x11] }
 0x43b   :  { %9814 = vmatpush2.bf16.msra.mxu0 %v12721_v49  ;;  %9462 = vmatprep.subr.bf16.mxu1 %v12726_v21  ;;  %v11740_v49 = vcombine.low %v8985_v4, %v8989_v16  ;;  %v11692_v21 = vcombine.low %v8989_v16, %v15109_v17  ;;  %v9016_v16 = vrot.slane %v8919_v29, 5 }
 0x43c   :  { %9815 = vmatprep.subr.bf16.mxu0 %v12729_v54  ;;  %8351 = vmatprep.mubr.bf16.mxu1 %v11589_v59  ;;  %v9000_v59 = vrot.slane %v8911_v3, 5  ;;  %v12754_v54 = vld [vmem:[#allocation7 + $0x870] ss:$8 sps:$4 sm:$0xff]  }
 0x43d   :  { %8753 = vmatprep.mubr.bf16.mxu0 %v11591_v38 }
 0x43e   :  { %9463 = vmatpush2.bf16.msra.mxu1 %v12724_v36  ;;  %v15118_v44 = vsel %vm13567_vm7, %v11676_v50, %v9000_v59 }
 0x43f   :  { %9816 = vmatpush2.bf16.msra.mxu0 %v12727_v40  ;;  %9464 = vmatprep.subr.bf16.mxu1 %v12732_v1  ;;  %v9004_v40 = vrot.slane %v8913_v45, 5  ;;  %v11678_v1 = vrot.slane %v8914_v11, 9  ;;  %v11694_v53 = vcombine.low %v8997_v20, %v15118_v44 }
 0x440   :  { %9817 = vmatprep.subr.bf16.mxu0 %v12735_v28  ;;  %v9008_v28 = vrot.slane %v8915_v5, 5 }
 0x441   :  { %8352 = vmatmul.mubr.bf16.gmra.mxu1 %v11588_v6  ;;  %v8912_v6 = vld [vmem:[#allocation3 + $0xa8] sm:$0xee] }
 0x442   :  { %8754 = vmatmul.mubr.bf16.gmra.mxu0 %v11590_v32  ;;  %9465 = vmatpush2.bf16.msra.mxu1 %v12730_v15  ;;  %v11677_v36 = vrot.slane %v8912_v6, 9  ;;  %v15134_v61 = vsel %vm13567_vm7, %v11678_v1, %v9008_v28  ;;  %v8923_v6 = vld [vmem:[#allocation3 + $0x20] sm:$0x11] }
 0x443   :  { %9818 = vmatpush2.bf16.msra.mxu0 %v12733_v22  ;;  %9466 = vmatprep.subr.bf16.mxu1 %v12738_v14  ;;  %v8917_v14 = vld [vmem:[#allocation3 + $0x30] sm:$0x11] }
 0x444   :  { %9819 = vmatprep.subr.bf16.mxu0 %v12741_v9  ;;  %8361 = vmatprep.mubr.bf16.mxu1 %v11591_v38  ;;  %v11695_v38 = vcombine.high %v8997_v20, %v15118_v44  ;;  %v15130_v60 = vsel %vm13567_vm7, %v11677_v36, %v9004_v40  ;;  %v8922_v20 = vld [vmem:[#allocation3 + $0xa0] sm:$0xee] }
 0x445   :  { %8763 = vmatprep.mubr.bf16.mxu0 %v11639_v25  ;;  %v8918_v25 = vld [vmem:[#allocation3 + $0x90] sm:$0xee]  ;;  %v15148_v3 = vcombine.high %v15118_v44, %v15130_v60  ;;  %v11696_v5 = vcombine.low %v15130_v60, %v15134_v61 }
 0x446   :  { %9467 = vmatpush2.bf16.msra.mxu1 %v12736_v46  ;;  %v12760_v46 = vld [vmem:[#allocation7 + $0x850] ss:$8 sps:$4 sm:$0xff]  }
 0x447   :  { %9820 = vmatpush2.bf16.msra.mxu0 %v12739_v43  ;;  %9468 = vmatprep.subr.bf16.mxu1 %v12744_v0  ;;  %v11697_v43 = vcombine.high %v15130_v60, %v15134_v61  ;;  %v11679_v0 = vrot.slane %v8916_v19, 9 }
 0x448   :  { %9821 = vmatprep.subr.bf16.mxu0 %v12747_v62  ;;  %v9012_v62 = vrot.slane %v8917_v14, 5  ;;  %v12769_v14 = vld [vmem:[#allocation7 + $0x820] ss:$8 sps:$4 sm:$0xff]  }
 0x449   :  { %8362 = vmatmul.mubr.bf16.gmra.mxu1 %v11590_v32 }
 0x44a   :  { %8764 = vmatmul.mubr.bf16.gmra.mxu0 %v11638_v30  ;;  %9469 = vmatpush2.bf16.msra.mxu1 %v12742_v35  ;;  %v11680_v30 = vrot.slane %v8918_v25, 9  ;;  %v15157_v33 = vsel %vm13567_vm7, %v11679_v0, %v9012_v62  ;;  %v8929_v62 = vld [vmem:[#allocation3 + $0x130] sm:$0x11] }
 0x44b   :  { %9822 = vmatpush2.bf16.msra.mxu0 %v12745_v23  ;;  %9470 = vmatprep.subr.bf16.mxu1 %v12750_v58  ;;  %v12763_v58 = vld [vmem:[#allocation7 + $0x840] ss:$8 sps:$4 sm:$0xff]  }
 0x44c   :  { %9823 = vmatprep.subr.bf16.mxu0 %v12753_v18  ;;  %9472 = vmatprep.mubr.bf16.mxu1 %v11693_v2  ;;  %v12768_v18 = vld [vmem:[#allocation7 + $0x834] ss:$8 sps:$4 sm:$0xff]   ;;  %v15162_v59 = vsel %vm13567_vm7, %v11680_v30, %v9016_v16  ;;  %v8924_v2 = vld [vmem:[#allocation3 + $0x108] sm:$0xee] }
 0x44d   :  { %9825 = vmatprep.mubr.bf16.mxu0 %v11741_v8  ;;  %v8925_v8 = vld [vmem:[#allocation3 + $0x40] sm:$0x11]  ;;  %v11683_v36 = vrot.slane %v8924_v2, 9  ;;  %v11698_v16 = vcombine.low %v15157_v33, %v15162_v59 }
 0x44e   :  { %9471 = vmatpush2.bf16.msra.mxu1 %v12748_v39  ;;  %v8926_v39 = vld [vmem:[#allocation3 + $0xd8] sm:$0xee]  ;;  %v9028_v40 = vrot.slane %v8925_v8, 5  ;;  %v12777_v8 = vld [vmem:[#allocation7 + $0x804] ss:$8 sps:$4 sm:$0xff]  }
 0x44f   :  { %9824 = vmatpush2.bf16.msra.mxu0 %v12751_v27  ;;  %10195 = vmatprep.subr.bf16.mxu1 %v12756_v10  ;;  %v8927_v10 = vld [vmem:[#allocation3 + $0x80] sm:$0x11] }
 0x451   :  { %v6310_v15 = vpop.f32.mrf.mxu1  ;;  %9473 = vmatmul.mubr.bf16.vlgmr.msra.gmra.mxu1 %v11692_v21  ;;  %v15174_v21 = vcombine.high %v15134_v61, %v15157_v33 }
 0x452   :  { %v6663_v22 = vpop.f32.mrf.mxu0  ;;  %9826 = vmatmul.mubr.bf16.vlgmr.msra.gmra.mxu0 %v11740_v49  ;;  %10196 = vmatpush1.bf16.msra.mxu1 %v12754_v54  ;;  %v15170_v49 = vcombine.low %v15118_v44, %v15130_v60  ;;  %v9032_v44 = vrot.slane %v8927_v10, 5  ;;  %v9036_v10 = vrot.slane %v8929_v62, 5 }
 0x453   :  { %v15125_v32 = vadd.f32 %v6663_v22, %v6310_v15  ;;  %9482 = vmatprep.mubr.bf16.mxu1 %v11695_v38  ;;  %v6312_v13 = vpop.f32.mrf.mxu1  ;;  %10197 = vmatprep.subr.bf16.mxu1 %v12759_v37  ;;  %v12766_v38 = vld [vmem:[#allocation7 + $0x830] ss:$8 sps:$4 sm:$0xff]   ;;  %v11699_v37 = vcombine.high %v15157_v33, %v15162_v59  ;;  %v12771_v15 = vld [vmem:[#allocation7 + $0x824] ss:$8 sps:$4 sm:$0xff]   ;;  %v11684_v22 = vrot.slane %v8926_v39, 9 }
 0x454   :  { %v6665_v55 = vpop.f32.mrf.mxu0  ;;  %9835 = vmatprep.mubr.bf16.mxu0 %v15123_v12 }
 0x455   :  { %v15136_v9 = vadd.f32 %v6665_v55, %v6312_v13  ;;  %v6314_v34 = vpop.f32.mrf.mxu1  ;;  %v9024_v13 = vrot.slane %v8923_v6, 5 }
 0x456   :  { %v6667_v56 = vpop.f32.mrf.mxu0  ;;  %10198 = vmatpush1.bf16.msra.mxu1 %v12757_v42  ;;  %v11682_v42 = vrot.slane %v8922_v20, 9 }
 0x457   :  { %v15142_v24 = vadd.f32 %v6667_v56, %v6314_v34  ;;  %v6316_v52 = vpop.f32.mrf.mxu1  ;;  %10199 = vmatprep.subr.bf16.mxu1 %v12762_v7  ;;  %v12774_v34 = vld [vmem:[#allocation7 + $0x814] ss:$8 sps:$4 sm:$0xff]   ;;  %v15188_v56 = vsel %vm13567_vm7, %v11683_v36, %v9028_v40 }
 0x458   :  { %v6669_v26 = vpop.f32.mrf.mxu0  ;;  %v12780_v36 = vld [vmem:[#allocation7 + $0x8f4] ss:$8 sps:$4 sm:$0xff]  }
 0x459   :  { %v15150_v17 = vadd.f32 %v6669_v26, %v6316_v52  ;;  %v6320_v4 = vpop.f32.mrf.mxu1  ;;  %9483 = vmatmul.mubr.bf16.gmra.mxu1 %v11694_v53  ;;  %v15192_v53 = vsel %vm13567_vm7, %v11684_v22, %v9032_v44  ;;  %v8930_v52 = vld [vmem:[#allocation3 + $0xe0] sm:$0xee]  ;;  %v8931_v26 = vld [vmem:[#allocation3 + $0x10] sm:$0x11]  ;;  %v8933_v22 = vld [vmem:[#allocation3 + $0x98] sm:$0x11] }
 0x45a   :  { %v6673_v35 = vpop.f32.mrf.mxu0  ;;  %9836 = vmatmul.mubr.bf16.gmra.mxu0 %v15140_v48  ;;  %10200 = vmatpush1.bf16.msra.mxu1 %v12760_v46  ;;  %v15196_v46 = vsel %vm13567_vm7, %v11682_v42, %v9024_v13  ;;  %v11686_v20 = vrot.slane %v8930_v52, 9  ;;  %v9040_v6 = vrot.slane %v8931_v26, 5  ;;  %v8934_v44 = vld [vmem:[#allocation3 + $0xd0] sm:$0xee]  ;;  %v8935_v42 = vld [vmem:[#allocation3] sm:$0x11] }
 0x45b   :  { %v15153_v23 = vadd.f32 %v6673_v35, %v6320_v4  ;;  %9492 = vmatprep.mubr.bf16.mxu1 %v11697_v43  ;;  %v6322_v41 = vpop.f32.mrf.mxu1  ;;  %10201 = vmatprep.subr.bf16.mxu1 %v12765_v57  ;;  %v8928_v43 = vld [vmem:[#allocation3 + $0x8] sm:$0xee]  ;;  %v15204_v4 = vcombine.low %v15134_v61, %v15157_v33 }
 0x45c   :  { %v6675_v50 = vpop.f32.mrf.mxu0  ;;  %9845 = vmatprep.mubr.bf16.mxu0 %v15148_v3  ;;  %v11685_v39 = vrot.slane %v8928_v43, 9  ;;  %v12783_v26 = vld [vmem:[#allocation7 + $0x8e4] ss:$8 sps:$4 sm:$0xff]  }
 0x45d   :  { %v15164_v27 = vadd.f32 %v6675_v50, %v6322_v41  ;;  %v6324_v45 = vpop.f32.mrf.mxu1  ;;  %v11749_v41 = vcombine.high %v15196_v46, %v15188_v56 }
 0x45e   :  { %v6677_v11 = vpop.f32.mrf.mxu0  ;;  %10202 = vmatpush1.bf16.msra.mxu1 %v12763_v58  ;;  %v12772_v58 = vld [vmem:[#allocation7 + $0x810] ss:$8 sps:$4 sm:$0xff]   ;;  %v15219_v40 = vsel %vm13567_vm7, %v11685_v39, %v9036_v10  ;;  %v12786_v39 = vld [vmem:[#allocation7 + $0x8d4] ss:$8 sps:$4 sm:$0xff]  }
 0x45f   :  { %v15176_v54 = vadd.f32 %v6677_v11, %v6324_v45  ;;  %v6326_v1 = vpop.f32.mrf.mxu1  ;;  %10203 = vmatprep.subr.bf16.mxu1 %v12768_v18  ;;  %v11701_v18 = vcombine.high %v15188_v56, %v15192_v53  ;;  %v15237_v43 = vcombine.high %v15192_v53, %v15219_v40 }
 0x460   :  { %v6679_v28 = vpop.f32.mrf.mxu0 }
 0x461   :  { %v15180_v55 = vadd.f32 %v6679_v28, %v6326_v1  ;;  %v6330_v7 = vpop.f32.mrf.mxu1  ;;  %9493 = vmatmul.mubr.bf16.gmra.mxu1 %v11696_v5  ;;  %v12775_v5 = vld [vmem:[#allocation7 + $0x800] ss:$8 sps:$4 sm:$0xff]   ;;  %v15223_v1 = vsel %vm13567_vm7, %v11686_v20, %v9040_v6  ;;  %v8936_v6 = vld [vmem:[#allocation3 + $0x58] sm:$0xee] }
 0x462   :  { %v6683_v60 = vpop.f32.mrf.mxu0  ;;  %9846 = vmatmul.mubr.bf16.gmra.mxu0 %v15170_v49  ;;  %10204 = vmatpush1.bf16.msra.mxu1 %v12766_v38  ;;  %v8932_v28 = vld [vmem:[#allocation3 + $0x100] sm:$0xee] }
 0x463   :  { %v15183_v19 = vadd.f32 %v6683_v60, %v6330_v7  ;;  %9502 = vmatprep.mubr.bf16.mxu1 %v11699_v37  ;;  %v6332_v25 = vpop.f32.mrf.mxu1  ;;  %10205 = vmatprep.subr.bf16.mxu1 %v12771_v15  ;;  %v11748_v60 = vcombine.low %v15196_v46, %v15188_v56  ;;  %v9044_v46 = vrot.slane %v8933_v22, 5  ;;  %v15256_v22 = vcombine.low %v15192_v53, %v15219_v40 }
 0x464   :  { %v6685_v29 = vpop.f32.mrf.mxu0  ;;  %9855 = vmatprep.mubr.bf16.mxu0 %v15174_v21 }
 0x465   :  { %v15198_v0 = vadd.f32 %v6685_v29, %v6332_v25  ;;  %v6334_v57 = vpop.f32.mrf.mxu1  ;;  %v12778_v29 = vld [vmem:[#allocation7 + $0x8f0] ss:$8 sps:$4 sm:$0xff]  }
 0x466   :  { %v6687_v30 = vpop.f32.mrf.mxu0  ;;  %10206 = vmatpush1.bf16.msra.mxu1 %v12769_v14  ;;  %v11700_v14 = vcombine.low %v15188_v56, %v15192_v53 }
 0x467   :  { %v15206_v35 = vadd.f32 %v6687_v30, %v6334_v57  ;;  %v6336_v50 = vpop.f32.mrf.mxu1  ;;  %10207 = vmatprep.subr.bf16.mxu1 %v12774_v34  ;;  %v11703_v34 = vcombine.high %v15219_v40, %v15223_v1  ;;  %v11687_v57 = vrot.slane %v8932_v28, 9  ;;  %v11688_v30 = vrot.slane %v8934_v44, 9 }
 0x468   :  { %v6689_v2 = vpop.f32.mrf.mxu0  ;;  %v11702_v28 = vcombine.low %v15219_v40, %v15223_v1 }
 0x469   :  { %v15212_v61 = vadd.f32 %v6689_v2, %v6336_v50  ;;  %v6340_v33 = vpop.f32.mrf.mxu1  ;;  %9503 = vmatmul.mubr.bf16.gmra.mxu1 %v11698_v16  ;;  %v9048_v16 = vrot.slane %v8935_v42, 5  ;;  %v12781_v50 = vld [vmem:[#allocation7 + $0x8e0] ss:$8 sps:$4 sm:$0xff]   ;;  %v9045_v10 = vsel %vm13567_vm7, %v11687_v57, %v9044_v46  ;;  %v12784_v42 = vld [vmem:[#allocation7 + $0x8d0] ss:$8 sps:$4 sm:$0xff]  }
 0x46a   :  { %v6693_v45 = vpop.f32.mrf.mxu0  ;;  %9856 = vmatmul.mubr.bf16.gmra.mxu0 %v15204_v4  ;;  %10208 = vmatpush1.bf16.msra.mxu1 %v12772_v58 }
 0x46b   :  { %v15215_v11 = vadd.f32 %v6693_v45, %v6340_v33  ;;  %9512 = vmatprep.mubr.bf16.mxu1 %v11701_v18  ;;  %v6342_v38 = vpop.f32.mrf.mxu1  ;;  %10209 = vmatprep.subr.bf16.mxu1 %v12777_v8  ;;  %v15248_v20 = vsel %vm13567_vm7, %v11688_v30, %v9048_v16  ;;  %v8937_v45 = vld [vmem:[#allocation3 + $0x120] sm:$0x11] }
 0x46c   :  { %v6695_v37 = vpop.f32.mrf.mxu0  ;;  %9865 = vmatprep.mubr.bf16.mxu0 %v11749_v41  ;;  %v12787_v30 = vld [vmem:[#allocation7 + $0x8c0] ss:$8 sps:$4 sm:$0xff]  }
 0x46d   :  { %v15225_v15 = vadd.f32 %v6695_v37, %v6342_v38  ;;  %v6344_v13 = vpop.f32.mrf.mxu1  ;;  %v8939_v38 = vld [vmem:[#allocation3 + $0x50] sm:$0x11] }
 0x46e   :  { %v6697_v7 = vpop.f32.mrf.mxu0  ;;  %10210 = vmatpush1.bf16.msra.mxu1 %v12775_v5  ;;  %v8938_v5 = vld [vmem:[#allocation3 + $0xc0] sm:$0xee] }
 0x46f   :  { %v15231_v25 = vadd.f32 %v6697_v7, %v6344_v13  ;;  %v6346_v62 = vpop.f32.mrf.mxu1  ;;  %10211 = vmatprep.subr.bf16.mxu1 %v12780_v36  ;;  %v11705_v13 = vcombine.high %v9045_v10, %v15248_v20  ;;  %v15262_v7 = vcombine.high %v15223_v1, %v9045_v10 }
 0x470   :  { %v6699_v52 = vpop.f32.mrf.mxu0 }
 0x471   :  { %v15239_v56 = vadd.f32 %v6699_v52, %v6346_v62  ;;  %v6350_v58 = vpop.f32.mrf.mxu1  ;;  %9513 = vmatmul.mubr.bf16.gmra.mxu1 %v11700_v14  ;;  %v9052_v62 = vrot.slane %v8937_v45, 5  ;;  %v11690_v52 = vrot.slane %v8938_v5, 9  ;;  %v11704_v45 = vcombine.low %v9045_v10, %v15248_v20 }
 0x472   :  { %v6703_v18 = vpop.f32.mrf.mxu0  ;;  %9866 = vmatmul.mubr.bf16.gmra.mxu0 %v11748_v60  ;;  %10212 = vmatpush2.bf16.msra.mxu1 %v12778_v29  ;;  %v12789_v29 = vld [vmem:[#allocation7 + $0x8c4] ss:$8 sps:$4 sm:$0xff]   ;;  %v15280_v5 = vcombine.low %v15223_v1, %v9045_v10  ;;  %v12793_v10 = vld [vmem:[#allocation7 + $0x8a0] ss:$8 sps:$4 sm:$0xff]  }
 0x473   :  { %v15241_v41 = vadd.f32 %v6703_v18, %v6350_v58  ;;  %9522 = vmatprep.mubr.bf16.mxu1 %v11703_v34  ;;  %v6352_v2 = vpop.f32.mrf.mxu1  ;;  %10213 = vmatprep.subr.bf16.mxu1 %v12783_v26  ;;  %v11689_v34 = vrot.slane %v8936_v6, 9  ;;  %v9056_v26 = vrot.slane %v8939_v38, 5  ;;  %v12792_v18 = vld [vmem:[#allocation7 + $0x8b4] ss:$8 sps:$4 sm:$0xff]  }
 0x474   :  { %v6705_v8 = vpop.f32.mrf.mxu0  ;;  %9875 = vmatprep.mubr.bf16.mxu0 %v15237_v43 }
 0x475   :  { %v15250_v33 = vadd.f32 %v6705_v8, %v6352_v2  ;;  %v6354_v37 = vpop.f32.mrf.mxu1  ;;  %v15274_v2 = vsel %vm13567_vm7, %v11690_v52, %v9056_v26  ;;  %v12798_v26 = vld [vmem:[#allocation7 + $0x894] ss:$8 sps:$4 sm:$0xff]  }
 0x476   :  { %v6707_v36 = vpop.f32.mrf.mxu0  ;;  %10214 = vmatpush2.bf16.msra.mxu1 %v12781_v50  ;;  %v9053_v50 = vsel %vm13567_vm7, %v11689_v34, %v9052_v62 }
 0x477   :  { %v15258_v44 = vadd.f32 %v6707_v36, %v6354_v37  ;;  %v6356_v60 = vpop.f32.mrf.mxu1  ;;  %10215 = vmatprep.subr.bf16.mxu1 %v12786_v39  ;;  %v12790_v37 = vld [vmem:[#allocation7 + $0x8b0] ss:$8 sps:$4 sm:$0xff]   ;;  %v11707_v36 = vcombine.high %v9053_v50, %v15274_v2 }
 0x478   :  { %v6709_v14 = vpop.f32.mrf.mxu0 }
 0x479   :  { %v15264_v57 = vadd.f32 %v6709_v14, %v6356_v60  ;;  %v6360_v53 = vpop.f32.mrf.mxu1  ;;  %9523 = vmatmul.mubr.bf16.gmra.mxu1 %v11702_v28  ;;  %v15286_v60 = vcombine.high %v15248_v20, %v9053_v50 }
 0x47a   :  { %v6713_v40 = vpop.f32.mrf.mxu0  ;;  %9876 = vmatmul.mubr.bf16.gmra.mxu0 %v15256_v22  ;;  %10216 = vmatpush2.bf16.msra.mxu1 %v12784_v42 }
 0x47b   :  { %v15267_v46 = vadd.f32 %v6713_v40, %v6360_v53  ;;  %9532 = vmatprep.mubr.bf16.mxu1 %v11705_v13  ;;  %v6362_v16 = vpop.f32.mrf.mxu1  ;;  %10217 = vmatprep.subr.bf16.mxu1 %v12789_v29  ;;  %v12795_v13 = vld [vmem:[#allocation7 + $0x8a4] ss:$8 sps:$4 sm:$0xff]  }
 0x47c   :  { %v6715_v58 = vpop.f32.mrf.mxu0  ;;  %9885 = vmatprep.mubr.bf16.mxu0 %v15262_v7 }
 0x47d   :  { %v15276_v8 = vadd.f32 %v6715_v58, %v6362_v16  ;;  %v6364_v39 = vpop.f32.mrf.mxu1  ;;  %v11706_v16 = vcombine.low %v9053_v50, %v15274_v2  ;;  %v15298_v58 = vcombine.low %v15248_v20, %v9053_v50  ;;  %v12799_v20 = vld [vmem:[#allocation7 + $0x880] ss:$8 sps:$4 sm:$0xff]  }
 0x47e   :  { %v6717_v6 = vpop.f32.mrf.mxu0  ;;  %10218 = vmatpush2.bf16.msra.mxu1 %v12787_v30 }
 0x47f   :  { %v15282_v38 = vadd.f32 %v6717_v6, %v6364_v39  ;;  %v6366_v28 = vpop.f32.mrf.mxu1  ;;  %10219 = vmatprep.subr.bf16.mxu1 %v12792_v18  ;;  %v12796_v39 = vld [vmem:[#allocation7 + $0x890] ss:$8 sps:$4 sm:$0xff]  }
 0x480   :  { %v6719_v42 = vpop.f32.mrf.mxu0 }
 0x481   :  { %v15288_v14 = vadd.f32 %v6719_v42, %v6366_v28  ;;  %v6370_v29 = vpop.f32.mrf.mxu1  ;;  %9533 = vmatmul.mubr.bf16.gmra.mxu1 %v11704_v45 }
 0x482   :  { %v6723_v34 = vpop.f32.mrf.mxu0  ;;  %9886 = vmatmul.mubr.bf16.gmra.mxu0 %v15280_v5  ;;  %10220 = vmatpush2.bf16.msra.mxu1 %v12790_v37  ;;  %v12801_v37 = vld [vmem:[#allocation7 + $0x884] ss:$8 sps:$4 sm:$0xff]  }
 0x483   :  { %v15291_v1 = vadd.f32 %v6723_v34, %v6370_v29  ;;  %9542 = vmatprep.mubr.bf16.mxu1 %v11707_v36  ;;  %v6372_v62 = vpop.f32.mrf.mxu1  ;;  %10221 = vmatprep.subr.bf16.mxu1 %v12795_v13 }
 0x484   :  { %v6725_v52 = vpop.f32.mrf.mxu0  ;;  %9895 = vmatprep.mubr.bf16.mxu0 %v15286_v60 }
 0x485   :  { %v15294_v53 = vadd.f32 %v6725_v52, %v6372_v62  ;;  %v6374_v40 = vpop.f32.mrf.mxu1 }
 0x486   :  { %v6727_v30 = vpop.f32.mrf.mxu0  ;;  %10222 = vmatpush2.bf16.msra.mxu1 %v12793_v10 }
 0x487   :  { %v15300_v18 = vadd.f32 %v6727_v30, %v6374_v40  ;;  %v6376_v6 = vpop.f32.mrf.mxu1  ;;  %10223 = vmatprep.subr.bf16.mxu1 %v12798_v26 }
 0x488   :  { %v6729_v45 = vpop.f32.mrf.mxu0 }
 0x489   :  { %v15302_v36 = vadd.f32 %v6729_v45, %v6376_v6  ;;  %v6380_v28 = vpop.f32.mrf.mxu1  ;;  %9543 = vmatmul.mubr.bf16.gmra.mxu1 %v11706_v16 }
 0x48a   :  { %v6733_v42 = vpop.f32.mrf.mxu0  ;;  %9896 = vmatmul.mubr.bf16.gmra.mxu0 %v15298_v58  ;;  %10224 = vmatpush2.bf16.msra.mxu1 %v12796_v39 }
 0x48b   :  { %v15305_v13 = vadd.f32 %v6733_v42, %v6380_v28  ;;  %10227 = vmatprep.mubr.bf16.mxu1 %v15123_v12  ;;  %v6382_v50 = vpop.f32.mrf.mxu1  ;;  %10225 = vmatprep.subr.bf16.mxu1 %v12801_v37  ;;  %v8920_v28 = vld [vmem:[#allocation3 + $0xf8] sm:$0xee]  ;;  %v8921_v42 = vld [vmem:[#allocation3 + $0x138] sm:$0x11] }
 0x48c   :  { %v6735_v29 = vpop.f32.mrf.mxu0 }
 0x48d   :  { %v15308_v34 = vadd.f32 %v6735_v29, %v6382_v50  ;;  %v6384_v10 = vpop.f32.mrf.mxu1 }
 0x48e   :  { %v6737_v62 = vpop.f32.mrf.mxu0  ;;  %10226 = vmatpush2.bf16.msra.mxu1 %v12799_v20 }
 0x48f   :  { %v15310_v52 = vadd.f32 %v6737_v62, %v6384_v10  ;;  %v6386_v26 = vpop.f32.mrf.mxu1  ;;  %v9020_v62 = vrot.slane %v8921_v42, 5 }
 0x490   :  { %v6739_v40 = vpop.f32.mrf.mxu0 }
 0x491   :  { %v15312_v30 = vadd.f32 %v6739_v40, %v6386_v26  ;;  %v7065_v16 = vpop.f32.mrf.mxu1  ;;  %10228 = vmatmul.mubr.bf16.vlgmr.msra.gmra.mxu1 %v15140_v48 }
 0x492   :  { %v15314_v6 = vpop.f32.mrf.mxu0  ;;  %v15318_v12 = vadd.f32 %v7065_v16, %v15125_v32  ;;  %10237 = vmatprep.mubr.bf16.mxu1 %v15148_v3  ;;  %v11681_v32 = vrot.slane %v8920_v28, 9 }
 0x493   :  { %v7067_v39 = vpop.f32.mrf.mxu1 }
 0x494   :  { %v15321_v45 = vpop.f32.mrf.mxu0  ;;  %v15324_v37 = vadd.f32 %v7067_v39, %v15136_v9  ;;  %v9021_v39 = vsel %vm13567_vm7, %v11681_v32, %v9020_v62 }
 0x495   :  { %v7069_v20 = vpop.f32.mrf.mxu1 }
 0x496   :  { %v15326_v50 = vpop.f32.mrf.mxu0  ;;  %v15329_v29 = vadd.f32 %v7069_v20, %v15142_v24 }
 0x497   :  { %v7071_v48 = vpop.f32.mrf.mxu1 }
 0x498   :  { %v15331_v10 = vpop.f32.mrf.mxu0  ;;  %v15334_v3 = vadd.f32 %v7071_v48, %v15150_v17 }
 0x499   :  { %v7075_v26 = vpop.f32.mrf.mxu1  ;;  %10238 = vmatmul.mubr.bf16.gmra.mxu1 %v15170_v49 }
 0x49a   :  { %v15336_v40 = vpop.f32.mrf.mxu0  ;;  %v15340_v9 = vadd.f32 %v7075_v26, %v15153_v23  ;;  %10247 = vmatprep.mubr.bf16.mxu1 %v15174_v21  ;;  %v11795_v23 = vcombine.high %v15162_v59, %v9021_v39 }
 0x49b   :  { %v7077_v24 = vpop.f32.mrf.mxu1 }
 0x49c   :  { %v15343_v16 = vpop.f32.mrf.mxu0  ;;  %v15348_v28 = vadd.f32 %v7077_v24, %v15164_v27 }
 0x49d   :  { %v7079_v17 = vpop.f32.mrf.mxu1 }
 0x49e   :  { %v15350_v42 = vpop.f32.mrf.mxu0  ;;  %v15353_v20 = vadd.f32 %v7079_v17, %v15176_v54 }
 0x49f   :  { %v7081_v49 = vpop.f32.mrf.mxu1 }
 0x4a0   :  { %v15356_v48 = vpop.f32.mrf.mxu0  ;;  %v15359_v21 = vadd.f32 %v7081_v49, %v15180_v55  ;;  %v11794_v55 = vcombine.low %v15162_v59, %v9021_v39 }
 0x4a1   :  { %v7085_v26 = vpop.f32.mrf.mxu1  ;;  %10248 = vmatmul.mubr.bf16.gmra.mxu1 %v15204_v4 }
 0x4a2   :  { %v15361_v31 = vpop.f32.mrf.mxu0  ;;  %v15365_v27 = vadd.f32 %v7085_v26, %v15183_v19  ;;  %10257 = vmatprep.mubr.bf16.mxu1 %v11795_v23 }
 0x4a3   :  { %v7087_v32 = vpop.f32.mrf.mxu1 }
 0x4a4   :  { %v15367_v54 = vpop.f32.mrf.mxu0  ;;  %v15370_v62 = vadd.f32 %v7087_v32, %v15198_v0 }
 0x4a5   :  { %v7089_v24 = vpop.f32.mrf.mxu1 }
 0x4a6   :  { %v15372_v17 = vpop.f32.mrf.mxu0  ;;  %v15376_v49 = vadd.f32 %v7089_v24, %v15206_v35 }
 0x4a7   :  { %v7091_v51 = vpop.f32.mrf.mxu1 }
 0x4a8   :  { %v15378_v4 = vpop.f32.mrf.mxu0  ;;  %v15381_v19 = vadd.f32 %v7091_v51, %v15212_v61 }
 0x4a9   :  { %v7095_v23 = vpop.f32.mrf.mxu1  ;;  %10258 = vmatmul.mubr.bf16.gmra.mxu1 %v11794_v55 }
 0x4aa   :  { %v15383_v26 = vpop.f32.mrf.mxu0  ;;  %v15386_v0 = vadd.f32 %v7095_v23, %v15215_v11  ;;  %10267 = vmatprep.mubr.bf16.mxu1 %v15237_v43 }
 0x4ab   :  { %v7097_v32 = vpop.f32.mrf.mxu1 }
 0x4ac   :  { %v15389_v59 = vpop.f32.mrf.mxu0  ;;  %v15392_v35 = vadd.f32 %v7097_v32, %v15225_v15 }
 0x4ad   :  { %v7099_v39 = vpop.f32.mrf.mxu1 }
 0x4ae   :  { %v15394_v24 = vpop.f32.mrf.mxu0  ;;  %v15397_v51 = vadd.f32 %v7099_v39, %v15231_v25  ;;  %v8940_v39 = vld [vmem:[#allocation3 + $0x88] sm:$0xee] }
 0x4af   :  { %v7101_v61 = vpop.f32.mrf.mxu1 }
 0x4b0   :  { %16176 = vst [vmem:[#allocation57_spill] sm:$0xff] %v15397_v51  ;;  %v15399_v63 = vpop.f32.mrf.mxu0  ;;  %v15402_v11 = vadd.f32 %v7101_v61, %v15239_v56  ;;  %v8941_v51 = vld [vmem:[#allocation3 + $0xb8] sm:$0x11] }
 0x4b1   :  { %v7105_v55 = vpop.f32.mrf.mxu1  ;;  %10268 = vmatmul.mubr.bf16.gmra.mxu1 %v15256_v22 }
 0x4b2   :  { %16177 = vst [vmem:[#allocation37_spill] sm:$0xff] %v15402_v11  ;;  %v15404_v43 = vpop.f32.mrf.mxu0  ;;  %v15408_v15 = vadd.f32 %v7105_v55, %v15241_v41  ;;  %10277 = vmatprep.mubr.bf16.mxu1 %v15262_v7  ;;  %v11691_v41 = vrot.slane %v8940_v39, 9  ;;  %v9060_v55 = vrot.slane %v8941_v51, 5 }
 0x4b3   :  { %16178 = vst [vmem:[#allocation58_spill] sm:$0xff] %v15404_v43  ;;  %v7107_v23 = vpop.f32.mrf.mxu1 }
 0x4b4   :  { %16179 = vst [vmem:[#allocation59_spill] sm:$0xff] %v15408_v15  ;;  %v15411_v32 = vpop.f32.mrf.mxu0  ;;  %v15414_v25 = vadd.f32 %v7107_v23, %v15250_v33  ;;  %v9061_v39 = vsel %vm13567_vm7, %v11691_v41, %v9060_v55 }
 0x4b5   :  { %16180 = vst [vmem:[#allocation60_spill] sm:$0xff] %v15411_v32  ;;  %v7109_v56 = vpop.f32.mrf.mxu1 }
 0x4b6   :  { %v15416_v61 = vpop.f32.mrf.mxu0  ;;  %v15419_v11 = vadd.f32 %v7109_v56, %v15258_v44 }
 0x4b7   :  { %v7111_v22 = vpop.f32.mrf.mxu1 }
 0x4b8   :  { %v15421_v43 = vpop.f32.mrf.mxu0  ;;  %v15424_v7 = vadd.f32 %v7111_v22, %v15264_v57 }
 0x4b9   :  { %v7115_v15 = vpop.f32.mrf.mxu1  ;;  %10278 = vmatmul.mubr.bf16.gmra.mxu1 %v15280_v5 }
 0x4ba   :  { %v15426_v32 = vpop.f32.mrf.mxu0  ;;  %v15430_v33 = vadd.f32 %v7115_v15, %v15267_v46  ;;  %10287 = vmatprep.mubr.bf16.mxu1 %v15286_v60  ;;  %v11803_v46 = vcombine.high %v15274_v2, %v9061_v39 }
 0x4bb   :  { %v7117_v44 = vpop.f32.mrf.mxu1 }
 0x4bc   :  { %16181 = vst [vmem:[#allocation38_spill] sm:$0xff] %v15430_v33  ;;  %v15433_v23 = vpop.f32.mrf.mxu0  ;;  %v15438_v51 = vadd.f32 %v7117_v44, %v15276_v8 }
 0x4bd   :  { %v7119_v57 = vpop.f32.mrf.mxu1 }
 0x4be   :  { %v15440_v56 = vpop.f32.mrf.mxu0  ;;  %v15443_v22 = vadd.f32 %v7119_v57, %v15282_v38 }
 0x4bf   :  { %v7121_v5 = vpop.f32.mrf.mxu1 }
 0x4c0   :  { %v15446_v15 = vpop.f32.mrf.mxu0  ;;  %v15449_v60 = vadd.f32 %v7121_v5, %v15288_v14  ;;  %v11802_v14 = vcombine.low %v15274_v2, %v9061_v39 }
 0x4c1   :  { %v7125_v33 = vpop.f32.mrf.mxu1  ;;  %10288 = vmatmul.mubr.bf16.gmra.mxu1 %v15298_v58 }
 0x4c2   :  { %16182 = vst [vmem:[#allocation53_spill] sm:$0xff] %v15449_v60  ;;  %v15451_v47 = vpop.f32.mrf.mxu0  ;;  %v15455_v8 = vadd.f32 %v7125_v33, %v15291_v1  ;;  %10297 = vmatprep.mubr.bf16.mxu1 %v11803_v46 }
 0x4c3   :  { %v7127_v41 = vpop.f32.mrf.mxu1 }
 0x4c4   :  { %v15457_v38 = vpop.f32.mrf.mxu0  ;;  %v15460_v55 = vadd.f32 %v7127_v41, %v15294_v53 }
 0x4c5   :  { %v7129_v44 = vpop.f32.mrf.mxu1 }
 0x4c6   :  { %16183 = vst [vmem:[#allocation39_spill] sm:$0xff] %v15460_v55  ;;  %v15462_v57 = vpop.f32.mrf.mxu0  ;;  %v15466_v5 = vadd.f32 %v7129_v44, %v15300_v18 }
 0x4c7   :  { %v7131_v60 = vpop.f32.mrf.mxu1 }
 0x4c8   :  { %v15468_v58 = vpop.f32.mrf.mxu0  ;;  %v15471_v1 = vadd.f32 %v7131_v60, %v15302_v36 }
 0x4c9   :  { %v7135_v33 = vpop.f32.mrf.mxu1  ;;  %10298 = vmatmul.mubr.bf16.gmra.mxu1 %v11802_v14 }
 0x4ca   :  { %16184 = vst [vmem:[#allocation40_spill] sm:$0xff] %v15471_v1  ;;  %v15473_v46 = vpop.f32.mrf.mxu0  ;;  %v15476_v53 = vadd.f32 %v7135_v33, %v15305_v13 }
 0x4cb   :  { %v7137_v41 = vpop.f32.mrf.mxu1 }
 0x4cc   :  { %16185 = vst [vmem:[#allocation61_spill] sm:$0xff] %v15476_v53  ;;  %v15478_v55 = vpop.f32.mrf.mxu0  ;;  %v15481_v2 = vadd.f32 %v7137_v41, %v15308_v34 }
 0x4cd   :  { %16186 = vst [vmem:[#allocation54_spill] sm:$0xff] %v15478_v55  ;;  %v7139_v18 = vpop.f32.mrf.mxu1 }
 0x4ce   :  { %16187 = vst [vmem:[#allocation62_spill] sm:$0xff] %v15481_v2  ;;  %v15483_v39 = vpop.f32.mrf.mxu0  ;;  %v15486_v44 = vadd.f32 %v7139_v18, %v15310_v52 }
 0x4cf   :  { %16188 = vst [vmem:[#allocation55_spill] sm:$0xff] %v15483_v39  ;;  %v7141_v36 = vpop.f32.mrf.mxu1 }
 0x4d0   :  { %16189 = vst [vmem:[#allocation56_spill] sm:$0xff] %v15486_v44  ;;  %v15488_v60 = vpop.f32.mrf.mxu0  ;;  %v15491_v14 = vadd.f32 %v7141_v36, %v15312_v30 }
 0x4d1   :  { %16190 = vst [vmem:[#allocation63_spill] sm:$0xff] %v15488_v60  ;;  %v8293_v13 = vpop.f32.mrf.mxu1 }
 0x4d2   :  { %16191 = vst [vmem:[#allocation42_spill] sm:$0xff] %v15491_v14  ;;  %v8695_v33 = vpop.f32.mrf.mxu0  ;;  %v8294_v53 = vadd.f32 %v8293_v13, %v15314_v6 }
 0x4d3   :  { %v8295_v55 = vpop.f32.mrf.mxu1 }
 0x4d4   :  { %v8697_v1 = vpop.f32.mrf.mxu0  ;;  %v8774_v34 = vadd.f32 %v8695_v33, %v8294_v53  ;;  %v8296_v41 = vadd.f32 %v8295_v55, %v15321_v45 }
 0x4d5   :  { %v8297_v2 = vpop.f32.mrf.mxu1 }
 0x4d6   :  { %v8699_v39 = vpop.f32.mrf.mxu0  ;;  %v15496_v52 = vadd.f32 %v8774_v34, %v15318_v12  ;;  %v8775_v18 = vadd.f32 %v8697_v1, %v8296_v41  ;;  %v8298_v44 = vadd.f32 %v8297_v2, %v15326_v50 }
 0x4d7   :  { %v8299_v60 = vpop.f32.mrf.mxu1 }
 0x4d8   :  { %v8701_v30 = vpop.f32.mrf.mxu0  ;;  %v15500_v36 = vadd.f32 %v8775_v18, %v15324_v37  ;;  %v8776_v14 = vadd.f32 %v8699_v39, %v8298_v44  ;;  %v8300_v6 = vadd.f32 %v8299_v60, %v15331_v10 }
 0x4d9   :  { %v8303_v13 = vpop.f32.mrf.mxu1 }
 0x4da   :  { %v8705_v53 = vpop.f32.mrf.mxu0  ;;  %v15504_v45 = vadd.f32 %v8776_v14, %v15329_v29  ;;  %v8777_v55 = vadd.f32 %v8701_v30, %v8300_v6  ;;  %v8304_v12 = vadd.f32 %v8303_v13, %v15336_v40 }
 0x4db   :  { %v8305_v33 = vpop.f32.mrf.mxu1 }
 0x4dc   :  { %v8707_v1 = vpop.f32.mrf.mxu0  ;;  %v15508_v50 = vadd.f32 %v8777_v55, %v15334_v3  ;;  %v8778_v2 = vadd.f32 %v8705_v53, %v8304_v12  ;;  %v8306_v37 = vadd.f32 %v8305_v33, %v15343_v16 }
 0x4dd   :  { %v8307_v34 = vpop.f32.mrf.mxu1 }
 0x4de   :  { %v8709_v39 = vpop.f32.mrf.mxu0  ;;  %v15512_v10 = vadd.f32 %v8778_v2, %v15340_v9  ;;  %v8779_v44 = vadd.f32 %v8707_v1, %v8306_v37  ;;  %v8308_v29 = vadd.f32 %v8307_v34, %v15350_v42 }
 0x4df   :  { %v8309_v60 = vpop.f32.mrf.mxu1 }
 0x4e0   :  { %v8711_v14 = vpop.f32.mrf.mxu0  ;;  %v15516_v40 = vadd.f32 %v8779_v44, %v15348_v28  ;;  %v8780_v41 = vadd.f32 %v8709_v39, %v8308_v29  ;;  %v8310_v3 = vadd.f32 %v8309_v60, %v15356_v48 }
 0x4e1   :  { %v8313_v18 = vpop.f32.mrf.mxu1 }
 0x4e2   :  { %v8715_v30 = vpop.f32.mrf.mxu0  ;;  %v15520_v16 = vadd.f32 %v8780_v41, %v15353_v20  ;;  %v8781_v6 = vadd.f32 %v8711_v14, %v8310_v3  ;;  %v8314_v9 = vadd.f32 %v8313_v18, %v15361_v31 }
 0x4e3   :  { %v8315_v13 = vpop.f32.mrf.mxu1 }
 0x4e4   :  { %v8717_v53 = vpop.f32.mrf.mxu0  ;;  %v15524_v42 = vadd.f32 %v8781_v6, %v15359_v21  ;;  %v8782_v55 = vadd.f32 %v8715_v30, %v8314_v9  ;;  %v8316_v28 = vadd.f32 %v8315_v13, %v15367_v54 }
 0x4e5   :  { %v8317_v12 = vpop.f32.mrf.mxu1 }
 0x4e6   :  { %v8719_v33 = vpop.f32.mrf.mxu0  ;;  %v15528_v48 = vadd.f32 %v8782_v55, %v15365_v27  ;;  %v8783_v1 = vadd.f32 %v8717_v53, %v8316_v28  ;;  %v8318_v20 = vadd.f32 %v8317_v12, %v15372_v17  ;;  %v16192_v28 = vld [vmem:[#allocation57_spill] sm:$0xff] }
 0x4e7   :  { %v8319_v2 = vpop.f32.mrf.mxu1 }
 0x4e8   :  { %v8721_v37 = vpop.f32.mrf.mxu0  ;;  %v15532_v31 = vadd.f32 %v8783_v1, %v15370_v62  ;;  %v8784_v34 = vadd.f32 %v8719_v33, %v8318_v20  ;;  %v8320_v21 = vadd.f32 %v8319_v2, %v15378_v4  ;;  %v16194_v33 = vld [vmem:[#allocation58_spill] sm:$0xff]  ;;  %v16195_v2 = vld [vmem:[#allocation37_spill] sm:$0xff] }
 0x4e9   :  { %v8323_v39 = vpop.f32.mrf.mxu1 }
 0x4ea   :  { %v8725_v44 = vpop.f32.mrf.mxu0  ;;  %v15536_v54 = vadd.f32 %v8784_v34, %v15376_v49  ;;  %v8785_v29 = vadd.f32 %v8721_v37, %v8320_v21  ;;  %v8324_v27 = vadd.f32 %v8323_v39, %v15383_v26  ;;  %v16197_v34 = vld [vmem:[#allocation60_spill] sm:$0xff] }
 0x4eb   :  { %v8325_v60 = vpop.f32.mrf.mxu1 }
 0x4ec   :  { %v8727_v14 = vpop.f32.mrf.mxu0  ;;  %v15540_v17 = vadd.f32 %v8785_v29, %v15381_v19  ;;  %v8786_v41 = vadd.f32 %v8725_v44, %v8324_v27  ;;  %v8326_v62 = vadd.f32 %v8325_v60, %v15389_v59  ;;  %v16198_v44 = vld [vmem:[#allocation59_spill] sm:$0xff] }
 0x4ed   :  { %v8327_v3 = vpop.f32.mrf.mxu1 }
 0x4ee   :  { %v8729_v18 = vpop.f32.mrf.mxu0  ;;  %v15544_v4 = vadd.f32 %v8786_v41, %v15386_v0  ;;  %v8787_v30 = vadd.f32 %v8727_v14, %v8326_v62  ;;  %v8328_v49 = vadd.f32 %v8327_v3, %v15394_v24 }
 0x4ef   :  { %v8329_v6 = vpop.f32.mrf.mxu1 }
 0x4f0   :  { %v8731_v9 = vpop.f32.mrf.mxu0  ;;  %v15548_v26 = vadd.f32 %v8787_v30, %v15392_v35  ;;  %v8788_v13 = vadd.f32 %v8729_v18, %v8328_v49  ;;  %v8330_v19 = vadd.f32 %v8329_v6, %v15399_v63 }
 0x4f1   :  { %v8333_v53 = vpop.f32.mrf.mxu1 }
 0x4f2   :  { %v8735_v55 = vpop.f32.mrf.mxu0  ;;  %v15552_v59 = vadd.f32 %v8788_v13, %v16192_v28  ;;  %v8789_v12 = vadd.f32 %v8731_v9, %v8330_v19  ;;  %v8334_v0 = vadd.f32 %v8333_v53, %v16194_v33 }
 0x4f3   :  { %v8335_v1 = vpop.f32.mrf.mxu1 }
 0x4f4   :  { %16193 = vst [vmem:[#allocation64_spill] sm:$0xff] %v15552_v59  ;;  %v8737_v20 = vpop.f32.mrf.mxu0  ;;  %v15556_v24 = vadd.f32 %v8789_v12, %v16195_v2  ;;  %v8790_v37 = vadd.f32 %v8735_v55, %v8334_v0  ;;  %v8336_v35 = vadd.f32 %v8335_v1, %v16197_v34  ;;  %v16203_v12 = vld [vmem:[#allocation38_spill] sm:$0xff] }
 0x4f5   :  { %v8337_v21 = vpop.f32.mrf.mxu1 }
 0x4f6   :  { %16196 = vst [vmem:[#allocation65_spill] sm:$0xff] %v15556_v24  ;;  %v8739_v39 = vpop.f32.mrf.mxu0  ;;  %v15560_v63 = vadd.f32 %v8790_v37, %v16198_v44  ;;  %v8791_v29 = vadd.f32 %v8737_v20, %v8336_v35  ;;  %v8338_v27 = vadd.f32 %v8337_v21, %v15416_v61  ;;  %v16207_v44 = vld [vmem:[#allocation53_spill] sm:$0xff] }
 0x4f7   :  { %v8339_v60 = vpop.f32.mrf.mxu1 }
 0x4f8   :  { %16199 = vst [vmem:[#allocation41_spill] sm:$0xff] %v15560_v63  ;;  %v8741_v14 = vpop.f32.mrf.mxu0  ;;  %v15564_v41 = vadd.f32 %v8791_v29, %v15414_v25  ;;  %v8792_v62 = vadd.f32 %v8739_v39, %v8338_v27  ;;  %v8340_v3 = vadd.f32 %v8339_v60, %v15421_v43 }
 0x4f9   :  { %v8343_v18 = vpop.f32.mrf.mxu1 }
 0x4fa   :  { %16200 = vst [vmem:[#allocation66_spill] sm:$0xff] %v15564_v41  ;;  %v8745_v30 = vpop.f32.mrf.mxu0  ;;  %v15568_v49 = vadd.f32 %v8792_v62, %v15419_v11  ;;  %v8793_v6 = vadd.f32 %v8741_v14, %v8340_v3  ;;  %v8344_v9 = vadd.f32 %v8343_v18, %v15426_v32  ;;  %v16210_v18 = vld [vmem:[#allocation39_spill] sm:$0xff] }
 0x4fb   :  { %v8345_v13 = vpop.f32.mrf.mxu1 }
 0x4fc   :  { %16201 = vst [vmem:[#allocation43_spill] sm:$0xff] %v15568_v49  ;;  %v8747_v19 = vpop.f32.mrf.mxu0  ;;  %v15572_v61 = vadd.f32 %v8793_v6, %v15424_v7  ;;  %v8794_v53 = vadd.f32 %v8745_v30, %v8344_v9  ;;  %v8346_v25 = vadd.f32 %v8345_v13, %v15433_v23 }
 0x4fd   :  { %v8347_v55 = vpop.f32.mrf.mxu1 }
 0x4fe   :  { %16202 = vst [vmem:[#allocation44_spill] sm:$0xff] %v15572_v61  ;;  %v8749_v28 = vpop.f32.mrf.mxu0  ;;  %v15576_v43 = vadd.f32 %v8794_v53, %v16203_v12  ;;  %v8795_v33 = vadd.f32 %v8747_v19, %v8346_v25  ;;  %v8348_v11 = vadd.f32 %v8347_v55, %v15440_v56  ;;  %v16213_v55 = vld [vmem:[#allocation40_spill] sm:$0xff]  ;;  %v16215_v12 = vld [vmem:[#allocation54_spill] sm:$0xff] }
 0x4ff   :  { %v8349_v0 = vpop.f32.mrf.mxu1 }
 0x500   :  { %16204 = vst [vmem:[#allocation45_spill] sm:$0xff] %v15576_v43  ;;  %v8751_v1 = vpop.f32.mrf.mxu0  ;;  %v15580_v32 = vadd.f32 %v8795_v33, %v15438_v51  ;;  %v8796_v20 = vadd.f32 %v8749_v28, %v8348_v11  ;;  %v8350_v7 = vadd.f32 %v8349_v0, %v15446_v15 }
 0x501   :  { %v8353_v2 = vpop.f32.mrf.mxu1 }
 0x502   :  { %16205 = vst [vmem:[#allocation67_spill] sm:$0xff] %v15580_v32  ;;  %v8755_v37 = vpop.f32.mrf.mxu0  ;;  %v15584_v23 = vadd.f32 %v8796_v20, %v15443_v22  ;;  %v8797_v34 = vadd.f32 %v8751_v1, %v8350_v7  ;;  %v8354_v35 = vadd.f32 %v8353_v2, %v15451_v47  ;;  %v16216_v1 = vld [vmem:[#allocation61_spill] sm:$0xff]  ;;  %v16218_v7 = vld [vmem:[#allocation55_spill] sm:$0xff] }
 0x503   :  { %v8355_v21 = vpop.f32.mrf.mxu1 }
 0x504   :  { %16206 = vst [vmem:[#allocation46_spill] sm:$0xff] %v15584_v23  ;;  %v8757_v39 = vpop.f32.mrf.mxu0  ;;  %v15588_v56 = vadd.f32 %v8797_v34, %v16207_v44  ;;  %v8798_v29 = vadd.f32 %v8755_v37, %v8354_v35  ;;  %v8356_v51 = vadd.f32 %v8355_v21, %v15457_v38  ;;  %v16219_v34 = vld [vmem:[#allocation62_spill] sm:$0xff]  ;;  %v16221_v21 = vld [vmem:[#allocation63_spill] sm:$0xff] }
 0x505   :  { %v8357_v27 = vpop.f32.mrf.mxu1 }
 0x506   :  { %16208 = vst [vmem:[#allocation47_spill] sm:$0xff] %v15588_v56  ;;  %v8759_v60 = vpop.f32.mrf.mxu0  ;;  %v15592_v15 = vadd.f32 %v8798_v29, %v15455_v8  ;;  %v8799_v14 = vadd.f32 %v8757_v39, %v8356_v51  ;;  %v8358_v22 = vadd.f32 %v8357_v27, %v15462_v57  ;;  %v16222_v51 = vld [vmem:[#allocation56_spill] sm:$0xff] }
 0x507   :  { %v8359_v62 = vpop.f32.mrf.mxu1 }
 0x508   :  { %16209 = vst [vmem:[#allocation49_spill] sm:$0xff] %v15592_v15  ;;  %v8761_v3 = vpop.f32.mrf.mxu0  ;;  %v15596_v47 = vadd.f32 %v8799_v14, %v16210_v18  ;;  %v8800_v30 = vadd.f32 %v8759_v60, %v8358_v22  ;;  %v8360_v6 = vadd.f32 %v8359_v62, %v15468_v58  ;;  %v16224_v62 = vld [vmem:[#allocation42_spill] sm:$0xff] }
 0x509   :  { %v8363_v9 = vpop.f32.mrf.mxu1 }
 0x50a   :  { %16211 = vst [vmem:[#allocation48_spill] sm:$0xff] %v15596_v47  ;;  %v8765_v13 = vpop.f32.mrf.mxu0  ;;  %v15600_v38 = vadd.f32 %v8800_v30, %v15466_v5  ;;  %v8801_v19 = vadd.f32 %v8761_v3, %v8360_v6  ;;  %v8364_v8 = vadd.f32 %v8363_v9, %v15473_v46 }
 0x50b   :  { %v8365_v53 = vpop.f32.mrf.mxu1 }
 0x50c   :  { %16212 = vst [vmem:[#allocation34_spill] sm:$0xff] %v15600_v38  ;;  %v8767_v25 = vpop.f32.mrf.mxu0  ;;  %v15604_v57 = vadd.f32 %v8801_v19, %v16213_v55  ;;  %v8802_v28 = vadd.f32 %v8765_v13, %v8364_v8  ;;  %v8366_v33 = vadd.f32 %v8365_v53, %v16215_v12 }
 0x50d   :  { %v8367_v11 = vpop.f32.mrf.mxu1 }
 0x50e   :  { %16214 = vst [vmem:[#allocation33_spill] sm:$0xff] %v15604_v57  ;;  %v8769_v0 = vpop.f32.mrf.mxu0  ;;  %v15608_v58 = vadd.f32 %v8802_v28, %v16216_v1  ;;  %v8803_v20 = vadd.f32 %v8767_v25, %v8366_v33  ;;  %v8368_v5 = vadd.f32 %v8367_v11, %v16218_v7 }
 0x50f   :  { %v8369_v2 = vpop.f32.mrf.mxu1 }
 0x510   :  { %16217 = vst [vmem:[#allocation35_spill] sm:$0xff] %v15608_v58  ;;  %v8771_v37 = vpop.f32.mrf.mxu0  ;;  %v15612_v46 = vadd.f32 %v8803_v20, %v16219_v34  ;;  %v8804_v35 = vadd.f32 %v8769_v0, %v8368_v5  ;;  %v8370_v39 = vadd.f32 %v8369_v2, %v16221_v21 }
 0x511   :  { %v9474_v44 = vpop.f32.mrf.mxu1 }
 0x512   :  { %16220 = vst [vmem:[#allocation36_spill] sm:$0xff] %v15612_v46  ;;  %v9827_v29 = vpop.f32.mrf.mxu0  ;;  %v15616_v27 = vadd.f32 %v8804_v35, %v16222_v51  ;;  %v8805_v60 = vadd.f32 %v8771_v37, %v8370_v39 }
 0x513   :  { %v9476_v14 = vpop.f32.mrf.mxu1 }
 0x514   :  { %16223 = vst [vmem:[#allocation57_spill] sm:$0xff] %v15616_v27  ;;  %v9829_v22 = vpop.f32.mrf.mxu0  ;;  %v15619_v3 = vadd.f32 %v8805_v60, %v16224_v62 }
 0x515   :  { %v9478_v18 = vpop.f32.mrf.mxu1 }
 0x516   :  { %16225 = vst [vmem:[#allocation58_spill] sm:$0xff] %v15619_v3  ;;  %v9831_v30 = vpop.f32.mrf.mxu0 }
 0x517   :  { %v9480_v6 = vpop.f32.mrf.mxu1 }
 0x518   :  { %v9833_v9 = vpop.f32.mrf.mxu0 }
 0x519   :  { %v9484_v13 = vpop.f32.mrf.mxu1 }
 0x51a   :  { %v9837_v19 = vpop.f32.mrf.mxu0 }
 0x51b   :  { %v9486_v8 = vpop.f32.mrf.mxu1 }
 0x51c   :  { %v9839_v53 = vpop.f32.mrf.mxu0 }
 0x51d   :  { %v9488_v25 = vpop.f32.mrf.mxu1 }
 0x51e   :  { %v9841_v28 = vpop.f32.mrf.mxu0 }
 0x51f   :  { %v15621_v55 = vpop.f32.mrf.mxu1 }
 0x520   :  { %v9843_v11 = vpop.f32.mrf.mxu0 }
 0x521   :  { %v15623_v12 = vpop.f32.mrf.mxu1 }
 0x522   :  { %v15631_v20 = vpop.f32.mrf.mxu0 }
 0x523   :  { %v15625_v33 = vpop.f32.mrf.mxu1 }
 0x524   :  { %v15637_v2 = vpop.f32.mrf.mxu0 }
 0x525   :  { %v15627_v0 = vpop.f32.mrf.mxu1 }
 0x526   :  { %v15643_v35 = vpop.f32.mrf.mxu0 }
 0x527   :  { %v15629_v1 = vpop.f32.mrf.mxu1 }
 0x528   :  { %v15649_v51 = vpop.f32.mrf.mxu0 }
 0x529   :  { %v15633_v7 = vpop.f32.mrf.mxu1 }
 0x52a   :  { %v15655_v3 = vpop.f32.mrf.mxu0 }
 0x52b   :  { %v15635_v5 = vpop.f32.mrf.mxu1 }
 0x52c   :  { %v15661_v58 = vpop.f32.mrf.mxu0 }
 0x52d   :  { %v15639_v37 = vpop.f32.mrf.mxu1 }
 0x52e   :  { %v15667_v47 = vpop.f32.mrf.mxu0 }
 0x52f   :  { %v15641_v34 = vpop.f32.mrf.mxu1 }
 0x530   :  { %v15673_v23 = vpop.f32.mrf.mxu0 }
 0x531   :  { %v15645_v21 = vpop.f32.mrf.mxu1 }
 0x532   :  { %v15679_v61 = vpop.f32.mrf.mxu0 }
 0x533   :  { %v15647_v39 = vpop.f32.mrf.mxu1 }
 0x534   :  { %v15685_v63 = vpop.f32.mrf.mxu0 }
 0x535   :  { %v15651_v60 = vpop.f32.mrf.mxu1 }
 0x536   :  { %16226 = vst [vmem:[#allocation37_spill] sm:$0xff] %v15651_v60  ;;  %v9834_v60 = vadd.f32 %v9833_v9, %v9480_v6 }
 0x537   :  { %v15653_v62 = vpop.f32.mrf.mxu1 }
 0x538   :  { %16227 = vst [vmem:[#allocation60_spill] sm:$0xff] %v15653_v62 }
 0x539   :  { %v15657_v27 = vpop.f32.mrf.mxu1 }
 0x53a   :  { %16228 = vst [vmem:[#allocation59_spill] sm:$0xff] %v15657_v27 }
 0x53b   :  { %v15659_v46 = vpop.f32.mrf.mxu1 }
 0x53c   :  { %16229 = vst [vmem:[#allocation38_spill] sm:$0xff] %v15659_v46  ;;  %v9830_v46 = vadd.f32 %v9829_v22, %v9476_v14  ;;  %v9842_v22 = vadd.f32 %v9841_v28, %v9488_v25 }
 0x53d   :  { %v15663_v57 = vpop.f32.mrf.mxu1 }
 0x53e   :  { %16230 = vst [vmem:[#allocation53_spill] sm:$0xff] %v15663_v57 }
 0x53f   :  { %v15665_v38 = vpop.f32.mrf.mxu1 }
 0x540   :  { %16231 = vst [vmem:[#allocation39_spill] sm:$0xff] %v15665_v38 }
 0x541   :  { %v15669_v15 = vpop.f32.mrf.mxu1 }
 0x542   :  { %16232 = vst [vmem:[#allocation40_spill] sm:$0xff] %v15669_v15  ;;  %v9828_v15 = vadd.f32 %v9827_v29, %v9474_v44  ;;  %v9838_v29 = vadd.f32 %v9837_v19, %v9484_v13  ;;  %v9850_v19 = vadd.f32 %v15637_v2, %v15625_v33  ;;  %v9858_v2 = vadd.f32 %v15655_v3, %v15633_v7 }
 0x543   :  { %v15671_v56 = vpop.f32.mrf.mxu1 }
 0x544   :  { %16233 = vst [vmem:[#allocation54_spill] sm:$0xff] %v15671_v56  ;;  %v15691_v56 = vpop.f32.mrf.mxu0 }
 0x545   :  { %v15675_v32 = vpop.f32.mrf.mxu1  ;;  %16240 = vst [vmem:[#allocation68_spill] sm:$0xff] %v15691_v56 }
 0x546   :  { %16234 = vst [vmem:[#allocation61_spill] sm:$0xff] %v15675_v32  ;;  %v15696_v62 = vpop.f32.mrf.mxu0 }
 0x547   :  { %v15677_v43 = vpop.f32.mrf.mxu1 }
 0x548   :  { %16235 = vst [vmem:[#allocation55_spill] sm:$0xff] %v15677_v43  ;;  %v9832_v43 = vadd.f32 %v9831_v30, %v9478_v18 }
 0x549   :  { %v15681_v49 = vpop.f32.mrf.mxu1 }
 0x54a   :  { %16236 = vst [vmem:[#allocation62_spill] sm:$0xff] %v15681_v49 }
 0x54b   :  { %v15683_v41 = vpop.f32.mrf.mxu1 }
 0x54c   :  { %16237 = vst [vmem:[#allocation63_spill] sm:$0xff] %v15683_v41 }
 0x54d   :  { %v15687_v24 = vpop.f32.mrf.mxu1 }
 0x54e   :  { %16238 = vst [vmem:[#allocation56_spill] sm:$0xff] %v15687_v24 }
 0x54f   :  { %v15689_v38 = vpop.f32.mrf.mxu1 }
 0x550   :  { %16239 = vst [vmem:[#allocation42_spill] sm:$0xff] %v15689_v38 }
 0x551   :  { %v10229_v57 = vpop.f32.mrf.mxu1 }
 0x552   :  { %v10308_v32 = vadd.f32 %v10229_v57, %v9828_v15  ;;  %v9877_v57 = vpop.f32.mrf.mxu0 }
 0x553   :  { %v10231_v27 = vpop.f32.mrf.mxu1 }
 0x554   :  { %v15694_v59 = vadd.f32 %v10308_v32, %v15496_v52  ;;  %v10309_v49 = vadd.f32 %v10231_v27, %v9830_v46  ;;  %v9840_v46 = vadd.f32 %v9839_v53, %v9486_v8 }
 0x555   :  { %v10233_v41 = vpop.f32.mrf.mxu1 }
 0x556   :  { %v15699_v24 = vadd.f32 %v10309_v49, %v15500_v36  ;;  %v10310_v38 = vadd.f32 %v10233_v41, %v9832_v43  ;;  %v9879_v36 = vpop.f32.mrf.mxu0  ;;  %v9844_v43 = vadd.f32 %v9843_v11, %v15621_v55  ;;  %v9854_v11 = vadd.f32 %v15649_v51, %v15629_v1 }
 0x557   :  { %v10235_v44 = vpop.f32.mrf.mxu1  ;;  %v9862_v51 = vadd.f32 %v15667_v47, %v15639_v37  ;;  %v16241_v37 = vld [vmem:[#allocation37_spill] sm:$0xff] }
 0x558   :  { %v15702_v56 = vadd.f32 %v10310_v38, %v15504_v45  ;;  %v10311_v15 = vadd.f32 %v10235_v44, %v9834_v60  ;;  %v9881_v13 = vpop.f32.mrf.mxu0  ;;  %v9860_v44 = vadd.f32 %v15661_v58, %v15635_v5  ;;  %v9870_v5 = vadd.f32 %v15685_v63, %v15647_v39 }
 0x559   :  { %v10239_v14 = vpop.f32.mrf.mxu1 }
 0x55a   :  { %v15705_v52 = vadd.f32 %v10311_v15, %v15508_v50  ;;  %v10312_v32 = vadd.f32 %v10239_v14, %v9838_v29  ;;  %v9848_v50 = vadd.f32 %v15631_v20, %v15623_v12  ;;  %v9864_v14 = vadd.f32 %v15673_v23, %v15641_v34 }
 0x55b   :  { %v10241_v27 = vpop.f32.mrf.mxu1  ;;  %v10514_v63 = vmul.f32 %v15702_v56, %v15702_v56 }
 0x55c   :  { %v15708_v18 = vadd.f32 %v10312_v32, %v15512_v10  ;;  %v10313_v41 = vadd.f32 %v10241_v27, %v9840_v46  ;;  %v16243_v27 = vld [vmem:[#allocation60_spill] sm:$0xff] }
 0x55d   :  { %v10243_v49 = vpop.f32.mrf.mxu1 }
 0x55e   :  { %v10314_v45 = vadd.f32 %v10243_v49, %v9842_v22  ;;  %v15712_v38 = vadd.f32 %v10313_v41, %v15516_v40  ;;  %v9852_v40 = vadd.f32 %v15643_v35, %v15627_v0  ;;  %v9874_v22 = vadd.f32 %v15696_v62, %v16243_v27  ;;  %v16244_v41 = vld [vmem:[#allocation64_spill] sm:$0xff]  ;;  %v16255_v27 = vld [vmem:[#allocation55_spill] sm:$0xff] }
 0x55f   :  { %v10245_v30 = vpop.f32.mrf.mxu1  ;;  %v10515_v62 = vmul.f32 %v15705_v52, %v15705_v52 }
 0x560   :  { %v15717_v6 = vadd.f32 %v10314_v45, %v15520_v16  ;;  %v10315_v9 = vadd.f32 %v10245_v30, %v9844_v43  ;;  %v9883_v16 = vpop.f32.mrf.mxu0  ;;  %v16246_v43 = vld [vmem:[#allocation38_spill] sm:$0xff]  ;;  %v16247_v30 = vld [vmem:[#allocation53_spill] sm:$0xff] }
 0x561   :  { %v10249_v10 = vpop.f32.mrf.mxu1  ;;  %v9880_v45 = vadd.f32 %v9879_v36, %v16246_v43  ;;  %v16251_v36 = vld [vmem:[#allocation54_spill] sm:$0xff] }
 0x562   :  { %v15722_v8 = vadd.f32 %v10315_v9, %v15524_v42  ;;  %v10316_v53 = vadd.f32 %v10249_v10, %v9848_v50  ;;  %v16248_v50 = vld [vmem:[#allocation39_spill] sm:$0xff]  ;;  %v16249_v10 = vld [vmem:[#allocation65_spill] sm:$0xff] }
 0x563   :  { %v10251_v25 = vpop.f32.mrf.mxu1  ;;  %v15771_v9 = vadd.f32 %v9883_v16, %v16248_v50 }
 0x564   :  { %v15727_v55 = vadd.f32 %v10316_v53, %v15528_v48  ;;  %v10317_v28 = vadd.f32 %v10251_v25, %v9850_v19  ;;  %v9887_v48 = vpop.f32.mrf.mxu0 }
 0x565   :  { %v10253_v12 = vpop.f32.mrf.mxu1 }
 0x566   :  { %v15732_v20 = vadd.f32 %v10317_v28, %v15532_v31  ;;  %v10318_v33 = vadd.f32 %v10253_v12, %v9852_v40  ;;  %v10512_v40 = vmul.f32 %v15694_v59, %v15694_v59  ;;  %v10516_v28 = vmul.f32 %v15708_v18, %v15708_v18  ;;  %v16252_v12 = vld [vmem:[#allocation61_spill] sm:$0xff] }
 0x567   :  { %v10255_v42 = vpop.f32.mrf.mxu1 }
 0x568   :  { %v15737_v60 = vadd.f32 %v10318_v33, %v15536_v54  ;;  %v10319_v0 = vadd.f32 %v10255_v42, %v9854_v11  ;;  %v9889_v54 = vpop.f32.mrf.mxu0  ;;  %v10513_v33 = vmul.f32 %v15699_v24, %v15699_v24  ;;  %v16253_v42 = vld [vmem:[#allocation41_spill] sm:$0xff] }
 0x569   :  { %v10259_v35 = vpop.f32.mrf.mxu1 }
 0x56a   :  { %v15742_v29 = vadd.f32 %v10319_v0, %v15540_v17  ;;  %v10320_v1 = vadd.f32 %v10259_v35, %v9858_v2  ;;  %v9868_v17 = vadd.f32 %v15679_v61, %v15645_v21  ;;  %v9882_v61 = vadd.f32 %v9881_v13, %v16247_v30  ;;  %v9891_v21 = vpop.f32.mrf.mxu0 }
 0x56b   :  { %v10261_v31 = vpop.f32.mrf.mxu1  ;;  %v15782_v13 = vadd.f32 %v9889_v54, %v16251_v36  ;;  %v15789_v11 = vadd.f32 %v9891_v21, %v16252_v12  ;;  %v10470_v35 = vadd.f32 %v15702_v56, %v15694_v59  ;;  %v10565_v54 = vadd.f32 %v10515_v62, %v10513_v33 }
 0x56c   :  { %v15747_v15 = vadd.f32 %v10320_v1, %v15544_v4  ;;  %v10321_v3 = vadd.f32 %v10261_v31, %v9860_v44  ;;  %v16242_v4 = vld [vmem:[#allocation68_spill] sm:$0xff]  ;;  %v10544_v44 = vadd.f32 %v10514_v63, %v10512_v40  ;;  %v10517_v1 = vmul.f32 %v15712_v38, %v15712_v38 }
 0x56d   :  { %v10263_v7 = vpop.f32.mrf.mxu1  ;;  %v9872_v46 = vadd.f32 %v16242_v4, %v16241_v37  ;;  %v10518_v31 = vmul.f32 %v15717_v6, %v15717_v6  ;;  %v10520_v37 = vmul.f32 %v15727_v55, %v15727_v55  ;;  %v10523_v12 = vmul.f32 %v15742_v29, %v15742_v29 }
 0x56e   :  { %v15752_v32 = vadd.f32 %v10321_v3, %v15548_v26  ;;  %v10322_v58 = vadd.f32 %v10263_v7, %v9862_v51  ;;  %v16245_v26 = vld [vmem:[#allocation59_spill] sm:$0xff]  ;;  %v10491_v3 = vadd.f32 %v15705_v52, %v15699_v24  ;;  %v16254_v7 = vld [vmem:[#allocation66_spill] sm:$0xff] }
 0x56f   :  { %v10265_v47 = vpop.f32.mrf.mxu1  ;;  %v9878_v34 = vadd.f32 %v9877_v57, %v16245_v26  ;;  %v16250_v57 = vld [vmem:[#allocation40_spill] sm:$0xff]  ;;  %v16256_v26 = vld [vmem:[#allocation43_spill] sm:$0xff] }
 0x570   :  { %v15763_v49 = vadd.f32 %v10322_v58, %v16244_v41  ;;  %v10323_v23 = vadd.f32 %v10265_v47, %v9864_v14  ;;  %v15779_v25 = vadd.f32 %v9887_v48, %v16250_v57  ;;  %v9893_v48 = vpop.f32.mrf.mxu0  ;;  %v10519_v47 = vmul.f32 %v15722_v8, %v15722_v8 }
 0x571   :  { %v10269_v39 = vpop.f32.mrf.mxu1  ;;  %v15813_v41 = vadd.f32 %v9893_v48, %v16255_v27 }
 0x572   :  { %v15776_v19 = vadd.f32 %v10323_v23, %v16249_v10  ;;  %v10324_v53 = vadd.f32 %v10269_v39, %v9868_v17  ;;  %v10471_v17 = vadd.f32 %v10470_v35, %v15708_v18  ;;  %v10492_v23 = vadd.f32 %v10491_v3, %v15712_v38  ;;  %v9897_v62 = vpop.f32.mrf.mxu0 }
 0x573   :  { %v10271_v16 = vpop.f32.mrf.mxu1  ;;  %v10521_v39 = vmul.f32 %v15732_v20, %v15732_v20  ;;  %v10522_v10 = vmul.f32 %v15737_v60, %v15737_v60  ;;  %v10525_v3 = vmul.f32 %v15752_v32, %v15752_v32 }
 0x574   :  { %v15794_v2 = vadd.f32 %v10324_v53, %v16253_v42  ;;  %v10325_v0 = vadd.f32 %v10271_v16, %v9870_v5  ;;  %v10545_v5 = vadd.f32 %v10544_v44, %v10516_v28  ;;  %v10472_v21 = vadd.f32 %v10471_v17, %v15717_v6  ;;  %v16257_v53 = vld [vmem:[#allocation44_spill] sm:$0xff] }
 0x575   :  { %v10273_v51 = vpop.f32.mrf.mxu1  ;;  %v10493_v40 = vadd.f32 %v10492_v23, %v15722_v8  ;;  %v10524_v42 = vmul.f32 %v15747_v15, %v15747_v15  ;;  %v10527_v23 = vmul.f32 %v15776_v19, %v15776_v19 }
 0x576   :  { %v15805_v14 = vadd.f32 %v10325_v0, %v16254_v7  ;;  %v10326_v58 = vadd.f32 %v10273_v51, %v9872_v46  ;;  %v10566_v46 = vadd.f32 %v10565_v54, %v10517_v1  ;;  %v10546_v63 = vadd.f32 %v10545_v5, %v10518_v31  ;;  %v16258_v0 = vld [vmem:[#allocation45_spill] sm:$0xff] }
 0x577   :  { %v10275_v4 = vpop.f32.mrf.mxu1  ;;  %v10494_v44 = vadd.f32 %v10493_v40, %v15732_v20 }
 0x578   :  { %v15817_v43 = vadd.f32 %v10326_v58, %v16256_v26  ;;  %v10327_v30 = vadd.f32 %v10275_v4, %v9874_v22  ;;  %v10473_v22 = vadd.f32 %v10472_v21, %v15727_v55  ;;  %v10547_v28 = vadd.f32 %v10546_v63, %v10520_v37  ;;  %v16260_v58 = vld [vmem:[#allocation67_spill] sm:$0xff] }
 0x579   :  { %v10279_v50 = vpop.f32.mrf.mxu1  ;;  %v10567_v33 = vadd.f32 %v10566_v46, %v10519_v47  ;;  %v10495_v47 = vadd.f32 %v10494_v44, %v15742_v29  ;;  %v10526_v4 = vmul.f32 %v15763_v49, %v15763_v49  ;;  %v16261_v46 = vld [vmem:[#allocation46_spill] sm:$0xff] }
 0x57a   :  { %v15825_v57 = vadd.f32 %v10327_v30, %v16257_v53  ;;  %v10328_v36 = vadd.f32 %v10279_v50, %v9878_v34  ;;  %v16259_v34 = vld [vmem:[#allocation62_spill] sm:$0xff]  ;;  %v10474_v31 = vadd.f32 %v10473_v22, %v15737_v60  ;;  %v10548_v7 = vadd.f32 %v10547_v28, %v10522_v10  ;;  %v16263_v22 = vld [vmem:[#allocation47_spill] sm:$0xff] }
 0x57b   :  { %v10281_v16 = vpop.f32.mrf.mxu1  ;;  %v15838_v1 = vadd.f32 %v9897_v62, %v16259_v34  ;;  %v10568_v54 = vadd.f32 %v10567_v33, %v10521_v39  ;;  %v10528_v50 = vmul.f32 %v15794_v2, %v15794_v2  ;;  %v10529_v10 = vmul.f32 %v15805_v14, %v15805_v14  ;;  %v16264_v34 = vld [vmem:[#allocation49_spill] sm:$0xff] }
 0x57c   :  { %v15834_v48 = vadd.f32 %v10328_v36, %v16258_v0  ;;  %v10329_v35 = vadd.f32 %v10281_v16, %v9880_v45  ;;  %v9899_v45 = vpop.f32.mrf.mxu0  ;;  %v10475_v37 = vadd.f32 %v10474_v31, %v15747_v15  ;;  %v10549_v30 = vadd.f32 %v10548_v7, %v10524_v42  ;;  %v16262_v36 = vld [vmem:[#allocation63_spill] sm:$0xff] }
 0x57d   :  { %v10283_v51 = vpop.f32.mrf.mxu1  ;;  %v10569_v26 = vadd.f32 %v10568_v54, %v10523_v12  ;;  %v9900_v40 = vadd.f32 %v9899_v45, %v16262_v36  ;;  %v10530_v42 = vmul.f32 %v15817_v43, %v15817_v43  ;;  %v16265_v45 = vld [vmem:[#allocation48_spill] sm:$0xff] }
 0x57e   :  { %v15844_v17 = vadd.f32 %v10329_v35, %v16260_v58  ;;  %v10330_v5 = vadd.f32 %v10283_v51, %v9882_v61  ;;  %v10496_v61 = vadd.f32 %v10495_v47, %v15752_v32  ;;  %v10476_v39 = vadd.f32 %v10475_v37, %v15763_v49  ;;  %v9901_v44 = vpop.f32.mrf.mxu0 }
 0x57f   :  { %v10285_v27 = vpop.f32.mrf.mxu1  ;;  %v10570_v53 = vadd.f32 %v10569_v26, %v10525_v3  ;;  %v10550_v12 = vadd.f32 %v10549_v30, %v10526_v4  ;;  %v10532_v58 = vmul.f32 %v15834_v48, %v15834_v48 }
 0x580   :  { %v15853_v21 = vadd.f32 %v10330_v5, %v16261_v46  ;;  %v10331_v63 = vadd.f32 %v10285_v27, %v15771_v9  ;;  %v10497_v9 = vadd.f32 %v10496_v61, %v15776_v19  ;;  %v10477_v33 = vadd.f32 %v10476_v39, %v15794_v2  ;;  %v16267_v39 = vld [vmem:[#allocation34_spill] sm:$0xff] }
 0x581   :  { %v10289_v62 = vpop.f32.mrf.mxu1  ;;  %v10571_v35 = vadd.f32 %v10570_v53, %v10527_v23  ;;  %v10551_v54 = vadd.f32 %v10550_v12, %v10528_v50  ;;  %v10533_v27 = vmul.f32 %v15844_v17, %v15844_v17  ;;  %v16266_v23 = vld [vmem:[#allocation56_spill] sm:$0xff]  ;;  %v9903_v53 = vpop.f32.mrf.mxu0 }
 0x582   :  { %v15864_v28 = vadd.f32 %v10331_v63, %v16263_v22  ;;  %v10332_v16 = vadd.f32 %v10289_v62, %v15779_v25  ;;  %v10498_v3 = vadd.f32 %v10497_v9, %v15805_v14  ;;  %v10531_v25 = vmul.f32 %v15825_v57, %v15825_v57 }
 0x583   :  { %v10291_v0 = vpop.f32.mrf.mxu1  ;;  %v10478_v7 = vadd.f32 %v10477_v33, %v15817_v43  ;;  %v10572_v47 = vadd.f32 %v10571_v35, %v10529_v10  ;;  %v9902_v26 = vadd.f32 %v9901_v44, %v16266_v23  ;;  %v10552_v30 = vadd.f32 %v10551_v54, %v10530_v42  ;;  %v16268_v33 = vld [vmem:[#allocation33_spill] sm:$0xff]  ;;  %v16269_v54 = vld [vmem:[#allocation42_spill] sm:$0xff] }
 0x584   :  { %v15872_v31 = vadd.f32 %v10332_v16, %v16264_v34  ;;  %v10333_v51 = vadd.f32 %v10291_v0, %v15782_v13  ;;  %v10499_v13 = vadd.f32 %v10498_v3, %v15825_v57  ;;  %v10534_v63 = vmul.f32 %v15853_v21, %v15853_v21 }
 0x585   :  { %v10293_v5 = vpop.f32.mrf.mxu1  ;;  %v10479_v46 = vadd.f32 %v10478_v7, %v15834_v48  ;;  %v10573_v10 = vadd.f32 %v10572_v47, %v10531_v25  ;;  %v10553_v36 = vadd.f32 %v10552_v30, %v10532_v58  ;;  %v10535_v12 = vmul.f32 %v15864_v28, %v15864_v28  ;;  %v16270_v58 = vld [vmem:[#allocation35_spill] sm:$0xff] }
 0x586   :  { %v15882_v37 = vadd.f32 %v10333_v51, %v16265_v45  ;;  %v10334_v4 = vadd.f32 %v10293_v5, %v15789_v11  ;;  %v10500_v11 = vadd.f32 %v10499_v13, %v15844_v17  ;;  %v10536_v16 = vmul.f32 %v15872_v31, %v15872_v31 }
 0x587   :  { %v10295_v61 = vpop.f32.mrf.mxu1  ;;  %v10480_v22 = vadd.f32 %v10479_v46, %v15853_v21  ;;  %v10574_v35 = vadd.f32 %v10573_v10, %v10533_v27  ;;  %v10554_v44 = vadd.f32 %v10553_v36, %v10534_v63  ;;  %v9904_v7 = vadd.f32 %v9903_v53, %v16269_v54  ;;  %v16271_v46 = vld [vmem:[#allocation36_spill] sm:$0xff]  ;;  %v16272_v10 = vld [vmem:[#allocation57_spill] sm:$0xff] }
 0x588   :  { %v15893_v50 = vadd.f32 %v10334_v4, %v16267_v39  ;;  %v10335_v62 = vadd.f32 %v10295_v61, %v15813_v41  ;;  %v10501_v41 = vadd.f32 %v10500_v11, %v15864_v28  ;;  %v10537_v25 = vmul.f32 %v15882_v37, %v15882_v37 }
 0x589   :  { %v10299_v9 = vpop.f32.mrf.mxu1  ;;  %v10481_v34 = vadd.f32 %v10480_v22, %v15872_v31  ;;  %v10555_v45 = vadd.f32 %v10554_v44, %v10536_v16  ;;  %v10575_v23 = vadd.f32 %v10574_v35, %v10535_v12 }
 0x58a   :  { %v15903_v42 = vadd.f32 %v10335_v62, %v16268_v33  ;;  %v10336_v0 = vadd.f32 %v10299_v9, %v15838_v1  ;;  %v10538_v51 = vmul.f32 %v15893_v50, %v15893_v50  ;;  %v10502_v1 = vadd.f32 %v10501_v41, %v15882_v37 }
 0x58b   :  { %v10301_v3 = vpop.f32.mrf.mxu1  ;;  %v10482_v4 = vadd.f32 %v10481_v34, %v15893_v50  ;;  %v10576_v11 = vadd.f32 %v10575_v23, %v10537_v25 }
 0x58c   :  { %v15914_v5 = vadd.f32 %v10336_v0, %v16270_v58  ;;  %v10337_v47 = vadd.f32 %v10301_v3, %v9900_v40  ;;  %v10539_v27 = vmul.f32 %v15903_v42, %v15903_v42  ;;  %v10503_v39 = vadd.f32 %v10502_v1, %v15903_v42  ;;  %v16273_v0 = vld [vmem:[#allocation58_spill] sm:$0xff] }
 0x58d   :  { %v10303_v13 = vpop.f32.mrf.mxu1  ;;  %v10556_v40 = vadd.f32 %v10555_v45, %v10538_v51 }
 0x58e   :  { %v10540_v30 = vmul.f32 %v15914_v5, %v15914_v5  ;;  %v15923_v63 = vadd.f32 %v10337_v47, %v16271_v46  ;;  %v10338_v61 = vadd.f32 %v10303_v13, %v9902_v26  ;;  %v10483_v22 = vadd.f32 %v10482_v4, %v15914_v5 }
 0x58f   :  { %v10305_v62 = vpop.f32.mrf.mxu1  ;;  %v10577_v12 = vadd.f32 %v10576_v11, %v10539_v27 }
 0x590   :  { %v15927_v53 = vadd.f32 %v10338_v61, %v16272_v10  ;;  %v10339_v36 = vadd.f32 %v10305_v62, %v9904_v7  ;;  %v10504_v16 = vadd.f32 %v10503_v39, %v15923_v63  ;;  %v10541_v9 = vmul.f32 %v15923_v63, %v15923_v63 }
 0x591   :  { %v10557_v33 = vadd.f32 %v10556_v40, %v10540_v30 }
 0x592   :  { %v10542_v26 = vmul.f32 %v15927_v53, %v15927_v53  ;;  %v15936_v41 = vadd.f32 %v10339_v36, %v16273_v0  ;;  %v10484_v35 = vadd.f32 %v10483_v22, %v15927_v53  ;;  %v10578_v44 = vadd.f32 %v10577_v12, %v10541_v9 }
 0x594   :  { %v10558_v34 = vadd.f32 %v10557_v33, %v10542_v26  ;;  %v10485_v51 = vrot.slane %v10484_v35, 4  ;;  %v10505_v3 = vadd.f32 %v10504_v16, %v15936_v41  ;;  %v10543_v25 = vmul.f32 %v15936_v41, %v15936_v41 }
 0x596   :  { %v10486_v54 = vadd.f32 %v10485_v51, %v10484_v35  ;;  %v10506_v7 = vrot.slane %v10505_v3, 4  ;;  %v10559_v58 = vrot.slane %v10558_v34, 4  ;;  %v10579_v47 = vadd.f32 %v10578_v44, %v10543_v25 }
 0x598   :  { %v10487_v1 = vrot.slane %v10486_v54, 2  ;;  %v10507_v45 = vadd.f32 %v10506_v7, %v10505_v3  ;;  %v10560_v4 = vadd.f32 %v10559_v58, %v10558_v34  ;;  %v10580_v13 = vrot.slane %v10579_v47, 4 }
 0x59a   :  { %v10488_v27 = vadd.f32 %v10487_v1, %v10486_v54  ;;  %v10508_v23 = vrot.slane %v10507_v45, 2  ;;  %v10561_v30 = vrot.slane %v10560_v4, 2  ;;  %v10581_v46 = vadd.f32 %v10580_v13, %v10579_v47  ;;  %v16274_v13 = vld [vmem:[#allocation51_spill] sm:$0xff] }
 0x59c   :  { %v10489_v61 = vrot.slane %v10488_v27, 1  ;;  %v10509_v39 = vadd.f32 %v10508_v23, %v10507_v45  ;;  %v10562_v40 = vadd.f32 %v10561_v30, %v10560_v4  ;;  %v10582_v62 = vrot.slane %v10581_v46, 2  ;;  %v10468_v23 = vld [vmem:[#allocation13] sm:$0x3] }
 0x59e   :  { %v10490_v11 = vadd.f32 %v10489_v61, %v10488_v27  ;;  %v10510_v10 = vrot.slane %v10509_v39, 1  ;;  %v10563_v36 = vrot.slane %v10562_v40, 1  ;;  %v10583_v22 = vadd.f32 %v10582_v62, %v10581_v46  ;;  %v16275_v61 = vld [vmem:[#allocation50_spill] sm:$0xff] }
 0x5a0   :  { %v10511_v16 = vadd.f32 %v10510_v10, %v10509_v39  ;;  %v10564_v9 = vadd.f32 %v10563_v36, %v10562_v40  ;;  %v10584_v12 = vrot.slane %v10583_v22, 1  ;;  %v10586_v33 = vmul.f32 0.0078125, %v10490_v11  ;;  %v16276_v40 = vld [vmem:[#allocation52_spill] sm:$0xff] }
 0x5a2   :  { %v10585_v26 = vadd.f32 %v10584_v12, %v10583_v22  ;;  %v10587_v0 = vmul.f32 0.0078125, %v10511_v16  ;;  %v10588_v35 = vmul.f32 0.0078125, %v10564_v9  ;;  %v10590_v44 = vmul.f32 %v10586_v33, %v10586_v33 }
 0x5a4   :  { %v10589_v34 = vmul.f32 0.0078125, %v10585_v26  ;;  %v10591_v51 = vmul.f32 %v10587_v0, %v10587_v0  ;;  %v10592_v3 = vsub.f32 %v10588_v35, %v10590_v44 }
 0x5a6   :  { %v10593_v25 = vsub.f32 %v10589_v34, %v10591_v51  ;;  %v10594_v54 = vmax.f32 %v10592_v3, 0.0 }
 0x5a8   :  { %v10595_v7 = vmax.f32 %v10593_v25, 0.0  ;;  %v10596_v58 = vadd.f32 1e-05, %v10594_v54 }
 0x5aa   :  { %v10597_v47 = vadd.f32 1e-05, %v10595_v7  ;;  %12802 = vrsqrt.f32 %v10596_v58 }
 0x5ac   :  { %12804 = vrsqrt.f32 %v10597_v47 }
 0x5b7   :  { %v12803_v1 = vpop.eup %12802 }
 0x5b9   :  { %v12805_v45 = vpop.eup %12804 }
 0x5ba   :  { %v10602_v4 = vcombine.low %v12803_v1, %v12805_v45 }
 0x5bc   :  { %v10609_v27 = vrot.slane %v10602_v4, %v16274_v13 }
 0x5be   :  { %v10616_v30 = vrot.slane %v10609_v27, %v16274_v13 }
 0x5c0   :  { %v10618_v46 = vmul.f32 %v10616_v30, %v10468_v23  ;;  %v10651_v23 = vld [vmem:[#allocation2] sm:$0xff]  ;;  %v10653_v30 = vld [vmem:[#allocation2 + $0x10] sm:$0xff] }
 0x5c2   :  { %v10623_v39 = vrot.slane %v10618_v46, %v16275_v61  ;;  %v10627_v62 = vrot.slane %v10618_v46, %v16276_v40 }
 0x5c4   :  { %v10630_v11 = vmul.f32 %v10623_v39, %v10586_v33  ;;  %v10631_v10 = vmul.f32 %v10627_v62, %v10587_v0  ;;  %v10683_v22 = vmul.f32 %v10623_v39, %v15694_v59  ;;  %v10684_v16 = vmul.f32 %v10627_v62, %v15699_v24  ;;  %v10469_v0 = vld [vmem:[#allocation14] sm:$0x3] }
 0x5c5   :  { %v10685_v9 = vmul.f32 %v10623_v39, %v15702_v56  ;;  %v10686_v12 = vmul.f32 %v10627_v62, %v15705_v52  ;;  %v10687_v26 = vmul.f32 %v10623_v39, %v15708_v18  ;;  %v10688_v44 = vmul.f32 %v10627_v62, %v15712_v38 }
 0x5c6   :  { %v10634_v36 = vcombine.low %v10630_v11, %v10631_v10  ;;  %v10689_v34 = vmul.f32 %v10623_v39, %v15717_v6  ;;  %v10690_v33 = vmul.f32 %v10627_v62, %v15722_v8  ;;  %v10691_v51 = vmul.f32 %v10623_v39, %v15727_v55  ;;  %v10658_v11 = vld [vmem:[#allocation2 + $0x38] sm:$0xff] }
 0x5c7   :  { %v10692_v59 = vmul.f32 %v10627_v62, %v15732_v20  ;;  %v10693_v24 = vmul.f32 %v10623_v39, %v15737_v60  ;;  %v10694_v56 = vmul.f32 %v10627_v62, %v15742_v29  ;;  %v10695_v18 = vmul.f32 %v10623_v39, %v15747_v15 }
 0x5c8   :  { %v10641_v35 = vrot.slane %v10634_v36, %v16274_v13  ;;  %v10696_v3 = vmul.f32 %v10627_v62, %v15752_v32  ;;  %v10697_v38 = vmul.f32 %v10623_v39, %v15763_v49  ;;  %v10698_v6 = vmul.f32 %v10627_v62, %v15776_v19 }
 0x5c9   :  { %v10699_v8 = vmul.f32 %v10623_v39, %v15794_v2  ;;  %v10700_v55 = vmul.f32 %v10627_v62, %v15805_v14  ;;  %v10701_v20 = vmul.f32 %v10623_v39, %v15817_v43  ;;  %v10710_v60 = vmul.f32 %v10627_v62, %v15903_v42 }
 0x5ca   :  { %v10648_v52 = vrot.slane %v10641_v35, %v16274_v13  ;;  %v10711_v29 = vmul.f32 %v10623_v39, %v15914_v5  ;;  %v10712_v54 = vmul.f32 %v10627_v62, %v15923_v63  ;;  %v10702_v15 = vmul.f32 %v10627_v62, %v15825_v57 }
 0x5cb   :  { %v10703_v32 = vmul.f32 %v10623_v39, %v15834_v48  ;;  %v10713_v49 = vmul.f32 %v10623_v39, %v15927_v53  ;;  %v10714_v19 = vmul.f32 %v10627_v62, %v15936_v41  ;;  %v10704_v2 = vmul.f32 %v10627_v62, %v15844_v17 }
 0x5cc   :  { %v10650_v25 = vsub.f32 %v10469_v0, %v10648_v52  ;;  %v10705_v14 = vmul.f32 %v10623_v39, %v15853_v21  ;;  %v10706_v5 = vmul.f32 %v10627_v62, %v15864_v28  ;;  %v10707_v63 = vmul.f32 %v10623_v39, %v15872_v31  ;;  %v10652_v28 = vld [vmem:[#allocation2 + $0x8] sm:$0xff]  ;;  %v10654_v31 = vld [vmem:[#allocation2 + $0x18] sm:$0xff] }
 0x5cd   :  { %v10708_v57 = vmul.f32 %v10627_v62, %v15882_v37  ;;  %v10709_v48 = vmul.f32 %v10623_v39, %v15893_v50  ;;  %v10655_v39 = vld [vmem:[#allocation2 + $0x20] sm:$0xff]  ;;  %v10657_v62 = vld [vmem:[#allocation2 + $0x30] sm:$0xff]  ;;  %v10662_v0 = vld [vmem:[#allocation2 + $0x58] sm:$0xff] }
 0x5ce   :  { %v10719_v43 = vrot.slane %v10650_v25, %v16275_v61  ;;  %v10723_v42 = vrot.slane %v10650_v25, %v16276_v40  ;;  %v10656_v40 = vld [vmem:[#allocation2 + $0x28] sm:$0xff] }
 0x5d0   :  { %v10726_v7 = vadd.f32 %v10719_v43, %v10683_v22  ;;  %v10727_v53 = vadd.f32 %v10723_v42, %v10684_v16  ;;  %v10728_v58 = vadd.f32 %v10719_v43, %v10685_v9  ;;  %v10729_v41 = vadd.f32 %v10723_v42, %v10686_v12  ;;  %v10659_v9 = vld [vmem:[#allocation2 + $0x40] sm:$0xff]  ;;  %v10660_v12 = vld [vmem:[#allocation2 + $0x48] sm:$0xff] }
 0x5d1   :  { %v10730_v47 = vadd.f32 %v10719_v43, %v10687_v26  ;;  %v10731_v17 = vadd.f32 %v10723_v42, %v10688_v44  ;;  %v10732_v1 = vadd.f32 %v10719_v43, %v10689_v34  ;;  %v10733_v21 = vadd.f32 %v10723_v42, %v10690_v33  ;;  %v10661_v26 = vld [vmem:[#allocation2 + $0x50] sm:$0xff] }
 0x5d2   :  { %v10734_v45 = vadd.f32 %v10719_v43, %v10691_v51  ;;  %v10735_v4 = vadd.f32 %v10723_v42, %v10692_v59  ;;  %v10736_v13 = vadd.f32 %v10719_v43, %v10693_v24  ;;  %v10737_v27 = vadd.f32 %v10723_v42, %v10694_v56  ;;  %v10663_v51 = vld [vmem:[#allocation2 + $0x60] sm:$0xff]  ;;  %v10664_v59 = vld [vmem:[#allocation2 + $0x68] sm:$0xff] }
 0x5d3   :  { %v10738_v46 = vadd.f32 %v10719_v43, %v10695_v18  ;;  %v10739_v37 = vadd.f32 %v10723_v42, %v10696_v3  ;;  %v10740_v61 = vadd.f32 %v10719_v43, %v10697_v38  ;;  %v10741_v50 = vadd.f32 %v10723_v42, %v10698_v6  ;;  %v10665_v3 = vld [vmem:[#allocation2 + $0x70] sm:$0xff]  ;;  %v10666_v38 = vld [vmem:[#allocation2 + $0x78] sm:$0xff]  ;;  %v10667_v6 = vld [vmem:[#allocation2 + $0x80] sm:$0xff] }
 0x5d4   :  { %v10742_v10 = vadd.f32 %v10719_v43, %v10699_v8  ;;  %v10743_v36 = vadd.f32 %v10723_v42, %v10700_v55  ;;  %v10744_v22 = vadd.f32 %v10719_v43, %v10701_v20  ;;  %v10745_v16 = vadd.f32 %v10723_v42, %v10702_v15  ;;  %v10668_v15 = vld [vmem:[#allocation2 + $0x88] sm:$0xff] }
 0x5d5   :  { %v10746_v35 = vadd.f32 %v10719_v43, %v10703_v32  ;;  %v10747_v44 = vadd.f32 %v10723_v42, %v10704_v2  ;;  %v10748_v34 = vadd.f32 %v10719_v43, %v10705_v14  ;;  %v10749_v33 = vadd.f32 %v10723_v42, %v10706_v5  ;;  %v10669_v32 = vld [vmem:[#allocation2 + $0x90] sm:$0xff]  ;;  %v10670_v2 = vld [vmem:[#allocation2 + $0x98] sm:$0xff] }
 0x5d6   :  { %v10750_v24 = vadd.f32 %v10719_v43, %v10707_v63  ;;  %v10751_v56 = vadd.f32 %v10723_v42, %v10708_v57  ;;  %v10752_v52 = vadd.f32 %v10719_v43, %v10709_v48  ;;  %v10753_v18 = vadd.f32 %v10723_v42, %v10710_v60  ;;  %v10671_v48 = vld [vmem:[#allocation2 + $0xa0] sm:$0xff]  ;;  %v10672_v60 = vld [vmem:[#allocation2 + $0xa8] sm:$0xff] }
 0x5d7   :  { %v10754_v8 = vadd.f32 %v10719_v43, %v10711_v29  ;;  %v10755_v55 = vadd.f32 %v10723_v42, %v10712_v54  ;;  %v10756_v20 = vadd.f32 %v10719_v43, %v10713_v49  ;;  %v10757_v25 = vadd.f32 %v10723_v42, %v10714_v19  ;;  %v10673_v29 = vld [vmem:[#allocation2 + $0xb0] sm:$0xff]  ;;  %v10674_v42 = vld [vmem:[#allocation2 + $0xb8] sm:$0xff] }
 0x5d8   :  { %v10758_v14 = vadd.f32 %v10726_v7, %v10651_v23  ;;  %v10759_v5 = vadd.f32 %v10727_v53, %v10652_v28  ;;  %v10760_v63 = vadd.f32 %v10728_v58, %v10653_v30  ;;  %v10761_v57 = vadd.f32 %v10729_v41, %v10654_v31  ;;  %v10675_v7 = vld [vmem:[#allocation2 + $0xc0] sm:$0xff]  ;;  %v10676_v23 = vld [vmem:[#allocation2 + $0xc8] sm:$0xff]  ;;  %v10677_v31 = vld [vmem:[#allocation2 + $0xd0] sm:$0xff] }
 0x5d9   :  { %v10762_v54 = vadd.f32 %v10730_v47, %v10655_v39  ;;  %v10763_v43 = vadd.f32 %v10731_v17, %v10656_v40  ;;  %v10764_v49 = vadd.f32 %v10732_v1, %v10657_v62  ;;  %v10765_v19 = vadd.f32 %v10733_v21, %v10658_v11  ;;  %v10678_v41 = vld [vmem:[#allocation2 + $0xd8] sm:$0xff]  ;;  %v10679_v39 = vld [vmem:[#allocation2 + $0xe0] sm:$0xff]  ;;  %v10680_v62 = vld [vmem:[#allocation2 + $0xe8] sm:$0xff] }
 0x5da   :  { %v10766_v28 = vadd.f32 %v10734_v45, %v10659_v9  ;;  %v10767_v53 = vadd.f32 %v10735_v4, %v10660_v12  ;;  %v10768_v30 = vadd.f32 %v10736_v13, %v10661_v26  ;;  %v10769_v58 = vadd.f32 %v10737_v27, %v10662_v0  ;;  %v10681_v11 = vld [vmem:[#allocation2 + $0xf0] sm:$0xff]  ;;  %v10682_v21 = vld [vmem:[#allocation2 + $0xf8] sm:$0xff] }
 0x5db   :  { %v10770_v47 = vadd.f32 %v10738_v46, %v10663_v51  ;;  %v10771_v17 = vadd.f32 %v10739_v37, %v10664_v59  ;;  %v10772_v40 = vadd.f32 %v10740_v61, %v10665_v3  ;;  %v10773_v1 = vadd.f32 %v10741_v50, %v10666_v38 }
 0x5dc   :  { %v10774_v9 = vadd.f32 %v10742_v10, %v10667_v6  ;;  %v10775_v45 = vadd.f32 %v10743_v36, %v10668_v15  ;;  %v10776_v4 = vadd.f32 %v10744_v22, %v10669_v32  ;;  %v10777_v12 = vadd.f32 %v10745_v16, %v10670_v2 }
 0x5dd   :  { %v15982_v13 = vadd.f32 %v10746_v35, %v10671_v48  ;;  %v15984_v26 = vadd.f32 %v10747_v44, %v10672_v60  ;;  %v15986_v0 = vadd.f32 %v10748_v34, %v10673_v29  ;;  %v15988_v27 = vadd.f32 %v10749_v33, %v10674_v42 }
 0x5de   :  { %v15990_v46 = vadd.f32 %v10750_v24, %v10675_v7  ;;  %v15992_v37 = vadd.f32 %v10751_v56, %v10676_v23  ;;  %v15994_v61 = vadd.f32 %v10752_v52, %v10677_v31  ;;  %v15996_v50 = vadd.f32 %v10753_v18, %v10678_v41 }
 0x5df   :  { %v15998_v10 = vadd.f32 %v10754_v8, %v10679_v39  ;;  %v16000_v36 = vadd.f32 %v10755_v55, %v10680_v62  ;;  %v16002_v22 = vadd.f32 %v10756_v20, %v10681_v11  ;;  %v16004_v16 = vadd.f32 %v10757_v25, %v10682_v21 }
 0x5e0   :  { %v10790_v35 = vmax.f32 %v10758_v14, 0.0  ;;  %v10791_v44 = vmax.f32 %v10759_v5, 0.0  ;;  %v10792_v34 = vmax.f32 %v10760_v63, 0.0  ;;  %v10793_v33 = vmax.f32 %v10761_v57, 0.0 }
 0x5e1   :  { %v10794_v51 = vmax.f32 %v10762_v54, 0.0  ;;  %v10795_v59 = vmax.f32 %v10763_v43, 0.0  ;;  %v10796_v24 = vmax.f32 %v10764_v49, 0.0  ;;  %v10797_v56 = vmax.f32 %v10765_v19, 0.0 }
 0x5e2   :  { %v10798_v52 = vmax.f32 %v10766_v28, 0.0  ;;  %v10799_v3 = vmax.f32 %v10767_v53, 0.0  ;;  %v10800_v18 = vmax.f32 %v10768_v30, 0.0  ;;  %v10801_v38 = vmax.f32 %v10769_v58, 0.0  ;;  %10822 = vst [vmem:[#allocation5] sm:$0xff] %v10790_v35  ;;  %10823 = vst [vmem:[#allocation5 + $0x8] sm:$0xff] %v10791_v44 }
 0x5e3   :  { %10824 = vst [vmem:[#allocation5 + $0x10] sm:$0xff] %v10792_v34  ;;  %10825 = vst [vmem:[#allocation5 + $0x18] sm:$0xff] %v10793_v33  ;;  %v10802_v6 = vmax.f32 %v10770_v47, 0.0  ;;  %v10803_v8 = vmax.f32 %v10771_v17, 0.0  ;;  %v10804_v55 = vmax.f32 %v10772_v40, 0.0  ;;  %v10805_v20 = vmax.f32 %v10773_v1, 0.0 }
 0x5e4   :  { %10826 = vst [vmem:[#allocation5 + $0x20] sm:$0xff] %v10794_v51  ;;  %10827 = vst [vmem:[#allocation5 + $0x28] sm:$0xff] %v10795_v59  ;;  %v10806_v25 = vmax.f32 %v10774_v9, 0.0  ;;  %v10807_v15 = vmax.f32 %v10775_v45, 0.0  ;;  %v10808_v32 = vmax.f32 %v10776_v4, 0.0  ;;  %v10809_v2 = vmax.f32 %v10777_v12, 0.0 }
 0x5e5   :  { %10828 = vst [vmem:[#allocation5 + $0x30] sm:$0xff] %v10796_v24  ;;  %10829 = vst [vmem:[#allocation5 + $0x38] sm:$0xff] %v10797_v56  ;;  %v10810_v14 = vmax.f32 %v15982_v13, 0.0  ;;  %v10811_v5 = vmax.f32 %v15984_v26, 0.0  ;;  %v10812_v63 = vmax.f32 %v15986_v0, 0.0  ;;  %v10813_v57 = vmax.f32 %v15988_v27, 0.0 }
 0x5e6   :  { %10830 = vst [vmem:[#allocation5 + $0x40] sm:$0xff] %v10798_v52  ;;  %10831 = vst [vmem:[#allocation5 + $0x48] sm:$0xff] %v10799_v3  ;;  %v10814_v48 = vmax.f32 %v15990_v46, 0.0  ;;  %v10815_v60 = vmax.f32 %v15992_v37, 0.0  ;;  %v10816_v29 = vmax.f32 %v15994_v61, 0.0  ;;  %v10817_v54 = vmax.f32 %v15996_v50, 0.0 }
 0x5e7   :  { %10832 = vst [vmem:[#allocation5 + $0x50] sm:$0xff] %v10800_v18  ;;  %10833 = vst [vmem:[#allocation5 + $0x58] sm:$0xff] %v10801_v38  ;;  %v10818_v43 = vmax.f32 %v15998_v10, 0.0  ;;  %v10819_v49 = vmax.f32 %v16000_v36, 0.0  ;;  %v10820_v19 = vmax.f32 %v16002_v22, 0.0  ;;  %v10821_v42 = vmax.f32 %v16004_v16, 0.0 }
 0x5e8   :  { %10834 = vst [vmem:[#allocation5 + $0x60] sm:$0xff] %v10802_v6  ;;  %10835 = vst [vmem:[#allocation5 + $0x68] sm:$0xff] %v10803_v8 }
 0x5e9   :  { %10836 = vst [vmem:[#allocation5 + $0x70] sm:$0xff] %v10804_v55  ;;  %10837 = vst [vmem:[#allocation5 + $0x78] sm:$0xff] %v10805_v20 }
 0x5ea   :  { %10838 = vst [vmem:[#allocation5 + $0x80] sm:$0xff] %v10806_v25  ;;  %10839 = vst [vmem:[#allocation5 + $0x88] sm:$0xff] %v10807_v15 }
 0x5eb   :  { %10840 = vst [vmem:[#allocation5 + $0x90] sm:$0xff] %v10808_v32  ;;  %10841 = vst [vmem:[#allocation5 + $0x98] sm:$0xff] %v10809_v2 }
 0x5ec   :  { %10842 = vst [vmem:[#allocation5 + $0xa0] sm:$0xff] %v10810_v14  ;;  %10843 = vst [vmem:[#allocation5 + $0xa8] sm:$0xff] %v10811_v5 }
 0x5ed   :  { %10844 = vst [vmem:[#allocation5 + $0xb0] sm:$0xff] %v10812_v63  ;;  %10845 = vst [vmem:[#allocation5 + $0xb8] sm:$0xff] %v10813_v57 }
 0x5ee   :  { %10846 = vst [vmem:[#allocation5 + $0xc0] sm:$0xff] %v10814_v48  ;;  %10847 = vst [vmem:[#allocation5 + $0xc8] sm:$0xff] %v10815_v60 }
 0x5ef   :  { %10848 = vst [vmem:[#allocation5 + $0xd0] sm:$0xff] %v10816_v29  ;;  %10849 = vst [vmem:[#allocation5 + $0xd8] sm:$0xff] %v10817_v54 }
 0x5f0   :  { %10850 = vst [vmem:[#allocation5 + $0xe0] sm:$0xff] %v10818_v43  ;;  %10851 = vst [vmem:[#allocation5 + $0xe8] sm:$0xff] %v10819_v49 }
 0x5f1   :  { %10852 = vst [vmem:[#allocation5 + $0xf0] sm:$0xff] %v10820_v19  ;;  %10853 = vst [vmem:[#allocation5 + $0xf8] sm:$0xff] %v10821_v42 }
 0x5f2   :  { %12957 = shalt.err (!%p12954_p11)  }
 0x5f3   :  { %10865 = dma.vmem_to_hbm [thread:$0]  %s10863_s30, 4096, %s16028_s7, [#allocation8 + $0x3] }
 0x5f4   :  { %12978 = dma.done.wait [#allocation8 + $0x3], 4096 }
 0x5f5   :  { %12979 = vsyncadd [#allocation8 + $0x3], 4294963200 }
 0x5f6   :  { %10870 = vsyncpa [#allocation10], 1 }
 0x5f7   :  { %10871 = vsyncpa [#allocation12], 1 }
 0x5f8   :  { %10872 = vsyncpa [#allocation15], 1 }
 0x5f9   :  { %10873 = vsyncmov [#allocation8] }
 0x5fc   :  { %s10874_s11 = vpop.sfrf %10873 }
 0x5fd   :  { %p11836_p12 = scmp.ne.s32.totalorder %s10874_s11, 0 }
 0x5ff   :  { %10878 = shalt.err (%p11836_p12)  }
 0x600   :  { %10880 = vsyncmov [#allocation8 + $0x1] }
 0x603   :  { %s10881_s12 = vpop.sfrf %10880 }
 0x604   :  { %p11837_p13 = scmp.ne.s32.totalorder %s10881_s12, 0 }
 0x606   :  { %10885 = shalt.err (%p11837_p13)  }
 0x607   :  { %10887 = vsyncmov [#allocation8 + $0x2] }
 0x60a   :  { %s10888_s13 = vpop.sfrf %10887 }
 0x60b   :  { %p11838_p0 = scmp.ne.s32.totalorder %s10888_s13, 0 }
 0x60d   :  { %10892 = shalt.err (%p11838_p0)  }
 0x60e   :  { %10894 = vsyncmov [#allocation8 + $0x3] }
 0x611   :  { %s10895_s14 = vpop.sfrf %10894 }
 0x612   :  { %p11839_p1 = scmp.ne.s32.totalorder %s10895_s14, 0 }
 0x614   :  { %10899 = shalt.err (%p11839_p1)  }

</bundles_post_ra>
